<compile_context>
chip_gen: v7x
topology: tpu7x:2x2x1
jax: 0.10.0
libtpu: 0.0.40
codegen_flags: <defaults>
</compile_context>

<pallas_src>
import functools

import jax
import jax.numpy as jnp
from jax.experimental import pallas as pl
from jax.experimental.pallas import tpu as pltpu


# ------------------------- module hyper-parameters ---------------------------
# convs1 : Conv(20,1) 'same' +BN+ELU+MaxPool(5,1); Conv(4,1) 'same' +BN+ELU+
#          MaxPool(2,1)                                  (all along H)
# convs2 : Conv(1,6) 'same' +BN+ELU+MaxPool((1,6),(1,3)) (along W)
# convs22: ConvTranspose2d((3,1), stride 2, pad 1, output_pad 1) + BN
_K1A, _PAD1A, _P1A = 20, (9, 10), 5
_K1B, _PAD1B, _P1B = 4, (1, 2), 2
_K2, _PAD2, _P2K, _P2S = 6, (2, 3), 6, 3
_KCT, _SCT, _PCT, _OPCT = 3, 2, 1, 1


def _tconv_sources(n_in, k, stride, pad, opad):
    """ConvTranspose axis expressed as a forward conv over a stride-dilated,
    cropped and padded axis: for each position of that axis return the source
    input index, or None where the dilated/padded value is zero."""
    lead = k - 1 - pad
    n_dil = (n_in - 1) * stride + 1
    total = 2 * lead + n_dil + opad
    src = []
    for d in range(total):
        j = d - lead
        src.append(j // stride if (0 <= j < n_dil and j % stride == 0) else None)
    return src


# ------------------------------ fused kernel ---------------------------------

def _make_cam_kernel(*, H1, W1, C1, O1, H2, W2, C2, O2):
    """Fused CAM forward for one batch element (one grid step)."""

    def kernel(xp1_ref, xp2_ref,
               ca1w1_ref, ca1w2_ref, ca2w1_ref, ca2w2_ref,
               w1a_ref, s1a_ref, w1b_ref, s1b_ref,
               w2_ref, s2_ref, wct_ref, sct_ref,
               smap1_ref, smap2_ref, y1_ref, prex2_ref, x2f_ref):

        def sigmoid(v):
            return 1.0 / (1.0 + jnp.exp(-v))

        def elu(v):                                        # ELU(alpha=1)
            return jnp.where(v > 0.0, v, jnp.exp(jnp.minimum(v, 0.0)) - 1.0)

        def channel_gate(x_valid, w1, w2):
            # CBAM channel attention gate -> (1, C); x_valid: (S, L, C).
            S, L, _ = x_valid.shape
            ssum = jnp.sum(x_valid[0], axis=0, keepdims=True)      # (1, C)
            smax = jnp.max(x_valid[0], axis=0, keepdims=True)
            for i in range(1, S):
                ssum = ssum + jnp.sum(x_valid[i], axis=0, keepdims=True)
                smax = jnp.maximum(smax, jnp.max(x_valid[i], axis=0, keepdims=True))
            stats = jnp.concatenate([ssum * (1.0 / (S * L)), smax], axis=0)  # (2, C)
            h = jnp.maximum(
                jnp.dot(stats, w1, preferred_element_type=jnp.float32), 0.0)
            g = jnp.dot(h, w2, preferred_element_type=jnp.float32)          # (2, C)
            return sigmoid(g[0:1, :] + g[1:2, :])                            # (1, C)

        def im2col(x3, k):
            # (S, L+k-1, C) -> (S, L, k*C); taps concatenated channel-major.
            L = x3.shape[1] - k + 1
            return jnp.concatenate([x3[:, t:t + L, :] for t in range(k)], axis=2)

        def pool_max(x3, k, s):
            # (S, L, C) -> (S, n, C): max-pool along axis 1.
            n = (x3.shape[1] - k) // s + 1
            return jnp.concatenate(
                [jnp.max(x3[:, p * s:p * s + k, :], axis=1, keepdims=True)
                 for p in range(n)], axis=1)

        # -------- branch 1: convs along H; the W columns are independent -----
        xp1 = xp1_ref[...]                                  # (W1, H1+19, C1)
        gate1 = channel_gate(xp1[:, _PAD1A[0]:_PAD1A[0] + H1, :],
                             ca1w1_ref[...], ca1w2_ref[...])
        g1 = xp1 * gate1.reshape(1, 1, C1)                  # zero padding stays 0
        smap1_ref[...] = g1[:, _PAD1A[0]:_PAD1A[0] + H1, :]

        # Conv(20,1) (+folded bias/BN) + ELU + MaxPool(5,1): one im2col matmul.
        cols = im2col(g1, _K1A)                             # (W1, H1, K1A*C1)
        y = jnp.dot(cols.reshape(W1 * H1, _K1A * C1), w1a_ref[...],
                    preferred_element_type=jnp.float32) + s1a_ref[...]
        y = pool_max(elu(y).reshape(W1, H1, O1), _P1A, _P1A)   # (W1, L1a, O1)
        L1a = y.shape[1]

        # Conv(4,1) (+folded bias/BN) + ELU + MaxPool(2,1).
        ypad = jnp.concatenate(
            [jnp.zeros((W1, _PAD1B[0], O1), jnp.float32), y,
             jnp.zeros((W1, _PAD1B[1], O1), jnp.float32)], axis=1)
        cols = im2col(ypad, _K1B)                           # (W1, L1a, K1B*O1)
        y = jnp.dot(cols.reshape(W1 * L1a, _K1B * O1), w1b_ref[...],
                    preferred_element_type=jnp.float32) + s1b_ref[...]
        y1_ref[...] = pool_max(elu(y).reshape(W1, L1a, O1), _P1B, _P1B)

        # -------- branch 2: conv along W; the H rows are independent ----------
        xp2 = xp2_ref[...]                                  # (H2, W2+5, C2)
        gate2 = channel_gate(xp2[:, _PAD2[0]:_PAD2[0] + W2, :],
                             ca2w1_ref[...], ca2w2_ref[...])
        g2 = xp2 * gate2.reshape(1, 1, C2)
        smap2_ref[...] = g2[:, _PAD2[0]:_PAD2[0] + W2, :]

        # Conv(1,6) (+folded bias/BN) + ELU + MaxPool((1,6),(1,3)); H2(=2) rows.
        n2 = (W2 - _P2K) // _P2S + 1
        pre_rows = []
        for hh in range(H2):
            row = g2[hh]                                    # (W2+5, C2)
            cr = jnp.concatenate([row[t:t + W2, :] for t in range(_K2)], axis=1)
            yr = elu(jnp.dot(cr, w2_ref[...],
                             preferred_element_type=jnp.float32) + s2_ref[...])
            pre_rows.append(jnp.concatenate(
                [jnp.max(yr[p * _P2S:p * _P2S + _P2K, :], axis=0, keepdims=True)
                 for p in range(n2)], axis=0))              # (n2, O2)
        prex2_ref[...] = jnp.stack(pre_rows, axis=0)        # (H2, n2, O2)

        # ConvTranspose2d((3,1), s=2, p=1, op=1) + BN, written as a forward
        # conv over the stride-dilated / cropped map, built in-register.
        w_src = _tconv_sources(n2, 1, _SCT, _PCT, _OPCT)    # output col -> src col
        h_src = _tconv_sources(H2, _KCT, _SCT, _PCT, _OPCT)  # dilated row -> src row
        w_out = len(w_src)
        zero_row = jnp.zeros((1, O2), jnp.float32)
        zero_plane = jnp.zeros((w_out, O2), jnp.float32)

        def dil_plane(hh):                                  # (w_out, O2)
            return jnp.concatenate(
                [pre_rows[hh][wi:wi + 1, :] if wi is not None else zero_row
                 for wi in w_src], axis=0)

        planes = [dil_plane(hi) if hi is not None else zero_plane for hi in h_src]
        outs = []
        for ho in range(len(h_src) - _KCT + 1):
            ccols = jnp.concatenate([planes[ho + t] for t in range(_KCT)], axis=1)
            outs.append(jnp.dot(ccols, wct_ref[...],
                                preferred_element_type=jnp.float32) + sct_ref[...])
        x2f_ref[...] = jnp.stack(outs, axis=0)              # (H_out, w_out, O2)

    return kernel


# ------------------------------ pallas_call wrapper ---------------------------

def cam_fused(xp1, xp2, weights, *, H1, W1, C1, O1, H2, W2, C2, O2):
    B = xp1.shape[0]
    L1 = (H1 // _P1A) // _P1B
    n2 = (W2 - _P2K) // _P2S + 1
    w_out = len(_tconv_sources(n2, 1, _SCT, _PCT, _OPCT))
    h_out = len(_tconv_sources(H2, _KCT, _SCT, _PCT, _OPCT)) - _KCT + 1

    kernel = _make_cam_kernel(H1=H1, W1=W1, C1=C1, O1=O1,
                              H2=H2, W2=W2, C2=C2, O2=O2)

    def bmap(b):                        # per-batch 4-D data blocks
        return (b, 0, 0, 0)

    def wmap(b):                        # weights: resident, batch-independent
        return (0, 0)

    out_shapes = (
        jax.ShapeDtypeStruct((B, W1, H1, C1), jnp.float32),       # gated x1
        jax.ShapeDtypeStruct((B, H2, W2, C2), jnp.float32),       # gated x2
        jax.ShapeDtypeStruct((B, W1, L1, O1), jnp.float32),       # convs1 out
        jax.ShapeDtypeStruct((B, H2, n2, O2), jnp.float32),       # pre_x2
        jax.ShapeDtypeStruct((B, h_out, w_out, O2), jnp.float32),  # convs22 out
    )
    in_specs = ([pl.BlockSpec((None,) + xp1.shape[1:], bmap),
                 pl.BlockSpec((None,) + xp2.shape[1:], bmap)]
                + [pl.BlockSpec(w.shape, wmap) for w in weights])
    out_specs = tuple(pl.BlockSpec((None,) + s.shape[1:], bmap) for s in out_shapes)

    return pl.pallas_call(
        kernel,
        out_shape=out_shapes,
        grid=(B,),
        in_specs=in_specs,
        out_specs=out_specs,
        compiler_params=pltpu.CompilerParams(dimension_semantics=("parallel",)),
    )(xp1, xp2, *weights)


# ------------------------------ glue / params --------------------------------

def init_params(key, in_channels=(4, 12), out_channels=(8, 8)):
    ks = jax.random.split(key, 12)
    c1, c2 = in_channels
    o1, o2 = out_channels
    p = {}
    # channel attention MLPs (ratio 2, no bias)
    p["ca1_w1"] = 0.5 * jax.random.normal(ks[0], (c1, max(c1 // 2, 1)), jnp.float32)
    p["ca1_w2"] = 0.5 * jax.random.normal(ks[1], (max(c1 // 2, 1), c1), jnp.float32)
    p["ca2_w1"] = 0.5 * jax.random.normal(ks[2], (c2, max(c2 // 2, 1)), jnp.float32)
    p["ca2_w2"] = 0.5 * jax.random.normal(ks[3], (max(c2 // 2, 1), c2), jnp.float32)
    # convs1: Conv(20,1) and Conv(4,1), weights stored as (K, Cin, Cout)
    p["c1a_w"] = 0.1 * jax.random.normal(ks[4], (20, c1, o1), jnp.float32)
    p["c1a_b"] = 0.1 * jax.random.normal(ks[5], (o1,), jnp.float32)
    p["c1b_w"] = 0.1 * jax.random.normal(ks[6], (4, o1, o1), jnp.float32)
    p["c1b_b"] = 0.1 * jax.random.normal(ks[7], (o1,), jnp.float32)
    # convs2: Conv(1,6)
    p["c2_w"] = 0.1 * jax.random.normal(ks[8], (6, c2, o2), jnp.float32)
    p["c2_b"] = 0.1 * jax.random.normal(ks[9], (o2,), jnp.float32)
    # convs22: ConvTranspose2d weight in PyTorch layout (Cin, Cout, kH=3, kW=1)
    p["ct_w"] = 0.1 * jax.random.normal(ks[10], (o2, o2, 3, 1), jnp.float32)
    p["ct_b"] = 0.1 * jax.random.normal(ks[11], (o2,), jnp.float32)
    # BatchNorm2d (eval mode, PyTorch default init)
    for name, c in (("bn1a", o1), ("bn1b", o1), ("bn2", o2), ("bn22", o2)):
        p[name + "_g"] = jnp.ones((c,), jnp.float32)
        p[name + "_b"] = jnp.zeros((c,), jnp.float32)
        p[name + "_m"] = jnp.zeros((c,), jnp.float32)
        p[name + "_v"] = jnp.ones((c,), jnp.float32)
    return p


def cam_forward(params, x1_nchw, x2_nchw):
    p = params
    B, C1, H1, W1 = x1_nchw.shape
    _, C2, H2, W2 = x2_nchw.shape
    O1 = p["c1a_w"].shape[2]
    O2 = p["c2_w"].shape[2]

    # Layout prep at the boundary of the single fused kernel (tiny XLA ops;
    # 'same' padding is applied here because zeros commute with the channel gate).
    xp1 = jnp.pad(jnp.transpose(x1_nchw, (0, 3, 2, 1)),      # (B, W1, H1, C1)
                  ((0, 0), (0, 0), _PAD1A, (0, 0)))
    xp2 = jnp.pad(jnp.transpose(x2_nchw, (0, 2, 3, 1)),      # (B, H2, W2, C2)
                  ((0, 0), (0, 0), _PAD2, (0, 0)))

    def fold(w_kic, bias, gamma, beta, mean, var, eps=1e-5):
        # Fold conv bias + BatchNorm(eval) into (scaled im2col weights, shift).
        scale = gamma / jnp.sqrt(var + eps)
        K, Cin, Cout = w_kic.shape
        w2d = (w_kic * scale).reshape(K * Cin, Cout)
        shift = (scale * (bias - mean) + beta).reshape(1, Cout)
        return w2d, shift

    w1a, s1a = fold(p["c1a_w"], p["c1a_b"], p["bn1a_g"], p["bn1a_b"],
                    p["bn1a_m"], p["bn1a_v"])
    w1b, s1b = fold(p["c1b_w"], p["c1b_b"], p["bn1b_g"], p["bn1b_b"],
                    p["bn1b_m"], p["bn1b_v"])
    w2c, s2c = fold(p["c2_w"], p["c2_b"], p["bn2_g"], p["bn2_b"],
                    p["bn2_m"], p["bn2_v"])
    wt = jnp.transpose(p["ct_w"][:, :, ::-1, 0], (2, 0, 1))  # flipped taps (kH,Ci,Co)
    wct, sct = fold(wt, p["ct_b"], p["bn22_g"], p["bn22_b"],
                    p["bn22_m"], p["bn22_v"])

    weights = (p["ca1_w1"], p["ca1_w2"], p["ca2_w1"], p["ca2_w2"],
               w1a, s1a, w1b, s1b, w2c, s2c, wct, sct)

    smap1_k, smap2_k, y1_k, prex2_k, x2f_k = cam_fused(
        xp1, xp2, weights, H1=H1, W1=W1, C1=C1, O1=O1,
        H2=H2, W2=W2, C2=C2, O2=O2)

    # Back to PyTorch NCHW (tiny transposes of the final outputs only).
    s_map1 = jnp.transpose(smap1_k, (0, 3, 2, 1))            # (B, C1, H1, W1)
    s_map2 = jnp.transpose(smap2_k, (0, 3, 1, 2))            # (B, C2, H2, W2)
    y1 = jnp.transpose(y1_k, (0, 3, 2, 1))                   # (B, O1, H, W)
    pre_x2 = jnp.transpose(prex2_k, (0, 3, 1, 2))            # (B, O2, H2, n2)
    x2_out = jnp.transpose(x2f_k, (0, 3, 1, 2))              # (B, O2, H, W)
    out = jnp.concatenate([y1, x2_out], axis=1)              # torch.cat(dim=1)
    return out, s_map1, s_map2, pre_x2, x2_out


if __name__ == "__main__":
    key = jax.random.PRNGKey(0)
    k_in1, k_in2, k_par = jax.random.split(key, 3)
    in_channels = (4, 12)
    out_channels = (8, 8)
    B = 2
    # NCHW inputs (PyTorch convention): x1 time-axis branch, x2 spectral branch.
    x1 = jax.random.normal(k_in1, (B, in_channels[0], 40, 4), jnp.float32)
    x2 = jax.random.normal(k_in2, (B, in_channels[1], 2, 12), jnp.float32)
    params = init_params(k_par, in_channels, out_channels)

    fwd = jax.jit(functools.partial(cam_forward, params))
    out, s_map1, s_map2, pre_x2, x2_final = fwd(x1, x2)
    jax.block_until_ready((out, s_map1, s_map2, pre_x2, x2_final))

    assert out.shape == (B, out_channels[0] + out_channels[1], 4, 4), out.shape
    assert s_map1.shape == x1.shape, s_map1.shape
    assert s_map2.shape == x2.shape, s_map2.shape
    assert pre_x2.shape == (B, out_channels[1], 2, 3), pre_x2.shape
    assert x2_final.shape == (B, out_channels[1], 4, 4), x2_final.shape
    print("KERNEL_OK")
</pallas_src>

<mosaic_0001>
module attributes {stable_mosaic.version = 11 : i64} {
  func.func @kernel(%arg0: i32, %arg1: memref<1x4x59x4xf32, #tpu.memory_space<vmem>>, %arg2: memref<1x2x17x12xf32, #tpu.memory_space<vmem>>, %arg3: memref<4x2xf32, #tpu.memory_space<vmem>>, %arg4: memref<2x4xf32, #tpu.memory_space<vmem>>, %arg5: memref<12x6xf32, #tpu.memory_space<vmem>>, %arg6: memref<6x12xf32, #tpu.memory_space<vmem>>, %arg7: memref<80x8xf32, #tpu.memory_space<vmem>>, %arg8: memref<1x8xf32, #tpu.memory_space<vmem>>, %arg9: memref<32x8xf32, #tpu.memory_space<vmem>>, %arg10: memref<1x8xf32, #tpu.memory_space<vmem>>, %arg11: memref<72x8xf32, #tpu.memory_space<vmem>>, %arg12: memref<1x8xf32, #tpu.memory_space<vmem>>, %arg13: memref<24x8xf32, #tpu.memory_space<vmem>>, %arg14: memref<1x8xf32, #tpu.memory_space<vmem>>, %arg15: memref<1x4x40x4xf32, #tpu.memory_space<vmem>>, %arg16: memref<1x2x12x12xf32, #tpu.memory_space<vmem>>, %arg17: memref<1x4x4x8xf32, #tpu.memory_space<vmem>>, %arg18: memref<1x2x3x8xf32, #tpu.memory_space<vmem>>, %arg19: memref<1x4x4x8xf32, #tpu.memory_space<vmem>>) attributes {dimension_semantics = [#tpu.dimension_semantics<parallel>], iteration_bounds = array<i64: 2>, scalar_prefetch = 0 : i64, scratch_operands = 0 : i64, tpu.core_type = #tpu.core_type<tc>, window_params = [{transform_indices = @transform_0, window_bounds = array<i64: 1, 4, 59, 4>}, {transform_indices = @transform_1, window_bounds = array<i64: 1, 2, 17, 12>}, {pipeline_mode = #tpu.pipeline_mode<synchronous>, transform_indices = @transform_2, window_bounds = array<i64: 4, 2>}, {pipeline_mode = #tpu.pipeline_mode<synchronous>, transform_indices = @transform_3, window_bounds = array<i64: 2, 4>}, {pipeline_mode = #tpu.pipeline_mode<synchronous>, transform_indices = @transform_4, window_bounds = array<i64: 12, 6>}, {pipeline_mode = #tpu.pipeline_mode<synchronous>, transform_indices = @transform_5, window_bounds = array<i64: 6, 12>}, {pipeline_mode = #tpu.pipeline_mode<synchronous>, transform_indices = @transform_6, window_bounds = array<i64: 80, 8>}, {pipeline_mode = #tpu.pipeline_mode<synchronous>, transform_indices = @transform_7, window_bounds = array<i64: 1, 8>}, {pipeline_mode = #tpu.pipeline_mode<synchronous>, transform_indices = @transform_8, window_bounds = array<i64: 32, 8>}, {pipeline_mode = #tpu.pipeline_mode<synchronous>, transform_indices = @transform_9, window_bounds = array<i64: 1, 8>}, {pipeline_mode = #tpu.pipeline_mode<synchronous>, transform_indices = @transform_10, window_bounds = array<i64: 72, 8>}, {pipeline_mode = #tpu.pipeline_mode<synchronous>, transform_indices = @transform_11, window_bounds = array<i64: 1, 8>}, {pipeline_mode = #tpu.pipeline_mode<synchronous>, transform_indices = @transform_12, window_bounds = array<i64: 24, 8>}, {pipeline_mode = #tpu.pipeline_mode<synchronous>, transform_indices = @transform_13, window_bounds = array<i64: 1, 8>}, {transform_indices = @transform_14, window_bounds = array<i64: 1, 4, 40, 4>}, {transform_indices = @transform_15, window_bounds = array<i64: 1, 2, 12, 12>}, {transform_indices = @transform_16, window_bounds = array<i64: 1, 4, 4, 8>}, {transform_indices = @transform_17, window_bounds = array<i64: 1, 2, 3, 8>}, {transform_indices = @transform_18, window_bounds = array<i64: 1, 4, 4, 8>}]} {
    %c0 = arith.constant 0 : index
    %c0_0 = arith.constant 0 : index
    %c0_1 = arith.constant 0 : index
    %c0_2 = arith.constant 0 : index
    %0 = vector.load %arg1[%c0, %c0_0, %c0_1, %c0_2] : memref<1x4x59x4xf32, #tpu.memory_space<vmem>>, vector<1x4x59x4xf32>
    %1 = vector.shape_cast %0 : vector<1x4x59x4xf32> to vector<4x59x4xf32>
    %2 = vector.extract_strided_slice %1 {offsets = [0, 9, 0], sizes = [4, 40, 4], strides = [1, 1, 1]} : vector<4x59x4xf32> to vector<4x40x4xf32>
    %c0_3 = arith.constant 0 : index
    %c0_4 = arith.constant 0 : index
    %3 = vector.load %arg3[%c0_3, %c0_4] : memref<4x2xf32, #tpu.memory_space<vmem>>, vector<4x2xf32>
    %c0_5 = arith.constant 0 : index
    %c0_6 = arith.constant 0 : index
    %4 = vector.load %arg4[%c0_5, %c0_6] : memref<2x4xf32, #tpu.memory_space<vmem>>, vector<2x4xf32>
    %5 = vector.extract_strided_slice %2 {offsets = [0, 0, 0], sizes = [1, 40, 4], strides = [1, 1, 1]} : vector<4x40x4xf32> to vector<1x40x4xf32>
    %6 = vector.shape_cast %5 : vector<1x40x4xf32> to vector<40x4xf32>
    %cst = arith.constant dense<0.000000e+00> : vector<4xf32>
    %7 = vector.multi_reduction <add>, %6, %cst [0] : vector<40x4xf32> to vector<4xf32>
    %8 = vector.shape_cast %7 : vector<4xf32> to vector<1x4xf32>
    %9 = vector.extract_strided_slice %2 {offsets = [0, 0, 0], sizes = [1, 40, 4], strides = [1, 1, 1]} : vector<4x40x4xf32> to vector<1x40x4xf32>
    %10 = vector.shape_cast %9 : vector<1x40x4xf32> to vector<40x4xf32>
    %cst_7 = arith.constant dense<0xFF800000> : vector<4xf32>
    %11 = vector.multi_reduction <maximumf>, %10, %cst_7 [0] : vector<40x4xf32> to vector<4xf32>
    %12 = vector.shape_cast %11 : vector<4xf32> to vector<1x4xf32>
    %13 = vector.extract_strided_slice %2 {offsets = [1, 0, 0], sizes = [1, 40, 4], strides = [1, 1, 1]} : vector<4x40x4xf32> to vector<1x40x4xf32>
    %14 = vector.shape_cast %13 : vector<1x40x4xf32> to vector<40x4xf32>
    %cst_8 = arith.constant dense<0.000000e+00> : vector<4xf32>
    %15 = vector.multi_reduction <add>, %14, %cst_8 [0] : vector<40x4xf32> to vector<4xf32>
    %16 = vector.shape_cast %15 : vector<4xf32> to vector<1x4xf32>
    %17 = arith.addf %8, %16 : vector<1x4xf32>
    %18 = vector.extract_strided_slice %2 {offsets = [1, 0, 0], sizes = [1, 40, 4], strides = [1, 1, 1]} : vector<4x40x4xf32> to vector<1x40x4xf32>
    %19 = vector.shape_cast %18 : vector<1x40x4xf32> to vector<40x4xf32>
    %cst_9 = arith.constant dense<0xFF800000> : vector<4xf32>
    %20 = vector.multi_reduction <maximumf>, %19, %cst_9 [0] : vector<40x4xf32> to vector<4xf32>
    %21 = vector.shape_cast %20 : vector<4xf32> to vector<1x4xf32>
    %22 = arith.maximumf %12, %21 : vector<1x4xf32>
    %23 = vector.extract_strided_slice %2 {offsets = [2, 0, 0], sizes = [1, 40, 4], strides = [1, 1, 1]} : vector<4x40x4xf32> to vector<1x40x4xf32>
    %24 = vector.shape_cast %23 : vector<1x40x4xf32> to vector<40x4xf32>
    %cst_10 = arith.constant dense<0.000000e+00> : vector<4xf32>
    %25 = vector.multi_reduction <add>, %24, %cst_10 [0] : vector<40x4xf32> to vector<4xf32>
    %26 = vector.shape_cast %25 : vector<4xf32> to vector<1x4xf32>
    %27 = arith.addf %17, %26 : vector<1x4xf32>
    %28 = vector.extract_strided_slice %2 {offsets = [2, 0, 0], sizes = [1, 40, 4], strides = [1, 1, 1]} : vector<4x40x4xf32> to vector<1x40x4xf32>
    %29 = vector.shape_cast %28 : vector<1x40x4xf32> to vector<40x4xf32>
    %cst_11 = arith.constant dense<0xFF800000> : vector<4xf32>
    %30 = vector.multi_reduction <maximumf>, %29, %cst_11 [0] : vector<40x4xf32> to vector<4xf32>
    %31 = vector.shape_cast %30 : vector<4xf32> to vector<1x4xf32>
    %32 = arith.maximumf %22, %31 : vector<1x4xf32>
    %33 = vector.extract_strided_slice %2 {offsets = [3, 0, 0], sizes = [1, 40, 4], strides = [1, 1, 1]} : vector<4x40x4xf32> to vector<1x40x4xf32>
    %34 = vector.shape_cast %33 : vector<1x40x4xf32> to vector<40x4xf32>
    %cst_12 = arith.constant dense<0.000000e+00> : vector<4xf32>
    %35 = vector.multi_reduction <add>, %34, %cst_12 [0] : vector<40x4xf32> to vector<4xf32>
    %36 = vector.shape_cast %35 : vector<4xf32> to vector<1x4xf32>
    %37 = arith.addf %27, %36 : vector<1x4xf32>
    %38 = vector.extract_strided_slice %2 {offsets = [3, 0, 0], sizes = [1, 40, 4], strides = [1, 1, 1]} : vector<4x40x4xf32> to vector<1x40x4xf32>
    %39 = vector.shape_cast %38 : vector<1x40x4xf32> to vector<40x4xf32>
    %cst_13 = arith.constant dense<0xFF800000> : vector<4xf32>
    %40 = vector.multi_reduction <maximumf>, %39, %cst_13 [0] : vector<40x4xf32> to vector<4xf32>
    %41 = vector.shape_cast %40 : vector<4xf32> to vector<1x4xf32>
    %42 = arith.maximumf %32, %41 : vector<1x4xf32>
    %cst_14 = arith.constant 6.250000e-03 : f32
    %43 = vector.broadcast %cst_14 : f32 to vector<1x4xf32>
    %44 = arith.mulf %37, %43 : vector<1x4xf32>
    %45 = tpu.concatenate %44, %42 in 0 : vector<1x4xf32>, vector<1x4xf32> -> vector<2x4xf32>
    %cst_15 = arith.constant dense<0.000000e+00> : vector<2x2xf32>
    %46 = tpu.matmul %45, %3, %cst_15 {dimension_numbers = #tpu.dot_dimension_numbers<[1], [0], [0], [1], [0, 0, 1, 1], [], []>} : vector<2x4xf32>, vector<4x2xf32>, vector<2x2xf32> -> vector<2x2xf32>
    %cst_16 = arith.constant 0.000000e+00 : f32
    %47 = vector.broadcast %cst_16 : f32 to vector<2x2xf32>
    %48 = arith.maximumf %46, %47 : vector<2x2xf32>
    %cst_17 = arith.constant dense<0.000000e+00> : vector<2x4xf32>
    %49 = tpu.matmul %48, %4, %cst_17 {dimension_numbers = #tpu.dot_dimension_numbers<[1], [0], [0], [1], [0, 0, 1, 1], [], []>} : vector<2x2xf32>, vector<2x4xf32>, vector<2x4xf32> -> vector<2x4xf32>
    %50 = vector.extract_strided_slice %49 {offsets = [0, 0], sizes = [1, 4], strides = [1, 1]} : vector<2x4xf32> to vector<1x4xf32>
    %51 = vector.extract_strided_slice %49 {offsets = [1, 0], sizes = [1, 4], strides = [1, 1]} : vector<2x4xf32> to vector<1x4xf32>
    %52 = arith.addf %50, %51 : vector<1x4xf32>
    %cst_18 = arith.constant 0.000000e+00 : f32
    %53 = vector.broadcast %cst_18 : f32 to vector<1x4xf32>
    %54 = arith.subf %53, %52 : vector<1x4xf32>
    %55 = math.exp %54 : vector<1x4xf32>
    %cst_19 = arith.constant 1.000000e+00 : f32
    %56 = vector.broadcast %cst_19 : f32 to vector<1x4xf32>
    %57 = arith.addf %56, %55 : vector<1x4xf32>
    %cst_20 = arith.constant 1.000000e+00 : f32
    %58 = vector.broadcast %cst_20 : f32 to vector<1x4xf32>
    %59 = arith.divf %58, %57 : vector<1x4xf32>
    %60 = vector.shape_cast %59 : vector<1x4xf32> to vector<1x1x4xf32>
    %61 = vector.broadcast %60 : vector<1x1x4xf32> to vector<4x59x4xf32>
    %62 = arith.mulf %1, %61 : vector<4x59x4xf32>
    %63 = vector.extract_strided_slice %62 {offsets = [0, 9, 0], sizes = [4, 40, 4], strides = [1, 1, 1]} : vector<4x59x4xf32> to vector<4x40x4xf32>
    %c0_21 = arith.constant 0 : index
    %c0_22 = arith.constant 0 : index
    %c0_23 = arith.constant 0 : index
    %c0_24 = arith.constant 0 : index
    %64 = vector.load %arg15[%c0_21, %c0_22, %c0_23, %c0_24] : memref<1x4x40x4xf32, #tpu.memory_space<vmem>>, vector<1x4x40x4xf32>
    %65 = vector.shape_cast %64 : vector<1x4x40x4xf32> to vector<4x40x4xf32>
    %66 = vector.shape_cast %63 : vector<4x40x4xf32> to vector<1x4x40x4xf32>
    tpu.vector_store %arg15[%c0_21, %c0_22, %c0_23, %c0_24], %66 {strides = array<i32>} : memref<1x4x40x4xf32, #tpu.memory_space<vmem>>, vector<1x4x40x4xf32>,
    %67 = vector.extract_strided_slice %62 {offsets = [0, 0, 0], sizes = [4, 40, 4], strides = [1, 1, 1]} : vector<4x59x4xf32> to vector<4x40x4xf32>
    %68 = vector.extract_strided_slice %62 {offsets = [0, 1, 0], sizes = [4, 40, 4], strides = [1, 1, 1]} : vector<4x59x4xf32> to vector<4x40x4xf32>
    %69 = vector.extract_strided_slice %62 {offsets = [0, 2, 0], sizes = [4, 40, 4], strides = [1, 1, 1]} : vector<4x59x4xf32> to vector<4x40x4xf32>
    %70 = vector.extract_strided_slice %62 {offsets = [0, 3, 0], sizes = [4, 40, 4], strides = [1, 1, 1]} : vector<4x59x4xf32> to vector<4x40x4xf32>
    %71 = vector.extract_strided_slice %62 {offsets = [0, 4, 0], sizes = [4, 40, 4], strides = [1, 1, 1]} : vector<4x59x4xf32> to vector<4x40x4xf32>
    %72 = vector.extract_strided_slice %62 {offsets = [0, 5, 0], sizes = [4, 40, 4], strides = [1, 1, 1]} : vector<4x59x4xf32> to vector<4x40x4xf32>
    %73 = vector.extract_strided_slice %62 {offsets = [0, 6, 0], sizes = [4, 40, 4], strides = [1, 1, 1]} : vector<4x59x4xf32> to vector<4x40x4xf32>
    %74 = vector.extract_strided_slice %62 {offsets = [0, 7, 0], sizes = [4, 40, 4], strides = [1, 1, 1]} : vector<4x59x4xf32> to vector<4x40x4xf32>
    %75 = vector.extract_strided_slice %62 {offsets = [0, 8, 0], sizes = [4, 40, 4], strides = [1, 1, 1]} : vector<4x59x4xf32> to vector<4x40x4xf32>
    %76 = vector.extract_strided_slice %62 {offsets = [0, 9, 0], sizes = [4, 40, 4], strides = [1, 1, 1]} : vector<4x59x4xf32> to vector<4x40x4xf32>
    %77 = vector.extract_strided_slice %62 {offsets = [0, 10, 0], sizes = [4, 40, 4], strides = [1, 1, 1]} : vector<4x59x4xf32> to vector<4x40x4xf32>
    %78 = vector.extract_strided_slice %62 {offsets = [0, 11, 0], sizes = [4, 40, 4], strides = [1, 1, 1]} : vector<4x59x4xf32> to vector<4x40x4xf32>
    %79 = vector.extract_strided_slice %62 {offsets = [0, 12, 0], sizes = [4, 40, 4], strides = [1, 1, 1]} : vector<4x59x4xf32> to vector<4x40x4xf32>
    %80 = vector.extract_strided_slice %62 {offsets = [0, 13, 0], sizes = [4, 40, 4], strides = [1, 1, 1]} : vector<4x59x4xf32> to vector<4x40x4xf32>
    %81 = vector.extract_strided_slice %62 {offsets = [0, 14, 0], sizes = [4, 40, 4], strides = [1, 1, 1]} : vector<4x59x4xf32> to vector<4x40x4xf32>
    %82 = vector.extract_strided_slice %62 {offsets = [0, 15, 0], sizes = [4, 40, 4], strides = [1, 1, 1]} : vector<4x59x4xf32> to vector<4x40x4xf32>
    %83 = vector.extract_strided_slice %62 {offsets = [0, 16, 0], sizes = [4, 40, 4], strides = [1, 1, 1]} : vector<4x59x4xf32> to vector<4x40x4xf32>
    %84 = vector.extract_strided_slice %62 {offsets = [0, 17, 0], sizes = [4, 40, 4], strides = [1, 1, 1]} : vector<4x59x4xf32> to vector<4x40x4xf32>
    %85 = vector.extract_strided_slice %62 {offsets = [0, 18, 0], sizes = [4, 40, 4], strides = [1, 1, 1]} : vector<4x59x4xf32> to vector<4x40x4xf32>
    %86 = vector.extract_strided_slice %62 {offsets = [0, 19, 0], sizes = [4, 40, 4], strides = [1, 1, 1]} : vector<4x59x4xf32> to vector<4x40x4xf32>
    %87 = tpu.concatenate %67, %68, %69, %70, %71, %72, %73, %74, %75, %76, %77, %78, %79, %80, %81, %82 in 2 : vector<4x40x4xf32>, vector<4x40x4xf32>, vector<4x40x4xf32>, vector<4x40x4xf32>, vector<4x40x4xf32>, vector<4x40x4xf32>, vector<4x40x4xf32>, vector<4x40x4xf32>, vector<4x40x4xf32>, vector<4x40x4xf32>, vector<4x40x4xf32>, vector<4x40x4xf32>, vector<4x40x4xf32>, vector<4x40x4xf32>, vector<4x40x4xf32>, vector<4x40x4xf32> -> vector<4x40x64xf32>
    %88 = tpu.concatenate %83, %84, %85, %86 in 2 : vector<4x40x4xf32>, vector<4x40x4xf32>, vector<4x40x4xf32>, vector<4x40x4xf32> -> vector<4x40x16xf32>
    %89 = tpu.concatenate %87, %88 in 2 : vector<4x40x64xf32>, vector<4x40x16xf32> -> vector<4x40x80xf32>
    %90 = vector.shape_cast %89 : vector<4x40x80xf32> to vector<160x80xf32>
    %c0_25 = arith.constant 0 : index
    %c0_26 = arith.constant 0 : index
    %91 = vector.load %arg7[%c0_25, %c0_26] : memref<80x8xf32, #tpu.memory_space<vmem>>, vector<80x8xf32>
    %cst_27 = arith.constant dense<0.000000e+00> : vector<160x8xf32>
    %92 = tpu.matmul %90, %91, %cst_27 {dimension_numbers = #tpu.dot_dimension_numbers<[1], [0], [0], [1], [0, 0, 1, 1], [], []>} : vector<160x80xf32>, vector<80x8xf32>, vector<160x8xf32> -> vector<160x8xf32>
    %c0_28 = arith.constant 0 : index
    %c0_29 = arith.constant 0 : index
    %93 = vector.load %arg8[%c0_28, %c0_29] : memref<1x8xf32, #tpu.memory_space<vmem>>, vector<1x8xf32>
    %94 = vector.broadcast %93 : vector<1x8xf32> to vector<160x8xf32>
    %95 = arith.addf %92, %94 : vector<160x8xf32>
    %cst_30 = arith.constant 0.000000e+00 : f32
    %96 = vector.broadcast %cst_30 : f32 to vector<160x8xf32>
    %97 = arith.cmpf ogt, %95, %96 : vector<160x8xf32>
    %cst_31 = arith.constant 0.000000e+00 : f32
    %98 = vector.broadcast %cst_31 : f32 to vector<160x8xf32>
    %99 = arith.minimumf %95, %98 : vector<160x8xf32>
    %100 = math.exp %99 : vector<160x8xf32>
    %cst_32 = arith.constant 1.000000e+00 : f32
    %101 = vector.broadcast %cst_32 : f32 to vector<160x8xf32>
    %102 = arith.subf %100, %101 : vector<160x8xf32>
    %103 = arith.select %97, %95, %102 : vector<160x8xi1>, vector<160x8xf32>
    %104 = vector.shape_cast %103 : vector<160x8xf32> to vector<4x40x8xf32>
    %105 = vector.extract_strided_slice %104 {offsets = [0, 0, 0], sizes = [4, 5, 8], strides = [1, 1, 1]} : vector<4x40x8xf32> to vector<4x5x8xf32>
    %cst_33 = arith.constant dense<0xFF800000> : vector<4x8xf32>
    %106 = vector.multi_reduction <maximumf>, %105, %cst_33 [1] : vector<4x5x8xf32> to vector<4x8xf32>
    %107 = vector.shape_cast %106 : vector<4x8xf32> to vector<4x1x8xf32>
    %108 = vector.extract_strided_slice %104 {offsets = [0, 5, 0], sizes = [4, 5, 8], strides = [1, 1, 1]} : vector<4x40x8xf32> to vector<4x5x8xf32>
    %cst_34 = arith.constant dense<0xFF800000> : vector<4x8xf32>
    %109 = vector.multi_reduction <maximumf>, %108, %cst_34 [1] : vector<4x5x8xf32> to vector<4x8xf32>
    %110 = vector.shape_cast %109 : vector<4x8xf32> to vector<4x1x8xf32>
    %111 = vector.extract_strided_slice %104 {offsets = [0, 10, 0], sizes = [4, 5, 8], strides = [1, 1, 1]} : vector<4x40x8xf32> to vector<4x5x8xf32>
    %cst_35 = arith.constant dense<0xFF800000> : vector<4x8xf32>
    %112 = vector.multi_reduction <maximumf>, %111, %cst_35 [1] : vector<4x5x8xf32> to vector<4x8xf32>
    %113 = vector.shape_cast %112 : vector<4x8xf32> to vector<4x1x8xf32>
    %114 = vector.extract_strided_slice %104 {offsets = [0, 15, 0], sizes = [4, 5, 8], strides = [1, 1, 1]} : vector<4x40x8xf32> to vector<4x5x8xf32>
    %cst_36 = arith.constant dense<0xFF800000> : vector<4x8xf32>
    %115 = vector.multi_reduction <maximumf>, %114, %cst_36 [1] : vector<4x5x8xf32> to vector<4x8xf32>
    %116 = vector.shape_cast %115 : vector<4x8xf32> to vector<4x1x8xf32>
    %117 = vector.extract_strided_slice %104 {offsets = [0, 20, 0], sizes = [4, 5, 8], strides = [1, 1, 1]} : vector<4x40x8xf32> to vector<4x5x8xf32>
    %cst_37 = arith.constant dense<0xFF800000> : vector<4x8xf32>
    %118 = vector.multi_reduction <maximumf>, %117, %cst_37 [1] : vector<4x5x8xf32> to vector<4x8xf32>
    %119 = vector.shape_cast %118 : vector<4x8xf32> to vector<4x1x8xf32>
    %120 = vector.extract_strided_slice %104 {offsets = [0, 25, 0], sizes = [4, 5, 8], strides = [1, 1, 1]} : vector<4x40x8xf32> to vector<4x5x8xf32>
    %cst_38 = arith.constant dense<0xFF800000> : vector<4x8xf32>
    %121 = vector.multi_reduction <maximumf>, %120, %cst_38 [1] : vector<4x5x8xf32> to vector<4x8xf32>
    %122 = vector.shape_cast %121 : vector<4x8xf32> to vector<4x1x8xf32>
    %123 = vector.extract_strided_slice %104 {offsets = [0, 30, 0], sizes = [4, 5, 8], strides = [1, 1, 1]} : vector<4x40x8xf32> to vector<4x5x8xf32>
    %cst_39 = arith.constant dense<0xFF800000> : vector<4x8xf32>
    %124 = vector.multi_reduction <maximumf>, %123, %cst_39 [1] : vector<4x5x8xf32> to vector<4x8xf32>
    %125 = vector.shape_cast %124 : vector<4x8xf32> to vector<4x1x8xf32>
    %126 = vector.extract_strided_slice %104 {offsets = [0, 35, 0], sizes = [4, 5, 8], strides = [1, 1, 1]} : vector<4x40x8xf32> to vector<4x5x8xf32>
    %cst_40 = arith.constant dense<0xFF800000> : vector<4x8xf32>
    %127 = vector.multi_reduction <maximumf>, %126, %cst_40 [1] : vector<4x5x8xf32> to vector<4x8xf32>
    %128 = vector.shape_cast %127 : vector<4x8xf32> to vector<4x1x8xf32>
    %129 = tpu.concatenate %107, %110, %113, %116, %119, %122, %125, %128 in 1 : vector<4x1x8xf32>, vector<4x1x8xf32>, vector<4x1x8xf32>, vector<4x1x8xf32>, vector<4x1x8xf32>, vector<4x1x8xf32>, vector<4x1x8xf32>, vector<4x1x8xf32> -> vector<4x8x8xf32>
    %cst_41 = arith.constant 0.000000e+00 : f32
    %130 = vector.broadcast %cst_41 : f32 to vector<4x1x8xf32>
    %cst_42 = arith.constant 0.000000e+00 : f32
    %131 = vector.broadcast %cst_42 : f32 to vector<4x2x8xf32>
    %132 = tpu.concatenate %130, %129, %131 in 1 : vector<4x1x8xf32>, vector<4x8x8xf32>, vector<4x2x8xf32> -> vector<4x11x8xf32>
    %133 = vector.extract_strided_slice %132 {offsets = [0, 0, 0], sizes = [4, 8, 8], strides = [1, 1, 1]} : vector<4x11x8xf32> to vector<4x8x8xf32>
    %134 = vector.extract_strided_slice %132 {offsets = [0, 1, 0], sizes = [4, 8, 8], strides = [1, 1, 1]} : vector<4x11x8xf32> to vector<4x8x8xf32>
    %135 = vector.extract_strided_slice %132 {offsets = [0, 2, 0], sizes = [4, 8, 8], strides = [1, 1, 1]} : vector<4x11x8xf32> to vector<4x8x8xf32>
    %136 = vector.extract_strided_slice %132 {offsets = [0, 3, 0], sizes = [4, 8, 8], strides = [1, 1, 1]} : vector<4x11x8xf32> to vector<4x8x8xf32>
    %137 = tpu.concatenate %133, %134, %135, %136 in 2 : vector<4x8x8xf32>, vector<4x8x8xf32>, vector<4x8x8xf32>, vector<4x8x8xf32> -> vector<4x8x32xf32>
    %138 = vector.shape_cast %137 : vector<4x8x32xf32> to vector<32x32xf32>
    %c0_43 = arith.constant 0 : index
    %c0_44 = arith.constant 0 : index
    %139 = vector.load %arg9[%c0_43, %c0_44] : memref<32x8xf32, #tpu.memory_space<vmem>>, vector<32x8xf32>
    %cst_45 = arith.constant dense<0.000000e+00> : vector<32x8xf32>
    %140 = tpu.matmul %138, %139, %cst_45 {dimension_numbers = #tpu.dot_dimension_numbers<[1], [0], [0], [1], [0, 0, 1, 1], [], []>} : vector<32x32xf32>, vector<32x8xf32>, vector<32x8xf32> -> vector<32x8xf32>
    %c0_46 = arith.constant 0 : index
    %c0_47 = arith.constant 0 : index
    %141 = vector.load %arg10[%c0_46, %c0_47] : memref<1x8xf32, #tpu.memory_space<vmem>>, vector<1x8xf32>
    %142 = vector.broadcast %141 : vector<1x8xf32> to vector<32x8xf32>
    %143 = arith.addf %140, %142 : vector<32x8xf32>
    %cst_48 = arith.constant 0.000000e+00 : f32
    %144 = vector.broadcast %cst_48 : f32 to vector<32x8xf32>
    %145 = arith.cmpf ogt, %143, %144 : vector<32x8xf32>
    %cst_49 = arith.constant 0.000000e+00 : f32
    %146 = vector.broadcast %cst_49 : f32 to vector<32x8xf32>
    %147 = arith.minimumf %143, %146 : vector<32x8xf32>
    %148 = math.exp %147 : vector<32x8xf32>
    %cst_50 = arith.constant 1.000000e+00 : f32
    %149 = vector.broadcast %cst_50 : f32 to vector<32x8xf32>
    %150 = arith.subf %148, %149 : vector<32x8xf32>
    %151 = arith.select %145, %143, %150 : vector<32x8xi1>, vector<32x8xf32>
    %152 = vector.shape_cast %151 : vector<32x8xf32> to vector<4x8x8xf32>
    %153 = vector.extract_strided_slice %152 {offsets = [0, 0, 0], sizes = [4, 2, 8], strides = [1, 1, 1]} : vector<4x8x8xf32> to vector<4x2x8xf32>
    %cst_51 = arith.constant dense<0xFF800000> : vector<4x8xf32>
    %154 = vector.multi_reduction <maximumf>, %153, %cst_51 [1] : vector<4x2x8xf32> to vector<4x8xf32>
    %155 = vector.shape_cast %154 : vector<4x8xf32> to vector<4x1x8xf32>
    %156 = vector.extract_strided_slice %152 {offsets = [0, 2, 0], sizes = [4, 2, 8], strides = [1, 1, 1]} : vector<4x8x8xf32> to vector<4x2x8xf32>
    %cst_52 = arith.constant dense<0xFF800000> : vector<4x8xf32>
    %157 = vector.multi_reduction <maximumf>, %156, %cst_52 [1] : vector<4x2x8xf32> to vector<4x8xf32>
    %158 = vector.shape_cast %157 : vector<4x8xf32> to vector<4x1x8xf32>
    %159 = vector.extract_strided_slice %152 {offsets = [0, 4, 0], sizes = [4, 2, 8], strides = [1, 1, 1]} : vector<4x8x8xf32> to vector<4x2x8xf32>
    %cst_53 = arith.constant dense<0xFF800000> : vector<4x8xf32>
    %160 = vector.multi_reduction <maximumf>, %159, %cst_53 [1] : vector<4x2x8xf32> to vector<4x8xf32>
    %161 = vector.shape_cast %160 : vector<4x8xf32> to vector<4x1x8xf32>
    %162 = vector.extract_strided_slice %152 {offsets = [0, 6, 0], sizes = [4, 2, 8], strides = [1, 1, 1]} : vector<4x8x8xf32> to vector<4x2x8xf32>
    %cst_54 = arith.constant dense<0xFF800000> : vector<4x8xf32>
    %163 = vector.multi_reduction <maximumf>, %162, %cst_54 [1] : vector<4x2x8xf32> to vector<4x8xf32>
    %164 = vector.shape_cast %163 : vector<4x8xf32> to vector<4x1x8xf32>
    %165 = tpu.concatenate %155, %158, %161, %164 in 1 : vector<4x1x8xf32>, vector<4x1x8xf32>, vector<4x1x8xf32>, vector<4x1x8xf32> -> vector<4x4x8xf32>
    %c0_55 = arith.constant 0 : index
    %c0_56 = arith.constant 0 : index
    %c0_57 = arith.constant 0 : index
    %c0_58 = arith.constant 0 : index
    %166 = vector.load %arg17[%c0_55, %c0_56, %c0_57, %c0_58] : memref<1x4x4x8xf32, #tpu.memory_space<vmem>>, vector<1x4x4x8xf32>
    %167 = vector.shape_cast %166 : vector<1x4x4x8xf32> to vector<4x4x8xf32>
    %168 = vector.shape_cast %165 : vector<4x4x8xf32> to vector<1x4x4x8xf32>
    tpu.vector_store %arg17[%c0_55, %c0_56, %c0_57, %c0_58], %168 {strides = array<i32>} : memref<1x4x4x8xf32, #tpu.memory_space<vmem>>, vector<1x4x4x8xf32>,
    %c0_59 = arith.constant 0 : index
    %c0_60 = arith.constant 0 : index
    %c0_61 = arith.constant 0 : index
    %c0_62 = arith.constant 0 : index
    %169 = vector.load %arg2[%c0_59, %c0_60, %c0_61, %c0_62] : memref<1x2x17x12xf32, #tpu.memory_space<vmem>>, vector<1x2x17x12xf32>
    %170 = vector.shape_cast %169 : vector<1x2x17x12xf32> to vector<2x17x12xf32>
    %171 = vector.extract_strided_slice %170 {offsets = [0, 2, 0], sizes = [2, 12, 12], strides = [1, 1, 1]} : vector<2x17x12xf32> to vector<2x12x12xf32>
    %c0_63 = arith.constant 0 : index
    %c0_64 = arith.constant 0 : index
    %172 = vector.load %arg5[%c0_63, %c0_64] : memref<12x6xf32, #tpu.memory_space<vmem>>, vector<12x6xf32>
    %c0_65 = arith.constant 0 : index
    %c0_66 = arith.constant 0 : index
    %173 = vector.load %arg6[%c0_65, %c0_66] : memref<6x12xf32, #tpu.memory_space<vmem>>, vector<6x12xf32>
    %174 = vector.extract_strided_slice %171 {offsets = [0, 0, 0], sizes = [1, 12, 12], strides = [1, 1, 1]} : vector<2x12x12xf32> to vector<1x12x12xf32>
    %175 = vector.shape_cast %174 : vector<1x12x12xf32> to vector<12x12xf32>
    %cst_67 = arith.constant dense<0.000000e+00> : vector<12xf32>
    %176 = vector.multi_reduction <add>, %175, %cst_67 [0] : vector<12x12xf32> to vector<12xf32>
    %177 = vector.shape_cast %176 : vector<12xf32> to vector<1x12xf32>
    %178 = vector.extract_strided_slice %171 {offsets = [0, 0, 0], sizes = [1, 12, 12], strides = [1, 1, 1]} : vector<2x12x12xf32> to vector<1x12x12xf32>
    %179 = vector.shape_cast %178 : vector<1x12x12xf32> to vector<12x12xf32>
    %cst_68 = arith.constant dense<0xFF800000> : vector<12xf32>
    %180 = vector.multi_reduction <maximumf>, %179, %cst_68 [0] : vector<12x12xf32> to vector<12xf32>
    %181 = vector.shape_cast %180 : vector<12xf32> to vector<1x12xf32>
    %182 = vector.extract_strided_slice %171 {offsets = [1, 0, 0], sizes = [1, 12, 12], strides = [1, 1, 1]} : vector<2x12x12xf32> to vector<1x12x12xf32>
    %183 = vector.shape_cast %182 : vector<1x12x12xf32> to vector<12x12xf32>
    %cst_69 = arith.constant dense<0.000000e+00> : vector<12xf32>
    %184 = vector.multi_reduction <add>, %183, %cst_69 [0] : vector<12x12xf32> to vector<12xf32>
    %185 = vector.shape_cast %184 : vector<12xf32> to vector<1x12xf32>
    %186 = arith.addf %177, %185 : vector<1x12xf32>
    %187 = vector.extract_strided_slice %171 {offsets = [1, 0, 0], sizes = [1, 12, 12], strides = [1, 1, 1]} : vector<2x12x12xf32> to vector<1x12x12xf32>
    %188 = vector.shape_cast %187 : vector<1x12x12xf32> to vector<12x12xf32>
    %cst_70 = arith.constant dense<0xFF800000> : vector<12xf32>
    %189 = vector.multi_reduction <maximumf>, %188, %cst_70 [0] : vector<12x12xf32> to vector<12xf32>
    %190 = vector.shape_cast %189 : vector<12xf32> to vector<1x12xf32>
    %191 = arith.maximumf %181, %190 : vector<1x12xf32>
    %cst_71 = arith.constant 0.0416666679 : f32
    %192 = vector.broadcast %cst_71 : f32 to vector<1x12xf32>
    %193 = arith.mulf %186, %192 : vector<1x12xf32>
    %194 = tpu.concatenate %193, %191 in 0 : vector<1x12xf32>, vector<1x12xf32> -> vector<2x12xf32>
    %cst_72 = arith.constant dense<0.000000e+00> : vector<2x6xf32>
    %195 = tpu.matmul %194, %172, %cst_72 {dimension_numbers = #tpu.dot_dimension_numbers<[1], [0], [0], [1], [0, 0, 1, 1], [], []>} : vector<2x12xf32>, vector<12x6xf32>, vector<2x6xf32> -> vector<2x6xf32>
    %cst_73 = arith.constant 0.000000e+00 : f32
    %196 = vector.broadcast %cst_73 : f32 to vector<2x6xf32>
    %197 = arith.maximumf %195, %196 : vector<2x6xf32>
    %cst_74 = arith.constant dense<0.000000e+00> : vector<2x12xf32>
    %198 = tpu.matmul %197, %173, %cst_74 {dimension_numbers = #tpu.dot_dimension_numbers<[1], [0], [0], [1], [0, 0, 1, 1], [], []>} : vector<2x6xf32>, vector<6x12xf32>, vector<2x12xf32> -> vector<2x12xf32>
    %199 = vector.extract_strided_slice %198 {offsets = [0, 0], sizes = [1, 12], strides = [1, 1]} : vector<2x12xf32> to vector<1x12xf32>
    %200 = vector.extract_strided_slice %198 {offsets = [1, 0], sizes = [1, 12], strides = [1, 1]} : vector<2x12xf32> to vector<1x12xf32>
    %201 = arith.addf %199, %200 : vector<1x12xf32>
    %cst_75 = arith.constant 0.000000e+00 : f32
    %202 = vector.broadcast %cst_75 : f32 to vector<1x12xf32>
    %203 = arith.subf %202, %201 : vector<1x12xf32>
    %204 = math.exp %203 : vector<1x12xf32>
    %cst_76 = arith.constant 1.000000e+00 : f32
    %205 = vector.broadcast %cst_76 : f32 to vector<1x12xf32>
    %206 = arith.addf %205, %204 : vector<1x12xf32>
    %cst_77 = arith.constant 1.000000e+00 : f32
    %207 = vector.broadcast %cst_77 : f32 to vector<1x12xf32>
    %208 = arith.divf %207, %206 : vector<1x12xf32>
    %209 = vector.shape_cast %208 : vector<1x12xf32> to vector<1x1x12xf32>
    %210 = vector.broadcast %209 : vector<1x1x12xf32> to vector<2x17x12xf32>
    %211 = arith.mulf %170, %210 : vector<2x17x12xf32>
    %212 = vector.extract_strided_slice %211 {offsets = [0, 2, 0], sizes = [2, 12, 12], strides = [1, 1, 1]} : vector<2x17x12xf32> to vector<2x12x12xf32>
    %c0_78 = arith.constant 0 : index
    %c0_79 = arith.constant 0 : index
    %c0_80 = arith.constant 0 : index
    %c0_81 = arith.constant 0 : index
    %213 = vector.load %arg16[%c0_78, %c0_79, %c0_80, %c0_81] : memref<1x2x12x12xf32, #tpu.memory_space<vmem>>, vector<1x2x12x12xf32>
    %214 = vector.shape_cast %213 : vector<1x2x12x12xf32> to vector<2x12x12xf32>
    %215 = vector.shape_cast %212 : vector<2x12x12xf32> to vector<1x2x12x12xf32>
    tpu.vector_store %arg16[%c0_78, %c0_79, %c0_80, %c0_81], %215 {strides = array<i32>} : memref<1x2x12x12xf32, #tpu.memory_space<vmem>>, vector<1x2x12x12xf32>,
    %216 = vector.extract_strided_slice %211 {offsets = [0, 0, 0], sizes = [1, 17, 12], strides = [1, 1, 1]} : vector<2x17x12xf32> to vector<1x17x12xf32>
    %217 = vector.shape_cast %216 : vector<1x17x12xf32> to vector<17x12xf32>
    %218 = vector.extract_strided_slice %217 {offsets = [0, 0], sizes = [12, 12], strides = [1, 1]} : vector<17x12xf32> to vector<12x12xf32>
    %219 = vector.extract_strided_slice %217 {offsets = [1, 0], sizes = [12, 12], strides = [1, 1]} : vector<17x12xf32> to vector<12x12xf32>
    %220 = vector.extract_strided_slice %217 {offsets = [2, 0], sizes = [12, 12], strides = [1, 1]} : vector<17x12xf32> to vector<12x12xf32>
    %221 = vector.extract_strided_slice %217 {offsets = [3, 0], sizes = [12, 12], strides = [1, 1]} : vector<17x12xf32> to vector<12x12xf32>
    %222 = vector.extract_strided_slice %217 {offsets = [4, 0], sizes = [12, 12], strides = [1, 1]} : vector<17x12xf32> to vector<12x12xf32>
    %223 = vector.extract_strided_slice %217 {offsets = [5, 0], sizes = [12, 12], strides = [1, 1]} : vector<17x12xf32> to vector<12x12xf32>
    %224 = tpu.concatenate %218, %219, %220, %221, %222, %223 in 1 : vector<12x12xf32>, vector<12x12xf32>, vector<12x12xf32>, vector<12x12xf32>, vector<12x12xf32>, vector<12x12xf32> -> vector<12x72xf32>
    %c0_82 = arith.constant 0 : index
    %c0_83 = arith.constant 0 : index
    %225 = vector.load %arg11[%c0_82, %c0_83] : memref<72x8xf32, #tpu.memory_space<vmem>>, vector<72x8xf32>
    %cst_84 = arith.constant dense<0.000000e+00> : vector<12x8xf32>
    %226 = tpu.matmul %224, %225, %cst_84 {dimension_numbers = #tpu.dot_dimension_numbers<[1], [0], [0], [1], [0, 0, 1, 1], [], []>} : vector<12x72xf32>, vector<72x8xf32>, vector<12x8xf32> -> vector<12x8xf32>
    %c0_85 = arith.constant 0 : index
    %c0_86 = arith.constant 0 : index
    %227 = vector.load %arg12[%c0_85, %c0_86] : memref<1x8xf32, #tpu.memory_space<vmem>>, vector<1x8xf32>
    %228 = vector.broadcast %227 : vector<1x8xf32> to vector<12x8xf32>
    %229 = arith.addf %226, %228 : vector<12x8xf32>
    %cst_87 = arith.constant 0.000000e+00 : f32
    %230 = vector.broadcast %cst_87 : f32 to vector<12x8xf32>
    %231 = arith.cmpf ogt, %229, %230 : vector<12x8xf32>
    %cst_88 = arith.constant 0.000000e+00 : f32
    %232 = vector.broadcast %cst_88 : f32 to vector<12x8xf32>
    %233 = arith.minimumf %229, %232 : vector<12x8xf32>
    %234 = math.exp %233 : vector<12x8xf32>
    %cst_89 = arith.constant 1.000000e+00 : f32
    %235 = vector.broadcast %cst_89 : f32 to vector<12x8xf32>
    %236 = arith.subf %234, %235 : vector<12x8xf32>
    %237 = arith.select %231, %229, %236 : vector<12x8xi1>, vector<12x8xf32>
    %238 = vector.extract_strided_slice %237 {offsets = [0, 0], sizes = [6, 8], strides = [1, 1]} : vector<12x8xf32> to vector<6x8xf32>
    %cst_90 = arith.constant dense<0xFF800000> : vector<8xf32>
    %239 = vector.multi_reduction <maximumf>, %238, %cst_90 [0] : vector<6x8xf32> to vector<8xf32>
    %240 = vector.shape_cast %239 : vector<8xf32> to vector<1x8xf32>
    %241 = vector.extract_strided_slice %237 {offsets = [3, 0], sizes = [6, 8], strides = [1, 1]} : vector<12x8xf32> to vector<6x8xf32>
    %cst_91 = arith.constant dense<0xFF800000> : vector<8xf32>
    %242 = vector.multi_reduction <maximumf>, %241, %cst_91 [0] : vector<6x8xf32> to vector<8xf32>
    %243 = vector.shape_cast %242 : vector<8xf32> to vector<1x8xf32>
    %244 = vector.extract_strided_slice %237 {offsets = [6, 0], sizes = [6, 8], strides = [1, 1]} : vector<12x8xf32> to vector<6x8xf32>
    %cst_92 = arith.constant dense<0xFF800000> : vector<8xf32>
    %245 = vector.multi_reduction <maximumf>, %244, %cst_92 [0] : vector<6x8xf32> to vector<8xf32>
    %246 = vector.shape_cast %245 : vector<8xf32> to vector<1x8xf32>
    %247 = tpu.concatenate %240, %243, %246 in 0 : vector<1x8xf32>, vector<1x8xf32>, vector<1x8xf32> -> vector<3x8xf32>
    %248 = vector.extract_strided_slice %211 {offsets = [1, 0, 0], sizes = [1, 17, 12], strides = [1, 1, 1]} : vector<2x17x12xf32> to vector<1x17x12xf32>
    %249 = vector.shape_cast %248 : vector<1x17x12xf32> to vector<17x12xf32>
    %250 = vector.extract_strided_slice %249 {offsets = [0, 0], sizes = [12, 12], strides = [1, 1]} : vector<17x12xf32> to vector<12x12xf32>
    %251 = vector.extract_strided_slice %249 {offsets = [1, 0], sizes = [12, 12], strides = [1, 1]} : vector<17x12xf32> to vector<12x12xf32>
    %252 = vector.extract_strided_slice %249 {offsets = [2, 0], sizes = [12, 12], strides = [1, 1]} : vector<17x12xf32> to vector<12x12xf32>
    %253 = vector.extract_strided_slice %249 {offsets = [3, 0], sizes = [12, 12], strides = [1, 1]} : vector<17x12xf32> to vector<12x12xf32>
    %254 = vector.extract_strided_slice %249 {offsets = [4, 0], sizes = [12, 12], strides = [1, 1]} : vector<17x12xf32> to vector<12x12xf32>
    %255 = vector.extract_strided_slice %249 {offsets = [5, 0], sizes = [12, 12], strides = [1, 1]} : vector<17x12xf32> to vector<12x12xf32>
    %256 = tpu.concatenate %250, %251, %252, %253, %254, %255 in 1 : vector<12x12xf32>, vector<12x12xf32>, vector<12x12xf32>, vector<12x12xf32>, vector<12x12xf32>, vector<12x12xf32> -> vector<12x72xf32>
    %c0_93 = arith.constant 0 : index
    %c0_94 = arith.constant 0 : index
    %257 = vector.load %arg11[%c0_93, %c0_94] : memref<72x8xf32, #tpu.memory_space<vmem>>, vector<72x8xf32>
    %cst_95 = arith.constant dense<0.000000e+00> : vector<12x8xf32>
    %258 = tpu.matmul %256, %257, %cst_95 {dimension_numbers = #tpu.dot_dimension_numbers<[1], [0], [0], [1], [0, 0, 1, 1], [], []>} : vector<12x72xf32>, vector<72x8xf32>, vector<12x8xf32> -> vector<12x8xf32>
    %c0_96 = arith.constant 0 : index
    %c0_97 = arith.constant 0 : index
    %259 = vector.load %arg12[%c0_96, %c0_97] : memref<1x8xf32, #tpu.memory_space<vmem>>, vector<1x8xf32>
    %260 = vector.broadcast %259 : vector<1x8xf32> to vector<12x8xf32>
    %261 = arith.addf %258, %260 : vector<12x8xf32>
    %cst_98 = arith.constant 0.000000e+00 : f32
    %262 = vector.broadcast %cst_98 : f32 to vector<12x8xf32>
    %263 = arith.cmpf ogt, %261, %262 : vector<12x8xf32>
    %cst_99 = arith.constant 0.000000e+00 : f32
    %264 = vector.broadcast %cst_99 : f32 to vector<12x8xf32>
    %265 = arith.minimumf %261, %264 : vector<12x8xf32>
    %266 = math.exp %265 : vector<12x8xf32>
    %cst_100 = arith.constant 1.000000e+00 : f32
    %267 = vector.broadcast %cst_100 : f32 to vector<12x8xf32>
    %268 = arith.subf %266, %267 : vector<12x8xf32>
    %269 = arith.select %263, %261, %268 : vector<12x8xi1>, vector<12x8xf32>
    %270 = vector.extract_strided_slice %269 {offsets = [0, 0], sizes = [6, 8], strides = [1, 1]} : vector<12x8xf32> to vector<6x8xf32>
    %cst_101 = arith.constant dense<0xFF800000> : vector<8xf32>
    %271 = vector.multi_reduction <maximumf>, %270, %cst_101 [0] : vector<6x8xf32> to vector<8xf32>
    %272 = vector.shape_cast %271 : vector<8xf32> to vector<1x8xf32>
    %273 = vector.extract_strided_slice %269 {offsets = [3, 0], sizes = [6, 8], strides = [1, 1]} : vector<12x8xf32> to vector<6x8xf32>
    %cst_102 = arith.constant dense<0xFF800000> : vector<8xf32>
    %274 = vector.multi_reduction <maximumf>, %273, %cst_102 [0] : vector<6x8xf32> to vector<8xf32>
    %275 = vector.shape_cast %274 : vector<8xf32> to vector<1x8xf32>
    %276 = vector.extract_strided_slice %269 {offsets = [6, 0], sizes = [6, 8], strides = [1, 1]} : vector<12x8xf32> to vector<6x8xf32>
    %cst_103 = arith.constant dense<0xFF800000> : vector<8xf32>
    %277 = vector.multi_reduction <maximumf>, %276, %cst_103 [0] : vector<6x8xf32> to vector<8xf32>
    %278 = vector.shape_cast %277 : vector<8xf32> to vector<1x8xf32>
    %279 = tpu.concatenate %272, %275, %278 in 0 : vector<1x8xf32>, vector<1x8xf32>, vector<1x8xf32> -> vector<3x8xf32>
    %280 = vector.shape_cast %247 : vector<3x8xf32> to vector<1x3x8xf32>
    %281 = vector.shape_cast %279 : vector<3x8xf32> to vector<1x3x8xf32>
    %282 = tpu.concatenate %280, %281 in 0 : vector<1x3x8xf32>, vector<1x3x8xf32> -> vector<2x3x8xf32>
    %c0_104 = arith.constant 0 : index
    %c0_105 = arith.constant 0 : index
    %c0_106 = arith.constant 0 : index
    %c0_107 = arith.constant 0 : index
    %283 = vector.load %arg18[%c0_104, %c0_105, %c0_106, %c0_107] : memref<1x2x3x8xf32, #tpu.memory_space<vmem>>, vector<1x2x3x8xf32>
    %284 = vector.shape_cast %283 : vector<1x2x3x8xf32> to vector<2x3x8xf32>
    %285 = vector.shape_cast %282 : vector<2x3x8xf32> to vector<1x2x3x8xf32>
    tpu.vector_store %arg18[%c0_104, %c0_105, %c0_106, %c0_107], %285 {strides = array<i32>} : memref<1x2x3x8xf32, #tpu.memory_space<vmem>>, vector<1x2x3x8xf32>,
    %cst_108 = arith.constant 0.000000e+00 : f32
    %286 = vector.broadcast %cst_108 : f32 to vector<1x8xf32>
    %cst_109 = arith.constant 0.000000e+00 : f32
    %287 = vector.broadcast %cst_109 : f32 to vector<4x8xf32>
    %288 = vector.extract_strided_slice %247 {offsets = [1, 0], sizes = [1, 8], strides = [1, 1]} : vector<3x8xf32> to vector<1x8xf32>
    %289 = vector.extract_strided_slice %247 {offsets = [2, 0], sizes = [1, 8], strides = [1, 1]} : vector<3x8xf32> to vector<1x8xf32>
    %290 = tpu.concatenate %286, %288, %286, %289 in 0 : vector<1x8xf32>, vector<1x8xf32>, vector<1x8xf32>, vector<1x8xf32> -> vector<4x8xf32>
    %291 = vector.extract_strided_slice %279 {offsets = [1, 0], sizes = [1, 8], strides = [1, 1]} : vector<3x8xf32> to vector<1x8xf32>
    %292 = vector.extract_strided_slice %279 {offsets = [2, 0], sizes = [1, 8], strides = [1, 1]} : vector<3x8xf32> to vector<1x8xf32>
    %293 = tpu.concatenate %286, %291, %286, %292 in 0 : vector<1x8xf32>, vector<1x8xf32>, vector<1x8xf32>, vector<1x8xf32> -> vector<4x8xf32>
    %294 = tpu.concatenate %287, %290, %287 in 1 : vector<4x8xf32>, vector<4x8xf32>, vector<4x8xf32> -> vector<4x24xf32>
    %c0_110 = arith.constant 0 : index
    %c0_111 = arith.constant 0 : index
    %295 = vector.load %arg13[%c0_110, %c0_111] : memref<24x8xf32, #tpu.memory_space<vmem>>, vector<24x8xf32>
    %cst_112 = arith.constant dense<0.000000e+00> : vector<4x8xf32>
    %296 = tpu.matmul %294, %295, %cst_112 {dimension_numbers = #tpu.dot_dimension_numbers<[1], [0], [0], [1], [0, 0, 1, 1], [], []>} : vector<4x24xf32>, vector<24x8xf32>, vector<4x8xf32> -> vector<4x8xf32>
    %c0_113 = arith.constant 0 : index
    %c0_114 = arith.constant 0 : index
    %297 = vector.load %arg14[%c0_113, %c0_114] : memref<1x8xf32, #tpu.memory_space<vmem>>, vector<1x8xf32>
    %298 = vector.broadcast %297 : vector<1x8xf32> to vector<4x8xf32>
    %299 = arith.addf %296, %298 : vector<4x8xf32>
    %300 = tpu.concatenate %290, %287, %293 in 1 : vector<4x8xf32>, vector<4x8xf32>, vector<4x8xf32> -> vector<4x24xf32>
    %c0_115 = arith.constant 0 : index
    %c0_116 = arith.constant 0 : index
    %301 = vector.load %arg13[%c0_115, %c0_116] : memref<24x8xf32, #tpu.memory_space<vmem>>, vector<24x8xf32>
    %cst_117 = arith.constant dense<0.000000e+00> : vector<4x8xf32>
    %302 = tpu.matmul %300, %301, %cst_117 {dimension_numbers = #tpu.dot_dimension_numbers<[1], [0], [0], [1], [0, 0, 1, 1], [], []>} : vector<4x24xf32>, vector<24x8xf32>, vector<4x8xf32> -> vector<4x8xf32>
    %c0_118 = arith.constant 0 : index
    %c0_119 = arith.constant 0 : index
    %303 = vector.load %arg14[%c0_118, %c0_119] : memref<1x8xf32, #tpu.memory_space<vmem>>, vector<1x8xf32>
    %304 = vector.broadcast %303 : vector<1x8xf32> to vector<4x8xf32>
    %305 = arith.addf %302, %304 : vector<4x8xf32>
    %306 = tpu.concatenate %287, %293, %287 in 1 : vector<4x8xf32>, vector<4x8xf32>, vector<4x8xf32> -> vector<4x24xf32>
    %c0_120 = arith.constant 0 : index
    %c0_121 = arith.constant 0 : index
    %307 = vector.load %arg13[%c0_120, %c0_121] : memref<24x8xf32, #tpu.memory_space<vmem>>, vector<24x8xf32>
    %cst_122 = arith.constant dense<0.000000e+00> : vector<4x8xf32>
    %308 = tpu.matmul %306, %307, %cst_122 {dimension_numbers = #tpu.dot_dimension_numbers<[1], [0], [0], [1], [0, 0, 1, 1], [], []>} : vector<4x24xf32>, vector<24x8xf32>, vector<4x8xf32> -> vector<4x8xf32>
    %c0_123 = arith.constant 0 : index
    %c0_124 = arith.constant 0 : index
    %309 = vector.load %arg14[%c0_123, %c0_124] : memref<1x8xf32, #tpu.memory_space<vmem>>, vector<1x8xf32>
    %310 = vector.broadcast %309 : vector<1x8xf32> to vector<4x8xf32>
    %311 = arith.addf %308, %310 : vector<4x8xf32>
    %312 = tpu.concatenate %293, %287, %287 in 1 : vector<4x8xf32>, vector<4x8xf32>, vector<4x8xf32> -> vector<4x24xf32>
    %c0_125 = arith.constant 0 : index
    %c0_126 = arith.constant 0 : index
    %313 = vector.load %arg13[%c0_125, %c0_126] : memref<24x8xf32, #tpu.memory_space<vmem>>, vector<24x8xf32>
    %cst_127 = arith.constant dense<0.000000e+00> : vector<4x8xf32>
    %314 = tpu.matmul %312, %313, %cst_127 {dimension_numbers = #tpu.dot_dimension_numbers<[1], [0], [0], [1], [0, 0, 1, 1], [], []>} : vector<4x24xf32>, vector<24x8xf32>, vector<4x8xf32> -> vector<4x8xf32>
    %c0_128 = arith.constant 0 : index
    %c0_129 = arith.constant 0 : index
    %315 = vector.load %arg14[%c0_128, %c0_129] : memref<1x8xf32, #tpu.memory_space<vmem>>, vector<1x8xf32>
    %316 = vector.broadcast %315 : vector<1x8xf32> to vector<4x8xf32>
    %317 = arith.addf %314, %316 : vector<4x8xf32>
    %318 = vector.shape_cast %299 : vector<4x8xf32> to vector<1x4x8xf32>
    %319 = vector.shape_cast %305 : vector<4x8xf32> to vector<1x4x8xf32>
    %320 = vector.shape_cast %311 : vector<4x8xf32> to vector<1x4x8xf32>
    %321 = vector.shape_cast %317 : vector<4x8xf32> to vector<1x4x8xf32>
    %322 = tpu.concatenate %318, %319, %320, %321 in 0 : vector<1x4x8xf32>, vector<1x4x8xf32>, vector<1x4x8xf32>, vector<1x4x8xf32> -> vector<4x4x8xf32>
    %c0_130 = arith.constant 0 : index
    %c0_131 = arith.constant 0 : index
    %c0_132 = arith.constant 0 : index
    %c0_133 = arith.constant 0 : index
    %323 = vector.load %arg19[%c0_130, %c0_131, %c0_132, %c0_133] : memref<1x4x4x8xf32, #tpu.memory_space<vmem>>, vector<1x4x4x8xf32>
    %324 = vector.shape_cast %323 : vector<1x4x4x8xf32> to vector<4x4x8xf32>
    %325 = vector.shape_cast %322 : vector<4x4x8xf32> to vector<1x4x4x8xf32>
    tpu.vector_store %arg19[%c0_130, %c0_131, %c0_132, %c0_133], %325 {strides = array<i32>} : memref<1x4x4x8xf32, #tpu.memory_space<vmem>>, vector<1x4x4x8xf32>,
    return
  }
  func.func @transform_0(%arg0: i32) -> (i32, i32, i32, i32) {
    %c0_i32 = arith.constant 0 : i32
    %c0_i32_0 = arith.constant 0 : i32
    %c0_i32_1 = arith.constant 0 : i32
    %c0_i32_2 = arith.constant 0 : i32
    return %arg0, %c0_i32, %c0_i32_0, %c0_i32_1 : i32, i32, i32, i32
  }
  func.func @transform_1(%arg0: i32) -> (i32, i32, i32, i32) {
    %c0_i32 = arith.constant 0 : i32
    %c0_i32_0 = arith.constant 0 : i32
    %c0_i32_1 = arith.constant 0 : i32
    %c0_i32_2 = arith.constant 0 : i32
    return %arg0, %c0_i32, %c0_i32_0, %c0_i32_1 : i32, i32, i32, i32
  }
  func.func @transform_2(%arg0: i32) -> (i32, i32) {
    %c0_i32 = arith.constant 0 : i32
    %c0_i32_0 = arith.constant 0 : i32
    %c0_i32_1 = arith.constant 0 : i32
    return %c0_i32, %c0_i32_0 : i32, i32
  }
  func.func @transform_3(%arg0: i32) -> (i32, i32) {
    %c0_i32 = arith.constant 0 : i32
    %c0_i32_0 = arith.constant 0 : i32
    %c0_i32_1 = arith.constant 0 : i32
    return %c0_i32, %c0_i32_0 : i32, i32
  }
  func.func @transform_4(%arg0: i32) -> (i32, i32) {
    %c0_i32 = arith.constant 0 : i32
    %c0_i32_0 = arith.constant 0 : i32
    %c0_i32_1 = arith.constant 0 : i32
    return %c0_i32, %c0_i32_0 : i32, i32
  }
  func.func @transform_5(%arg0: i32) -> (i32, i32) {
    %c0_i32 = arith.constant 0 : i32
    %c0_i32_0 = arith.constant 0 : i32
    %c0_i32_1 = arith.constant 0 : i32
    return %c0_i32, %c0_i32_0 : i32, i32
  }
  func.func @transform_6(%arg0: i32) -> (i32, i32) {
    %c0_i32 = arith.constant 0 : i32
    %c0_i32_0 = arith.constant 0 : i32
    %c0_i32_1 = arith.constant 0 : i32
    return %c0_i32, %c0_i32_0 : i32, i32
  }
  func.func @transform_7(%arg0: i32) -> (i32, i32) {
    %c0_i32 = arith.constant 0 : i32
    %c0_i32_0 = arith.constant 0 : i32
    %c0_i32_1 = arith.constant 0 : i32
    return %c0_i32, %c0_i32_0 : i32, i32
  }
  func.func @transform_8(%arg0: i32) -> (i32, i32) {
    %c0_i32 = arith.constant 0 : i32
    %c0_i32_0 = arith.constant 0 : i32
    %c0_i32_1 = arith.constant 0 : i32
    return %c0_i32, %c0_i32_0 : i32, i32
  }
  func.func @transform_9(%arg0: i32) -> (i32, i32) {
    %c0_i32 = arith.constant 0 : i32
    %c0_i32_0 = arith.constant 0 : i32
    %c0_i32_1 = arith.constant 0 : i32
    return %c0_i32, %c0_i32_0 : i32, i32
  }
  func.func @transform_10(%arg0: i32) -> (i32, i32) {
    %c0_i32 = arith.constant 0 : i32
    %c0_i32_0 = arith.constant 0 : i32
    %c0_i32_1 = arith.constant 0 : i32
    return %c0_i32, %c0_i32_0 : i32, i32
  }
  func.func @transform_11(%arg0: i32) -> (i32, i32) {
    %c0_i32 = arith.constant 0 : i32
    %c0_i32_0 = arith.constant 0 : i32
    %c0_i32_1 = arith.constant 0 : i32
    return %c0_i32, %c0_i32_0 : i32, i32
  }
  func.func @transform_12(%arg0: i32) -> (i32, i32) {
    %c0_i32 = arith.constant 0 : i32
    %c0_i32_0 = arith.constant 0 : i32
    %c0_i32_1 = arith.constant 0 : i32
    return %c0_i32, %c0_i32_0 : i32, i32
  }
  func.func @transform_13(%arg0: i32) -> (i32, i32) {
    %c0_i32 = arith.constant 0 : i32
    %c0_i32_0 = arith.constant 0 : i32
    %c0_i32_1 = arith.constant 0 : i32
    return %c0_i32, %c0_i32_0 : i32, i32
  }
  func.func @transform_14(%arg0: i32) -> (i32, i32, i32, i32) {
    %c0_i32 = arith.constant 0 : i32
    %c0_i32_0 = arith.constant 0 : i32
    %c0_i32_1 = arith.constant 0 : i32
    %c0_i32_2 = arith.constant 0 : i32
    return %arg0, %c0_i32, %c0_i32_0, %c0_i32_1 : i32, i32, i32, i32
  }
  func.func @transform_15(%arg0: i32) -> (i32, i32, i32, i32) {
    %c0_i32 = arith.constant 0 : i32
    %c0_i32_0 = arith.constant 0 : i32
    %c0_i32_1 = arith.constant 0 : i32
    %c0_i32_2 = arith.constant 0 : i32
    return %arg0, %c0_i32, %c0_i32_0, %c0_i32_1 : i32, i32, i32, i32
  }
  func.func @transform_16(%arg0: i32) -> (i32, i32, i32, i32) {
    %c0_i32 = arith.constant 0 : i32
    %c0_i32_0 = arith.constant 0 : i32
    %c0_i32_1 = arith.constant 0 : i32
    %c0_i32_2 = arith.constant 0 : i32
    return %arg0, %c0_i32, %c0_i32_0, %c0_i32_1 : i32, i32, i32, i32
  }
  func.func @transform_17(%arg0: i32) -> (i32, i32, i32, i32) {
    %c0_i32 = arith.constant 0 : i32
    %c0_i32_0 = arith.constant 0 : i32
    %c0_i32_1 = arith.constant 0 : i32
    %c0_i32_2 = arith.constant 0 : i32
    return %arg0, %c0_i32, %c0_i32_0, %c0_i32_1 : i32, i32, i32, i32
  }
  func.func @transform_18(%arg0: i32) -> (i32, i32, i32, i32) {
    %c0_i32 = arith.constant 0 : i32
    %c0_i32_0 = arith.constant 0 : i32
    %c0_i32_1 = arith.constant 0 : i32
    %c0_i32_2 = arith.constant 0 : i32
    return %arg0, %c0_i32, %c0_i32_0, %c0_i32_1 : i32, i32, i32, i32
  }
}

</mosaic_0001>

<bundles_post_ra>
// kernel: cam_forward.1
= control target key start
LH: loop header
LB: loop body
LE: loop exit
PB: predicated region body
PF: predicated region fallthrough
CT: control target
= control target key end

     0   :  { %s5799_s27 = smov 0   ;;  %s9673_s0 = inlined_call_operand.vmem [shape: f32[2,4,59,4], index: 0, kind: input, shape index: {}]   ;;  %s9674_s1 = inlined_call_operand.vmem [shape: f32[2,2,17,12], index: 1, kind: input, shape index: {}]   ;;  %s9675_s2 = inlined_call_operand.vmem [shape: f32[4,2], index: 2, kind: input, shape index: {}]   ;;  %s9676_s3 = inlined_call_operand.vmem [shape: f32[2,4], index: 3, kind: input, shape index: {}]   ;;  %s9677_s4 = inlined_call_operand.vmem [shape: f32[12,6], index: 4, kind: input, shape index: {}]   ;;  %s9678_s5 = inlined_call_operand.vmem [shape: f32[6,12], index: 5, kind: input, shape index: {}]   ;;  %s9679_s6 = inlined_call_operand.vmem [shape: f32[80,8], index: 6, kind: input, shape index: {}]   ;;  %s9680_s7 = inlined_call_operand.vmem [shape: f32[1,8], index: 7, kind: input, shape index: {}]   ;;  %s9681_s8 = inlined_call_operand.vmem [shape: f32[32,8], index: 8, kind: input, shape index: {}]   ;;  %s9682_s9 = inlined_call_operand.vmem [shape: f32[1,8], index: 9, kind: input, shape index: {}]   ;;  %s9683_s10 = inlined_call_operand.vmem [shape: f32[72,8], index: 10, kind: input, shape index: {}]   ;;  %s9684_s11 = inlined_call_operand.vmem [shape: f32[1,8], index: 11, kind: input, shape index: {}]   ;;  %s9685_s12 = inlined_call_operand.vmem [shape: f32[24,8], index: 12, kind: input, shape index: {}]   ;;  %s9686_s13 = inlined_call_operand.vmem [shape: f32[1,8], index: 13, kind: input, shape index: {}]   ;;  %s9687_s14 = inlined_call_operand.vmem [shape: f32[2,4,40,4], index: 14, kind: output, shape index: {0}]   ;;  %s9688_s15 = inlined_call_operand.vmem [shape: f32[2,2,12,12], index: 15, kind: output, shape index: {1}]   ;;  %s9689_s16 = inlined_call_operand.vmem [shape: f32[2,4,4,8], index: 16, kind: output, shape index: {2}]   ;;  %s9690_s17 = inlined_call_operand.vmem [shape: f32[2,2,3,8], index: 17, kind: output, shape index: {3}]   ;;  %s9691_s18 = inlined_call_operand.vmem [shape: f32[2,4,4,8], index: 18, kind: output, shape index: {4}]  }
   0x1   :  { %9838 = sst [smem:[#allocation240_spill]] %s9673_s0 }
   0x2   :  { %9839 = sst [smem:[#allocation241_spill]] %s9674_s1 }
   0x3   :  { %9840 = sst [smem:[#allocation242_spill]] %s9675_s2 }
   0x4   :  { %9841 = sst [smem:[#allocation243_spill]] %s9676_s3 }
   0x5   :  { %9842 = sst [smem:[#allocation244_spill]] %s9687_s14 }
   0x6   :  { %9843 = sst [smem:[#allocation245_spill]] %s9691_s18 }
   0x7 LB: > { %9844 = sst [smem:[#allocation2_spill]] %s5682_s27  ;;  %s5161_s28 = sadd.s32 4294967295, %s5682_s27   ;;  %s5682_s27 = sphi %s5799_s27, %s29_s27  }
   0x8   : > { %p5165_p0 = scmp.ge.s32.totalorder %s5682_s27, 1  ;;  %p531_p1 = scmp.lt.s32.totalorder %s5682_s27, 3 }
   0xa   : > { %p532_p2 = pnand %p5165_p0, %p531_p1 }
   0xc   : > { %535 = sbr.rel (%p532_p2) target bundleno = 2962 (0xb92), region = 76 }
  0x13   : > { %s9845_s0 = sld [smem:[#allocation242_spill]]  ;;  %vm9820_vm0 = vcmask 1043456   ;;  %p610_p3 = scmp.lt.s32.totalorder %s5161_s28, 1  ;;  %v9693_v1 = vmov 0.0   ;;  %vm9824_vm1 = vmmov 0   ;;  %vm9817_vm2 = vcmask 1046528  }
  0x14   : > { %5342 = vmatprep.subr.mxu0 %v9693_v1  ;;  %5344 = vmatprep.mubr.msk.f32.mxu0 %vm9824_vm1, %v9693_v1  ;;  %s9846_s21 = sld [smem:[#allocation240_spill]]  ;;  %vm702_vm3 = vcmask 31744   ;;  %vm718_vm4 = vcmask 31745   ;;  %vm725_vm5 = vcmask 24576   ;;  %vm9823_vm6 = vcmask 1040384   ;;  %s9847_s3 = sld [smem:[#allocation243_spill]] }
  0x15   : > { %s10627_s28 = smov (!%p610_p3, %s5161_s28), 1  ;;  %5347 = vmatprep.subr.mxu1 %v9693_v1  ;;  %5349 = vmatprep.mubr.msk.f32.mxu1 %vm9824_vm1, %v9693_v1  ;;  %vm9822_vm7 = vcmask 1041408   ;;  %vm986_vm8 = vcmask 15360   ;;  %s9849_s14 = sld [smem:[#allocation244_spill]]  ;;  %vm9819_vm9 = vcmask 1044480   ;;  %vm9818_vm10 = vcmask 1045504  }
  0x16   : > { %s5252_s19 = sshll.u32 %s10627_s28, 8  ;;  %s5583_s24 = smul.u32 160, %s10627_s28  ;;  %vm9821_vm11 = vcmask 1042432   ;;  %vm9828_vm12 = vcmask 64512   ;;  %vm9826_vm13 = vcmask 97280   ;;  %vm9833_vm14 = vcmask 130048  }
  0x17   : > { %s9756_s30 = smov 32   ;;  %s9759_s1 = smov 8   ;;  %vm2512_vm15 = vcmask 162816   ;;  %vm2947_vm1 = vcmask 523264  }
  0x18   : > { %s9769_s20 = smov 16   ;;  %s9803_s2 = smov 24  }
  0x19   : > { %v677_v0 = vld [vmem:[%s9845_s0] sm:$0xf]  ;;  %s9771_s0 = smov 4   ;;  %s9784_s23 = smov 28  }
  0x1a   : > { %5343 = vmatpush3.msk.msra.mxu0 %vm9820_vm0, %v677_v0  ;;  %s5823_s22 = scalar_lea.vmem %s9846_s21, %s5252_s19  ;;  %s9762_s19 = smov 12  }
  0x1b   : > { %v5826_v2 = vld [vmem:[%s5823_s22 + $0x8] sm:$0xff]  ;;  %v5829_v3 = vld [vmem:[%s5823_s22 + $0x10] sm:$0xff]  ;;  %v5832_v4 = vld [vmem:[%s5823_s22 + $0x18] sm:$0xff]  ;;  %s6026_s29 = scalar_lea.vmem %s9849_s14, %s5583_s24  ;;  %s9806_s21 = smov 20  }
  0x1c   : > { %v5835_v5 = vld [vmem:[%s5823_s22 + $0x20] sm:$0xff]  ;;  %v5838_v6 = vld [vmem:[%s5823_s22 + $0x28] sm:$0xff]  ;;  %v5841_v7 = vld [vmem:[%s5823_s22 + $0x30] sm:$0xff]  ;;  %v686_v8 = vrot.slane %v5826_v2, 1  ;;  %v687_v9 = vrot.slane %v5829_v3, 1  ;;  %v689_v10 = vrot.slane %v5832_v4, 1 }
  0x1d   : > { %v691_v11 = vrot.slane %v5835_v5, 1  ;;  %v693_v12 = vrot.slane %v5838_v6, 1  ;;  %v695_v13 = vrot.slane %v5841_v7, 1  ;;  %v5852_v16 = vld [vmem:[%s5823_s22 + $0x48] sm:$0xff]  ;;  %v5859_v21 = vld [vmem:[%s5823_s22 + $0x50] sm:$0xff]  ;;  %v5862_v22 = vld [vmem:[%s5823_s22 + $0x58] sm:$0xff] }
  0x1e   : > { %v688_v14 = vsel %vm9817_vm2, %v686_v8, %v687_v9  ;;  %v690_v15 = vsel %vm9817_vm2, %v687_v9, %v689_v10  ;;  %v719_v25 = vsel %vm718_vm4, %v5826_v2, -inf  ;;  %v720_v26 = vsel %vm702_vm3, %v5829_v3, -inf  ;;  %v5871_v27 = vld [vmem:[%s5823_s22 + $0x60] sm:$0xff]  ;;  %v5874_v28 = vld [vmem:[%s5823_s22 + $0x68] sm:$0xff]  ;;  %v5877_v29 = vld [vmem:[%s5823_s22 + $0x70] sm:$0xff]  ;;  %s9791_s24 = smov 40  }
  0x1f   : > { %v692_v17 = vsel %vm9817_vm2, %v689_v10, %v691_v11  ;;  %v694_v18 = vsel %vm9817_vm2, %v691_v11, %v693_v12  ;;  %v696_v19 = vsel %vm9817_vm2, %v693_v12, %v695_v13  ;;  %v703_v20 = vsel %vm702_vm3, %v688_v14, 0.0  ;;  %v5906_v60 = vld [vmem:[%s5823_s22 + $0x88] sm:$0xff]  ;;  %v5909_v61 = vld [vmem:[%s5823_s22 + $0x90] sm:$0xff]  ;;  %v5917_v9 = vld [vmem:[%s5823_s22 + $0x98] sm:$0xff]  ;;  %s9810_s25 = smov 36   ;;  %s9774_s26 = smov 44  }
  0x20   : > { %v704_v23 = vsel %vm702_vm3, %v690_v15, 0.0  ;;  %v706_v24 = vsel %vm702_vm3, %v692_v17, 0.0  ;;  %v708_v31 = vsel %vm702_vm3, %v694_v18, 0.0  ;;  %v710_v32 = vsel %vm702_vm3, %v696_v19, 0.0  ;;  %v5926_v14 = vld [vmem:[%s5823_s22 + $0xa0] sm:$0xff]  ;;  %v5929_v15 = vld [vmem:[%s5823_s22 + $0xa8] sm:$0xff] }
  0x21   : > { %v705_v30 = vadd.f32 %v704_v23, %v703_v20  ;;  %v721_v33 = vsel %vm702_vm3, %v5832_v4, -inf  ;;  %v722_v34 = vsel %vm702_vm3, %v5835_v5, -inf  ;;  %v723_v35 = vsel %vm702_vm3, %v5838_v6, -inf  ;;  %s10170_s27 = smov 20   ;;  %s10173_s18 = smov 36  }
  0x22   : > { %v726_v36 = vsel %vm725_vm5, %v5841_v7, -inf  ;;  %v743_v37 = vrot.slane %v5852_v16, 1  ;;  %v724_v39 = vmax.f32 %v719_v25, %v723_v35  ;;  %v744_v41 = vrot.slane %v5859_v21, 1 }
  0x23   : > { %v707_v38 = vadd.f32 %v706_v24, %v705_v30  ;;  %v727_v40 = vmax.f32 %v720_v26, %v726_v36  ;;  %v746_v42 = vrot.slane %v5862_v22, 1  ;;  %v748_v43 = vrot.slane %v5871_v27, 1  ;;  %v5935_v30 = vld [vmem:[%s5823_s22 + $0xb0] sm:$0xff] }
  0x24   : > { %v750_v44 = vrot.slane %v5874_v28, 1  ;;  %v752_v45 = vrot.slane %v5877_v29, 1  ;;  %v729_v48 = vmax.f32 %v721_v33, %v722_v34  ;;  %v745_v49 = vsel %vm9817_vm2, %v743_v37, %v744_v41 }
  0x25   : > { %v709_v46 = vadd.f32 %v708_v31, %v707_v38  ;;  %v728_v47 = vmax.f32 %v724_v39, %v727_v40  ;;  %v747_v50 = vsel %vm9817_vm2, %v744_v41, %v746_v42  ;;  %v749_v51 = vsel %vm9817_vm2, %v746_v42, %v748_v43 }
  0x26   : > { %v751_v52 = vsel %vm9817_vm2, %v748_v43, %v750_v44  ;;  %v759_v54 = vsel %vm702_vm3, %v745_v49, 0.0  ;;  %v760_v55 = vsel %vm702_vm3, %v747_v50, 0.0  ;;  %v753_v56 = vsel %vm9817_vm2, %v750_v44, %v752_v45 }
  0x27   : > { %v711_v53 = vadd.f32 %v710_v32, %v709_v46  ;;  %v761_v57 = vadd.f32 %v760_v55, %v759_v54  ;;  %v762_v58 = vsel %vm702_vm3, %v749_v51, 0.0  ;;  %v775_v59 = vsel %vm718_vm4, %v5852_v16, -inf  ;;  %v5953_v55 = vld [vmem:[%s5823_s22 + $0xc8] sm:$0xff] }
  0x28   : > { %v730_v62 = vmax.f32 %v728_v47, %v729_v48  ;;  %v764_v63 = vsel %vm702_vm3, %v751_v52, 0.0  ;;  %v776_v0 = vsel %vm702_vm3, %v5859_v21, -inf  ;;  %v777_v8 = vsel %vm702_vm3, %v5862_v22, -inf }
  0x29   : > { %v763_v10 = vadd.f32 %v762_v58, %v761_v57  ;;  %v778_v11 = vsel %vm702_vm3, %v5871_v27, -inf  ;;  %v779_v12 = vsel %vm702_vm3, %v5874_v28, -inf  ;;  %v781_v13 = vsel %vm725_vm5, %v5877_v29, -inf }
  0x2a   : > { %v712_v17 = vrot.slane %v711_v53, 4  ;;  %v766_v18 = vsel %vm702_vm3, %v753_v56, 0.0  ;;  %v780_v19 = vmax.f32 %v775_v59, %v779_v12  ;;  %v782_v20 = vmax.f32 %v776_v0, %v781_v13  ;;  %v5956_v56 = vld [vmem:[%s5823_s22 + $0xd0] sm:$0xff]  ;;  %v5973_v12 = vld [vmem:[%s5823_s22 + $0xe0] sm:$0xff]  ;;  %v5976_v13 = vld [vmem:[%s5823_s22 + $0xe8] sm:$0xff] }
  0x2b   : > { %v765_v23 = vadd.f32 %v764_v63, %v763_v10  ;;  %v784_v24 = vmax.f32 %v777_v8, %v778_v11  ;;  %v799_v25 = vrot.slane %v5906_v60, 1  ;;  %v800_v26 = vrot.slane %v5909_v61, 1  ;;  %v5963_v63 = vld [vmem:[%s5823_s22 + $0xd8] sm:$0xff] }
  0x2c   : > { %v783_v31 = vmax.f32 %v780_v19, %v782_v20  ;;  %v802_v32 = vrot.slane %v5917_v9, 1  ;;  %v804_v35 = vrot.slane %v5926_v14, 1  ;;  %v806_v36 = vrot.slane %v5929_v15, 1 }
  0x2d   : > { %v767_v33 = vadd.f32 %v766_v18, %v765_v23  ;;  %v801_v34 = vsel %vm9817_vm2, %v799_v25, %v800_v26  ;;  %v731_v37 = vrot.slane %v730_v62, 4  ;;  %v713_v39 = vadd.f32 %v712_v17, %v711_v53 }
  0x2e   : > { %v803_v38 = vsel %vm9817_vm2, %v800_v26, %v802_v32  ;;  %v785_v40 = vmax.f32 %v783_v31, %v784_v24  ;;  %v805_v41 = vsel %vm9817_vm2, %v802_v32, %v804_v35  ;;  %v808_v42 = vrot.slane %v5935_v30, 1  ;;  %v5981_v31 = vld [vmem:[%s5823_s22 + $0xf0] sm:$0xff] }
  0x2f   : > { %v768_v43 = vrot.slane %v767_v33, 4  ;;  %v807_v44 = vsel %vm9817_vm2, %v804_v35, %v806_v36  ;;  %v815_v45 = vsel %vm702_vm3, %v801_v34, 0.0  ;;  %v816_v46 = vsel %vm702_vm3, %v803_v38, 0.0 }
  0x30   : > { %v818_v47 = vsel %vm702_vm3, %v805_v41, 0.0  ;;  %v732_v48 = vmax.f32 %v730_v62, %v731_v37  ;;  %v809_v49 = vsel %vm9817_vm2, %v806_v36, %v808_v42  ;;  %v817_v50 = vadd.f32 %v816_v46, %v815_v45 }
  0x31   : > { %v714_v51 = vrot.slane %v713_v39, 2  ;;  %v786_v52 = vrot.slane %v785_v40, 4  ;;  %v820_v53 = vsel %vm702_vm3, %v807_v44, 0.0  ;;  %v831_v54 = vsel %vm718_vm4, %v5906_v60, -inf }
  0x32   : > { %v769_v57 = vadd.f32 %v768_v43, %v767_v33  ;;  %v819_v58 = vadd.f32 %v818_v47, %v817_v50  ;;  %v832_v59 = vsel %vm702_vm3, %v5909_v61, -inf  ;;  %v833_v62 = vsel %vm702_vm3, %v5917_v9, -inf }
  0x33   : > { %v822_v0 = vsel %vm702_vm3, %v809_v49, 0.0  ;;  %v834_v8 = vsel %vm702_vm3, %v5926_v14, -inf  ;;  %v835_v10 = vsel %vm702_vm3, %v5929_v15, -inf  ;;  %v837_v11 = vsel %vm725_vm5, %v5935_v30, -inf }
  0x34   : > { %v733_v17 = vrot.slane %v732_v48, 2  ;;  %v821_v18 = vadd.f32 %v820_v53, %v819_v58  ;;  %v836_v19 = vmax.f32 %v831_v54, %v835_v10  ;;  %v838_v20 = vmax.f32 %v832_v59, %v837_v11 }
  0x35   : > { %v715_v23 = vadd.f32 %v714_v51, %v713_v39  ;;  %v840_v24 = vmax.f32 %v833_v62, %v834_v8  ;;  %v855_v25 = vrot.slane %v5953_v55, 1  ;;  %v856_v26 = vrot.slane %v5956_v56, 1 }
  0x36   : > { %v787_v32 = vmax.f32 %v785_v40, %v786_v52  ;;  %v823_v33 = vadd.f32 %v822_v0, %v821_v18  ;;  %v839_v34 = vmax.f32 %v836_v19, %v838_v20  ;;  %v858_v35 = vrot.slane %v5963_v63, 1 }
  0x37   : > { %v770_v36 = vrot.slane %v769_v57, 2  ;;  %v857_v37 = vsel %vm9817_vm2, %v855_v25, %v856_v26  ;;  %v860_v38 = vrot.slane %v5973_v12, 1  ;;  %v862_v41 = vrot.slane %v5976_v13, 1 }
  0x38   : > { %v734_v39 = vmax.f32 %v732_v48, %v733_v17  ;;  %v824_v42 = vrot.slane %v823_v33, 4  ;;  %v841_v43 = vmax.f32 %v839_v34, %v840_v24  ;;  %v859_v44 = vsel %vm9817_vm2, %v856_v26, %v858_v35 }
  0x39   : > { %v716_v45 = vrot.slane %v715_v23, 1  ;;  %v861_v46 = vsel %vm9817_vm2, %v858_v35, %v860_v38  ;;  %v863_v40 = vsel %vm9817_vm2, %v860_v38, %v862_v41  ;;  %v864_v47 = vrot.slane %v5981_v31, 1 }
  0x3a   : > { %v788_v49 = vrot.slane %v787_v32, 2  ;;  %v825_v50 = vadd.f32 %v824_v42, %v823_v33  ;;  %v842_v51 = vrot.slane %v841_v43, 4  ;;  %v871_v52 = vsel %vm702_vm3, %v857_v37, 0.0 }
  0x3b   : > { %v771_v53 = vadd.f32 %v770_v36, %v769_v57  ;;  %v865_v54 = vsel %vm9817_vm2, %v862_v41, %v864_v47  ;;  %v872_v48 = vsel %vm702_vm3, %v859_v44, 0.0  ;;  %v874_v58 = vsel %vm702_vm3, %v861_v46, 0.0 }
  0x3c   : > { %v826_v59 = vrot.slane %v825_v50, 2  ;;  %v843_v62 = vmax.f32 %v841_v43, %v842_v51  ;;  %v873_v0 = vadd.f32 %v872_v48, %v871_v52  ;;  %v876_v8 = vsel %vm702_vm3, %v863_v40, 0.0 }
  0x3d   : > { %v887_v10 = vsel %vm718_vm4, %v5953_v55, -inf  ;;  %v888_v11 = vsel %vm702_vm3, %v5956_v56, -inf  ;;  %v889_v57 = vsel %vm702_vm3, %v5963_v63, -inf  ;;  %v890_v17 = vsel %vm702_vm3, %v5973_v12, -inf }
  0x3e   : > { %v789_v18 = vmax.f32 %v787_v32, %v788_v49  ;;  %v844_v19 = vrot.slane %v843_v62, 2  ;;  %v875_v20 = vadd.f32 %v874_v58, %v873_v0  ;;  %v891_v24 = vsel %vm702_vm3, %v5976_v13, -inf }
  0x3f   : > { %v772_v25 = vrot.slane %v771_v53, 1  ;;  %v878_v26 = vsel %vm702_vm3, %v865_v54, 0.0  ;;  %v892_v33 = vmax.f32 %v887_v10, %v891_v24  ;;  %v893_v34 = vsel %vm725_vm5, %v5981_v31, -inf }
  0x40   : > { %v827_v35 = vadd.f32 %v826_v59, %v825_v50  ;;  %v877_v36 = vadd.f32 %v876_v8, %v875_v20  ;;  %v894_v37 = vmax.f32 %v888_v11, %v893_v34  ;;  %v896_v38 = vmax.f32 %v889_v57, %v890_v17  ;;  %v678_v34 = vld [vmem:[%s9847_s3] sm:$0x3]  ;;  %s10172_s3 = smov 24  }
  0x41   : > { %v735_v41 = vrot.slane %v734_v39, 1  ;;  %v790_v42 = vrot.slane %v789_v18, 1  ;;  %v845_v43 = vmax.f32 %v843_v62, %v844_v19  ;;  %v717_v46 = vadd.f32 %v716_v45, %v715_v23  ;;  %5348 = vmatpush3.msk.msra.mxu1 %vm9822_vm7, %v678_v34 }
  0x42   : > { %v879_v32 = vadd.f32 %v878_v26, %v877_v36  ;;  %v895_v44 = vmax.f32 %v892_v33, %v894_v37  ;;  %v773_v40 = vadd.f32 %v772_v25, %v771_v53  ;;  %v828_v47 = vrot.slane %v827_v35, 1 }
  0x43   : > { %v736_v52 = vmax.f32 %v734_v39, %v735_v41  ;;  %v791_v54 = vmax.f32 %v789_v18, %v790_v42  ;;  %v846_v48 = vrot.slane %v845_v43, 1 }
  0x44   : > { %v880_v49 = vrot.slane %v879_v32, 4  ;;  %v897_v51 = vmax.f32 %v895_v44, %v896_v38  ;;  %v774_v10 = vadd.f32 %v773_v40, %v717_v46  ;;  %v829_v50 = vadd.f32 %v828_v47, %v827_v35 }
  0x45   : > { %v792_v11 = vmax.f32 %v736_v52, %v791_v54  ;;  %v847_v57 = vmax.f32 %v845_v43, %v846_v48  ;;  %v1074_v47 = vlaneseq }
  0x46   : > { %v881_v58 = vadd.f32 %v880_v49, %v879_v32  ;;  %v898_v0 = vrot.slane %v897_v51, 4  ;;  %v830_v19 = vadd.f32 %v829_v50, %v774_v10 }
  0x47   : > { %v848_v45 = vmax.f32 %v792_v11, %v847_v57  ;;  %v6015_v49 = vshrl.u32 %v1074_v47, 7 }
  0x48   : > { %v882_v59 = vrot.slane %v881_v58, 2  ;;  %v899_v8 = vmax.f32 %v897_v51, %v898_v0 }
  0x49   : > { %9848 = vst [vmem:[#allocation3_spill] sm:$0xff] %v6015_v49  ;;  %v9692_v51 = vsub.s32 0, %v6015_v49 }
  0x4a   : > { %v883_v17 = vadd.f32 %v882_v59, %v881_v58  ;;  %v900_v62 = vrot.slane %v899_v8, 2 }
  0x4c   : > { %v884_v20 = vrot.slane %v883_v17, 1  ;;  %v901_v23 = vmax.f32 %v899_v8, %v900_v62 }
  0x4e   : > { %v885_v53 = vadd.f32 %v884_v20, %v883_v17  ;;  %v902_v24 = vrot.slane %v901_v23, 1 }
  0x50   : > { %v886_v25 = vadd.f32 %v885_v53, %v830_v19  ;;  %v903_v39 = vmax.f32 %v901_v23, %v902_v24  ;;  %v652_v53 = vld [vmem:[%s5823_s22 + $0x38] sm:$0x7] }
  0x52   : > { %v904_v18 = vmax.f32 %v848_v45, %v903_v39  ;;  %v905_v26 = vmul.f32 0.00625, %v886_v25 }
  0x54   : > { %v907_v33 = vsel %vm9823_vm6, %v905_v26, %v904_v18 }
  0x55   : > { %5345 = vmatmul.mubr.msk.f32.vlgmr.msra.gmra.mrb[0].mxu0 %vm702_vm3, %v907_v33 }
 0x128   : > { %v981_v35 = vpop.f32.mrb[0].mxu0 }
 0x129   : > { %v985_v36 = vmax.f32 %v981_v35, 0.0  ;;  %v5346_v37 = vpop.f32.mrb[1].mxu0 }
 0x12b   : > { %5350 = vmatmul.mubr.msk.f32.vlgmr.msra.gmra.mrb[0].mxu1 %vm986_vm8, %v985_v36  ;;  %vm9831_vm8 = vcmask 261120  }
 0x1fe   : > { %v1060_v38 = vpop.f32.mrb[0].mxu1 }
 0x1ff   : > { %v1065_v41 = vrot.slane %v1060_v38, 1  ;;  %v5351_v42 = vpop.f32.mrb[1].mxu1 }
 0x201   : > { %v1067_v43 = vadd.f32 %v1065_v41, %v1060_v38 }
 0x203   : > { %v1068_v32 = vsub.f32 0.0, %v1067_v43 }
 0x205   : > { %v1069_v44 = vmul.f32 1.442695, %v1068_v32 }
 0x207   : > { %5612 = vpow2.f32 %v1069_v44 }
 0x211   : > { %v5613_v46 = vpop.eup %5612 }
 0x212   : > { %v1071_v40 = vadd.f32 1.0, %v5613_v46 }
 0x214   : > { %5614 = vrcp.f32 %v1071_v40 }
 0x21e   : > { %v5615_v52 = vpop.eup %5614 }
 0x21f   : > { %v6021_v54 = vrot.slane %v5615_v52, %v9692_v51 }
 0x221   : > { %v6030_v48 = vmul.f32 %v6021_v54, %v5826_v2  ;;  %v6034_v58 = vmul.f32 %v6021_v54, %v5829_v3  ;;  %v6038_v0 = vmul.f32 %v6021_v54, %v5832_v4  ;;  %v6042_v10 = vmul.f32 %v6021_v54, %v5835_v5 }
 0x222   : > { %v6046_v50 = vmul.f32 %v6021_v54, %v5838_v6  ;;  %v6050_v2 = vmul.f32 %v6021_v54, %v5841_v7  ;;  %v6054_v3 = vmul.f32 %v6021_v54, %v5852_v16  ;;  %v6058_v4 = vmul.f32 %v6021_v54, %v5859_v21 }
 0x223   : > { %9850 = vst [vmem:[#allocation4_spill] sm:$0xff] %v6030_v48  ;;  %v6062_v5 = vmul.f32 %v6021_v54, %v5862_v22  ;;  %v6066_v6 = vmul.f32 %v6021_v54, %v5871_v27  ;;  %v6070_v7 = vmul.f32 %v6021_v54, %v5874_v28  ;;  %v6074_v16 = vmul.f32 %v6021_v54, %v5877_v29 }
 0x224   : > { %9851 = vst [vmem:[#allocation5_spill] sm:$0xff] %v6054_v3  ;;  %1110 = vst.msk [vmem:[%s6026_s29 - $0x1] sm:$0xfe] %vm718_vm4, %v6030_v48  ;;  %1891 = vrot.lane.b32.xlu0 %v6034_v58, %s9756_s30  ;;  %v6092_v21 = vmul.f32 %v6021_v54, %v5906_v60  ;;  %v6096_v22 = vmul.f32 %v6021_v54, %v5909_v61  ;;  %v6100_v27 = vmul.f32 %v6021_v54, %v5917_v9 }
 0x225   : > { %1111 = vst.msk [vmem:[%s6026_s29 + $0x7] sm:$0xff] %vm702_vm3, %v6034_v58  ;;  %1112 = vst.msk [vmem:[%s6026_s29 + $0xf] sm:$0xff] %vm702_vm3, %v6038_v0  ;;  %v6104_v28 = vmul.f32 %v6021_v54, %v5926_v14  ;;  %1889 = vrot.lane.b32.xlu1 %v6030_v48, %s9756_s30  ;;  %v6122_v29 = vmul.f32 %v6021_v54, %v5929_v15  ;;  %v6126_v60 = vmul.f32 %v6021_v54, %v5935_v30 }
 0x226   : > { %1113 = vst.msk [vmem:[%s6026_s29 + $0x17] sm:$0xff] %vm702_vm3, %v6042_v10  ;;  %9852 = vst [vmem:[#allocation6_spill] sm:$0xff] %v6092_v21  ;;  %v6130_v61 = vmul.f32 %v6021_v54, %v5953_v55  ;;  %v6134_v9 = vmul.f32 %v6021_v54, %v5956_v56  ;;  %v6150_v14 = vmul.f32 %v6021_v54, %v5963_v63  ;;  %v9701_v56 = vrot.slane %v6034_v58, 1 }
 0x227   : > { %1114 = vst.msk [vmem:[%s6026_s29 + $0x1f] sm:$0xff] %vm702_vm3, %v6046_v50  ;;  %1117 = vst.msk [vmem:[%s6026_s29 + $0x2f] sm:$0xff] %vm702_vm3, %v6058_v4  ;;  %v6154_v15 = vmul.f32 %v6021_v54, %v5973_v12  ;;  %v6158_v30 = vmul.f32 %v6021_v54, %v5976_v13  ;;  %v6162_v55 = vmul.f32 %v6021_v54, %v5981_v31  ;;  %v1163_v63 = vrot.slane %v6038_v0, 1 }
 0x228   : > { %1115 = vst.msk [vmem:[%s6026_s29 + $0x27] sm:$0x1] %vm725_vm5, %v6050_v2  ;;  %9853 = vst [vmem:[#allocation7_spill] sm:$0xff] %v6122_v29  ;;  %1899 = vrot.lane.b32.xlu0 %v6054_v3, %s9756_s30  ;;  %v1165_v13 = vrot.slane %v6042_v10, 1  ;;  %v9698_v59 = vrot.slane %v6034_v58, 3  ;;  %v1373_v8 = vrot.slane %v6038_v0, 3  ;;  %v1085_v18 = vmul.f32 %v6021_v54, %v652_v53 }
 0x229   : > { %1116 = vst.msk [vmem:[%s6026_s29 + $0x27] sm:$0xfe] %vm718_vm4, %v6054_v3  ;;  %9854 = vst [vmem:[#allocation8_spill] sm:$0xff] %v6126_v60  ;;  %1893 = vrot.lane.b32.xlu1 %v6038_v0, %s9756_s30  ;;  %v6225_v12 = vsel %vm9817_vm2, %v9701_v56, %v1163_v63  ;;  %v1167_v57 = vrot.slane %v6046_v50, 1  ;;  %v9699_v17 = vrot.slane %v6034_v58, 2  ;;  %v1268_v62 = vrot.slane %v6038_v0, 2 }
 0x22a   : > { %9855 = vst [vmem:[#allocation9_spill] sm:$0xff] %v6134_v9  ;;  %1118 = vst.msk [vmem:[%s6026_s29 + $0x37] sm:$0xff] %vm702_vm3, %v6062_v5  ;;  %v6233_v31 = vsel %vm9817_vm2, %v1163_v63, %v1165_v13  ;;  %v6244_v11 = vsel %vm9819_vm9, %v9698_v59, %v1373_v8  ;;  %v1953_v20 = vrot.slane %v6050_v2, 1  ;;  %v1270_v45 = vrot.slane %v6042_v10, 2 }
 0x22b   : > { %1119 = vst.msk [vmem:[%s6026_s29 + $0x3f] sm:$0xff] %vm702_vm3, %v6066_v6  ;;  %1120 = vst.msk [vmem:[%s6026_s29 + $0x47] sm:$0xff] %vm702_vm3, %v6070_v7  ;;  %v6254_v19 = vsel %vm9817_vm2, %v1165_v13, %v1167_v57  ;;  %v6262_v23 = vsel %vm9818_vm10, %v9699_v17, %v1268_v62  ;;  %v1272_v25 = vrot.slane %v6046_v50, 2  ;;  %v2021_v39 = vrot.slane %v6050_v2, 2 }
 0x22c   : > { %1121 = vst.msk [vmem:[%s6026_s29 + $0x4f] sm:$0x1] %vm725_vm5, %v6074_v16  ;;  %9856 = vst [vmem:[#allocation10_spill] sm:$0xff] %v6150_v14  ;;  %1907 = vrot.lane.b32.xlu0 %v6070_v7, %s9756_s30  ;;  %v6269_v24 = vsel %vm9817_vm2, %v1167_v57, %v1953_v20  ;;  %v6277_v26 = vsel %vm9818_vm10, %v1268_v62, %v1270_v45  ;;  %v1375_v33 = vrot.slane %v6042_v10, 3  ;;  %v2747_v35 = vrot.slane %v1085_v18, 1 }
 0x22d   : > { %9857 = vst [vmem:[#allocation11_spill] sm:$0xff] %v6154_v15  ;;  %9858 = vst [vmem:[#allocation12_spill] sm:$0xff] %v6158_v30  ;;  %1895 = vrot.lane.b32.xlu1 %v6042_v10, %s9756_s30  ;;  %v6283_v34 = vsel %vm9818_vm10, %v1272_v25, %v2021_v39  ;;  %v2779_v38 = vrot.slane %v1085_v18, 2  ;;  %v6295_v41 = vsel %vm9818_vm10, %v1270_v45, %v1272_v25  ;;  %v1377_v42 = vrot.slane %v6046_v50, 3 }
 0x22e   : > { %9859 = vst [vmem:[#allocation13_spill] sm:$0xff] %v6162_v55  ;;  %1122 = vst.msk [vmem:[%s6026_s29 + $0x4f] sm:$0xfe] %vm718_vm4, %v6092_v21  ;;  %v6288_v36 = vsel %vm9819_vm9, %v1373_v8, %v1375_v33  ;;  %v2748_v37 = vsel %vm9817_vm2, %v1953_v20, %v2747_v35  ;;  %v2089_v32 = vrot.slane %v6050_v2, 3  ;;  %v2811_v44 = vrot.slane %v1085_v18, 3 }
 0x22f   : > { %1123 = vst.msk [vmem:[%s6026_s29 + $0x57] sm:$0xff] %vm702_vm3, %v6096_v22  ;;  %1124 = vst.msk [vmem:[%s6026_s29 + $0x5f] sm:$0xff] %vm702_vm3, %v6100_v27  ;;  %v2780_v43 = vsel %vm9818_vm10, %v2021_v39, %v2779_v38  ;;  %v6304_v46 = vsel %vm9819_vm9, %v1375_v33, %v1377_v42  ;;  %v1174_v47 = vrot.slane %v6062_v5, 1  ;;  %v1176_v52 = vrot.slane %v6066_v6, 1 }
 0x230   : > { %1125 = vst.msk [vmem:[%s6026_s29 + $0x67] sm:$0xff] %vm702_vm3, %v6104_v28  ;;  %1126 = vst.msk [vmem:[%s6026_s29 + $0x6f] sm:$0xff] %vm702_vm3, %v6122_v29  ;;  %1911 = vrot.lane.b32.xlu0 %v6096_v22, %s9756_s30  ;;  %v2812_v40 = vsel %vm9819_vm9, %v2089_v32, %v2811_v44  ;;  %v6313_v63 = vsel %vm9819_vm9, %v1377_v42, %v2089_v32  ;;  %v9697_v13 = vrot.slane %v6058_v4, 1  ;;  %v1279_v57 = vrot.slane %v6062_v5, 2 }
 0x231   : > { %1127 = vst.msk [vmem:[%s6026_s29 + $0x77] sm:$0x1] %vm725_vm5, %v6126_v60  ;;  %1133 = vst.msk [vmem:[%s6026_s29 + $0x9f] sm:$0x1] %vm725_vm5, %v6162_v55  ;;  %1897 = vrot.lane.b32.xlu1 %v6046_v50, %s9756_s30  ;;  %v6319_v8 = vsel %vm9817_vm2, %v1174_v47, %v1176_v52  ;;  %v1281_v62 = vrot.slane %v6066_v6, 2  ;;  %v9696_v45 = vrot.slane %v6058_v4, 2 }
 0x232   : > { %1128 = vst.msk [vmem:[%s6026_s29 + $0x77] sm:$0xfe] %vm718_vm4, %v6130_v61  ;;  %v6328_v20 = vsel %vm9817_vm2, %v9697_v13, %v1174_v47  ;;  %v1384_v25 = vrot.slane %v6062_v5, 3  ;;  %v1386_v39 = vrot.slane %v6066_v6, 3  ;;  %v9695_v33 = vrot.slane %v6058_v4, 3 }
 0x233   : > { %1129 = vst.msk [vmem:[%s6026_s29 + $0x7f] sm:$0xff] %vm702_vm3, %v6134_v9  ;;  %1130 = vst.msk [vmem:[%s6026_s29 + $0x87] sm:$0xff] %vm702_vm3, %v6150_v14  ;;  %v6334_v53 = vsel %vm9818_vm10, %v1279_v57, %v1281_v62  ;;  %v6343_v18 = vsel %vm9818_vm10, %v9696_v45, %v1279_v57  ;;  %v1955_v38 = vrot.slane %v6074_v16, 1  ;;  %v1283_v32 = vrot.slane %v6070_v7, 2  ;;  %v660_v47 = vld [vmem:[%s5823_s22 + $0x78] sm:$0x7] }
 0x234   : > { %1131 = vst.msk [vmem:[%s6026_s29 + $0x8f] sm:$0xff] %vm702_vm3, %v6154_v15  ;;  %1132 = vst.msk [vmem:[%s6026_s29 + $0x97] sm:$0xff] %vm702_vm3, %v6158_v30  ;;  %1913 = vrot.lane.b32.xlu0 %v6100_v27, %s9756_s30  ;;  %v6349_v35 = vsel %vm9819_vm9, %v1384_v25, %v1386_v39  ;;  %v6358_v42 = vsel %vm9819_vm9, %v9695_v33, %v1384_v25  ;;  %v2023_v44 = vrot.slane %v6074_v16, 2  ;;  %v1388_v25 = vrot.slane %v6070_v7, 3  ;;  %s9807_s29 = smov 48  }
 0x235   : > { %1901 = vrot.lane.b32.xlu1 %v6058_v4, %s9756_s30  ;;  %v2091_v51 = vrot.slane %v6074_v16, 3  ;;  %v6383_v1 = vsel %vm9818_vm10, %v1281_v62, %v1283_v32  ;;  %v9700_v33 = vrot.slane %v6096_v22, 1  ;;  %v1185_v45 = vrot.slane %v6100_v27, 1 }
 0x236   : > { %v6376_v57 = vsel %vm9818_vm10, %v1283_v32, %v2023_v44  ;;  %v6396_v13 = vsel %vm9819_vm9, %v1386_v39, %v1388_v25  ;;  %v1290_v59 = vrot.slane %v6100_v27, 2  ;;  %v1395_v56 = vrot.slane %v6100_v27, 3 }
 0x237   : > { %v6403_v32 = vsel %vm9817_vm2, %v9700_v33, %v1185_v45  ;;  %v9705_v33 = vrot.slane %v6096_v22, 3  ;;  %vm9832_vm4 = vcmask 195584   ;;  %vm2554_vm5 = vcmask 228352  }
 0x238   : > { %1915 = vrot.lane.b32.xlu0 %v6104_v28, %s9756_s30  ;;  %9860 = vst [vmem:[#allocation14_spill] sm:$0xff] %v6403_v32 }
 0x239   : > { %1903 = vrot.lane.b32.xlu1 %v6062_v5, %s9756_s30 }
 0x23c   : > { %1206 = vrot.lane.b32.xlu0 %v6225_v12, %s9771_s0 }
 0x23d   : > { %1905 = vrot.lane.b32.xlu1 %v6066_v6, %s9756_s30 }
 0x240   : > { %1208 = vrot.lane.b32.xlu0 %v6233_v31, %s9771_s0 }
 0x241   : > { %1909 = vrot.lane.b32.xlu1 %v6092_v21, %s9756_s30 }
 0x244   : > { %1416 = vrot.lane.b32.xlu0 %v6244_v11, %s9762_s19 }
 0x245   : > { %1917 = vrot.lane.b32.xlu1 %v6122_v29, %s9756_s30  ;;  %s9780_s30 = smov 52  }
 0x248   : > { %1210 = vrot.lane.b32.xlu0 %v6254_v19, %s9771_s0 }
 0x249   : > { %1311 = vrot.lane.b32.xlu1 %v6262_v23, %s9759_s1 }
 0x24c   : > { %2755 = vrot.lane.b32.xlu0 %v6269_v24, %s9771_s0 }
 0x24d   : > { %1313 = vrot.lane.b32.xlu1 %v6277_v26, %s9759_s1 }
 0x250   : > { %2787 = vrot.lane.b32.xlu0 %v6283_v34, %s9759_s1 }
 0x251   : > { %1418 = vrot.lane.b32.xlu1 %v6288_v36, %s9762_s19 }
 0x254   : > { %2757 = vrot.lane.b32.xlu0 %v2748_v37, %s9771_s0  ;;  %v1178_v37 = vrot.slane %v6070_v7, 1 }
 0x255   : > { %1315 = vrot.lane.b32.xlu1 %v6295_v41, %s9759_s1 }
 0x258   : > { %2789 = vrot.lane.b32.xlu0 %v2780_v43, %s9759_s1  ;;  %v6363_v43 = vsel %vm9817_vm2, %v1178_v37, %v1955_v38 }
 0x259   : > { %1420 = vrot.lane.b32.xlu1 %v6304_v46, %s9762_s19 }
 0x25c   : > { %2821 = vrot.lane.b32.xlu0 %v2812_v40, %s9762_s19  ;;  %v6370_v40 = vsel %vm9817_vm2, %v1176_v52, %v1178_v37  ;;  %v1093_v52 = vmul.f32 %v6021_v54, %v660_v47  ;;  %v6389_v37 = vsel %vm9819_vm9, %v1388_v25, %v2091_v51  ;;  %v9704_v47 = vrot.slane %v6096_v22, 2 }
 0x25d   : > { %2819 = vrot.lane.b32.xlu1 %v6313_v63, %s9762_s19 }
 0x25e   : > { %v2749_v62 = vrot.slane %v1093_v52, 1  ;;  %v2781_v39 = vrot.slane %v1093_v52, 2  ;;  %v6414_v25 = vsel %vm9818_vm10, %v9704_v47, %v1290_v59 }
 0x25f   : > { %9861 = vst [vmem:[#allocation15_spill] sm:$0xff] %v6414_v25 }
 0x260   : > { %1218 = vrot.lane.b32.xlu0 %v6319_v8, %s9771_s0  ;;  %v2750_v17 = vsel %vm9817_vm2, %v1955_v38, %v2749_v62  ;;  %v2782_v49 = vsel %vm9818_vm10, %v2023_v44, %v2781_v39  ;;  %v1187_v38 = vrot.slane %v6104_v28, 1  ;;  %v1189_v62 = vrot.slane %v6122_v29, 1 }
 0x261   : > { %1216 = vrot.lane.b32.xlu1 %v6328_v20, %s9771_s0  ;;  %v1292_v39 = vrot.slane %v6104_v28, 2 }
 0x262   : > { %v6434_v44 = vsel %vm9817_vm2, %v1187_v38, %v1189_v62 }
 0x263   : > { %9863 = vst [vmem:[#allocation17_spill] sm:$0xff] %v6434_v44 }
 0x264   : > { %1323 = vrot.lane.b32.xlu0 %v6334_v53, %s9759_s1 }
 0x265   : > { %1321 = vrot.lane.b32.xlu1 %v6343_v18, %s9759_s1 }
 0x268   : > { %1428 = vrot.lane.b32.xlu0 %v6349_v35, %s9762_s19 }
 0x269   : > { %1426 = vrot.lane.b32.xlu1 %v6358_v42, %s9762_s19 }
 0x26c   : > { %2759 = vrot.lane.b32.xlu0 %v6363_v43, %s9771_s0 }
 0x26d   : > { %1220 = vrot.lane.b32.xlu1 %v6370_v40, %s9771_s0 }
 0x270   : > { %2791 = vrot.lane.b32.xlu0 %v6376_v57, %s9759_s1 }
 0x271   : > { %1325 = vrot.lane.b32.xlu1 %v6383_v1, %s9759_s1 }
 0x274   : > { %2823 = vrot.lane.b32.xlu0 %v6389_v37, %s9762_s19 }
 0x275   : > { %1430 = vrot.lane.b32.xlu1 %v6396_v13, %s9762_s19 }
 0x278   : > { %1226 = vrot.lane.b32.xlu0 %v6403_v32, %s9771_s0  ;;  %v2813_v32 = vrot.slane %v1093_v52, 3  ;;  %v6440_v52 = vsel %vm9817_vm2, %v1185_v45, %v1187_v38  ;;  %v6455_v45 = vsel %vm9818_vm10, %v1290_v59, %v1292_v39  ;;  %v1397_v38 = vrot.slane %v6104_v28, 3 }
 0x279   : > { %2761 = vrot.lane.b32.xlu1 %v2750_v17, %s9771_s0  ;;  %v6425_v17 = vsel %vm9819_vm9, %v9705_v33, %v1395_v56  ;;  %9864 = vst [vmem:[#allocation18_spill] sm:$0xff] %v6440_v52  ;;  %v668_v33 = vld [vmem:[%s5823_s22 + $0xb8] sm:$0x7]  ;;  %9866 = vst [vmem:[#allocation20_spill] sm:$0xff] %v6455_v45 }
 0x27a   : > { %9862 = vst [vmem:[#allocation16_spill] sm:$0xff] %v6425_v17  ;;  %v2814_v47 = vsel %vm9819_vm9, %v2091_v51, %v2813_v32  ;;  %v1294_v32 = vrot.slane %v6122_v29, 2 }
 0x27c   : > { %1331 = vrot.lane.b32.xlu0 %v6414_v25, %s9759_s1 }
 0x27d   : > { %2793 = vrot.lane.b32.xlu1 %v2782_v49, %s9759_s1  ;;  %v1957_v49 = vrot.slane %v6126_v60, 1 }
 0x27f   : > { %v6447_v51 = vsel %vm9817_vm2, %v1189_v62, %v1957_v49 }
 0x280   : > { %1436 = vrot.lane.b32.xlu0 %v6425_v17, %s9762_s19  ;;  %9865 = vst [vmem:[#allocation19_spill] sm:$0xff] %v6447_v51  ;;  %v1101_v17 = vmul.f32 %v6021_v54, %v668_v33  ;;  %v6466_v33 = vsel %vm9819_vm9, %v1395_v56, %v1397_v38  ;;  %v2093_v56 = vrot.slane %v6126_v60, 3 }
 0x281   : > { %2825 = vrot.lane.b32.xlu1 %v2814_v47, %s9762_s19  ;;  %v2025_v47 = vrot.slane %v6126_v60, 2  ;;  %9868 = vst [vmem:[#allocation22_spill] sm:$0xff] %v6466_v33  ;;  %v1406_v60 = vrot.slane %v6150_v14, 3 }
 0x282   : > { %v2815_v25 = vrot.slane %v1101_v17, 3 }
 0x283   : > { %v6461_v62 = vsel %vm9818_vm10, %v1294_v32, %v2025_v47 }
 0x284   : > { %1230 = vrot.lane.b32.xlu0 %v6434_v44, %s9771_s0  ;;  %9867 = vst [vmem:[#allocation21_spill] sm:$0xff] %v6461_v62  ;;  %v2751_v44 = vrot.slane %v1101_v17, 1 }
 0x285   : > { %1228 = vrot.lane.b32.xlu1 %v6440_v52, %s9771_s0  ;;  %v1399_v52 = vrot.slane %v6122_v29, 3 }
 0x286   : > { %v2752_v59 = vsel %vm9817_vm2, %v1957_v49, %v2751_v44 }
 0x287   : > { %v6482_v44 = vsel %vm9819_vm9, %v1397_v38, %v1399_v52 }
 0x288   : > { %2763 = vrot.lane.b32.xlu0 %v6447_v51, %s9771_s0  ;;  %v2783_v51 = vrot.slane %v1101_v17, 2  ;;  %9870 = vst [vmem:[#allocation24_spill] sm:$0xff] %v6482_v44  ;;  %v6495_v17 = vsel %vm9819_vm9, %v1399_v52, %v2093_v56 }
 0x289   : > { %1333 = vrot.lane.b32.xlu1 %v6455_v45, %s9759_s1  ;;  %v6473_v45 = vsel %vm9818_vm10, %v1292_v39, %v1294_v32  ;;  %v2816_v32 = vsel %vm9819_vm9, %v2093_v56, %v2815_v25  ;;  %9873 = vst [vmem:[#allocation27_spill] sm:$0xff] %v6495_v17  ;;  %v9721_v56 = vrot.slane %v6134_v9, 2 }
 0x28a   : > { %9869 = vst [vmem:[#allocation23_spill] sm:$0xff] %v6473_v45 }
 0x28c   : > { %2795 = vrot.lane.b32.xlu0 %v6461_v62, %s9759_s1  ;;  %v2784_v62 = vsel %vm9818_vm10, %v2025_v47, %v2783_v51  ;;  %v1198_v51 = vrot.slane %v6154_v15, 1  ;;  %v9716_v47 = vrot.slane %v6134_v9, 1 }
 0x28d   : > { %1438 = vrot.lane.b32.xlu1 %v6466_v33, %s9762_s19 }
 0x290   : > { %2765 = vrot.lane.b32.xlu0 %v2752_v59, %s9771_s0  ;;  %v1196_v59 = vrot.slane %v6150_v14, 1 }
 0x291   : > { %1335 = vrot.lane.b32.xlu1 %v6473_v45, %s9759_s1  ;;  %v1686_v45 = vrot.slane %v6038_v0, 6 }
 0x292   : > { %v6505_v25 = vsel %vm9817_vm2, %v1196_v59, %v1198_v51  ;;  %v6514_v52 = vsel %vm9817_vm2, %v9716_v47, %v1196_v59  ;;  %v9724_v47 = vrot.slane %v6134_v9, 3 }
 0x293   : > { %9876 = vst [vmem:[#allocation30_spill] sm:$0xff] %v6505_v25  ;;  %9877 = vst [vmem:[#allocation31_spill] sm:$0xff] %v6514_v52 }
 0x294   : > { %2797 = vrot.lane.b32.xlu0 %v2784_v62, %s9759_s1 }
 0x295   : > { %1440 = vrot.lane.b32.xlu1 %v6482_v44, %s9762_s19  ;;  %v2095_v44 = vrot.slane %v6162_v55, 3 }
 0x296   : > { %v6486_v49 = vpop.permute.xlu0 %1891 }
 0x297   : > { %9871 = vst [vmem:[#allocation25_spill] sm:$0xff] %v6486_v49  ;;  %v6488_v39 = vpop.permute.xlu1 %1889  ;;  %v1301_v49 = vrot.slane %v6150_v14, 2  ;;  %v1410_v14 = vrot.slane %v6158_v30, 3 }
 0x298   : > { %9872 = vst [vmem:[#allocation26_spill] sm:$0xff] %v6488_v39  ;;  %2829 = vrot.lane.b32.xlu0 %v2816_v32, %s9762_s19  ;;  %v1303_v39 = vrot.slane %v6154_v15, 2 }
 0x299   : > { %2827 = vrot.lane.b32.xlu1 %v6495_v17, %s9762_s19  ;;  %v6533_v59 = vsel %vm9818_vm10, %v9721_v56, %v1301_v49  ;;  %v2027_v17 = vrot.slane %v6162_v55, 2 }
 0x29a   : > { %v6500_v38 = vpop.permute.xlu0 %1899  ;;  %9881 = vst [vmem:[#allocation35_spill] sm:$0xff] %v6533_v59 }
 0x29b   : > { %9874 = vst [vmem:[#allocation28_spill] sm:$0xff] %v6500_v38  ;;  %v6502_v62 = vpop.permute.xlu1 %1893 }
 0x29c   : > { %9875 = vst [vmem:[#allocation29_spill] sm:$0xff] %v6502_v62  ;;  %1238 = vrot.lane.b32.xlu0 %v6505_v25, %s9771_s0  ;;  %v6524_v62 = vsel %vm9818_vm10, %v1301_v49, %v1303_v39  ;;  %v1408_v25 = vrot.slane %v6154_v15, 3  ;;  %v1959_v15 = vrot.slane %v6162_v55, 1  ;;  %v6552_v49 = vsel %vm9819_vm9, %v9724_v47, %v1406_v60  ;;  %v645_v47 = vld [vmem:[%s5823_s22] sm:$0xff] }
 0x29d   : > { %1236 = vrot.lane.b32.xlu1 %v6514_v52, %s9771_s0  ;;  %9880 = vst [vmem:[#allocation34_spill] sm:$0xff] %v6524_v62  ;;  %9885 = vst [vmem:[#allocation39_spill] sm:$0xff] %v6552_v49  ;;  %v6599_v55 = vsel %vm9819_vm9, %v1410_v14, %v2095_v44 }
 0x29e   : > { %v6519_v32 = vpop.permute.xlu0 %1907  ;;  %v6543_v52 = vsel %vm9819_vm9, %v1406_v60, %v1408_v25  ;;  %9897 = vst [vmem:[#allocation51_spill] sm:$0xff] %v6599_v55 }
 0x29f   : > { %9878 = vst [vmem:[#allocation32_spill] sm:$0xff] %v6519_v32  ;;  %v6521_v38 = vpop.permute.xlu1 %1895  ;;  %9884 = vst [vmem:[#allocation38_spill] sm:$0xff] %v6543_v52 }
 0x2a0   : > { %9879 = vst [vmem:[#allocation33_spill] sm:$0xff] %v6521_v38  ;;  %1343 = vrot.lane.b32.xlu0 %v6524_v62, %s9759_s1  ;;  %v1200_v62 = vrot.slane %v6158_v30, 1 }
 0x2a1   : > { %1341 = vrot.lane.b32.xlu1 %v6533_v59, %s9759_s1  ;;  %v1305_v59 = vrot.slane %v6158_v30, 2 }
 0x2a2   : > { %v6538_v32 = vpop.permute.xlu0 %1911  ;;  %v6568_v60 = vsel %vm9817_vm2, %v1198_v51, %v1200_v62 }
 0x2a3   : > { %9882 = vst [vmem:[#allocation36_spill] sm:$0xff] %v6538_v32  ;;  %v6540_v38 = vpop.permute.xlu1 %1897  ;;  %9889 = vst [vmem:[#allocation43_spill] sm:$0xff] %v6568_v60  ;;  %v6589_v51 = vsel %vm9818_vm10, %v1303_v39, %v1305_v59  ;;  %v6606_v39 = vsel %vm9819_vm9, %v1408_v25, %v1410_v14 }
 0x2a4   : > { %9883 = vst [vmem:[#allocation37_spill] sm:$0xff] %v6540_v38  ;;  %1448 = vrot.lane.b32.xlu0 %v6543_v52, %s9762_s19  ;;  %v6561_v38 = vsel %vm9817_vm2, %v1200_v62, %v1959_v15  ;;  %9894 = vst [vmem:[#allocation48_spill] sm:$0xff] %v6589_v51 }
 0x2a5   : > { %1446 = vrot.lane.b32.xlu1 %v6552_v49, %s9762_s19  ;;  %9888 = vst [vmem:[#allocation42_spill] sm:$0xff] %v6561_v38  ;;  %v6579_v49 = vsel %vm9818_vm10, %v1305_v59, %v2027_v17  ;;  %9898 = vst [vmem:[#allocation52_spill] sm:$0xff] %v6606_v39 }
 0x2a6   : > { %v6556_v56 = vpop.permute.xlu0 %1913  ;;  %9892 = vst [vmem:[#allocation46_spill] sm:$0xff] %v6579_v49 }
 0x2a7   : > { %9886 = vst [vmem:[#allocation40_spill] sm:$0xff] %v6556_v56  ;;  %v6558_v32 = vpop.permute.xlu1 %1901  ;;  %v676_v56 = vld [vmem:[%s5823_s22 + $0xf8] sm:$0x7] }
 0x2a8   : > { %9887 = vst [vmem:[#allocation41_spill] sm:$0xff] %v6558_v32  ;;  %2767 = vrot.lane.b32.xlu0 %v6561_v38, %s9771_s0  ;;  %v6584_v38 = vmul.f32 %v6021_v54, %v645_v47  ;;  %v1109_v62 = vmul.f32 %v6021_v54, %v676_v56 }
 0x2a9   : > { %1240 = vrot.lane.b32.xlu1 %v6568_v60, %s9771_s0  ;;  %v1159_v60 = vrot.slane %v6030_v48, 1 }
 0x2aa   : > { %v6574_v52 = vpop.permute.xlu0 %1915  ;;  %9893 = vst [vmem:[#allocation47_spill] sm:$0xff] %v6584_v38  ;;  %v1158_v47 = vrot.slane %v6584_v38, 1  ;;  %v2753_v56 = vrot.slane %v1109_v62, 1  ;;  %v2785_v14 = vrot.slane %v1109_v62, 2 }
 0x2ab   : > { %9890 = vst [vmem:[#allocation44_spill] sm:$0xff] %v6574_v52  ;;  %v6576_v32 = vpop.permute.xlu1 %1903 }
 0x2ac   : > { %9891 = vst [vmem:[#allocation45_spill] sm:$0xff] %v6576_v32  ;;  %2799 = vrot.lane.b32.xlu0 %v6579_v49, %s9759_s1  ;;  %v1160_v49 = vsel %vm9817_vm2, %v1158_v47, %v1159_v60  ;;  %v2754_v30 = vsel %vm9817_vm2, %v1959_v15, %v2753_v56  ;;  %v1369_v47 = vrot.slane %v6030_v48, 3  ;;  %v2817_v15 = vrot.slane %v1109_v62, 3 }
 0x2ad   : > { %1345 = vrot.lane.b32.xlu1 %v6589_v51, %s9759_s1  ;;  %v1263_v51 = vrot.slane %v6584_v38, 2 }
 0x2ae   : > { %v6594_v52 = vpop.permute.xlu0 %1206 }
 0x2af   : > { %9895 = vst [vmem:[#allocation49_spill] sm:$0xff] %v6594_v52  ;;  %v6596_v32 = vpop.permute.xlu1 %1905  ;;  %v1264_v52 = vrot.slane %v6030_v48, 2 }
 0x2b0   : > { %9896 = vst [vmem:[#allocation50_spill] sm:$0xff] %v6596_v32  ;;  %2831 = vrot.lane.b32.xlu0 %v6599_v55, %s9762_s19 }
 0x2b1   : > { %1450 = vrot.lane.b32.xlu1 %v6606_v39, %s9762_s19  ;;  %v1265_v39 = vsel %vm9818_vm10, %v1263_v51, %v1264_v52  ;;  %v1473_v51 = vrot.slane %v6030_v48, 4 }
 0x2b2   : > { %v6610_v59 = vpop.permute.xlu0 %1208 }
 0x2b3   : > { %9899 = vst [vmem:[#allocation53_spill] sm:$0xff] %v6610_v59  ;;  %v6612_v32 = vpop.permute.xlu1 %1909  ;;  %v2786_v59 = vsel %vm9818_vm10, %v2027_v17, %v2785_v14  ;;  %v9907_v14 = vrot.slane %v6034_v58, 1 }
 0x2b4   : > { %9900 = vst [vmem:[#allocation54_spill] sm:$0xff] %v6612_v32  ;;  %1202 = vrot.lane.b32.xlu0 %v1160_v49, %s9771_s0  ;;  %v1368_v32 = vrot.slane %v6584_v38, 3 }
 0x2b5   : > { %2769 = vrot.lane.b32.xlu1 %v2754_v30, %s9771_s0 }
 0x2b6   : > { %v6620_v25 = vpop.permute.xlu0 %1416  ;;  %v1370_v56 = vsel %vm9819_vm9, %v1368_v32, %v1369_v47  ;;  %v1578_v32 = vrot.slane %v6030_v48, 5 }
 0x2b7   : > { %9901 = vst [vmem:[#allocation55_spill] sm:$0xff] %v6620_v25  ;;  %v6622_v55 = vpop.permute.xlu1 %1917  ;;  %v2818_v25 = vsel %vm9819_vm9, %v2095_v44, %v2817_v15  ;;  %v1681_v15 = vrot.slane %v6584_v38, 6 }
 0x2b8   : > { %9902 = vst [vmem:[#allocation56_spill] sm:$0xff] %v6622_v55  ;;  %1307 = vrot.lane.b32.xlu0 %v1265_v39, %s9759_s1  ;;  %v1472_v55 = vrot.slane %v6584_v38, 4 }
 0x2b9   : > { %2801 = vrot.lane.b32.xlu1 %v2786_v59, %s9759_s1  ;;  %v1577_v59 = vrot.slane %v6584_v38, 5 }
 0x2ba   : > { %v6630_v49 = vpop.permute.xlu0 %1210  ;;  %v1474_v39 = vsel %vm9820_vm0, %v1472_v55, %v1473_v51 }
 0x2bb   : > { %9903 = vst [vmem:[#allocation57_spill] sm:$0xff] %v6630_v49  ;;  %v6632_v30 = vpop.permute.xlu1 %1311  ;;  %v6650_v49 = vsel %vm9817_vm2, %v1159_v60, %v9907_v14  ;;  %v1579_v55 = vsel %vm9821_vm11, %v1577_v59, %v1578_v32  ;;  %v9910_v60 = vrot.slane %v6034_v58, 2  ;;  %v1785_v59 = vrot.slane %v6584_v38, 7 }
 0x2bc   : > { %9904 = vst [vmem:[#allocation58_spill] sm:$0xff] %v6632_v30  ;;  %1412 = vrot.lane.b32.xlu0 %v1370_v56, %s9762_s19  ;;  %v1682_v56 = vrot.slane %v6030_v48, 6 }
 0x2bd   : > { %2833 = vrot.lane.b32.xlu1 %v2818_v25, %s9762_s19  ;;  %v1267_v14 = vsel %vm9818_vm10, %v1264_v52, %v9910_v60 }
 0x2be   : > { %v6640_v17 = vpop.permute.xlu0 %2755 }
 0x2bf   : > { %9905 = vst [vmem:[#allocation59_spill] sm:$0xff] %v6640_v17  ;;  %v6642_v62 = vpop.permute.xlu1 %1313  ;;  %v1683_v17 = vsel %vm9822_vm7, %v1681_v15, %v1682_v56 }
 0x2c0   : > { %9906 = vst [vmem:[#allocation60_spill] sm:$0xff] %v6642_v62  ;;  %1516 = vrot.lane.b32.xlu0 %v1474_v39, %s9769_s20  ;;  %v9913_v62 = vrot.slane %v6034_v58, 3 }
 0x2c1   : > { %1204 = vrot.lane.b32.xlu1 %v6650_v49, %s9771_s0 }
 0x2c2   : > { %v6655_v44 = vpop.permute.xlu0 %2787  ;;  %v6677_v52 = vsel %vm9819_vm9, %v1369_v47, %v9913_v62  ;;  %v1580_v47 = vrot.slane %v6034_v58, 5 }
 0x2c3   : > { %9908 = vst [vmem:[#allocation61_spill] sm:$0xff] %v6655_v44  ;;  %v6657_v25 = vpop.permute.xlu1 %1418 }
 0x2c4   : > { %9909 = vst [vmem:[#allocation62_spill] sm:$0xff] %v6657_v25  ;;  %1621 = vrot.lane.b32.xlu0 %v1579_v55, %s9806_s21  ;;  %v1786_v25 = vrot.slane %v6030_v48, 7  ;;  %v1475_v55 = vrot.slane %v6034_v58, 4  ;;  %v9742_v48 = vrot.slane %v6034_v58, 7 }
 0x2c5   : > { %1309 = vrot.lane.b32.xlu1 %v1267_v14, %s9759_s1 }
 0x2c6   : > { %v6667_v39 = vpop.permute.xlu0 %2757  ;;  %v1787_v38 = vsel %vm9823_vm6, %v1785_v59, %v1786_v25  ;;  %v6704_v59 = vsel %vm9823_vm6, %v1786_v25, %v9742_v48 }
 0x2c7   : > { %9911 = vst [vmem:[#allocation63_spill] sm:$0xff] %v6667_v39  ;;  %v6669_v44 = vpop.permute.xlu1 %1315  ;;  %v6690_v39 = vsel %vm9820_vm0, %v1473_v51, %v1475_v55  ;;  %v1477_v51 = vrot.slane %v6038_v0, 4 }
 0x2c8   : > { %9912 = vst [vmem:[#allocation64_spill] sm:$0xff] %v6669_v44  ;;  %1725 = vrot.lane.b32.xlu0 %v1683_v17, %s9803_s2  ;;  %v653_v17 = vld [vmem:[%s5823_s22 + $0x40] sm:$0xff]  ;;  %v6712_v44 = vsel %vm9821_vm11, %v1578_v32, %v1580_v47 }
 0x2c9   : > { %1414 = vrot.lane.b32.xlu1 %v6677_v52, %s9762_s19  ;;  %v6746_v33 = vsel %vm9820_vm0, %v1475_v55, %v1477_v51 }
 0x2ca   : > { %v6683_v60 = vpop.permute.xlu0 %2789 }
 0x2cb   : > { %9914 = vst [vmem:[#allocation65_spill] sm:$0xff] %v6683_v60  ;;  %v6685_v15 = vpop.permute.xlu1 %1420 }
 0x2cc   : > { %9915 = vst [vmem:[#allocation66_spill] sm:$0xff] %v6685_v15  ;;  %1829 = vrot.lane.b32.xlu0 %v1787_v38, %s9784_s23  ;;  %v9743_v15 = vrot.slane %v6042_v10, 4  ;;  %v6709_v38 = vmul.f32 %v6021_v54, %v653_v17 }
 0x2cd   : > { %1518 = vrot.lane.b32.xlu1 %v6690_v39, %s9769_s20 }
 0x2ce   : > { %v6697_v62 = vpop.permute.xlu0 %2821  ;;  %9918 = vst [vmem:[#allocation69_spill] sm:$0xff] %v6709_v38  ;;  %v6726_v17 = vsel %vm9820_vm0, %v1477_v51, %v9743_v15  ;;  %v1169_v32 = vrot.slane %v6709_v38, 1  ;;  %v9749_v51 = vrot.slane %v6042_v10, 6 }
 0x2cf   : > { %9916 = vst [vmem:[#allocation67_spill] sm:$0xff] %v6697_v62  ;;  %v6699_v60 = vpop.permute.xlu1 %2819  ;;  %v1684_v62 = vrot.slane %v6034_v58, 6 }
 0x2d0   : > { %9917 = vst [vmem:[#allocation68_spill] sm:$0xff] %v6699_v60  ;;  %1831 = vrot.lane.b32.xlu0 %v6704_v59, %s9784_s23  ;;  %v9748_v60 = vrot.slane %v6054_v3, 1 }
 0x2d1   : > { %1623 = vrot.lane.b32.xlu1 %v6712_v44, %s9806_s21  ;;  %v6731_v30 = vsel %vm9822_vm7, %v1682_v56, %v1684_v62  ;;  %v1582_v56 = vrot.slane %v6038_v0, 5 }
 0x2d2   : > { %v6719_v25 = vpop.permute.xlu0 %1218  ;;  %v1171_v15 = vsel %vm9817_vm2, %v1169_v32, %v9748_v60 }
 0x2d3   : > { %9919 = vst [vmem:[#allocation70_spill] sm:$0xff] %v6719_v25  ;;  %v6721_v48 = vpop.permute.xlu1 %1216  ;;  %v6760_v32 = vsel %vm9821_vm11, %v1580_v47, %v1582_v56 }
 0x2d4   : > { %9920 = vst [vmem:[#allocation71_spill] sm:$0xff] %v6721_v48  ;;  %1522 = vrot.lane.b32.xlu0 %v6726_v17, %s9769_s20 }
 0x2d5   : > { %1727 = vrot.lane.b32.xlu1 %v6731_v30, %s9803_s2 }
 0x2d6   : > { %v6737_v25 = vpop.permute.xlu0 %1323 }
 0x2d7   : > { %9921 = vst [vmem:[#allocation72_spill] sm:$0xff] %v6737_v25  ;;  %v6739_v48 = vpop.permute.xlu1 %1321 }
 0x2d8   : > { %9922 = vst [vmem:[#allocation73_spill] sm:$0xff] %v6739_v48  ;;  %1212 = vrot.lane.b32.xlu0 %v1171_v15, %s9771_s0  ;;  %v6757_v48 = vsel %vm9822_vm7, %v1684_v62, %v1686_v45  ;;  %v1584_v62 = vrot.slane %v6042_v10, 5 }
 0x2d9   : > { %1520 = vrot.lane.b32.xlu1 %v6746_v33, %s9769_s20 }
 0x2da   : > { %v6752_v9 = vpop.permute.xlu0 %1428 }
 0x2db   : > { %9923 = vst [vmem:[#allocation74_spill] sm:$0xff] %v6752_v9  ;;  %v6754_v25 = vpop.permute.xlu1 %1426  ;;  %v6782_v9 = vsel %vm9822_vm7, %v1686_v45, %v9749_v51  ;;  %v1274_v45 = vrot.slane %v6709_v38, 2 }
 0x2dc   : > { %9924 = vst [vmem:[#allocation75_spill] sm:$0xff] %v6754_v25  ;;  %1729 = vrot.lane.b32.xlu0 %v6757_v48, %s9803_s2  ;;  %v9753_v25 = vrot.slane %v6042_v10, 7 }
 0x2dd   : > { %1625 = vrot.lane.b32.xlu1 %v6760_v32, %s9806_s21 }
 0x2de   : > { %v6766_v55 = vpop.permute.xlu0 %2759 }
 0x2df   : > { %9925 = vst [vmem:[#allocation76_spill] sm:$0xff] %v6766_v55  ;;  %v6768_v15 = vpop.permute.xlu1 %1220  ;;  %v6785_v55 = vsel %vm9821_vm11, %v1582_v56, %v1584_v62  ;;  %v1275_v56 = vrot.slane %v6054_v3, 2 }
 0x2e0   : > { %9926 = vst [vmem:[#allocation77_spill] sm:$0xff] %v6768_v15  ;;  %2029 = vrot.lane.b32.xlu0 %v1267_v14, %s9791_s24 }
 0x2e1   : > { %1961 = vrot.lane.b32.xlu1 %v6650_v49, %s9810_s25 }
 0x2e2   : > { %v6775_v47 = vpop.permute.xlu0 %2791 }
 0x2e3   : > { %9927 = vst [vmem:[#allocation78_spill] sm:$0xff] %v6775_v47  ;;  %v6777_v60 = vpop.permute.xlu1 %1325  ;;  %v1379_v47 = vrot.slane %v6709_v38, 3 }
 0x2e4   : > { %9928 = vst [vmem:[#allocation79_spill] sm:$0xff] %v6777_v60  ;;  %1731 = vrot.lane.b32.xlu0 %v6782_v9, %s9803_s2  ;;  %v9752_v60 = vrot.slane %v6054_v3, 3 }
 0x2e5   : > { %1627 = vrot.lane.b32.xlu1 %v6785_v55, %s9806_s21 }
 0x2e6   : > { %v6791_v14 = vpop.permute.xlu0 %2823 }
 0x2e7   : > { %9929 = vst [vmem:[#allocation80_spill] sm:$0xff] %v6791_v14  ;;  %v6793_v49 = vpop.permute.xlu1 %1430  ;;  %v1381_v14 = vsel %vm9819_vm9, %v1379_v47, %v9752_v60  ;;  %v9935_v47 = vrot.slane %v6034_v58, 7 }
 0x2e8   : > { %9930 = vst [vmem:[#allocation81_spill] sm:$0xff] %v6793_v49  ;;  %2031 = vrot.lane.b32.xlu0 %v6262_v23, %s9791_s24  ;;  %v1790_v49 = vrot.slane %v6038_v0, 7  ;;  %v1276_v23 = vsel %vm9818_vm10, %v1274_v45, %v1275_v56 }
 0x2e9   : > { %1963 = vrot.lane.b32.xlu1 %v6225_v12, %s9810_s25 }
 0x2ea   : > { %v6803_v51 = vpop.permute.xlu0 %1226  ;;  %v6827_v60 = vsel %vm9823_vm6, %v9935_v47, %v1790_v49 }
 0x2eb   : > { %9931 = vst [vmem:[#allocation82_spill] sm:$0xff] %v6803_v51  ;;  %v6805_v15 = vpop.permute.xlu1 %2761  ;;  %v6822_v51 = vsel %vm9823_vm6, %v1790_v49, %v9753_v25  ;;  %v9940_v25 = vrot.slane %v6058_v4, 1 }
 0x2ec   : > { %9932 = vst [vmem:[#allocation83_spill] sm:$0xff] %v6805_v15  ;;  %1422 = vrot.lane.b32.xlu0 %v1381_v14, %s9762_s19  ;;  %v1589_v15 = vrot.slane %v6054_v3, 5 }
 0x2ed   : > { %1317 = vrot.lane.b32.xlu1 %v1276_v23, %s9759_s1  ;;  %v9754_v23 = vrot.slane %v6046_v50, 4 }
 0x2ee   : > { %v6815_v29 = vpop.permute.xlu0 %1331 }
 0x2ef   : > { %9933 = vst [vmem:[#allocation84_spill] sm:$0xff] %v6815_v29  ;;  %v6817_v12 = vpop.permute.xlu1 %2793  ;;  %v9941_v29 = vrot.slane %v6054_v3, 1 }
 0x2f0   : > { %9934 = vst [vmem:[#allocation85_spill] sm:$0xff] %v6817_v12  ;;  %1835 = vrot.lane.b32.xlu0 %v6822_v51, %s9784_s23 }
 0x2f1   : > { %1833 = vrot.lane.b32.xlu1 %v6827_v60, %s9784_s23 }
 0x2f2   : > { %v6833_v14 = vpop.permute.xlu0 %1436 }
 0x2f3   : > { %9936 = vst [vmem:[#allocation86_spill] sm:$0xff] %v6833_v14  ;;  %v6835_v45 = vpop.permute.xlu1 %2825  ;;  %v6851_v14 = vsel %vm9817_vm2, %v9941_v29, %v9940_v25  ;;  %v1483_v25 = vrot.slane %v6709_v38, 4 }
 0x2f4   : > { %9937 = vst [vmem:[#allocation87_spill] sm:$0xff] %v6835_v45  ;;  %2099 = vrot.lane.b32.xlu0 %v6244_v11, %s9774_s26  ;;  %v9755_v45 = vrot.slane %v6046_v50, 5  ;;  %v9942_v11 = vrot.slane %v6042_v10, 4 }
 0x2f5   : > { %2097 = vrot.lane.b32.xlu1 %v6677_v52, %s9774_s26 }
 0x2f6   : > { %v6842_v49 = vpop.permute.xlu0 %1230  ;;  %v6859_v12 = vsel %vm9820_vm0, %v9942_v11, %v9754_v23  ;;  %v6872_v29 = vsel %vm9821_vm11, %v1584_v62, %v9755_v45  ;;  %v1484_v11 = vrot.slane %v6054_v3, 4 }
 0x2f7   : > { %9938 = vst [vmem:[#allocation88_spill] sm:$0xff] %v6842_v49  ;;  %v6844_v47 = vpop.permute.xlu1 %1228 }
 0x2f8   : > { %9939 = vst [vmem:[#allocation89_spill] sm:$0xff] %v6844_v47  ;;  %1214 = vrot.lane.b32.xlu0 %v6851_v14, %s9771_s0  ;;  %v1588_v47 = vrot.slane %v6709_v38, 5 }
 0x2f9   : > { %1524 = vrot.lane.b32.xlu1 %v6859_v12, %s9769_s20 }
 0x2fa   : > { %v6865_v52 = vpop.permute.xlu0 %2763 }
 0x2fb   : > { %9943 = vst [vmem:[#allocation90_spill] sm:$0xff] %v6865_v52  ;;  %v6867_v49 = vpop.permute.xlu1 %1333 }
 0x2fc   : > { %9944 = vst [vmem:[#allocation91_spill] sm:$0xff] %v6867_v49  ;;  %1629 = vrot.lane.b32.xlu0 %v6872_v29, %s9806_s21  ;;  %v1485_v49 = vsel %vm9820_vm0, %v1483_v25, %v1484_v11  ;;  %v9949_v25 = vrot.slane %v6058_v4, 2 }
 0x2fd   : > { %2165 = vrot.lane.b32.xlu1 %v6690_v39, %s9807_s29 }
 0x2fe   : > { %v6880_v23 = vpop.permute.xlu0 %2795 }
 0x2ff   : > { %v6882_v52 = vpop.permute.xlu1 %1438 }
 0x300   : > { %1965 = vrot.lane.b32.xlu0 %v6233_v31, %s9810_s25 }
 0x301   : > { %1526 = vrot.lane.b32.xlu1 %v1485_v49, %s9769_s20  ;;  %v1590_v49 = vsel %vm9821_vm11, %v1588_v47, %v1589_v15  ;;  %v9951_v47 = vrot.slane %v6042_v10, 6 }
 0x302   : > { %v6888_v62 = vpop.permute.xlu0 %2765 }
 0x303   : > { %9945 = vst [vmem:[#allocation92_spill] sm:$0xff] %v6888_v62  ;;  %v6890_v45 = vpop.permute.xlu1 %1335  ;;  %v6906_v62 = vsel %vm9818_vm10, %v1275_v56, %v9949_v25 }
 0x304   : > { %9946 = vst [vmem:[#allocation93_spill] sm:$0xff] %v6890_v45  ;;  %2233 = vrot.lane.b32.xlu0 %v6712_v44, %s9780_s30  ;;  %v9758_v45 = vrot.slane %v6046_v50, 6 }
 0x305   : > { %2167 = vrot.lane.b32.xlu1 %v6746_v33, %s9807_s29 }
 0x306   : > { %v6898_v39 = vpop.permute.xlu0 %2797 }
 0x307   : > { %9947 = vst [vmem:[#allocation94_spill] sm:$0xff] %v6898_v39  ;;  %v6900_v31 = vpop.permute.xlu1 %1440  ;;  %v6921_v39 = vsel %vm9822_vm7, %v9951_v47, %v9758_v45  ;;  %v9956_v45 = vrot.slane %v6058_v4, 3 }
 0x308   : > { %9948 = vst [vmem:[#allocation95_spill] sm:$0xff] %v6900_v31  ;;  %1631 = vrot.lane.b32.xlu0 %v1590_v49, %s9806_s21 }
 0x309   : > { %1319 = vrot.lane.b32.xlu1 %v6906_v62, %s9759_s1  ;;  %s9777_s1 = smov 56  }
 0x30a   : > { %v6912_v44 = vpop.permute.xlu0 %2829 }
 0x30b   : > { %9950 = vst [vmem:[#allocation96_spill] sm:$0xff] %v6912_v44  ;;  %v6914_v33 = vpop.permute.xlu1 %2827 }
 0x30c   : > { %1967 = vrot.lane.b32.xlu0 %v6254_v19, %s9810_s25  ;;  %v9957_v19 = vrot.slane %v6054_v3, 3 }
 0x30d   : > { %1733 = vrot.lane.b32.xlu1 %v6921_v39, %s9803_s2 }
 0x30e   : > { %v6927_v56 = vpop.permute.xlu0 %1238  ;;  %v6944_v44 = vsel %vm9819_vm9, %v9957_v19, %v9956_v45  ;;  %v9959_v45 = vrot.slane %v6042_v10, 7 }
 0x30f   : > { %9952 = vst [vmem:[#allocation97_spill] sm:$0xff] %v6927_v56  ;;  %v6929_v49 = vpop.permute.xlu1 %1236  ;;  %v9761_v56 = vrot.slane %v6046_v50, 7 }
 0x310   : > { %9953 = vst [vmem:[#allocation98_spill] sm:$0xff] %v6929_v49  ;;  %2235 = vrot.lane.b32.xlu0 %v6760_v32, %s9780_s30  ;;  %v1692_v32 = vrot.slane %v6709_v38, 6 }
 0x311   : > { %2033 = vrot.lane.b32.xlu1 %v6277_v26, %s9791_s24  ;;  %v1693_v26 = vrot.slane %v6054_v3, 6  ;;  %v6962_v19 = vsel %vm9823_vm6, %v9959_v45, %v9761_v56  ;;  %v1797_v56 = vrot.slane %v6054_v3, 7 }
 0x312   : > { %v6935_v25 = vpop.permute.xlu0 %1343 }
 0x313   : > { %9954 = vst [vmem:[#allocation99_spill] sm:$0xff] %v6935_v25  ;;  %v6937_v47 = vpop.permute.xlu1 %1341  ;;  %v1694_v49 = vsel %vm9822_vm7, %v1692_v32, %v1693_v26  ;;  %v1796_v32 = vrot.slane %v6709_v38, 7 }
 0x314   : > { %9955 = vst [vmem:[#allocation100_spill] sm:$0xff] %v6937_v47  ;;  %1424 = vrot.lane.b32.xlu0 %v6944_v44, %s9762_s19  ;;  %s9800_s19 = smov 60  }
 0x315   : > { %2301 = vrot.lane.b32.xlu1 %v6731_v30, %s9777_s1 }
 0x316   : > { %v6953_v25 = vpop.permute.xlu0 %1448 }
 0x317   : > { %9958 = vst [vmem:[#allocation101_spill] sm:$0xff] %v6953_v25  ;;  %v6955_v47 = vpop.permute.xlu1 %1446 }
 0x318   : > { %1837 = vrot.lane.b32.xlu0 %v6962_v19, %s9784_s23 }
 0x319   : > { %1735 = vrot.lane.b32.xlu1 %v1694_v49, %s9803_s2  ;;  %v1486_v49 = vrot.slane %v6058_v4, 4 }
 0x31a   : > { %v6968_v31 = vpop.permute.xlu0 %2767 }
 0x31b   : > { %9960 = vst [vmem:[#allocation102_spill] sm:$0xff] %v6968_v31  ;;  %v6970_v30 = vpop.permute.xlu1 %1240  ;;  %v6993_v31 = vsel %vm9820_vm0, %v1484_v11, %v1486_v49 }
 0x31c   : > { %2101 = vrot.lane.b32.xlu0 %v6288_v36, %s9774_s26 }
 0x31d   : > { %2035 = vrot.lane.b32.xlu1 %v6295_v41, %s9791_s24 }
 0x31e   : > { %v6976_v25 = vpop.permute.xlu0 %2799 }
 0x31f   : > { %9961 = vst [vmem:[#allocation103_spill] sm:$0xff] %v6976_v25  ;;  %v6978_v45 = vpop.permute.xlu1 %1345  ;;  %v1798_v25 = vsel %vm9823_vm6, %v1796_v32, %v1797_v56 }
 0x320   : > { %2369 = vrot.lane.b32.xlu0 %v6704_v59, %s9800_s19 }
 0x321   : > { %2303 = vrot.lane.b32.xlu1 %v6757_v48, %s9777_s1  ;;  %v1591_v48 = vrot.slane %v6058_v4, 5 }
 0x322   : > { %v6987_v36 = vpop.permute.xlu0 %2831 }
 0x323   : > { %9962 = vst [vmem:[#allocation104_spill] sm:$0xff] %v6987_v36  ;;  %v6989_v41 = vpop.permute.xlu1 %1450  ;;  %v7013_v38 = vsel %vm9821_vm11, %v1589_v15, %v1591_v48 }
 0x324   : > { %1839 = vrot.lane.b32.xlu0 %v1798_v25, %s9784_s23  ;;  %v1488_v25 = vrot.slane %v6062_v5, 4 }
 0x325   : > { %1528 = vrot.lane.b32.xlu1 %v6993_v31, %s9769_s20 }
 0x326   : > { %v6998_v59 = vpop.permute.xlu0 %1202 }
 0x327   : > { %v7000_v3 = vpop.permute.xlu1 %2769 }
 0x328   : > { %9963 = vst [vmem:[#allocation105_spill] sm:$0xff] %v7000_v3  ;;  %2103 = vrot.lane.b32.xlu0 %v6304_v46, %s9774_s26 }
 0x329   : > { %2169 = vrot.lane.b32.xlu1 %v6726_v17, %s9807_s29  ;;  %v7024_v17 = vsel %vm9820_vm0, %v1486_v49, %v1488_v25 }
 0x32a   : > { %v7007_v32 = vpop.permute.xlu0 %1307 }
 0x32b   : > { %v7009_v11 = vpop.permute.xlu1 %2801 }
 0x32c   : > { %9964 = vst [vmem:[#allocation106_spill] sm:$0xff] %v7009_v11  ;;  %2371 = vrot.lane.b32.xlu0 %v6827_v60, %s9800_s19  ;;  %v1695_v60 = vrot.slane %v6058_v4, 6 }
 0x32d   : > { %1633 = vrot.lane.b32.xlu1 %v7013_v38, %s9806_s21 }
 0x32e   : > { %v7019_v46 = vpop.permute.xlu0 %1412 }
 0x32f   : > { %v7021_v3 = vpop.permute.xlu1 %2833 }
 0x330   : > { %9965 = vst [vmem:[#allocation107_spill] sm:$0xff] %v7021_v3  ;;  %1530 = vrot.lane.b32.xlu0 %v7024_v17, %s9769_s20  ;;  %v9766_v3 = vrot.slane %v6062_v5, 5 }
 0x331   : > { %1969 = vrot.lane.b32.xlu1 %v6269_v24, %s9810_s25  ;;  %v7045_v24 = vsel %vm9822_vm7, %v1693_v26, %v1695_v60 }
 0x332   : > { %v7030_v15 = vpop.permute.xlu0 %1516 }
 0x333   : > { %9966 = vst [vmem:[#allocation108_spill] sm:$0xff] %v7030_v15  ;;  %v7032_v11 = vpop.permute.xlu1 %1204  ;;  %v7050_v15 = vsel %vm9821_vm11, %v1591_v48, %v9766_v3  ;;  %v1799_v3 = vrot.slane %v6058_v4, 7 }
 0x334   : > { %2171 = vrot.lane.b32.xlu0 %v6859_v12, %s9807_s29 }
 0x335   : > { %2237 = vrot.lane.b32.xlu1 %v6785_v55, %s9780_s30 }
 0x336   : > { %v7040_v49 = vpop.permute.xlu0 %1621 }
 0x337   : > { %9967 = vst [vmem:[#allocation109_spill] sm:$0xff] %v7040_v49  ;;  %v7042_v36 = vpop.permute.xlu1 %1309  ;;  %v1697_v49 = vrot.slane %v6062_v5, 6 }
 0x338   : > { %1737 = vrot.lane.b32.xlu0 %v7045_v24, %s9803_s2 }
 0x339   : > { %1635 = vrot.lane.b32.xlu1 %v7050_v15, %s9806_s21 }
 0x33a   : > { %v7056_v12 = vpop.permute.xlu0 %1725 }
 0x33b   : > { %9968 = vst [vmem:[#allocation110_spill] sm:$0xff] %v7056_v12  ;;  %v7058_v55 = vpop.permute.xlu1 %1414 }
 0x33c   : > { %9969 = vst [vmem:[#allocation111_spill] sm:$0xff] %v7058_v55  ;;  %2037 = vrot.lane.b32.xlu0 %v6283_v34, %s9791_s24  ;;  %v9999_v55 = vrot.slane %v6096_v22, 1 }
 0x33d   : > { %1971 = vrot.lane.b32.xlu1 %v6851_v14, %s9810_s25  ;;  %v7079_v14 = vsel %vm9823_vm6, %v1797_v56, %v1799_v3 }
 0x33e   : > { %v7064_v26 = vpop.permute.xlu0 %1829 }
 0x33f   : > { %9970 = vst [vmem:[#allocation112_spill] sm:$0xff] %v7064_v26  ;;  %v7066_v48 = vpop.permute.xlu1 %1518  ;;  %v7082_v26 = vsel %vm9822_vm7, %v1695_v60, %v1697_v49 }
 0x340   : > { %9971 = vst [vmem:[#allocation113_spill] sm:$0xff] %v7066_v48  ;;  %2305 = vrot.lane.b32.xlu0 %v6782_v9, %s9777_s1 }
 0x341   : > { %2239 = vrot.lane.b32.xlu1 %v6872_v29, %s9780_s30 }
 0x342   : > { %v7074_v12 = vpop.permute.xlu0 %1831 }
 0x343   : > { %9972 = vst [vmem:[#allocation114_spill] sm:$0xff] %v7074_v12  ;;  %v7076_v34 = vpop.permute.xlu1 %1623  ;;  %v9767_v12 = vrot.slane %v6062_v5, 7 }
 0x344   : > { %9973 = vst [vmem:[#allocation115_spill] sm:$0xff] %v7076_v34  ;;  %1841 = vrot.lane.b32.xlu0 %v7079_v14, %s9784_s23 }
 0x345   : > { %1739 = vrot.lane.b32.xlu1 %v7082_v26, %s9803_s2 }
 0x346   : > { %v7088_v9 = vpop.permute.xlu0 %1522 }
 0x347   : > { %9974 = vst [vmem:[#allocation116_spill] sm:$0xff] %v7088_v9  ;;  %v7090_v29 = vpop.permute.xlu1 %1727  ;;  %v1490_v9 = vrot.slane %v6066_v6, 4 }
 0x348   : > { %9975 = vst [vmem:[#allocation117_spill] sm:$0xff] %v7090_v29  ;;  %2105 = vrot.lane.b32.xlu0 %v6313_v63, %s9774_s26 }
 0x349   : > { %2039 = vrot.lane.b32.xlu1 %v6906_v62, %s9791_s24  ;;  %v7113_v62 = vsel %vm9823_vm6, %v1799_v3, %v9767_v12  ;;  %v9983_v3 = vrot.slane %v6046_v50, 4  ;;  %v9768_v12 = vrot.slane %v6070_v7, 4 }
 0x34a   : > { %v7096_v56 = vpop.permute.xlu0 %1212 }
 0x34b   : > { %9976 = vst [vmem:[#allocation118_spill] sm:$0xff] %v7096_v56  ;;  %v7098_v60 = vpop.permute.xlu1 %1520  ;;  %v7116_v56 = vsel %vm9820_vm0, %v1488_v25, %v1490_v9 }
 0x34c   : > { %9977 = vst [vmem:[#allocation119_spill] sm:$0xff] %v7098_v60  ;;  %2373 = vrot.lane.b32.xlu0 %v6822_v51, %s9800_s19  ;;  %v2157_v51 = vrot.slane %v6050_v2, 4  ;;  %v661_v60 = vld [vmem:[%s5823_s22 + $0x80] sm:$0xff] }
 0x34d   : > { %2307 = vrot.lane.b32.xlu1 %v6921_v39, %s9777_s1 }
 0x34e   : > { %v7106_v29 = vpop.permute.xlu0 %1729  ;;  %v2158_v25 = vsel %vm9820_vm0, %v9983_v3, %v2157_v51 }
 0x34f   : > { %9978 = vst [vmem:[#allocation120_spill] sm:$0xff] %v7106_v29  ;;  %v7108_v63 = vpop.permute.xlu1 %1625 }
 0x350   : > { %9979 = vst [vmem:[#allocation121_spill] sm:$0xff] %v7108_v63  ;;  %1843 = vrot.lane.b32.xlu0 %v7113_v62, %s9784_s23  ;;  %v7129_v63 = vmul.f32 %v6021_v54, %v661_v60  ;;  %v1181_v60 = vrot.slane %v6092_v21, 1 }
 0x351   : > { %1532 = vrot.lane.b32.xlu1 %v7116_v56, %s9769_s20 }
 0x352   : > { %v7124_v39 = vpop.permute.xlu0 %2029  ;;  %9982 = vst [vmem:[#allocation124_spill] sm:$0xff] %v7129_v63 }
 0x353   : > { %9980 = vst [vmem:[#allocation122_spill] sm:$0xff] %v7124_v39  ;;  %v7126_v29 = vpop.permute.xlu1 %1961  ;;  %v1180_v39 = vrot.slane %v7129_v63, 1 }
 0x354   : > { %9981 = vst [vmem:[#allocation123_spill] sm:$0xff] %v7126_v29  ;;  %2107 = vrot.lane.b32.xlu0 %v6944_v44, %s9774_s26  ;;  %v7147_v29 = vsel %vm9820_vm0, %v1490_v9, %v9768_v12  ;;  %v1286_v9 = vrot.slane %v6092_v21, 2 }
 0x355   : > { %2173 = vrot.lane.b32.xlu1 %v2158_v25, %s9807_s29  ;;  %v1182_v3 = vsel %vm9817_vm2, %v1180_v39, %v1181_v60  ;;  %v1595_v25 = vrot.slane %v6066_v6, 5 }
 0x356   : > { %v7138_v34 = vpop.permute.xlu0 %1731 }
 0x357   : > { %9984 = vst [vmem:[#allocation125_spill] sm:$0xff] %v7138_v34  ;;  %v7140_v48 = vpop.permute.xlu1 %1627  ;;  %v1285_v34 = vrot.slane %v7129_v63, 2 }
 0x358   : > { %9985 = vst [vmem:[#allocation126_spill] sm:$0xff] %v7140_v48  ;;  %2375 = vrot.lane.b32.xlu0 %v6962_v19, %s9800_s19 }
 0x359   : > { %1534 = vrot.lane.b32.xlu1 %v7147_v29, %s9769_s20  ;;  %v1287_v39 = vsel %vm9818_vm10, %v1285_v34, %v1286_v9  ;;  %s9991_s20 = smov 8  }
 0x35a   : > { %v7153_v44 = vpop.permute.xlu0 %2031 }
 0x35b   : > { %9986 = vst [vmem:[#allocation127_spill] sm:$0xff] %v7153_v44  ;;  %v7155_v51 = vpop.permute.xlu1 %1963  ;;  %v9990_v44 = vrot.slane %v6062_v5, 5 }
 0x35c   : > { %9987 = vst [vmem:[#allocation128_spill] sm:$0xff] %v7155_v51  ;;  %1222 = vrot.lane.b32.xlu0 %v1182_v3, %s9771_s0  ;;  %v1699_v3 = vrot.slane %v6066_v6, 6 }
 0x35d   : > { %2175 = vrot.lane.b32.xlu1 %v6993_v31, %s9807_s29  ;;  %v7171_v51 = vsel %vm9821_vm11, %v9990_v44, %v1595_v25 }
 0x35e   : > { %v7164_v19 = vpop.permute.xlu0 %1422 }
 0x35f   : > { %9988 = vst [vmem:[#allocation129_spill] sm:$0xff] %v7164_v19  ;;  %v7166_v12 = vpop.permute.xlu1 %1317  ;;  %v2225_v19 = vrot.slane %v6050_v2, 5 }
 0x360   : > { %9989 = vst [vmem:[#allocation130_spill] sm:$0xff] %v7166_v12  ;;  %1637 = vrot.lane.b32.xlu0 %v7171_v51, %s9806_s21  ;;  %v7184_v12 = vsel %vm9822_vm7, %v1697_v49, %v1699_v3 }
 0x361   : > { %1327 = vrot.lane.b32.xlu1 %v1287_v39, %s9991_s20  ;;  %v9996_v39 = vrot.slane %v6046_v50, 5 }
 0x362   : > { %v7178_v48 = vpop.permute.xlu0 %1835 }
 0x363   : > { %9992 = vst [vmem:[#allocation131_spill] sm:$0xff] %v7178_v48  ;;  %v7180_v31 = vpop.permute.xlu1 %1833  ;;  %v2226_v48 = vsel %vm9821_vm11, %v9996_v39, %v2225_v19  ;;  %v10000_v19 = vrot.slane %v6046_v50, 6  ;;  %v1391_v39 = vrot.slane %v6092_v21, 3 }
 0x364   : > { %9993 = vst [vmem:[#allocation132_spill] sm:$0xff] %v7180_v31  ;;  %1973 = vrot.lane.b32.xlu0 %v6328_v20, %s9810_s25  ;;  %v2293_v31 = vrot.slane %v6050_v2, 6 }
 0x365   : > { %1741 = vrot.lane.b32.xlu1 %v7184_v12, %s9803_s2 }
 0x366   : > { %v7190_v34 = vpop.permute.xlu0 %2099 }
 0x367   : > { %9994 = vst [vmem:[#allocation133_spill] sm:$0xff] %v7190_v34  ;;  %v7192_v44 = vpop.permute.xlu1 %2097  ;;  %v7208_v34 = vsel %vm9817_vm2, %v1181_v60, %v9999_v55 }
 0x368   : > { %9995 = vst [vmem:[#allocation134_spill] sm:$0xff] %v7192_v44  ;;  %2241 = vrot.lane.b32.xlu0 %v2226_v48, %s9780_s30  ;;  %v9773_v44 = vrot.slane %v6070_v7, 5  ;;  %v2294_v48 = vsel %vm9822_vm7, %v10000_v19, %v2293_v31  ;;  %v1803_v31 = vrot.slane %v6066_v6, 7 }
 0x369   : > { %2041 = vrot.lane.b32.xlu1 %v6343_v18, %s9791_s24  ;;  %v1390_v18 = vrot.slane %v7129_v63, 3 }
 0x36a   : > { %v7201_v49 = vpop.permute.xlu0 %1214  ;;  %v7226_v55 = vsel %vm9821_vm11, %v1595_v25, %v9773_v44 }
 0x36b   : > { %9997 = vst [vmem:[#allocation135_spill] sm:$0xff] %v7201_v49  ;;  %v7203_v20 = vpop.permute.xlu1 %1524  ;;  %v1392_v60 = vsel %vm9819_vm9, %v1390_v18, %v1391_v39 }
 0x36c   : > { %9998 = vst [vmem:[#allocation136_spill] sm:$0xff] %v7203_v20  ;;  %1224 = vrot.lane.b32.xlu0 %v7208_v34, %s9771_s0  ;;  %s10003_s0 = smov 12  }
 0x36d   : > { %2309 = vrot.lane.b32.xlu1 %v2294_v48, %s9777_s1 }
 0x36e   : > { %v7219_v49 = vpop.permute.xlu0 %1629 }
 0x36f   : > { %10001 = vst [vmem:[#allocation137_spill] sm:$0xff] %v7219_v49  ;;  %v7221_v20 = vpop.permute.xlu1 %2165 }
 0x370   : > { %10002 = vst [vmem:[#allocation138_spill] sm:$0xff] %v7221_v20  ;;  %1639 = vrot.lane.b32.xlu0 %v7226_v55, %s9806_s21  ;;  %v10006_v20 = vrot.slane %v6062_v5, 7 }
 0x371   : > { %1432 = vrot.lane.b32.xlu1 %v1392_v60, %s10003_s0  ;;  %v2361_v60 = vrot.slane %v6050_v2, 7 }
 0x372   : > { %v7233_v19 = vpop.permute.xlu0 %1965  ;;  %v7240_v49 = vsel %vm9823_vm6, %v10006_v20, %v1803_v31 }
 0x373   : > { %10004 = vst [vmem:[#allocation139_spill] sm:$0xff] %v7233_v19  ;;  %v7235_v48 = vpop.permute.xlu1 %1526 }
 0x374   : > { %10005 = vst [vmem:[#allocation140_spill] sm:$0xff] %v7235_v48  ;;  %1975 = vrot.lane.b32.xlu0 %v6319_v8, %s9810_s25  ;;  %v10011_v8 = vrot.slane %v6096_v22, 2 }
 0x375   : > { %1845 = vrot.lane.b32.xlu1 %v7240_v49, %s9784_s23 }
 0x376   : > { %v7246_v25 = vpop.permute.xlu0 %2233  ;;  %v7262_v19 = vsel %vm9818_vm10, %v1286_v9, %v10011_v8 }
 0x377   : > { %10007 = vst [vmem:[#allocation141_spill] sm:$0xff] %v7246_v25  ;;  %v7248_v18 = vpop.permute.xlu1 %2167  ;;  %v9776_v25 = vrot.slane %v6070_v7, 6 }
 0x378   : > { %10008 = vst [vmem:[#allocation142_spill] sm:$0xff] %v7248_v18  ;;  %2243 = vrot.lane.b32.xlu0 %v7013_v38, %s9780_s30  ;;  %v10012_v18 = vrot.slane %v6046_v50, 7 }
 0x379   : > { %2109 = vrot.lane.b32.xlu1 %v6358_v42, %s9774_s26  ;;  %v1494_v42 = vrot.slane %v7129_v63, 4  ;;  %v7280_v9 = vsel %vm9822_vm7, %v1699_v3, %v9776_v25  ;;  %s10014_s26 = smov 16  }
 0x37a   : > { %v7255_v20 = vpop.permute.xlu0 %1631  ;;  %v2362_v38 = vsel %vm9823_vm6, %v10012_v18, %v2361_v60 }
 0x37b   : > { %10009 = vst [vmem:[#allocation143_spill] sm:$0xff] %v7255_v20  ;;  %v7257_v44 = vpop.permute.xlu1 %1319  ;;  %v1495_v20 = vrot.slane %v6092_v21, 4 }
 0x37c   : > { %10010 = vst [vmem:[#allocation144_spill] sm:$0xff] %v7257_v44  ;;  %1329 = vrot.lane.b32.xlu0 %v7262_v19, %s9991_s20 }
 0x37d   : > { %2377 = vrot.lane.b32.xlu1 %v2362_v38, %s9800_s19  ;;  %v1496_v18 = vsel %vm9820_vm0, %v1494_v42, %v1495_v20  ;;  %v1599_v38 = vrot.slane %v7129_v63, 5 }
 0x37e   : > { %v7273_v44 = vpop.permute.xlu0 %1967 }
 0x37f   : > { %10013 = vst [vmem:[#allocation145_spill] sm:$0xff] %v7273_v44  ;;  %v7275_v48 = vpop.permute.xlu1 %1733  ;;  %v1600_v44 = vrot.slane %v6092_v21, 5 }
 0x380   : > { %1743 = vrot.lane.b32.xlu0 %v7280_v9, %s9803_s2 }
 0x381   : > { %1536 = vrot.lane.b32.xlu1 %v1496_v18, %s10014_s26  ;;  %v1601_v18 = vsel %vm9821_vm11, %v1599_v38, %v1600_v44 }
 0x382   : > { %v7286_v60 = vpop.permute.xlu0 %2235 }
 0x383   : > { %10015 = vst [vmem:[#allocation146_spill] sm:$0xff] %v7286_v60  ;;  %v7288_v8 = vpop.permute.xlu1 %2033  ;;  %v10020_v60 = vrot.slane %v6096_v22, 3 }
 0x384   : > { %10016 = vst [vmem:[#allocation147_spill] sm:$0xff] %v7288_v8  ;;  %2043 = vrot.lane.b32.xlu0 %v6334_v53, %s9791_s24 }
 0x385   : > { %2177 = vrot.lane.b32.xlu1 %v7024_v17, %s9807_s29  ;;  %v7311_v8 = vsel %vm9819_vm9, %v1391_v39, %v10020_v60  ;;  %v9779_v17 = vrot.slane %v6070_v7, 7  ;;  %v1602_v39 = vrot.slane %v6096_v22, 5 }
 0x386   : > { %v7296_v3 = vpop.permute.xlu0 %1424 }
 0x387   : > { %10017 = vst [vmem:[#allocation148_spill] sm:$0xff] %v7296_v3  ;;  %v7298_v42 = vpop.permute.xlu1 %2301 }
 0x388   : > { %10018 = vst [vmem:[#allocation149_spill] sm:$0xff] %v7298_v42  ;;  %2311 = vrot.lane.b32.xlu0 %v7045_v24, %s9777_s1  ;;  %s10025_s1 = smov 44   ;;  %v10191_v42 = vld [vmem:[#allocation58_spill] sm:$0xff] }
 0x389   : > { %1641 = vrot.lane.b32.xlu1 %v1601_v18, %s9806_s21  ;;  %v7325_v18 = vsel %vm9823_vm6, %v1803_v31, %v9779_v17 }
 0x38a   : > { %v7304_v25 = vpop.permute.xlu0 %1837 }
 0x38b   : > { %v7306_v53 = vpop.permute.xlu1 %1735 }
 0x38c   : > { %10019 = vst [vmem:[#allocation150_spill] sm:$0xff] %v7306_v53  ;;  %1434 = vrot.lane.b32.xlu0 %v7311_v8, %s10003_s0 }
 0x38d   : > { %1977 = vrot.lane.b32.xlu1 %v6370_v40, %s9810_s25 }
 0x38e   : > { %v7318_v24 = vpop.permute.xlu0 %2101 }
 0x38f   : > { %10021 = vst [vmem:[#allocation151_spill] sm:$0xff] %v7318_v24  ;;  %v7320_v38 = vpop.permute.xlu1 %2035  ;;  %v7337_v24 = vsel %vm9821_vm11, %v1600_v44, %v1602_v39 }
 0x390   : > { %10022 = vst [vmem:[#allocation152_spill] sm:$0xff] %v7320_v38  ;;  %1847 = vrot.lane.b32.xlu0 %v7325_v18, %s9784_s23  ;;  %v1497_v38 = vrot.slane %v6096_v22, 4 }
 0x391   : > { %2245 = vrot.lane.b32.xlu1 %v7050_v15, %s9780_s30 }
 0x392   : > { %v7332_v60 = vpop.permute.xlu0 %2369 }
 0x393   : > { %10023 = vst [vmem:[#allocation153_spill] sm:$0xff] %v7332_v60  ;;  %v7334_v40 = vpop.permute.xlu1 %2303 }
 0x394   : > { %10024 = vst [vmem:[#allocation154_spill] sm:$0xff] %v7334_v40  ;;  %2111 = vrot.lane.b32.xlu0 %v6349_v35, %s10025_s1  ;;  %v7357_v35 = vsel %vm9820_vm0, %v1495_v20, %v1497_v38  ;;  %v1704_v40 = vrot.slane %v6092_v21, 6 }
 0x395   : > { %1643 = vrot.lane.b32.xlu1 %v7337_v24, %s9806_s21 }
 0x396   : > { %v7343_v31 = vpop.permute.xlu0 %1839 }
 0x397   : > { %10026 = vst [vmem:[#allocation155_spill] sm:$0xff] %v7343_v31  ;;  %v7345_v17 = vpop.permute.xlu1 %1528 }
 0x398   : > { %10027 = vst [vmem:[#allocation156_spill] sm:$0xff] %v7345_v17  ;;  %2379 = vrot.lane.b32.xlu0 %v7079_v14, %s9800_s19  ;;  %v1706_v17 = vrot.slane %v6096_v22, 6 }
 0x399   : > { %1979 = vrot.lane.b32.xlu1 %v6363_v43, %s9810_s25 }
 0x39a   : > { %v7352_v15 = vpop.permute.xlu0 %2103 }
 0x39b   : > { %10028 = vst [vmem:[#allocation157_spill] sm:$0xff] %v7352_v15  ;;  %v7354_v44 = vpop.permute.xlu1 %2169  ;;  %v1703_v15 = vrot.slane %v7129_v63, 6 }
 0x39c   : > { %10029 = vst [vmem:[#allocation158_spill] sm:$0xff] %v7354_v44  ;;  %1538 = vrot.lane.b32.xlu0 %v7357_v35, %s10014_s26  ;;  %v7371_v44 = vsel %vm9822_vm7, %v1704_v40, %v1706_v17 }
 0x39d   : > { %2247 = vrot.lane.b32.xlu1 %v7171_v51, %s9780_s30  ;;  %v1705_v51 = vsel %vm9822_vm7, %v1703_v15, %v1704_v40  ;;  %s10036_s30 = smov 56   ;;  %v1807_v15 = vrot.slane %v7129_v63, 7  ;;  %v1604_v63 = vrot.slane %v6100_v27, 5 }
 0x39e   : > { %v7365_v14 = vpop.permute.xlu0 %2371 }
 0x39f   : > { %10030 = vst [vmem:[#allocation159_spill] sm:$0xff] %v7365_v14  ;;  %v7367_v43 = vpop.permute.xlu1 %1633 }
 0x3a0   : > { %10031 = vst [vmem:[#allocation160_spill] sm:$0xff] %v7367_v43  ;;  %2179 = vrot.lane.b32.xlu0 %v7116_v56, %s9807_s29  ;;  %v1499_v56 = vrot.slane %v6100_v27, 4 }
 0x3a1   : > { %1747 = vrot.lane.b32.xlu1 %v7371_v44, %s9803_s2 }
 0x3a2   : > { %v7377_v20 = vpop.permute.xlu0 %1530 }
 0x3a3   : > { %10032 = vst [vmem:[#allocation161_spill] sm:$0xff] %v7377_v20  ;;  %v7379_v60 = vpop.permute.xlu1 %1969 }
 0x3a4   : > { %10033 = vst [vmem:[#allocation162_spill] sm:$0xff] %v7379_v60  ;;  %1745 = vrot.lane.b32.xlu0 %v1705_v51, %s9803_s2  ;;  %v7401_v51 = vsel %vm9820_vm0, %v1497_v38, %v1499_v56 }
 0x3a5   : > { %2047 = vrot.lane.b32.xlu1 %v6376_v57, %s9791_s24  ;;  %v1808_v57 = vrot.slane %v6092_v21, 7 }
 0x3a6   : > { %v7385_v14 = vpop.permute.xlu0 %2171 }
 0x3a7   : > { %10034 = vst [vmem:[#allocation163_spill] sm:$0xff] %v7385_v14  ;;  %v7387_v43 = vpop.permute.xlu1 %2237  ;;  %v1809_v14 = vsel %vm9823_vm6, %v1807_v15, %v1808_v57  ;;  %v669_v15 = vld [vmem:[%s5823_s22 + $0xc0] sm:$0xff]  ;;  %s10048_s22 = smov 52  }
 0x3a8   : > { %10035 = vst [vmem:[#allocation164_spill] sm:$0xff] %v7387_v43  ;;  %2045 = vrot.lane.b32.xlu0 %v6383_v1, %s9791_s24 }
 0x3a9   : > { %2315 = vrot.lane.b32.xlu1 %v7184_v12, %s10036_s30 }
 0x3aa   : > { %v7394_v60 = vpop.permute.xlu0 %1737 }
 0x3ab   : > { %10037 = vst [vmem:[#allocation165_spill] sm:$0xff] %v7394_v60  ;;  %v7396_v40 = vpop.permute.xlu1 %1635  ;;  %v2974_v60 = vld [vmem:[%s9679_s6 + $0x30] sm:$0xff] }
 0x3ac   : > { %10038 = vst [vmem:[#allocation166_spill] sm:$0xff] %v7396_v40  ;;  %2313 = vrot.lane.b32.xlu0 %v7082_v26, %s10036_s30  ;;  %v7421_v26 = vsel %vm9821_vm11, %v1602_v39, %v1604_v63 }
 0x3ad   : > { %1540 = vrot.lane.b32.xlu1 %v7401_v51, %s10014_s26 }
 0x3ae   : > { %v7407_v1 = vpop.permute.xlu0 %2037 }
 0x3af   : > { %10039 = vst [vmem:[#allocation167_spill] sm:$0xff] %v7407_v1  ;;  %v7409_v12 = vpop.permute.xlu1 %1971  ;;  %v10093_v1 = vld [vmem:[#allocation18_spill] sm:$0xff] }
 0x3b0   : > { %10040 = vst [vmem:[#allocation168_spill] sm:$0xff] %v7409_v12  ;;  %1849 = vrot.lane.b32.xlu0 %v1809_v14, %s9784_s23 }
 0x3b1   : > { %2181 = vrot.lane.b32.xlu1 %v7147_v29, %s9807_s29  ;;  %v9786_v29 = vrot.slane %v6096_v22, 7 }
 0x3b2   : > { %v7416_v38 = vpop.permute.xlu0 %2305 }
 0x3b3   : > { %10041 = vst [vmem:[#allocation169_spill] sm:$0xff] %v7416_v38  ;;  %v7418_v21 = vpop.permute.xlu1 %2239  ;;  %v7436_v38 = vmul.f32 %v6021_v54, %v669_v15  ;;  %v9787_v54 = vrot.slane %v6130_v61, 1 }
 0x3b4   : > { %10042 = vst [vmem:[#allocation170_spill] sm:$0xff] %v7418_v21  ;;  %2113 = vrot.lane.b32.xlu0 %v6396_v13, %s10025_s1  ;;  %v7447_v21 = vsel %vm9823_vm6, %v1808_v57, %v9786_v29  ;;  %v1708_v57 = vrot.slane %v6100_v27, 6 }
 0x3b5   : > { %1645 = vrot.lane.b32.xlu1 %v7421_v26, %s9806_s21  ;;  %10045 = vst [vmem:[#allocation173_spill] sm:$0xff] %v7436_v38 }
 0x3b6   : > { %v7428_v14 = vpop.permute.xlu0 %1841 }
 0x3b7   : > { %10043 = vst [vmem:[#allocation171_spill] sm:$0xff] %v7428_v14  ;;  %v7430_v12 = vpop.permute.xlu1 %1739 }
 0x3b8   : > { %10044 = vst [vmem:[#allocation172_spill] sm:$0xff] %v7430_v12  ;;  %2381 = vrot.lane.b32.xlu0 %v7113_v62, %s9800_s19  ;;  %v1191_v62 = vrot.slane %v7436_v38, 1 }
 0x3b9   : > { %1981 = vrot.lane.b32.xlu1 %v7208_v34, %s9810_s25 }
 0x3ba   : > { %v7440_v13 = vpop.permute.xlu0 %2105 }
 0x3bb   : > { %10046 = vst [vmem:[#allocation174_spill] sm:$0xff] %v7440_v13  ;;  %v7442_v39 = vpop.permute.xlu1 %2039  ;;  %v1193_v13 = vsel %vm9817_vm2, %v1191_v62, %v9787_v54  ;;  %v2159_v54 = vrot.slane %v6074_v16, 4 }
 0x3bc   : > { %10047 = vst [vmem:[#allocation175_spill] sm:$0xff] %v7442_v39  ;;  %1851 = vrot.lane.b32.xlu0 %v7447_v21, %s9784_s23  ;;  %s10051_s23 = smov 4  }
 0x3bd   : > { %2249 = vrot.lane.b32.xlu1 %v7226_v55, %s10048_s22  ;;  %v9788_v55 = vrot.slane %v6104_v28, 4 }
 0x3be   : > { %v7455_v34 = vpop.permute.xlu0 %2373 }
 0x3bf   : > { %10049 = vst [vmem:[#allocation176_spill] sm:$0xff] %v7455_v34  ;;  %v7457_v15 = vpop.permute.xlu1 %2307  ;;  %v7472_v34 = vsel %vm9822_vm7, %v1706_v17, %v1708_v57 }
 0x3c0   : > { %10050 = vst [vmem:[#allocation177_spill] sm:$0xff] %v7457_v15  ;;  %2115 = vrot.lane.b32.xlu0 %v6389_v37, %s10025_s1  ;;  %v10068_v15 = vrot.slane %v6070_v7, 6 }
 0x3c1   : > { %1232 = vrot.lane.b32.xlu1 %v1193_v13, %s10051_s23  ;;  %v7485_v13 = vsel %vm9820_vm0, %v1499_v56, %v9788_v55  ;;  %v9790_v56 = vrot.slane %v6104_v28, 6 }
 0x3c2   : > { %v7466_v29 = vpop.permute.xlu0 %1843 }
 0x3c3   : > { %10052 = vst [vmem:[#allocation178_spill] sm:$0xff] %v7466_v29  ;;  %v7468_v39 = vpop.permute.xlu1 %1532 }
 0x3c4   : > { %10053 = vst [vmem:[#allocation179_spill] sm:$0xff] %v7468_v39  ;;  %2383 = vrot.lane.b32.xlu0 %v7240_v49, %s9800_s19  ;;  %v9789_v39 = vrot.slane %v6104_v28, 5 }
 0x3c5   : > { %1749 = vrot.lane.b32.xlu1 %v7472_v34, %s9803_s2 }
 0x3c6   : > { %v7478_v37 = vpop.permute.xlu0 %2107 }
 0x3c7   : > { %10054 = vst [vmem:[#allocation180_spill] sm:$0xff] %v7478_v37  ;;  %v7480_v62 = vpop.permute.xlu1 %2173  ;;  %v10058_v37 = vrot.slane %v6070_v7, 4 }
 0x3c8   : > { %10055 = vst [vmem:[#allocation181_spill] sm:$0xff] %v7480_v62  ;;  %1542 = vrot.lane.b32.xlu0 %v7485_v13, %s10014_s26 }
 0x3c9   : > { %2049 = vrot.lane.b32.xlu1 %v7262_v19, %s9791_s24  ;;  %v2160_v62 = vsel %vm9820_vm0, %v10058_v37, %v2159_v54  ;;  %v7516_v54 = vsel %vm9822_vm7, %v1708_v57, %v9790_v56  ;;  %v10064_v57 = vld [vmem:[#allocation15_spill] sm:$0xff] }
 0x3ca   : > { %v7492_v49 = vpop.permute.xlu0 %2375 }
 0x3cb   : > { %10056 = vst [vmem:[#allocation182_spill] sm:$0xff] %v7492_v49  ;;  %v7494_v17 = vpop.permute.xlu1 %1534  ;;  %v7511_v49 = vsel %vm9821_vm11, %v1604_v63, %v9789_v39  ;;  %v10063_v63 = vld [vmem:[#allocation14_spill] sm:$0xff]  ;;  %v2295_v39 = vrot.slane %v6074_v16, 6 }
 0x3cc   : > { %10057 = vst [vmem:[#allocation183_spill] sm:$0xff] %v7494_v17  ;;  %2183 = vrot.lane.b32.xlu0 %v2160_v62, %s9807_s29  ;;  %v2227_v62 = vrot.slane %v6074_v16, 5 }
 0x3cd   : > { %2317 = vrot.lane.b32.xlu1 %v7280_v9, %s10036_s30 }
 0x3ce   : > { %v7504_v55 = vpop.permute.xlu0 %1222 }
 0x3cf   : > { %10059 = vst [vmem:[#allocation184_spill] sm:$0xff] %v7504_v55  ;;  %v7506_v19 = vpop.permute.xlu1 %2175 }
 0x3d0   : > { %10060 = vst [vmem:[#allocation185_spill] sm:$0xff] %v7506_v19  ;;  %1647 = vrot.lane.b32.xlu0 %v7511_v49, %s9806_s21  ;;  %v10067_v19 = vrot.slane %v6070_v7, 5 }
 0x3d1   : > { %1751 = vrot.lane.b32.xlu1 %v7516_v54, %s9803_s2 }
 0x3d2   : > { %v7522_v9 = vpop.permute.xlu0 %1637  ;;  %v2228_v17 = vsel %vm9821_vm11, %v10067_v19, %v2227_v62  ;;  %v1812_v62 = vrot.slane %v6100_v27, 7 }
 0x3d3   : > { %10061 = vst [vmem:[#allocation186_spill] sm:$0xff] %v7522_v9  ;;  %v7524_v37 = vpop.permute.xlu1 %1327  ;;  %v1297_v9 = vrot.slane %v6130_v61, 2 }
 0x3d4   : > { %10062 = vst [vmem:[#allocation187_spill] sm:$0xff] %v7524_v37  ;;  %1983 = vrot.lane.b32.xlu0 %v10063_v63, %s9810_s25  ;;  %v1296_v37 = vrot.slane %v7436_v38, 2  ;;  %v2296_v63 = vsel %vm9822_vm7, %v10068_v15, %v2295_v39  ;;  %v9793_v15 = vrot.slane %v6104_v28, 7 }
 0x3d5   : > { %2051 = vrot.lane.b32.xlu1 %v10064_v57, %s9791_s24  ;;  %v1401_v57 = vrot.slane %v7436_v38, 3  ;;  %s10074_s24 = smov 28  }
 0x3d6   : > { %v7532_v56 = vpop.permute.xlu0 %1973  ;;  %v1298_v19 = vsel %vm9818_vm10, %v1296_v37, %v1297_v9 }
 0x3d7   : > { %10065 = vst [vmem:[#allocation14_spill] sm:$0xff] %v7532_v56  ;;  %v7534_v55 = vpop.permute.xlu1 %1741  ;;  %v9794_v56 = vrot.slane %v6130_v61, 3 }
 0x3d8   : > { %10066 = vst [vmem:[#allocation15_spill] sm:$0xff] %v7534_v55  ;;  %2251 = vrot.lane.b32.xlu0 %v2228_v17, %s10048_s22 }
 0x3d9   : > { %2319 = vrot.lane.b32.xlu1 %v2296_v63, %s10036_s30  ;;  %v1403_v39 = vsel %vm9819_vm9, %v1401_v57, %v9794_v56  ;;  %v10080_v56 = vld [vmem:[#allocation7_spill] sm:$0xff] }
 0x3da   : > { %v7548_v55 = vpop.permute.xlu0 %2241 }
 0x3db   : > { %10069 = vst [vmem:[#allocation188_spill] sm:$0xff] %v7548_v55  ;;  %v7550_v29 = vpop.permute.xlu1 %2041  ;;  %v7572_v55 = vsel %vm9823_vm6, %v1812_v62, %v9793_v15 }
 0x3dc   : > { %10070 = vst [vmem:[#allocation189_spill] sm:$0xff] %v7550_v29  ;;  %1337 = vrot.lane.b32.xlu0 %v1298_v19, %s9991_s20  ;;  %v10073_v29 = vrot.slane %v6096_v22, 7 }
 0x3dd   : > { %1442 = vrot.lane.b32.xlu1 %v1403_v39, %s10003_s0  ;;  %v10077_v39 = vld [vmem:[#allocation16_spill] sm:$0xff] }
 0x3de   : > { %v7560_v17 = vpop.permute.xlu0 %1224  ;;  %v7567_v37 = vsel %vm9823_vm6, %v10073_v29, %v1812_v62  ;;  %v2363_v29 = vrot.slane %v6074_v16, 7 }
 0x3df   : > { %10071 = vst [vmem:[#allocation190_spill] sm:$0xff] %v7560_v17  ;;  %v7562_v63 = vpop.permute.xlu1 %2309  ;;  %v9795_v17 = vrot.slane %v10080_v56, 4 }
 0x3e0   : > { %10072 = vst [vmem:[#allocation191_spill] sm:$0xff] %v7562_v63  ;;  %1853 = vrot.lane.b32.xlu0 %v7567_v37, %s10074_s24  ;;  %v10081_v63 = vrot.slane %v6070_v7, 7 }
 0x3e1   : > { %1855 = vrot.lane.b32.xlu1 %v7572_v55, %s10074_s24 }
 0x3e2   : > { %v7578_v57 = vpop.permute.xlu0 %1639 }
 0x3e3   : > { %10075 = vst [vmem:[#allocation192_spill] sm:$0xff] %v7578_v57  ;;  %v7580_v19 = vpop.permute.xlu1 %1432  ;;  %v2364_v57 = vsel %vm9823_vm6, %v10081_v63, %v2363_v29  ;;  %v10087_v63 = vrot.slane %v6130_v61, 1 }
 0x3e4   : > { %10076 = vst [vmem:[#allocation193_spill] sm:$0xff] %v7580_v19  ;;  %2117 = vrot.lane.b32.xlu0 %v7311_v8, %s10025_s1 }
 0x3e5   : > { %2119 = vrot.lane.b32.xlu1 %v10077_v39, %s10025_s1  ;;  %v10084_v39 = vrot.slane %v6104_v28, 4 }
 0x3e6   : > { %v7587_v62 = vpop.permute.xlu0 %1975 }
 0x3e7   : > { %10078 = vst [vmem:[#allocation16_spill] sm:$0xff] %v7587_v62  ;;  %v7589_v15 = vpop.permute.xlu1 %1845  ;;  %v7607_v62 = vsel %vm9820_vm0, %v10084_v39, %v9795_v17  ;;  %v1505_v39 = vrot.slane %v7436_v38, 4  ;;  %v1506_v17 = vrot.slane %v6130_v61, 4 }
 0x3e8   : > { %10079 = vst [vmem:[#allocation194_spill] sm:$0xff] %v7589_v15  ;;  %2385 = vrot.lane.b32.xlu0 %v7325_v18, %s9800_s19  ;;  %v10085_v15 = vld [vmem:[#allocation9_spill] sm:$0xff]  ;;  %v9796_v18 = vrot.slane %v10080_v56, 5 }
 0x3e9   : > { %2387 = vrot.lane.b32.xlu1 %v2364_v57, %s9800_s19  ;;  %v10086_v12 = vrot.slane %v10085_v15, 1 }
 0x3ea   : > { %v7598_v8 = vpop.permute.xlu0 %2243 }
 0x3eb   : > { %10082 = vst [vmem:[#allocation7_spill] sm:$0xff] %v7598_v8  ;;  %v7600_v19 = vpop.permute.xlu1 %2109  ;;  %v7614_v29 = vsel %vm9817_vm2, %v10087_v63, %v10086_v12  ;;  %v10090_v12 = vrot.slane %v6104_v28, 5  ;;  %v1507_v8 = vsel %vm9820_vm0, %v1505_v39, %v1506_v17  ;;  %vm9830_vm2 = vcmask 293888  }
 0x3ec   : > { %10083 = vst [vmem:[#allocation195_spill] sm:$0xff] %v7600_v19  ;;  %1544 = vrot.lane.b32.xlu0 %v7607_v62, %s10014_s26 }
 0x3ed   : > { %1234 = vrot.lane.b32.xlu1 %v7614_v29, %s10051_s23  ;;  %v7632_v63 = vsel %vm9821_vm11, %v10090_v12, %v9796_v18  ;;  %v1611_v18 = vrot.slane %v6130_v61, 5  ;;  %s10105_s23 = smov 40  }
 0x3ee   : > { %v7621_v57 = vpop.permute.xlu0 %1329 }
 0x3ef   : > { %10088 = vst [vmem:[#allocation9_spill] sm:$0xff] %v7621_v57  ;;  %v7623_v19 = vpop.permute.xlu1 %2377 }
 0x3f0   : > { %10089 = vst [vmem:[#allocation196_spill] sm:$0xff] %v7623_v19  ;;  %2185 = vrot.lane.b32.xlu0 %v7357_v35, %s9807_s29  ;;  %v1610_v35 = vrot.slane %v7436_v38, 5 }
 0x3f1   : > { %1649 = vrot.lane.b32.xlu1 %v7632_v63, %s9806_s21 }
 0x3f2   : > { %v7638_v57 = vpop.permute.xlu0 %1743 }
 0x3f3   : > { %10091 = vst [vmem:[#allocation197_spill] sm:$0xff] %v7638_v57  ;;  %v7640_v19 = vpop.permute.xlu1 %1536 }
 0x3f4   : > { %10092 = vst [vmem:[#allocation198_spill] sm:$0xff] %v7640_v19  ;;  %1546 = vrot.lane.b32.xlu0 %v1507_v8, %s10014_s26  ;;  %v10098_v19 = vrot.slane %v10085_v15, 2 }
 0x3f5   : > { %1985 = vrot.lane.b32.xlu1 %v10093_v1, %s9810_s25  ;;  %v1612_v1 = vsel %vm9821_vm11, %v1610_v35, %v1611_v18  ;;  %v10101_v35 = vrot.slane %v6104_v28, 6 }
 0x3f6   : > { %v7646_v43 = vpop.permute.xlu0 %2043 }
 0x3f7   : > { %10094 = vst [vmem:[#allocation18_spill] sm:$0xff] %v7646_v43  ;;  %v7648_v12 = vpop.permute.xlu1 %2177  ;;  %v9797_v43 = vrot.slane %v10080_v56, 6 }
 0x3f8   : > { %10095 = vst [vmem:[#allocation199_spill] sm:$0xff] %v7648_v12  ;;  %2187 = vrot.lane.b32.xlu0 %v7401_v51, %s9807_s29  ;;  %v7664_v12 = vsel %vm9818_vm10, %v1297_v9, %v10098_v19  ;;  %v10102_v9 = vld [vmem:[#allocation17_spill] sm:$0xff]  ;;  %vm2617_vm10 = vcmask 326656  }
 0x3f9   : > { %2253 = vrot.lane.b32.xlu1 %v7337_v24, %s10048_s22 }
 0x3fa   : > { %v7656_v39 = vpop.permute.xlu0 %2311 }
 0x3fb   : > { %10096 = vst [vmem:[#allocation200_spill] sm:$0xff] %v7656_v39  ;;  %v7658_v8 = vpop.permute.xlu1 %1641  ;;  %v7679_v39 = vsel %vm9822_vm7, %v10101_v35, %v9797_v43  ;;  %v10109_v43 = vrot.slane %v10085_v15, 3 }
 0x3fc   : > { %10097 = vst [vmem:[#allocation201_spill] sm:$0xff] %v7658_v8  ;;  %1651 = vrot.lane.b32.xlu0 %v1612_v1, %s9806_s21 }
 0x3fd   : > { %1339 = vrot.lane.b32.xlu1 %v7664_v12, %s9991_s20 }
 0x3fe   : > { %v7670_v51 = vpop.permute.xlu0 %1434 }
 0x3ff   : > { %10099 = vst [vmem:[#allocation202_spill] sm:$0xff] %v7670_v51  ;;  %v7672_v24 = vpop.permute.xlu1 %1977 }
 0x400   : > { %10100 = vst [vmem:[#allocation203_spill] sm:$0xff] %v7672_v24  ;;  %1987 = vrot.lane.b32.xlu0 %v10102_v9, %s9810_s25  ;;  %v10106_v24 = vld [vmem:[#allocation20_spill] sm:$0xff]  ;;  %v10110_v9 = vrot.slane %v6130_v61, 3 }
 0x401   : > { %1753 = vrot.lane.b32.xlu1 %v7679_v39, %s9803_s2 }
 0x402   : > { %v7685_v19 = vpop.permute.xlu0 %1847  ;;  %v7702_v51 = vsel %vm9819_vm9, %v10110_v9, %v10109_v43  ;;  %v10113_v43 = vrot.slane %v6104_v28, 7  ;;  %vm2638_vm9 = vcmask 359424  }
 0x403   : > { %10103 = vst [vmem:[#allocation17_spill] sm:$0xff] %v7685_v19  ;;  %v7687_v1 = vpop.permute.xlu1 %2245  ;;  %v9798_v19 = vrot.slane %v10080_v56, 7 }
 0x404   : > { %10104 = vst [vmem:[#allocation204_spill] sm:$0xff] %v7687_v1  ;;  %2255 = vrot.lane.b32.xlu0 %v7421_v26, %s10048_s22  ;;  %v1714_v26 = vrot.slane %v7436_v38, 6 }
 0x405   : > { %2053 = vrot.lane.b32.xlu1 %v10106_v24, %s10105_s23  ;;  %v1715_v24 = vrot.slane %v6130_v61, 6  ;;  %v7720_v9 = vsel %vm9823_vm6, %v10113_v43, %v9798_v19  ;;  %v1819_v19 = vrot.slane %v6130_v61, 7 }
 0x406   : > { %v7693_v8 = vpop.permute.xlu0 %2111 }
 0x407   : > { %10107 = vst [vmem:[#allocation20_spill] sm:$0xff] %v7693_v8  ;;  %v7695_v35 = vpop.permute.xlu1 %1643  ;;  %v1716_v8 = vsel %vm9822_vm7, %v1714_v26, %v1715_v24  ;;  %v1818_v26 = vrot.slane %v7436_v38, 7 }
 0x408   : > { %10108 = vst [vmem:[#allocation205_spill] sm:$0xff] %v7695_v35  ;;  %1444 = vrot.lane.b32.xlu0 %v7702_v51, %s10003_s0 }
 0x409   : > { %2321 = vrot.lane.b32.xlu1 %v7371_v44, %s10036_s30 }
 0x40a   : > { %v7711_v35 = vpop.permute.xlu0 %2379 }
 0x40b   : > { %10111 = vst [vmem:[#allocation206_spill] sm:$0xff] %v7711_v35  ;;  %v7713_v1 = vpop.permute.xlu1 %1979  ;;  %v10117_v35 = vld [vmem:[#allocation23_spill] sm:$0xff] }
 0x40c   : > { %10112 = vst [vmem:[#allocation207_spill] sm:$0xff] %v7713_v1  ;;  %1857 = vrot.lane.b32.xlu0 %v7720_v9, %s10074_s24  ;;  %v10116_v1 = vld [vmem:[#allocation22_spill] sm:$0xff] }
 0x40d   : > { %1755 = vrot.lane.b32.xlu1 %v1716_v8, %s9803_s2  ;;  %v1508_v8 = vrot.slane %v10085_v15, 4 }
 0x40e   : > { %v7726_v57 = vpop.permute.xlu0 %1538 }
 0x40f   : > { %10114 = vst [vmem:[#allocation208_spill] sm:$0xff] %v7726_v57  ;;  %v7728_v44 = vpop.permute.xlu1 %2247 }
 0x410   : > { %10115 = vst [vmem:[#allocation209_spill] sm:$0xff] %v7728_v44  ;;  %2121 = vrot.lane.b32.xlu0 %v10116_v1, %s10025_s1 }
 0x411   : > { %2055 = vrot.lane.b32.xlu1 %v10117_v35, %s10105_s23  ;;  %v1820_v35 = vsel %vm9823_vm6, %v1818_v26, %v1819_v19 }
 0x412   : > { %v7734_v14 = vpop.permute.xlu0 %2179 }
 0x413   : > { %10118 = vst [vmem:[#allocation22_spill] sm:$0xff] %v7734_v14  ;;  %v7736_v43 = vpop.permute.xlu1 %1747 }
 0x414   : > { %10119 = vst [vmem:[#allocation23_spill] sm:$0xff] %v7736_v43  ;;  %2389 = vrot.lane.b32.xlu0 %v7447_v21, %s9800_s19  ;;  %v7751_v43 = vsel %vm9820_vm0, %v1506_v17, %v1508_v8 }
 0x415   : > { %2323 = vrot.lane.b32.xlu1 %v7472_v34, %s10036_s30  ;;  %v10124_v34 = vld [vmem:[#allocation24_spill] sm:$0xff] }
 0x416   : > { %v7745_v1 = vpop.permute.xlu0 %1745 }
 0x417   : > { %10120 = vst [vmem:[#allocation210_spill] sm:$0xff] %v7745_v1  ;;  %v7747_v44 = vpop.permute.xlu1 %2047  ;;  %v1613_v1 = vrot.slane %v10085_v15, 5 }
 0x418   : > { %10121 = vst [vmem:[#allocation211_spill] sm:$0xff] %v7747_v44  ;;  %1859 = vrot.lane.b32.xlu0 %v1820_v35, %s10074_s24  ;;  %v10127_v35 = vld [vmem:[#allocation10_spill] sm:$0xff] }
 0x419   : > { %1548 = vrot.lane.b32.xlu1 %v7751_v43, %s10014_s26  ;;  %v1510_v44 = vrot.slane %v10127_v35, 4  ;;  %v7771_v14 = vsel %vm9821_vm11, %v1611_v18, %v1613_v1 }
 0x41a   : > { %v7756_v21 = vpop.permute.xlu0 %2045 }
 0x41b   : > { %10122 = vst [vmem:[#allocation212_spill] sm:$0xff] %v7756_v21  ;;  %v7758_v38 = vpop.permute.xlu1 %2315 }
 0x41c   : > { %10123 = vst [vmem:[#allocation213_spill] sm:$0xff] %v7758_v38  ;;  %2123 = vrot.lane.b32.xlu0 %v10124_v34, %s10025_s1 }
 0x41d   : > { %2189 = vrot.lane.b32.xlu1 %v7485_v13, %s9807_s29  ;;  %v7782_v13 = vsel %vm9820_vm0, %v1508_v8, %v1510_v44 }
 0x41e   : > { %v7765_v26 = vpop.permute.xlu0 %2313 }
 0x41f   : > { %10125 = vst [vmem:[#allocation24_spill] sm:$0xff] %v7765_v26  ;;  %v7767_v17 = vpop.permute.xlu1 %1540  ;;  %v10130_v26 = vld [vmem:[#allocation19_spill] sm:$0xff] }
 0x420   : > { %10126 = vst [vmem:[#allocation214_spill] sm:$0xff] %v7767_v17  ;;  %2391 = vrot.lane.b32.xlu0 %v7567_v37, %s9800_s19  ;;  %s10133_s19 = smov 32   ;;  %v1615_v37 = vrot.slane %v10127_v35, 5 }
 0x421   : > { %1653 = vrot.lane.b32.xlu1 %v7771_v14, %s9806_s21 }
 0x422   : > { %v7777_v34 = vpop.permute.xlu0 %1849 }
 0x423   : > { %10128 = vst [vmem:[#allocation10_spill] sm:$0xff] %v7777_v34  ;;  %v7779_v38 = vpop.permute.xlu1 %2181  ;;  %v1717_v34 = vrot.slane %v10085_v15, 6 }
 0x424   : > { %10129 = vst [vmem:[#allocation215_spill] sm:$0xff] %v7779_v38  ;;  %1550 = vrot.lane.b32.xlu0 %v7782_v13, %s10014_s26 }
 0x425   : > { %1989 = vrot.lane.b32.xlu1 %v10130_v26, %s9810_s25  ;;  %v7803_v26 = vsel %vm9821_vm11, %v1613_v1, %v1615_v37 }
 0x426   : > { %v7788_v18 = vpop.permute.xlu0 %2113 }
 0x427   : > { %10131 = vst [vmem:[#allocation19_spill] sm:$0xff] %v7788_v18  ;;  %v7790_v17 = vpop.permute.xlu1 %1645 }
 0x428   : > { %10132 = vst [vmem:[#allocation216_spill] sm:$0xff] %v7790_v17  ;;  %1919 = vrot.lane.b32.xlu0 %v6130_v61, %s10133_s19 }
 0x429   : > { %2257 = vrot.lane.b32.xlu1 %v7511_v49, %s10048_s22  ;;  %v7814_v49 = vsel %vm9822_vm7, %v1715_v24, %v1717_v34 }
 0x42a   : > { %v7797_v8 = vpop.permute.xlu0 %2381 }
 0x42b   : > { %10134 = vst [vmem:[#allocation217_spill] sm:$0xff] %v7797_v8  ;;  %v7799_v38 = vpop.permute.xlu1 %1981  ;;  %v9802_v8 = vrot.slane %v10127_v35, 6 }
 0x42c   : > { %10135 = vst [vmem:[#allocation218_spill] sm:$0xff] %v7799_v38  ;;  %2191 = vrot.lane.b32.xlu0 %v7607_v62, %s9807_s29  ;;  %v10140_v62 = vld [vmem:[#allocation21_spill] sm:$0xff] }
 0x42d   : > { %1655 = vrot.lane.b32.xlu1 %v7803_v26, %s9806_s21 }
 0x42e   : > { %v7809_v17 = vpop.permute.xlu0 %1851 }
 0x42f   : > { %10136 = vst [vmem:[#allocation219_spill] sm:$0xff] %v7809_v17  ;;  %v7811_v18 = vpop.permute.xlu1 %2249  ;;  %v1821_v17 = vrot.slane %v10085_v15, 7 }
 0x430   : > { %10137 = vst [vmem:[#allocation220_spill] sm:$0xff] %v7811_v18  ;;  %1757 = vrot.lane.b32.xlu0 %v7814_v49, %s9803_s2 }
 0x431   : > { %1991 = vrot.lane.b32.xlu1 %v7614_v29, %s9810_s25  ;;  %v7837_v29 = vsel %vm9822_vm7, %v1717_v34, %v9802_v8 }
 0x432   : > { %v7820_v1 = vpop.permute.xlu0 %2115 }
 0x433   : > { %10138 = vst [vmem:[#allocation221_spill] sm:$0xff] %v7820_v1  ;;  %v7822_v38 = vpop.permute.xlu1 %1232  ;;  %v9805_v1 = vrot.slane %v10127_v35, 7 }
 0x434   : > { %10139 = vst [vmem:[#allocation222_spill] sm:$0xff] %v7822_v38  ;;  %2057 = vrot.lane.b32.xlu0 %v10140_v62, %s10105_s23  ;;  %v7848_v38 = vsel %vm9823_vm6, %v1819_v19, %v1821_v17 }
 0x435   : > { %2259 = vrot.lane.b32.xlu1 %v7632_v63, %s10048_s22 }
 0x436   : > { %v7829_v24 = vpop.permute.xlu0 %2383 }
 0x437   : > { %10141 = vst [vmem:[#allocation21_spill] sm:$0xff] %v7829_v24  ;;  %v7831_v18 = vpop.permute.xlu1 %1749  ;;  %v10148_v24 = vld [vmem:[#allocation11_spill] sm:$0xff] }
 0x438   : > { %10142 = vst [vmem:[#allocation223_spill] sm:$0xff] %v7831_v18  ;;  %2325 = vrot.lane.b32.xlu0 %v7516_v54, %s10036_s30  ;;  %v10147_v54 = vld [vmem:[#allocation27_spill] sm:$0xff]  ;;  %v1512_v18 = vrot.slane %v10148_v24, 4  ;;  %v1825_v40 = vrot.slane %v10148_v24, 7 }
 0x439   : > { %1759 = vrot.lane.b32.xlu1 %v7837_v29, %s9803_s2  ;;  %s10151_s2 = smov 60  }
 0x43a   : > { %v7843_v62 = vpop.permute.xlu0 %1542 }
 0x43b   : > { %10143 = vst [vmem:[#allocation224_spill] sm:$0xff] %v7843_v62  ;;  %v7845_v63 = vpop.permute.xlu1 %2049  ;;  %v10160_v62 = vld [vmem:[#allocation12_spill] sm:$0xff] }
 0x43c   : > { %10144 = vst [vmem:[#allocation225_spill] sm:$0xff] %v7845_v63  ;;  %1861 = vrot.lane.b32.xlu0 %v7848_v38, %s10074_s24  ;;  %v9809_v21 = vrot.slane %v10160_v62, 4  ;;  %v10180_v20 = vrot.slane %v10160_v62, 6 }
 0x43d   : > { %2059 = vrot.lane.b32.xlu1 %v7664_v12, %s10105_s23  ;;  %v7869_v12 = vsel %vm9820_vm0, %v1510_v44, %v1512_v18  ;;  %v10154_v44 = vld [vmem:[#allocation8_spill] sm:$0xff] }
 0x43e   : > { %v7854_v34 = vpop.permute.xlu0 %2183  ;;  %v2297_v57 = vrot.slane %v10154_v44, 6 }
 0x43f   : > { %10145 = vst [vmem:[#allocation226_spill] sm:$0xff] %v7854_v34  ;;  %v7856_v8 = vpop.permute.xlu1 %2317 }
 0x440   : > { %10146 = vst [vmem:[#allocation227_spill] sm:$0xff] %v7856_v8  ;;  %2125 = vrot.lane.b32.xlu0 %v10147_v54, %s10025_s1 }
 0x441   : > { %2327 = vrot.lane.b32.xlu1 %v7679_v39, %s10036_s30  ;;  %v7882_v39 = vsel %vm9823_vm6, %v1821_v17, %v9805_v1  ;;  %v1617_v17 = vrot.slane %v10148_v24, 5 }
 0x442   : > { %v7863_v19 = vpop.permute.xlu0 %1647 }
 0x443   : > { %10149 = vst [vmem:[#allocation27_spill] sm:$0xff] %v7863_v19  ;;  %v7865_v63 = vpop.permute.xlu1 %1751 }
 0x444   : > { %10150 = vst [vmem:[#allocation11_spill] sm:$0xff] %v7865_v63  ;;  %2393 = vrot.lane.b32.xlu0 %v7572_v55, %s10151_s2  ;;  %v2161_v63 = vrot.slane %v10154_v44, 4 }
 0x445   : > { %1552 = vrot.lane.b32.xlu1 %v7869_v12, %s10014_s26 }
 0x446   : > { %v7875_v54 = vpop.permute.xlu0 %1983 }
 0x447   : > { %10152 = vst [vmem:[#allocation228_spill] sm:$0xff] %v7875_v54  ;;  %v7877_v8 = vpop.permute.xlu1 %2051  ;;  %v10157_v54 = vrot.slane %v10080_v56, 4 }
 0x448   : > { %10153 = vst [vmem:[#allocation229_spill] sm:$0xff] %v7877_v8  ;;  %1863 = vrot.lane.b32.xlu0 %v7882_v39, %s10074_s24 }
 0x449   : > { %1921 = vrot.lane.b32.xlu1 %v10085_v15, %s10133_s19  ;;  %v2162_v8 = vsel %vm9820_vm0, %v10157_v54, %v2161_v63  ;;  %v10163_v54 = vld [vmem:[#allocation31_spill] sm:$0xff] }
 0x44a   : > { %v7889_v55 = vpop.permute.xlu0 %2251 }
 0x44b   : > { %10155 = vst [vmem:[#allocation8_spill] sm:$0xff] %v7889_v55  ;;  %v7891_v34 = vpop.permute.xlu1 %2319  ;;  %v7906_v55 = vsel %vm9821_vm11, %v1615_v37, %v1617_v17  ;;  %v2229_v37 = vrot.slane %v10154_v44, 5 }
 0x44c   : > { %10156 = vst [vmem:[#allocation230_spill] sm:$0xff] %v7891_v34  ;;  %2127 = vrot.lane.b32.xlu0 %v7702_v51, %s10025_s1 }
 0x44d   : > { %2193 = vrot.lane.b32.xlu1 %v2162_v8, %s9807_s29  ;;  %v7919_v8 = vsel %vm9820_vm0, %v1512_v18, %v9809_v21  ;;  %v9813_v18 = vrot.slane %v10160_v62, 5  ;;  %v2968_v21 = vld [vmem:[%s9679_s6] sm:$0xff] }
 0x44e   : > { %v7900_v1 = vpop.permute.xlu0 %1337 }
 0x44f   : > { %10158 = vst [vmem:[#allocation231_spill] sm:$0xff] %v7900_v1  ;;  %v7902_v19 = vpop.permute.xlu1 %1442  ;;  %v10166_v1 = vrot.slane %v10080_v56, 5 }
 0x450   : > { %10159 = vst [vmem:[#allocation232_spill] sm:$0xff] %v7902_v19  ;;  %2395 = vrot.lane.b32.xlu0 %v7720_v9, %s10151_s2 }
 0x451   : > { %1657 = vrot.lane.b32.xlu1 %v7906_v55, %s9806_s21  ;;  %v2230_v34 = vsel %vm9821_vm11, %v10166_v1, %v2229_v37  ;;  %v1721_v1 = vrot.slane %v10148_v24, 6  ;;  %v7951_v37 = vsel %vm9821_vm11, %v1617_v17, %v9813_v18  ;;  %s10169_s21 = smov 48   ;;  %v10171_v18 = vrot.slane %v10127_v35, 6 }
 0x452   : > { %v7912_v51 = vpop.permute.xlu0 %1853 }
 0x453   : > { %10161 = vst [vmem:[#allocation12_spill] sm:$0xff] %v7912_v51  ;;  %v7914_v63 = vpop.permute.xlu1 %1855  ;;  %v8009_v3 = vsel %vm9822_vm7, %v1721_v1, %v10180_v20  ;;  %v10183_v20 = vrot.slane %v10127_v35, 7 }
 0x454   : > { %10162 = vst [vmem:[#allocation233_spill] sm:$0xff] %v7914_v63  ;;  %1554 = vrot.lane.b32.xlu0 %v7919_v8, %s10014_s26 }
 0x455   : > { %1993 = vrot.lane.b32.xlu1 %v10163_v54, %s9810_s25  ;;  %v2969_v54 = vld [vmem:[%s9679_s6 + $0x8] sm:$0xff]  ;;  %s5701_s25 = smov 64  }
 0x456   : > { %v7926_v9 = vpop.permute.xlu0 %2117 }
 0x457   : > { %10164 = vst [vmem:[#allocation31_spill] sm:$0xff] %v7926_v9  ;;  %v7928_v19 = vpop.permute.xlu1 %2119 }
 0x458   : > { %10165 = vst [vmem:[#allocation234_spill] sm:$0xff] %v7928_v19  ;;  %1923 = vrot.lane.b32.xlu0 %v10127_v35, %s10133_s19  ;;  %v5506_v19 = vpack.c.bf16 %v2969_v54, %v2968_v21  ;;  %v2970_v21 = vld [vmem:[%s9679_s6 + $0x10] sm:$0xff] }
 0x459   : > { %2261 = vrot.lane.b32.xlu1 %v2230_v34, %s10048_s22  ;;  %v2971_v34 = vld [vmem:[%s9679_s6 + $0x18] sm:$0xff] }
 0x45a   : > { %v7943_v9 = vpop.permute.xlu0 %2385  ;;  %5507 = vmatprep.subr.bf16.mxu0 %v5506_v19  ;;  %v5510_v54 = vpack.c.bf16 %v2971_v34, %v2970_v21  ;;  %v2973_v21 = vld [vmem:[%s9679_s6 + $0x28] sm:$0xff]  ;;  %v10174_v34 = vld [vmem:[#allocation30_spill] sm:$0xff] }
 0x45b   : > { %10167 = vst [vmem:[#allocation235_spill] sm:$0xff] %v7943_v9  ;;  %v7945_v63 = vpop.permute.xlu1 %2387  ;;  %5509 = vmatpush3.bf16.msra.mxu0 %v5506_v19  ;;  %v2972_v19 = vld [vmem:[%s9679_s6 + $0x20] sm:$0xff] }
 0x45c   : > { %10168 = vst [vmem:[#allocation236_spill] sm:$0xff] %v7945_v63  ;;  %2195 = vrot.lane.b32.xlu0 %v7751_v43, %s10169_s21  ;;  %v7970_v43 = vsel %vm9822_vm7, %v10171_v18, %v1721_v1  ;;  %5511 = vmatprep.subr.bf16.mxu0 %v5510_v54  ;;  %v5514_v9 = vpack.c.bf16 %v2973_v21, %v2972_v19  ;;  %v2975_v19 = vld [vmem:[%s9679_s6 + $0x38] sm:$0xff] }
 0x45d   : > { %1659 = vrot.lane.b32.xlu1 %v7951_v37, %s10170_s27  ;;  %v5518_v21 = vpack.c.bf16 %v2975_v19, %v2974_v60  ;;  %v2976_v60 = vld [vmem:[%s9679_s6 + $0x40] sm:$0xff]  ;;  %v8027_v1 = vsel %vm9823_vm6, %v10183_v20, %v1825_v40  ;;  %v9814_v20 = vrot.slane %v10160_v62, 7  ;;  %s10527_s27 = sld [smem:[#allocation241_spill]] }
 0x45e   : > { %v7963_v63 = vpop.permute.xlu0 %1544 }
 0x45f   : > { %v7965_v17 = vpop.permute.xlu1 %1234  ;;  %5513 = vmatpush3.bf16.msra.mxu0 %v5510_v54  ;;  %v10176_v54 = vld [vmem:[#allocation35_spill] sm:$0xff] }
 0x460   : > { %1761 = vrot.lane.b32.xlu0 %v7970_v43, %s10172_s3  ;;  %5515 = vmatprep.subr.bf16.mxu0 %v5514_v9 }
 0x461   : > { %1995 = vrot.lane.b32.xlu1 %v10174_v34, %s10173_s18 }
 0x462   : > { %v7982_v51 = vpop.permute.xlu0 %2185 }
 0x463   : > { %10175 = vst [vmem:[#allocation30_spill] sm:$0xff] %v7982_v51  ;;  %v7984_v18 = vpop.permute.xlu1 %1649  ;;  %5517 = vmatpush3.bf16.msra.mxu0 %v5514_v9 }
 0x464   : > { %2061 = vrot.lane.b32.xlu0 %v10176_v54, %s10105_s23  ;;  %v10179_v54 = vrot.slane %v10080_v56, 6  ;;  %5519 = vmatprep.subr.bf16.mxu0 %v5518_v21 }
 0x465   : > { %2263 = vrot.lane.b32.xlu1 %v7771_v14, %s10048_s22  ;;  %v2977_v14 = vld [vmem:[%s9679_s6 + $0x48] sm:$0xff] }
 0x466   : > { %v7998_v34 = vpop.permute.xlu0 %1546  ;;  %v2298_v9 = vsel %vm9822_vm7, %v10179_v54, %v2297_v57  ;;  %v5522_v57 = vpack.c.bf16 %v2977_v14, %v2976_v60  ;;  %v2365_v14 = vrot.slane %v10154_v44, 7 }
 0x467   : > { %10177 = vst [vmem:[#allocation35_spill] sm:$0xff] %v7998_v34  ;;  %v8000_v51 = vpop.permute.xlu1 %1985  ;;  %5521 = vmatpush3.bf16.msra.mxu0 %v5518_v21  ;;  %v10184_v21 = vld [vmem:[#allocation34_spill] sm:$0xff]  ;;  %v10186_v34 = vld [vmem:[#allocation39_spill] sm:$0xff] }
 0x468   : > { %10178 = vst [vmem:[#allocation237_spill] sm:$0xff] %v8000_v51  ;;  %2329 = vrot.lane.b32.xlu0 %v2298_v9, %s10036_s30  ;;  %5523 = vmatprep.subr.bf16.mxu0 %v5522_v57 }
 0x469   : > { %1763 = vrot.lane.b32.xlu1 %v8009_v3, %s10172_s3 }
 0x46a   : > { %v8020_v19 = vpop.permute.xlu0 %2187 }
 0x46b   : > { %10181 = vst [vmem:[#allocation238_spill] sm:$0xff] %v8020_v19  ;;  %v8022_v54 = vpop.permute.xlu1 %2253  ;;  %5525 = vmatpush3.bf16.msra.mxu0 %v5522_v57 }
 0x46c   : > { %10182 = vst [vmem:[#allocation239_spill] sm:$0xff] %v8022_v54  ;;  %1865 = vrot.lane.b32.xlu0 %v8027_v1, %s10074_s24  ;;  %v10189_v54 = vld [vmem:[#allocation49_spill] sm:$0xff] }
 0x46d   : > { %2063 = vrot.lane.b32.xlu1 %v10184_v21, %s10105_s23  ;;  %v10188_v21 = vrot.slane %v10080_v56, 7  ;;  %v2431_v51 = vsel %vm702_vm3, %v6034_v58, %v10189_v54 }
 0x46e   : > { %v8033_v9 = vpop.permute.xlu0 %1651  ;;  %v2452_v31 = vsel %vm9828_vm12, %v2431_v51, %v10191_v42  ;;  %v10197_v42 = vld [vmem:[#allocation71_spill] sm:$0xff] }
 0x46f   : > { %10185 = vst [vmem:[#allocation34_spill] sm:$0xff] %v8033_v9  ;;  %v8035_v60 = vpop.permute.xlu1 %1339  ;;  %v2366_v9 = vsel %vm9823_vm6, %v10188_v21, %v2365_v14  ;;  %v10192_v14 = vld [vmem:[#allocation60_spill] sm:$0xff]  ;;  %v2436_v51 = vsel %vm702_vm3, %v6058_v4, %v10197_v42  ;;  %v10204_v42 = vld [vmem:[#allocation66_spill] sm:$0xff] }
 0x470   : > { %2129 = vrot.lane.b32.xlu0 %v10186_v34, %s10025_s1  ;;  %v8056_v34 = vsel %vm9823_vm6, %v1825_v40, %v9814_v20  ;;  %v10194_v40 = vld [vmem:[#allocation62_spill] sm:$0xff]  ;;  %v10196_v20 = vld [vmem:[#allocation55_spill] sm:$0xff] }
 0x471   : > { %2331 = vrot.lane.b32.xlu1 %v7814_v49, %s10036_s30  ;;  %v10190_v49 = vld [vmem:[#allocation53_spill] sm:$0xff] }
 0x472   : > { %v8043_v19 = vpop.permute.xlu0 %1987 }
 0x473   : > { %10187 = vst [vmem:[#allocation39_spill] sm:$0xff] %v8043_v19  ;;  %v8045_v57 = vpop.permute.xlu1 %1753  ;;  %v2432_v19 = vsel %vm702_vm3, %v6038_v0, %v10190_v49  ;;  %v8078_v0 = vsel %vm9826_vm13, %v2452_v31, %v10196_v20  ;;  %v10200_v20 = vld [vmem:[#allocation64_spill] sm:$0xff] }
 0x474   : > { %2397 = vrot.lane.b32.xlu0 %v2366_v9, %s10151_s2  ;;  %v2453_v58 = vsel %vm9828_vm12, %v2432_v19, %v10192_v14  ;;  %v10198_v19 = vld [vmem:[#allocation57_spill] sm:$0xff] }
 0x475   : > { %1867 = vrot.lane.b32.xlu1 %v8056_v34, %s10074_s24  ;;  %v8072_v21 = vsel %vm9826_vm13, %v2453_v58, %v10194_v40  ;;  %v2433_v49 = vsel %vm702_vm3, %v6042_v10, %v10198_v19  ;;  %v10199_v14 = vld [vmem:[#allocation73_spill] sm:$0xff]  ;;  %v10206_v19 = vld [vmem:[#allocation59_spill] sm:$0xff]  ;;  %s9837_s24 = sshll.u32 %s10627_s28, 4 }
 0x476   : > { %v8068_v54 = vpop.permute.xlu0 %2255  ;;  %v2457_v58 = vsel %vm9828_vm12, %v2436_v51, %v10199_v14  ;;  %v2454_v40 = vsel %vm9828_vm12, %v2433_v49, %v10200_v20  ;;  %v10205_v10 = vld [vmem:[#allocation77_spill] sm:$0xff]  ;;  %v10207_v49 = vld [vmem:[#allocation79_spill] sm:$0xff]  ;;  %s9372_s14 = scalar_lea.vmem %s9689_s16, %s9837_s24 }
 0x477   : > { %10193 = vst [vmem:[#allocation49_spill] sm:$0xff] %v8068_v54  ;;  %v8074_v9 = vpop.permute.xlu1 %2053  ;;  %v10201_v54 = vld [vmem:[#allocation75_spill] sm:$0xff]  ;;  %v8104_v53 = vsel %vm9826_vm13, %v2454_v40, %v10204_v42  ;;  %v2438_v51 = vsel %vm702_vm3, %v6066_v6, %v10205_v10  ;;  %v10208_v20 = vld [vmem:[#allocation61_spill] sm:$0xff]  ;;  %v10212_v10 = vld [vmem:[#allocation68_spill] sm:$0xff] }
 0x478   : > { %10195 = vst [vmem:[#allocation53_spill] sm:$0xff] %v8074_v9  ;;  %2889 = vrot.lane.b32.xlu0 %v8072_v21, %s5701_s25  ;;  %v8098_v9 = vsel %vm9826_vm13, %v2457_v58, %v10201_v54  ;;  %v2843_v54 = vsel %vm702_vm3, %v6046_v50, %v10206_v19  ;;  %v2459_v14 = vsel %vm9828_vm12, %v2438_v51, %v10207_v49  ;;  %v10209_v42 = vld [vmem:[#allocation81_spill] sm:$0xff]  ;;  %v10213_v50 = vld [vmem:[#allocation76_spill] sm:$0xff]  ;;  %v10214_v19 = vld [vmem:[#allocation63_spill] sm:$0xff] }
 0x479   : > { %2887 = vrot.lane.b32.xlu1 %v8078_v0, %s5701_s25  ;;  %10202 = vst [vmem:[#allocation58_spill] sm:$0xff] %v8098_v9  ;;  %v2851_v40 = vsel %vm9828_vm12, %v2843_v54, %v10208_v20  ;;  %v2845_v51 = vsel %vm702_vm3, %v6070_v7, %v10213_v50  ;;  %v2844_v54 = vsel %vm702_vm3, %v6050_v2, %v10214_v19  ;;  %v10215_v49 = vld [vmem:[#allocation78_spill] sm:$0xff]  ;;  %v10218_v7 = vld [vmem:[#allocation67_spill] sm:$0xff] }
 0x47a   : > { %v8092_v31 = vpop.permute.xlu0 %1444  ;;  %v10219_v50 = vld [vmem:[#allocation83_spill] sm:$0xff] }
 0x47b   : > { %v8100_v4 = vpop.permute.xlu1 %2321  ;;  %v2846_v2 = vsel %vm702_vm3, %v6074_v16, %v10219_v50  ;;  %v10224_v16 = vld [vmem:[#allocation74_spill] sm:$0xff] }
 0x47c   : > { %10203 = vst [vmem:[#allocation60_spill] sm:$0xff] %v8100_v4  ;;  %2897 = vrot.lane.b32.xlu0 %v8098_v9, %s5701_s25  ;;  %v8124_v4 = vsel %vm9826_vm13, %v2459_v14, %v10209_v42  ;;  %v2859_v9 = vsel %vm9826_vm13, %v2851_v40, %v10212_v10  ;;  %v2853_v14 = vsel %vm9828_vm12, %v2845_v51, %v10215_v49  ;;  %v10216_v42 = vld [vmem:[#allocation65_spill] sm:$0xff]  ;;  %v10217_v10 = vld [vmem:[#allocation80_spill] sm:$0xff]  ;;  %v10220_v51 = vld [vmem:[#allocation70_spill] sm:$0xff] }
 0x47d   : > { %2891 = vrot.lane.b32.xlu1 %v8104_v53, %s5701_s25  ;;  %10210 = vst [vmem:[#allocation62_spill] sm:$0xff] %v8124_v4  ;;  %v2852_v40 = vsel %vm9828_vm12, %v2844_v54, %v10216_v42  ;;  %v2437_v19 = vsel %vm702_vm3, %v6062_v5, %v10220_v51  ;;  %v10221_v54 = vld [vmem:[#allocation85_spill] sm:$0xff]  ;;  %v10222_v42 = vld [vmem:[#allocation72_spill] sm:$0xff] }
 0x47e   : > { %v8118_v58 = vpop.permute.xlu0 %1857  ;;  %v2854_v49 = vsel %vm9828_vm12, %v2846_v2, %v10221_v54  ;;  %v10225_v5 = vld [vmem:[#allocation89_spill] sm:$0xff]  ;;  %v10226_v2 = vld [vmem:[#allocation82_spill] sm:$0xff] }
 0x47f   : > { %v8126_v6 = vpop.permute.xlu1 %1755  ;;  %v2442_v50 = vsel %vm702_vm3, %v6100_v27, %v10225_v5  ;;  %v2441_v51 = vsel %vm702_vm3, %v6096_v22, %v10226_v2  ;;  %v10231_v22 = vld [vmem:[#allocation90_spill] sm:$0xff] }
 0x480   : > { %10211 = vst [vmem:[#allocation55_spill] sm:$0xff] %v8126_v6  ;;  %2901 = vrot.lane.b32.xlu0 %v8124_v4, %s5701_s25  ;;  %v2861_v6 = vsel %vm9826_vm13, %v2853_v14, %v10217_v10  ;;  %v10223_v10 = vld [vmem:[#allocation87_spill] sm:$0xff]  ;;  %v2847_v5 = vsel %vm702_vm3, %v10080_v56, %v10231_v22 }
 0x481   : > { %2893 = vrot.lane.b32.xlu1 %v2859_v9, %s5701_s25  ;;  %v2860_v9 = vsel %vm9826_vm13, %v2852_v40, %v10218_v7  ;;  %v2458_v40 = vsel %vm9828_vm12, %v2437_v19, %v10222_v42  ;;  %v10227_v19 = vld [vmem:[#allocation91_spill] sm:$0xff]  ;;  %v10229_v42 = vld [vmem:[#allocation84_spill] sm:$0xff]  ;;  %v2855_v2 = vsel %vm9828_vm12, %v2847_v5, %v6880_v23 }
 0x482   : > { %v8141_v20 = vpop.permute.xlu0 %2121  ;;  %v2463_v54 = vsel %vm9828_vm12, %v2442_v50, %v10227_v19  ;;  %v10232_v50 = vld [vmem:[#allocation88_spill] sm:$0xff]  ;;  %v10233_v19 = vld [vmem:[#allocation93_spill] sm:$0xff]  ;;  %v10234_v56 = vld [vmem:[#allocation95_spill] sm:$0xff] }
 0x483   : > { %v8147_v4 = vpop.permute.xlu1 %2055 }
 0x484   : > { %2903 = vrot.lane.b32.xlu0 %v2861_v6, %s5701_s25  ;;  %v2862_v6 = vsel %vm9826_vm13, %v2854_v49, %v10223_v10  ;;  %v8190_v10 = vsel %vm9826_vm13, %v2463_v54, %v6882_v52  ;;  %v2443_v52 = vsel %vm702_vm3, %v6104_v28, %v10232_v50  ;;  %v10236_v50 = vld [vmem:[#allocation92_spill] sm:$0xff] }
 0x485   : > { %2895 = vrot.lane.b32.xlu1 %v2860_v9, %s5701_s25  ;;  %v8171_v9 = vsel %vm9826_vm13, %v2458_v40, %v10224_v16  ;;  %v2462_v40 = vsel %vm9828_vm12, %v2441_v51, %v10229_v42  ;;  %v2464_v54 = vsel %vm9828_vm12, %v2443_v52, %v10233_v19  ;;  %v2863_v42 = vsel %vm9826_vm13, %v2855_v2, %v6914_v33  ;;  %v10235_v33 = vld [vmem:[#allocation38_spill] sm:$0xff] }
 0x486   : > { %v8161_v14 = vpop.permute.xlu0 %2389  ;;  %v2848_v52 = vsel %vm702_vm3, %v10154_v44, %v10236_v50  ;;  %v10237_v2 = vld [vmem:[#allocation94_spill] sm:$0xff] }
 0x487   : > { %v8167_v7 = vpop.permute.xlu1 %2323  ;;  %v2856_v19 = vsel %vm9828_vm12, %v2848_v52, %v10237_v2  ;;  %v10242_v50 = vld [vmem:[#allocation98_spill] sm:$0xff] }
 0x488   : > { %2905 = vrot.lane.b32.xlu0 %v2862_v6, %s5701_s25  ;;  %v10230_v6 = vld [vmem:[#allocation86_spill] sm:$0xff]  ;;  %v2446_v52 = vsel %vm702_vm3, %v10085_v15, %v10242_v50  ;;  %v10247_v50 = vld [vmem:[#allocation48_spill] sm:$0xff] }
 0x489   : > { %2899 = vrot.lane.b32.xlu1 %v8171_v9, %s5701_s25  ;;  %v8196_v16 = vsel %vm9826_vm13, %v2462_v40, %v10230_v6  ;;  %v8220_v6 = vsel %vm9826_vm13, %v2464_v54, %v10234_v56 }
 0x48a   : > { %v8184_v49 = vpop.permute.xlu0 %1859 }
 0x48b   : > { %10228 = vst [vmem:[#allocation71_spill] sm:$0xff] %v8184_v49  ;;  %v8192_v27 = vpop.permute.xlu1 %1548 }
 0x48c   : > { %2909 = vrot.lane.b32.xlu0 %v8190_v10, %s5701_s25 }
 0x48d   : > { %2907 = vrot.lane.b32.xlu1 %v8196_v16, %s5701_s25 }
 0x48e   : > { %v8210_v51 = vpop.permute.xlu0 %2123 }
 0x48f   : > { %v8216_v40 = vpop.permute.xlu1 %2189 }
 0x490   : > { %2913 = vrot.lane.b32.xlu0 %v2863_v42, %s5701_s25  ;;  %v10239_v42 = vld [vmem:[#allocation96_spill] sm:$0xff] }
 0x491   : > { %2911 = vrot.lane.b32.xlu1 %v8220_v6, %s5701_s25  ;;  %v2864_v56 = vsel %vm9826_vm13, %v2856_v19, %v10239_v42  ;;  %v10243_v19 = vld [vmem:[#allocation100_spill] sm:$0xff] }
 0x492   : > { %v8225_v28 = vpop.permute.xlu0 %2391  ;;  %v2467_v42 = vsel %vm9828_vm12, %v2446_v52, %v10243_v19 }
 0x493   : > { %v8227_v23 = vpop.permute.xlu1 %1653 }
 0x494   : > { %1925 = vrot.lane.b32.xlu0 %v10148_v24, %s10133_s19 }
 0x495   : > { %2131 = vrot.lane.b32.xlu1 %v10235_v33, %s10025_s1 }
 0x496   : > { %v8233_v22 = vpop.permute.xlu0 %1550 }
 0x497   : > { %v8235_v5 = vpop.permute.xlu1 %1989 }
 0x498   : > { %2197 = vrot.lane.b32.xlu0 %v7782_v13, %s10169_s21 }
 0x499   : > { %2399 = vrot.lane.b32.xlu1 %v7848_v38, %s10151_s2  ;;  %v10241_v38 = vld [vmem:[#allocation43_spill] sm:$0xff] }
 0x49a   : > { %v8246_v54 = vpop.permute.xlu0 %1919 }
 0x49b   : > { %10238 = vst [vmem:[#allocation57_spill] sm:$0xff] %v8246_v54  ;;  %v8250_v33 = vpop.permute.xlu1 %2257  ;;  %v8274_v54 = vsel %vm9826_vm13, %v2467_v42, %v6955_v47  ;;  %v10250_v42 = vld [vmem:[#allocation46_spill] sm:$0xff] }
 0x49c   : > { %2915 = vrot.lane.b32.xlu0 %v2864_v56, %s5701_s25 }
 0x49d   : > { %1927 = vrot.lane.b32.xlu1 %v10160_v62, %s10133_s19 }
 0x49e   : > { %v8255_v13 = vpop.permute.xlu0 %2191 }
 0x49f   : > { %10240 = vst [vmem:[#allocation73_spill] sm:$0xff] %v8255_v13  ;;  %v8257_v44 = vpop.permute.xlu1 %1655  ;;  %v10258_v13 = vld [vmem:[#allocation101_spill] sm:$0xff] }
 0x4a0   : > { %1997 = vrot.lane.b32.xlu0 %v10241_v38, %s10173_s18  ;;  %v10246_v38 = vld [vmem:[#allocation42_spill] sm:$0xff] }
 0x4a1   : > { %2199 = vrot.lane.b32.xlu1 %v7869_v12, %s10169_s21 }
 0x4a2   : > { %v8266_v2 = vpop.permute.xlu0 %1757 }
 0x4a3   : > { %v8270_v56 = vpop.permute.xlu1 %1991 }
 0x4a4   : > { %10244 = vst [vmem:[#allocation64_spill] sm:$0xff] %v8270_v56  ;;  %2265 = vrot.lane.b32.xlu0 %v7803_v26, %s10048_s22 }
 0x4a5   : > { %2917 = vrot.lane.b32.xlu1 %v8274_v54, %s5701_s25 }
 0x4a6   : > { %v8280_v12 = vpop.permute.xlu0 %2057 }
 0x4a7   : > { %v8282_v15 = vpop.permute.xlu1 %2259 }
 0x4a8   : > { %10245 = vst [vmem:[#allocation75_spill] sm:$0xff] %v8282_v15  ;;  %1999 = vrot.lane.b32.xlu0 %v10246_v38, %s10173_s18  ;;  %v10251_v38 = vld [vmem:[#allocation52_spill] sm:$0xff] }
 0x4a9   : > { %2065 = vrot.lane.b32.xlu1 %v10247_v50, %s10105_s23 }
 0x4aa   : > { %v8288_v52 = vpop.permute.xlu0 %2325 }
 0x4ab   : > { %10248 = vst [vmem:[#allocation66_spill] sm:$0xff] %v8288_v52  ;;  %v8290_v47 = vpop.permute.xlu1 %1759 }
 0x4ac   : > { %2267 = vrot.lane.b32.xlu0 %v7906_v55, %s10048_s22 }
 0x4ad   : > { %2333 = vrot.lane.b32.xlu1 %v7837_v29, %s10036_s30 }
 0x4ae   : > { %v8296_v26 = vpop.permute.xlu0 %1861 }
 0x4af   : > { %v8298_v19 = vpop.permute.xlu1 %2059 }
 0x4b0   : > { %10249 = vst [vmem:[#allocation77_spill] sm:$0xff] %v8298_v19  ;;  %2067 = vrot.lane.b32.xlu0 %v10250_v42, %s10105_s23  ;;  %v10254_v19 = vld [vmem:[#allocation51_spill] sm:$0xff]  ;;  %v10255_v42 = vld [vmem:[#allocation97_spill] sm:$0xff] }
 0x4b1   : > { %2133 = vrot.lane.b32.xlu1 %v10251_v38, %s10025_s1  ;;  %v2447_v38 = vsel %vm702_vm3, %v10127_v35, %v10255_v42 }
 0x4b2   : > { %v2126_v50 = vpop.permute.xlu0 %2125 }
 0x4b3   : > { %v8304_v56 = vpop.permute.xlu1 %2327 }
 0x4b4   : > { %10252 = vst [vmem:[#allocation59_spill] sm:$0xff] %v8304_v56  ;;  %2335 = vrot.lane.b32.xlu0 %v7970_v43, %s10036_s30  ;;  %v10256_v56 = vld [vmem:[#allocation99_spill] sm:$0xff] }
 0x4b5   : > { %2401 = vrot.lane.b32.xlu1 %v7882_v39, %s10151_s2  ;;  %v2468_v43 = vsel %vm9828_vm12, %v2447_v38, %v10256_v56  ;;  %v10257_v39 = vld [vmem:[#allocation13_spill] sm:$0xff] }
 0x4b6   : > { %v8310_v29 = vpop.permute.xlu0 %2393  ;;  %v8328_v52 = vsel %vm9826_vm13, %v2468_v43, %v10258_v13  ;;  %v2231_v42 = vrot.slane %v10257_v39, 5  ;;  %v2448_v13 = vsel %vm702_vm3, %v10148_v24, %v6970_v30  ;;  %v2299_v38 = vrot.slane %v10257_v39, 6 }
 0x4b7   : > { %10253 = vst [vmem:[#allocation79_spill] sm:$0xff] %v8310_v29  ;;  %v8312_v55 = vpop.permute.xlu1 %1552  ;;  %v2163_v29 = vrot.slane %v10257_v39, 4  ;;  %v2367_v30 = vrot.slane %v10257_v39, 7 }
 0x4b8   : > { %2135 = vrot.lane.b32.xlu0 %v10254_v19, %s10025_s1  ;;  %v10259_v19 = vrot.slane %v10160_v62, 4  ;;  %s5253_s1 = sshll.u32 %s10627_s28, 5 }
 0x4b9   : > { %2201 = vrot.lane.b32.xlu1 %v7919_v8, %s10169_s21 }
 0x4ba   : > { %v1864_v49 = vpop.permute.xlu0 %1863  ;;  %v2164_v56 = vsel %vm9820_vm0, %v10259_v19, %v2163_v29  ;;  %v2469_v29 = vsel %vm9828_vm12, %v2448_v13, %v6978_v45  ;;  %vm9827_vm0 = vcmask 392192  }
 0x4bb   : > { %v8323_v15 = vpop.permute.xlu1 %1921  ;;  %v2490_v24 = vsel %vm9826_vm13, %v2469_v29, %v6989_v41  ;;  %v10261_v41 = vrot.slane %v10160_v62, 6 }
 0x4bc   : > { %2403 = vrot.lane.b32.xlu0 %v8027_v1, %s10151_s2  ;;  %v2506_v1 = vsel %vm9833_vm14, %v8220_v6, %v7963_v63  ;;  %v10260_v6 = vrot.slane %v10160_v62, 5 }
 0x4bd   : > { %2919 = vrot.lane.b32.xlu1 %v8328_v52, %s5701_s25  ;;  %v2527_v43 = vsel %vm2512_vm15, %v2506_v1, %v7984_v18  ;;  %v2300_v13 = vsel %vm9822_vm7, %v10261_v41, %v2299_v38  ;;  %vm2701_vm7 = vcmask 457728  }
 0x4be   : > { %v8334_v8 = vpop.permute.xlu0 %2127  ;;  %v2548_v63 = vsel %vm9832_vm4, %v2527_v43, %v8045_v57  ;;  %v2232_v18 = vsel %vm9821_vm11, %v10260_v6, %v2231_v42  ;;  %v10262_v57 = vrot.slane %v10160_v62, 7  ;;  %v2509_v42 = vsel %vm9833_vm14, %v8274_v54, %v8233_v22  ;;  %v10266_v6 = vld [vmem:[#allocation4_spill] sm:$0xff] }
 0x4bf   : > { %v2194_v35 = vpop.permute.xlu1 %2193  ;;  %v2569_v45 = vsel %vm2554_vm5, %v2548_v63, %v8118_v58  ;;  %v10263_v58 = vld [vmem:[#allocation56_spill] sm:$0xff]  ;;  %v2530_v63 = vsel %vm2512_vm15, %v2509_v42, %v8257_v44  ;;  %vm2680_vm11 = vcmask 424960  }
 0x4c0   : > { %2203 = vrot.lane.b32.xlu0 %v2164_v56, %s10169_s21  ;;  %v2368_v1 = vsel %vm9823_vm6, %v10262_v57, %v2367_v30  ;;  %v2590_v29 = vsel %vm9831_vm8, %v2569_v45, %v10263_v58  ;;  %v10264_v30 = vld [vmem:[#allocation102_spill] sm:$0xff]  ;;  %v2551_v54 = vsel %vm9832_vm4, %v2530_v63, %v8290_v47  ;;  %v10267_v58 = vld [vmem:[#allocation103_spill] sm:$0xff]  ;;  %v10271_v63 = vld [vmem:[#allocation108_spill] sm:$0xff]  ;;  %vm9829_vm6 = vcmask 490496  }
 0x4c1   : > { %2269 = vrot.lane.b32.xlu1 %v7951_v37, %s10048_s22  ;;  %v2611_v38 = vsel %vm9830_vm2, %v2590_v29, %v8235_v5  ;;  %v2849_v45 = vsel %vm702_vm3, %v10160_v62, %v10264_v30  ;;  %v10265_v5 = vld [vmem:[#allocation47_spill] sm:$0xff]  ;;  %v2572_v62 = vsel %vm2554_vm5, %v2551_v54, %v1864_v49 }
 0x4c2   : > { %v8354_v19 = vpop.permute.xlu0 %2395  ;;  %v2632_v22 = vsel %vm2617_vm10, %v2611_v38, %v8280_v12  ;;  %v2429_v44 = vsel %vm702_vm3, %v10265_v5, %v6998_v59  ;;  %v2857_v29 = vsel %vm9828_vm12, %v2849_v45, %v10267_v58  ;;  %v10274_v5 = vld [vmem:[#allocation109_spill] sm:$0xff] }
 0x4c3   : > { %v8361_v37 = vpop.permute.xlu1 %1657  ;;  %v2450_v12 = vsel %vm9828_vm12, %v2429_v44, %v7007_v32  ;;  %v10275_v44 = vld [vmem:[#allocation115_spill] sm:$0xff] }
 0x4c4   : > { %2921 = vrot.lane.b32.xlu0 %v2490_v24, %s5701_s25 }
 0x4c5   : > { %2271 = vrot.lane.b32.xlu1 %v2232_v18, %s10048_s22  ;;  %v2653_v18 = vsel %vm2638_vm9, %v2632_v22, %v2126_v50  ;;  %v10268_v50 = vld [vmem:[#allocation111_spill] sm:$0xff]  ;;  %v10273_v22 = vld [vmem:[#allocation106_spill] sm:$0xff]  ;;  %s5255_s22 = sshll.u32 %s10627_s28, 3 }
 0x4c6   : > { %v1555_v56 = vpop.permute.xlu0 %1554 }
 0x4c7   : > { %v8381_v43 = vpop.permute.xlu1 %1993 }
 0x4c8   : > { %2337 = vrot.lane.b32.xlu0 %v8009_v3, %s10036_s30  ;;  %v2430_v3 = vsel %vm702_vm3, %v10266_v6, %v7032_v11  ;;  %v2471_v11 = vsel %vm9826_vm13, %v2450_v12, %v7019_v46  ;;  %v10272_v46 = vld [vmem:[#allocation113_spill] sm:$0xff] }
 0x4c9   : > { %2339 = vrot.lane.b32.xlu1 %v2300_v13, %s10036_s30  ;;  %v2451_v47 = vsel %vm9828_vm12, %v2430_v3, %v7042_v36  ;;  %v2674_v13 = vsel %vm9827_vm0, %v2653_v18, %v2194_v35  ;;  %v10269_v36 = vld [vmem:[#allocation104_spill] sm:$0xff]  ;;  %v10270_v35 = vld [vmem:[#allocation105_spill] sm:$0xff]  ;;  %v2492_v30 = vsel %vm9833_vm14, %v2471_v11, %v10271_v63  ;;  %v10276_v18 = vld [vmem:[#allocation110_spill] sm:$0xff]  ;;  %s5582_s30 = smul.u32 48, %s10627_s28 }
 0x4ca   : > { %v1924_v41 = vpop.permute.xlu0 %1923  ;;  %v2472_v49 = vsel %vm9826_vm13, %v2451_v47, %v10268_v50  ;;  %v2865_v32 = vsel %vm9826_vm13, %v2857_v29, %v10269_v36  ;;  %v2850_v38 = vsel %vm702_vm3, %v10257_v39, %v10270_v35  ;;  %v2445_v39 = vsel %vm702_vm3, %v6130_v61, %v7965_v17  ;;  %v10279_v29 = vld [vmem:[#allocation112_spill] sm:$0xff]  ;;  %v10283_v35 = vld [vmem:[#allocation121_spill] sm:$0xff] }
 0x4cb   : > { %v2262_v57 = vpop.permute.xlu1 %2261  ;;  %v2593_v59 = vsel %vm9831_vm8, %v2572_v62, %v1924_v41  ;;  %v2493_v45 = vsel %vm9833_vm14, %v2472_v49, %v10272_v46  ;;  %v2858_v54 = vsel %vm9828_vm12, %v2850_v38, %v10273_v22  ;;  %v10277_v41 = vld [vmem:[#allocation117_spill] sm:$0xff]  ;;  %v2466_v12 = vsel %vm9828_vm12, %v2445_v39, %v8035_v60  ;;  %v10280_v50 = vld [vmem:[#allocation116_spill] sm:$0xff]  ;;  %v10281_v49 = vld [vmem:[#allocation119_spill] sm:$0xff]  ;;  %s9293_s29 = scalar_lea.vmem %s10527_s27, %s5582_s30  ;;  %s629_s30 = scalar_lea.vmem %s9688_s15, %s5253_s1 }
 0x4cc   : > { %v8418_v42 = vsel %vm2680_vm11, %v2674_v13, %v2262_v57  ;;  %2405 = vrot.lane.b32.xlu0 %v8056_v34, %s10151_s2  ;;  %v2513_v34 = vsel %vm2512_vm15, %v2492_v30, %v10274_v5  ;;  %v2514_v6 = vsel %vm2512_vm15, %v2493_v45, %v10275_v44  ;;  %v2511_v47 = vsel %vm9833_vm14, %v2490_v24, %v1555_v56  ;;  %v10278_v57 = vld [vmem:[#allocation107_spill] sm:$0xff]  ;;  %v10285_v45 = vld [vmem:[#allocation26_spill] sm:$0xff]  ;;  %v10288_v44 = vld [vmem:[#allocation120_spill] sm:$0xff]  ;;  %s9612_s27 = scalar_lea.vmem %s9690_s17, %s5255_s22 }
 0x4cd   : > { %2407 = vrot.lane.b32.xlu1 %v2368_v1, %s10151_s2  ;;  %v2534_v62 = vsel %vm9832_vm4, %v2513_v34, %v10276_v18  ;;  %v2535_v1 = vsel %vm9832_vm4, %v2514_v6, %v10277_v41  ;;  %v2866_v58 = vsel %vm9826_vm13, %v2858_v54, %v10278_v57  ;;  %v2487_v17 = vsel %vm9826_vm13, %v2466_v12, %v8092_v31  ;;  %v10282_v31 = vld [vmem:[#allocation114_spill] sm:$0xff]  ;;  %v10289_v39 = vld [vmem:[#allocation25_spill] sm:$0xff] }
 0x4ce   : > { %v8441_v3 = vpop.permute.xlu0 %2195  ;;  %v2555_v61 = vsel %vm2554_vm5, %v2534_v62, %v10279_v29  ;;  %v2495_v60 = vsel %vm9833_vm14, %v8072_v21, %v10280_v50  ;;  %v2494_v24 = vsel %vm9833_vm14, %v8078_v0, %v10281_v49  ;;  %v2508_v56 = vsel %vm9833_vm14, %v2487_v17, %v8192_v27  ;;  %v10284_v27 = vld [vmem:[#allocation126_spill] sm:$0xff]  ;;  %v10290_v62 = vld [vmem:[#allocation123_spill] sm:$0xff]  ;;  %v10294_v29 = vld [vmem:[#allocation132_spill] sm:$0xff] }
 0x4cf   : > { %v1660_v13 = vpop.permute.xlu1 %1659  ;;  %v2510_v36 = vsel %vm9833_vm14, %v8328_v52, %v8312_v55  ;;  %v2515_v38 = vsel %vm2512_vm15, %v2494_v24, %v10283_v35  ;;  %v2529_v21 = vsel %vm2512_vm15, %v2508_v56, %v8227_v23  ;;  %v2516_v30 = vsel %vm2512_vm15, %v2495_v60, %v10284_v27  ;;  %v10286_v5 = vld [vmem:[#allocation118_spill] sm:$0xff]  ;;  %v10297_v56 = vld [vmem:[#allocation127_spill] sm:$0xff] }
 0x4d0   : > { %v2532_v11 = vsel %vm2512_vm15, %v2511_v47, %v1660_v13  ;;  %2923 = vrot.lane.b32.xlu0 %v2865_v32, %s5701_s25  ;;  %v2556_v32 = vsel %vm2554_vm5, %v2535_v1, %v10282_v31  ;;  %v2531_v0 = vsel %vm2512_vm15, %v2510_v36, %v8361_v37  ;;  %v2550_v52 = vsel %vm9832_vm4, %v2529_v21, %v8266_v2  ;;  %v10287_v37 = vld [vmem:[#allocation69_spill] sm:$0xff]  ;;  %v10293_v57 = vld [vmem:[#allocation130_spill] sm:$0xff] }
 0x4d1   : > { %2925 = vrot.lane.b32.xlu1 %v2866_v58, %s5701_s25  ;;  %v2576_v22 = vsel %vm9831_vm8, %v2555_v61, %v10285_v45  ;;  %v2571_v54 = vsel %vm2554_vm5, %v2550_v52, %v8296_v26  ;;  %v2434_v34 = vsel %vm702_vm3, %v10287_v37, %v10286_v5  ;;  %v2536_v6 = vsel %vm9832_vm4, %v2515_v38, %v10288_v44  ;;  %v10291_v1 = vld [vmem:[#allocation125_spill] sm:$0xff]  ;;  %v10296_v49 = vld [vmem:[#allocation122_spill] sm:$0xff]  ;;  %s10619_s25 = sshll.u32 %s10627_s28, 4 }
 0x4d2   : > { %v1762_v63 = vpop.permute.xlu0 %1761  ;;  %v2577_v2 = vsel %vm9831_vm8, %v2556_v32, %v10289_v39  ;;  %v2592_v18 = vsel %vm9831_vm8, %v2571_v54, %v8323_v15  ;;  %v2597_v41 = vsel %vm9830_vm2, %v2576_v22, %v10290_v62  ;;  %v2537_v26 = vsel %vm9832_vm4, %v2516_v30, %v10291_v1  ;;  %v10295_v15 = vld [vmem:[#allocation131_spill] sm:$0xff]  ;;  %v10298_v36 = vld [vmem:[#allocation129_spill] sm:$0xff]  ;;  %v10299_v32 = vld [vmem:[#allocation136_spill] sm:$0xff] }
 0x4d3   : > { %v1996_v55 = vpop.permute.xlu1 %1995  ;;  %v2552_v46 = vsel %vm9832_vm4, %v2531_v0, %v1762_v63  ;;  %v2613_v47 = vsel %vm9830_vm2, %v2592_v18, %v8381_v43  ;;  %v2455_v58 = vsel %vm9828_vm12, %v2434_v34, %v10293_v57  ;;  %v2557_v61 = vsel %vm2554_vm5, %v2536_v6, %v10294_v29  ;;  %v10300_v38 = vld [vmem:[#allocation29_spill] sm:$0xff]  ;;  %v10302_v30 = vld [vmem:[#allocation134_spill] sm:$0xff]  ;;  %v10304_v22 = vld [vmem:[#allocation135_spill] sm:$0xff] }
 0x4d4   : > { %v2614_v23 = vsel %vm9830_vm2, %v2593_v59, %v1996_v55  ;;  %v10292_v59 = vld [vmem:[#allocation128_spill] sm:$0xff]  ;;  %v2558_v17 = vsel %vm2554_vm5, %v2537_v26, %v10295_v15  ;;  %v2618_v24 = vsel %vm2617_vm10, %v2597_v41, %v10296_v49  ;;  %v2476_v31 = vsel %vm9826_vm13, %v2455_v58, %v10298_v36  ;;  %v10301_v0 = vld [vmem:[#allocation33_spill] sm:$0xff]  ;;  %v10307_v44 = vld [vmem:[#allocation138_spill] sm:$0xff] }
 0x4d5   : > { %v2598_v12 = vsel %vm9830_vm2, %v2577_v2, %v10292_v59  ;;  %v2496_v35 = vsel %vm9833_vm14, %v8104_v53, %v10299_v32  ;;  %v2578_v21 = vsel %vm9831_vm8, %v2557_v61, %v10300_v38  ;;  %v2579_v63 = vsel %vm9831_vm8, %v2558_v17, %v10301_v0  ;;  %v10303_v55 = vld [vmem:[#allocation133_spill] sm:$0xff]  ;;  %v10308_v39 = vld [vmem:[#allocation140_spill] sm:$0xff]  ;;  %v10309_v41 = vld [vmem:[#allocation139_spill] sm:$0xff] }
 0x4d6   : > { %v2062_v13 = vpop.permute.xlu0 %2061  ;;  %v2619_v43 = vsel %vm2617_vm10, %v2598_v12, %v10297_v56  ;;  %v2639_v52 = vsel %vm2638_vm9, %v2618_v24, %v10302_v30  ;;  %v10305_v54 = vld [vmem:[#allocation5_spill] sm:$0xff]  ;;  %v2497_v2 = vsel %vm9833_vm14, %v2476_v31, %v10308_v39  ;;  %v2599_v1 = vsel %vm9830_vm2, %v2578_v21, %v10309_v41  ;;  %v10311_v12 = vld [vmem:[#allocation143_spill] sm:$0xff]  ;;  %v10312_v57 = vld [vmem:[#allocation142_spill] sm:$0xff] }
 0x4d7   : > { %v8511_v50 = vpop.permute.xlu1 %2263  ;;  %v2634_v60 = vsel %vm2617_vm10, %v2613_v47, %v2062_v13  ;;  %v2640_v45 = vsel %vm2638_vm9, %v2619_v43, %v10303_v55  ;;  %v2435_v5 = vsel %vm702_vm3, %v10305_v54, %v10304_v22  ;;  %v10306_v37 = vld [vmem:[#allocation137_spill] sm:$0xff]  ;;  %v2660_v6 = vsel %vm9827_vm0, %v2639_v52, %v10307_v44  ;;  %v10313_v29 = vld [vmem:[#allocation144_spill] sm:$0xff]  ;;  %v10315_v15 = vld [vmem:[#allocation150_spill] sm:$0xff] }
 0x4d8   : > { %v2517_v53 = vsel %vm2512_vm15, %v2496_v35, %v10306_v37  ;;  %v10310_v26 = vld [vmem:[#allocation141_spill] sm:$0xff]  ;;  %v2518_v47 = vsel %vm2512_vm15, %v2497_v2, %v10311_v12  ;;  %v2661_v58 = vsel %vm9827_vm0, %v2640_v45, %v10312_v57  ;;  %v10316_v24 = vld [vmem:[#allocation147_spill] sm:$0xff]  ;;  %v10317_v43 = vld [vmem:[#allocation146_spill] sm:$0xff] }
 0x4d9   : > { %v2538_v18 = vsel %vm9832_vm4, %v2517_v53, %v7275_v48  ;;  %v2681_v59 = vsel %vm2680_vm11, %v2660_v6, %v10310_v26  ;;  %v2456_v48 = vsel %vm9828_vm12, %v2435_v5, %v10313_v29  ;;  %v10314_v61 = vld [vmem:[#allocation145_spill] sm:$0xff]  ;;  %v2539_v17 = vsel %vm9832_vm4, %v2518_v47, %v10315_v15  ;;  %v10320_v0 = vld [vmem:[#allocation148_spill] sm:$0xff]  ;;  %v10323_v54 = vld [vmem:[#allocation151_spill] sm:$0xff] }
 0x4da   : > { %v8527_v27 = vpop.permute.xlu0 %2329  ;;  %v2559_v13 = vsel %vm2554_vm5, %v2538_v18, %v7304_v25  ;;  %v2620_v56 = vsel %vm2617_vm10, %v2599_v1, %v10316_v24  ;;  %v2682_v36 = vsel %vm2680_vm11, %v2661_v58, %v10317_v43  ;;  %v10318_v25 = vld [vmem:[#allocation155_spill] sm:$0xff]  ;;  %v10319_v38 = vld [vmem:[#allocation149_spill] sm:$0xff]  ;;  %v10322_v45 = vld [vmem:[#allocation152_spill] sm:$0xff] }
 0x4db   : > { %v1764_v34 = vpop.permute.xlu1 %1763  ;;  %v2560_v31 = vsel %vm2554_vm5, %v2539_v17, %v10318_v25  ;;  %v2702_v21 = vsel %vm2701_vm7, %v2681_v59, %v10319_v38  ;;  %v10321_v30 = vld [vmem:[#allocation37_spill] sm:$0xff]  ;;  %v2641_v5 = vsel %vm2638_vm9, %v2620_v56, %v10323_v54  ;;  %v10325_v53 = vld [vmem:[#allocation156_spill] sm:$0xff]  ;;  %v10326_v44 = vld [vmem:[#allocation154_spill] sm:$0xff] }
 0x4dc   : > { %v2553_v62 = vsel %vm9832_vm4, %v2532_v11, %v1764_v34  ;;  %v2600_v11 = vsel %vm9830_vm2, %v2579_v63, %v10314_v61  ;;  %v2477_v63 = vsel %vm9826_vm13, %v2456_v48, %v10320_v0  ;;  %v2580_v52 = vsel %vm9831_vm8, %v2559_v13, %v10321_v30  ;;  %v10327_v39 = vld [vmem:[#allocation157_spill] sm:$0xff]  ;;  %v10329_v41 = vld [vmem:[#allocation28_spill] sm:$0xff]  ;;  %v10330_v59 = vld [vmem:[#allocation158_spill] sm:$0xff] }
 0x4dd   : > { %v2621_v22 = vsel %vm2617_vm10, %v2600_v11, %v10322_v45  ;;  %v2498_v34 = vsel %vm9833_vm14, %v2477_v63, %v10325_v53  ;;  %v2703_v6 = vsel %vm2701_vm7, %v2682_v36, %v10326_v44  ;;  %v2581_v1 = vsel %vm9831_vm8, %v2560_v31, %v10329_v41  ;;  %v10331_v47 = vld [vmem:[#allocation161_spill] sm:$0xff]  ;;  %v10332_v13 = vld [vmem:[#allocation58_spill] sm:$0xff]  ;;  %v10334_v11 = vld [vmem:[#allocation159_spill] sm:$0xff] }
 0x4de   : > { %v1866_v49 = vpop.permute.xlu0 %1865  ;;  %v2642_v2 = vsel %vm2638_vm9, %v2621_v22, %v10327_v39  ;;  %v2662_v12 = vsel %vm9827_vm0, %v2641_v5, %v10330_v59  ;;  %v2499_v57 = vsel %vm9833_vm14, %v10332_v13, %v10331_v47  ;;  %v10333_v58 = vld [vmem:[#allocation165_spill] sm:$0xff]  ;;  %v2724_v15 = vsel %vm9829_vm6, %v2703_v6, %v10334_v11  ;;  %v10335_v17 = vld [vmem:[#allocation162_spill] sm:$0xff]  ;;  %v10337_v43 = vld [vmem:[#allocation171_spill] sm:$0xff] }
 0x4df   : > { %v2064_v32 = vpop.permute.xlu1 %2063  ;;  %v8568_v35 = vsel %vm2554_vm5, %v2552_v46, %v1866_v49  ;;  %v10324_v46 = vld [vmem:[#allocation153_spill] sm:$0xff]  ;;  %v2601_v49 = vsel %vm9830_vm2, %v2580_v52, %v10335_v17  ;;  %v10336_v24 = vld [vmem:[#allocation166_spill] sm:$0xff]  ;;  %v10338_v25 = vld [vmem:[#allocation164_spill] sm:$0xff]  ;;  %vm2985_vm13 = vcmask 654336  }
 0x4e0   : > { %v8577_v55 = vsel %vm2617_vm10, %v2614_v23, %v2064_v32  ;;  %v2723_v37 = vsel %vm9829_vm6, %v2702_v21, %v10324_v46  ;;  %v10328_v23 = vld [vmem:[#allocation160_spill] sm:$0xff]  ;;  %v2520_v56 = vsel %vm2512_vm15, %v2499_v57, %v10336_v24  ;;  %v2683_v31 = vsel %vm2680_vm11, %v2662_v12, %v10338_v25  ;;  %v10339_v32 = vld [vmem:[#allocation163_spill] sm:$0xff]  ;;  %v10343_v45 = vld [vmem:[#allocation170_spill] sm:$0xff] }
 0x4e1   : > { %v2519_v18 = vsel %vm2512_vm15, %v2498_v34, %v10328_v23  ;;  %v2663_v38 = vsel %vm9827_vm0, %v2642_v2, %v10339_v32  ;;  %v10341_v0 = vld [vmem:[#allocation172_spill] sm:$0xff]  ;;  %v10344_v54 = vld [vmem:[#allocation169_spill] sm:$0xff]  ;;  %v10345_v46 = vld [vmem:[#allocation178_spill] sm:$0xff] }
 0x4e2   : > { %v2130_v26 = vpop.permute.xlu0 %2129  ;;  %v2540_v29 = vsel %vm9832_vm4, %v2519_v18, %v10333_v58  ;;  %v2541_v63 = vsel %vm9832_vm4, %v2520_v56, %v10341_v0  ;;  %v10342_v30 = vld [vmem:[#allocation168_spill] sm:$0xff]  ;;  %v2684_v22 = vsel %vm2680_vm11, %v2663_v38, %v10343_v45  ;;  %v2704_v5 = vsel %vm2701_vm7, %v2683_v31, %v10344_v54  ;;  %v10346_v44 = vld [vmem:[#allocation175_spill] sm:$0xff]  ;;  %v10347_v39 = vld [vmem:[#allocation174_spill] sm:$0xff] }
 0x4e3   : > { %v8602_v48 = vpop.permute.xlu1 %2331  ;;  %v8605_v61 = vsel %vm2638_vm9, %v2634_v60, %v2130_v26  ;;  %v2561_v36 = vsel %vm2554_vm5, %v2540_v29, %v10337_v43  ;;  %v10340_v60 = vld [vmem:[#allocation167_spill] sm:$0xff]  ;;  %v2602_v52 = vsel %vm9830_vm2, %v2581_v1, %v10342_v30  ;;  %v2562_v53 = vsel %vm2554_vm5, %v2541_v63, %v10345_v46  ;;  %v10348_v23 = vld [vmem:[#allocation176_spill] sm:$0xff]  ;;  %v10349_v41 = vld [vmem:[#allocation41_spill] sm:$0xff] }
 0x4e4   : > { %v2622_v21 = vsel %vm2617_vm10, %v2601_v49, %v10340_v60  ;;  %v2623_v6 = vsel %vm2617_vm10, %v2602_v52, %v10346_v44  ;;  %v2725_v18 = vsel %vm9829_vm6, %v2704_v5, %v10348_v23  ;;  %v2582_v1 = vsel %vm9831_vm8, %v2561_v36, %v10349_v41  ;;  %v10350_v59 = vld [vmem:[#allocation177_spill] sm:$0xff]  ;;  %v10351_v47 = vld [vmem:[#allocation179_spill] sm:$0xff]  ;;  %v10353_v11 = vld [vmem:[#allocation180_spill] sm:$0xff] }
 0x4e5   : > { %v2643_v2 = vsel %vm2638_vm9, %v2622_v21, %v10347_v39  ;;  %v2705_v12 = vsel %vm2701_vm7, %v2684_v22, %v10350_v59  ;;  %v2500_v13 = vsel %vm9833_vm14, %v8171_v9, %v10351_v47  ;;  %v10352_v58 = vld [vmem:[#allocation181_spill] sm:$0xff]  ;;  %v2644_v17 = vsel %vm2638_vm9, %v2623_v6, %v10353_v11  ;;  %v10354_v49 = vld [vmem:[#allocation186_spill] sm:$0xff]  ;;  %v10356_v36 = vld [vmem:[#allocation183_spill] sm:$0xff] }
 0x4e6   : > { %v8631_v34 = vpop.permute.xlu0 %2397  ;;  %v2664_v29 = vsel %vm9827_vm0, %v2643_v2, %v10352_v58  ;;  %v2521_v24 = vsel %vm2512_vm15, %v2500_v13, %v10354_v49  ;;  %v10355_v56 = vld [vmem:[#allocation45_spill] sm:$0xff]  ;;  %v10357_v25 = vld [vmem:[#allocation62_spill] sm:$0xff]  ;;  %v10359_v32 = vld [vmem:[#allocation15_spill] sm:$0xff] }
 0x4e7   : > { %v1868_v26 = vpop.permute.xlu1 %1867  ;;  %v2583_v43 = vsel %vm9831_vm8, %v2562_v53, %v10355_v56  ;;  %v2501_v9 = vsel %vm9833_vm14, %v10357_v25, %v10356_v36  ;;  %v10358_v31 = vld [vmem:[#allocation182_spill] sm:$0xff]  ;;  %v2542_v38 = vsel %vm9832_vm4, %v2521_v24, %v10359_v32  ;;  %v10360_v21 = vld [vmem:[#allocation185_spill] sm:$0xff]  ;;  %v10361_v63 = vld [vmem:[#allocation184_spill] sm:$0xff] }
 0x4e8   : > { %v8647_v57 = vsel %vm2554_vm5, %v2553_v62, %v1868_v26  ;;  %v2726_v62 = vsel %vm9829_vm6, %v2705_v12, %v10358_v31  ;;  %v2665_v0 = vsel %vm9827_vm0, %v2644_v17, %v10360_v21  ;;  %v10362_v30 = vld [vmem:[#allocation124_spill] sm:$0xff]  ;;  %v10363_v45 = vld [vmem:[#allocation194_spill] sm:$0xff]  ;;  %v10364_v46 = vld [vmem:[#allocation187_spill] sm:$0xff]  ;;  %vm10373_vm0 = vcmask 97280  }
 0x4e9   : > { %v2439_v52 = vsel %vm702_vm3, %v10362_v30, %v10361_v63  ;;  %v2563_v22 = vsel %vm2554_vm5, %v2542_v38, %v10363_v45  ;;  %v10365_v44 = vld [vmem:[#allocation14_spill] sm:$0xff]  ;;  %v10366_v39 = vld [vmem:[#allocation188_spill] sm:$0xff]  ;;  %v10367_v41 = vld [vmem:[#allocation189_spill] sm:$0xff] }
 0x4ea   : > { %v2890_v60 = vpop.permute.xlu0 %2889  ;;  %v2460_v53 = vsel %vm9828_vm12, %v2439_v52, %v10364_v46  ;;  %v2603_v6 = vsel %vm9830_vm2, %v2582_v1, %v10365_v44  ;;  %v2685_v2 = vsel %vm2680_vm11, %v2664_v29, %v10366_v39  ;;  %v10368_v59 = vld [vmem:[#allocation191_spill] sm:$0xff]  ;;  %v10369_v47 = vld [vmem:[#allocation190_spill] sm:$0xff]  ;;  %v10371_v58 = vld [vmem:[#allocation192_spill] sm:$0xff] }
 0x4eb   : > { %v2888_v54 = vpop.permute.xlu1 %2887  ;;  %v2949_v5 = vsel %vm2947_vm1, %v2724_v15, %v2890_v60  ;;  %v2624_v26 = vsel %vm2617_vm10, %v2603_v6, %v10367_v41  ;;  %v2706_v12 = vsel %vm2701_vm7, %v2685_v2, %v10368_v59  ;;  %v10370_v13 = vld [vmem:[#allocation6_spill] sm:$0xff]  ;;  %v2522_v11 = vsel %vm2512_vm15, %v2501_v9, %v10371_v58  ;;  %v10372_v1 = vld [vmem:[#allocation193_spill] sm:$0xff]  ;;  %v10374_v17 = vld [vmem:[#allocation16_spill] sm:$0xff] }
 0x4ec   : > { %v2948_v23 = vsel %vm2947_vm1, %v2723_v37, %v2888_v54  ;;  %v2440_v15 = vsel %vm702_vm3, %v10370_v13, %v10369_v47  ;;  %v2481_v29 = vsel %vm10373_vm0, %v2460_v53, %v10372_v1  ;;  %v2604_v37 = vsel %vm9830_vm2, %v2583_v43, %v10374_v17  ;;  %v10375_v49 = vld [vmem:[#allocation7_spill] sm:$0xff]  ;;  %v10376_v56 = vld [vmem:[#allocation50_spill] sm:$0xff]  ;;  %v10378_v32 = vld [vmem:[#allocation196_spill] sm:$0xff] }
 0x4ed   : > { %5372 = vmatprep.mubr.msk.f32.mxu0 %vm2985_vm13, %v2948_v23  ;;  %v2686_v24 = vsel %vm2680_vm11, %v2665_v0, %v10375_v49  ;;  %v2584_v36 = vsel %vm9831_vm8, %v2563_v22, %v10376_v56  ;;  %v10377_v31 = vld [vmem:[#allocation195_spill] sm:$0xff]  ;;  %v2727_v38 = vsel %vm9829_vm6, %v2706_v12, %v10378_v32  ;;  %v10379_v60 = vld [vmem:[#allocation9_spill] sm:$0xff]  ;;  %v10381_v0 = vld [vmem:[#allocation18_spill] sm:$0xff] }
 0x4ee   : > { %5373 = vmatmul.mubr.msk.f32.vlgmr.msra.gmra.mrb[2].mxu0 %vm2985_vm13, %v2949_v5  ;;  %v2898_v25 = vpop.permute.xlu0 %2897  ;;  %v2645_v9 = vsel %vm2638_vm9, %v2624_v26, %v10377_v31  ;;  %v2461_v21 = vsel %vm9828_vm12, %v2440_v15, %v10379_v60  ;;  %v10380_v63 = vld [vmem:[#allocation197_spill] sm:$0xff]  ;;  %v2625_v52 = vsel %vm2617_vm10, %v2604_v37, %v10381_v0  ;;  %v10382_v45 = vld [vmem:[#allocation202_spill] sm:$0xff]  ;;  %v10385_v6 = vld [vmem:[#allocation199_spill] sm:$0xff]  ;;  %vm10386_vm12 = vcmask 392192  }
 0x4ef   : > { %v2543_v43 = vsel %vm9832_vm4, %v2522_v11, %v10380_v63  ;;  %v2892_v30 = vpop.permute.xlu1 %2891  ;;  %v2482_v22 = vsel %vm10373_vm0, %v2461_v21, %v10382_v45  ;;  %v10383_v54 = vld [vmem:[#allocation17_spill] sm:$0xff]  ;;  %v10384_v53 = vld [vmem:[#allocation198_spill] sm:$0xff]  ;;  %v2666_v39 = vsel %vm10386_vm12, %v2645_v9, %v10385_v6  ;;  %v10387_v2 = vld [vmem:[#allocation20_spill] sm:$0xff] }
 0x4f0   : > { %v2564_v5 = vsel %vm2554_vm5, %v2543_v43, %v10383_v54  ;;  %v2950_v46 = vsel %vm2947_vm1, %v2725_v18, %v2892_v30  ;;  %v2502_v44 = vsel %vm9833_vm14, %v2481_v29, %v10384_v53  ;;  %v2646_v23 = vsel %vm2638_vm9, %v2625_v52, %v10387_v2  ;;  %v10388_v41 = vld [vmem:[#allocation208_spill] sm:$0xff]  ;;  %v10389_v59 = vld [vmem:[#allocation201_spill] sm:$0xff]  ;;  %v10391_v13 = vld [vmem:[#allocation203_spill] sm:$0xff] }
 0x4f1   : > { %v2503_v26 = vsel %vm9833_vm14, %v2482_v22, %v10388_v41  ;;  %5375 = vmatprep.mubr.msk.f32.mxu0 %vm2985_vm13, %v2950_v46  ;;  %v2523_v12 = vsel %vm2512_vm15, %v2502_v44, %v10389_v59  ;;  %v10390_v47 = vld [vmem:[#allocation200_spill] sm:$0xff]  ;;  %v2605_v15 = vsel %vm9830_vm2, %v2584_v36, %v10391_v13  ;;  %v10392_v58 = vld [vmem:[#allocation22_spill] sm:$0xff]  ;;  %vm10393_vm0 = vmmov %vm10386_vm12 }
 0x4f2   : > { %v2707_v18 = vsel %vm2701_vm7, %v2686_v24, %v10390_v47  ;;  %v2667_v11 = vsel %vm10393_vm0, %v2646_v23, %v10392_v58  ;;  %v2902_v1 = vpop.permute.xlu0 %2901  ;;  %v10394_v29 = vld [vmem:[#allocation204_spill] sm:$0xff]  ;;  %v10396_v56 = vld [vmem:[#allocation206_spill] sm:$0xff]  ;;  %v10398_v60 = vld [vmem:[#allocation205_spill] sm:$0xff] }
 0x4f3   : > { %v2687_v17 = vsel %vm2680_vm11, %v2666_v39, %v10394_v29  ;;  %v10395_v37 = vld [vmem:[#allocation32_spill] sm:$0xff]  ;;  %v2728_v31 = vsel %vm9829_vm6, %v2707_v18, %v10396_v56  ;;  %v10397_v9 = vld [vmem:[#allocation210_spill] sm:$0xff]  ;;  %v2894_v24 = vpop.permute.xlu1 %2893  ;;  %v2524_v36 = vsel %vm2512_vm15, %v2503_v26, %v10398_v60  ;;  %v10401_v52 = vld [vmem:[#allocation207_spill] sm:$0xff] }
 0x4f4   : > { %v2585_v49 = vsel %vm9831_vm8, %v2564_v5, %v10395_v37  ;;  %v2544_v32 = vsel %vm9832_vm4, %v2523_v12, %v10397_v9  ;;  %v10399_v21 = vld [vmem:[#allocation212_spill] sm:$0xff]  ;;  %v10400_v43 = vld [vmem:[#allocation10_spill] sm:$0xff]  ;;  %v2951_v0 = vsel %vm2947_vm1, %v2726_v62, %v2894_v24  ;;  %v10402_v22 = vld [vmem:[#allocation23_spill] sm:$0xff] }
 0x4f5   : > { %v2626_v63 = vsel %vm2617_vm10, %v2605_v15, %v10399_v21  ;;  %v2565_v30 = vsel %vm2554_vm5, %v2544_v32, %v10400_v43  ;;  %v2606_v45 = vsel %vm9830_vm2, %v2585_v49, %v10401_v52  ;;  %v2545_v54 = vsel %vm9832_vm4, %v2524_v36, %v10402_v22  ;;  %v10403_v5 = vld [vmem:[#allocation209_spill] sm:$0xff]  ;;  %v10404_v53 = vld [vmem:[#allocation19_spill] sm:$0xff]  ;;  %5376 = vmatmul.mubr.msk.f32.gmra.mrb[4].mxu0 %vm2985_vm13, %v2951_v0  ;;  %v10407_v23 = vld [vmem:[#allocation214_spill] sm:$0xff] }
 0x4f6   : > { %v2688_v46 = vsel %vm2680_vm11, %v2667_v11, %v10403_v5  ;;  %v2647_v44 = vsel %vm2638_vm9, %v2626_v63, %v10404_v53  ;;  %v10405_v6 = vld [vmem:[#allocation211_spill] sm:$0xff]  ;;  %v10406_v2 = vld [vmem:[#allocation213_spill] sm:$0xff]  ;;  %v2504_v41 = vsel %vm9833_vm14, %v8196_v16, %v10407_v23  ;;  %v2904_v12 = vpop.permute.xlu0 %2903  ;;  %v10409_v47 = vld [vmem:[#allocation24_spill] sm:$0xff]  ;;  %v2953_v0 = vsel %vm2947_vm1, %v2728_v31, %v2898_v25 }
 0x4f7   : > { %v2627_v39 = vsel %vm2617_vm10, %v2606_v45, %v10405_v6  ;;  %v2709_v62 = vsel %vm2701_vm7, %v2688_v46, %v10406_v2  ;;  %v10408_v26 = vld [vmem:[#allocation219_spill] sm:$0xff]  ;;  %v2708_v18 = vsel %vm2701_vm7, %v2687_v17, %v10409_v47  ;;  %v10410_v13 = vld [vmem:[#allocation216_spill] sm:$0xff]  ;;  %v10411_v58 = vld [vmem:[#allocation54_spill] sm:$0xff]  ;;  %v2896_v49 = vpop.permute.xlu1 %2895 }
 0x4f8   : > { %v2566_v59 = vsel %vm2554_vm5, %v2545_v54, %v10408_v26  ;;  %v2525_v15 = vsel %vm2512_vm15, %v2504_v41, %v10410_v13  ;;  %v2586_v11 = vsel %vm9831_vm8, %v2565_v30, %v10411_v58  ;;  %v10412_v29 = vld [vmem:[#allocation224_spill] sm:$0xff]  ;;  %v10413_v56 = vld [vmem:[#allocation217_spill] sm:$0xff]  ;;  %v10414_v9 = vld [vmem:[#allocation215_spill] sm:$0xff]  ;;  %v2952_v60 = vsel %vm2947_vm1, %v2727_v38, %v2896_v49 }
 0x4f9   : > { %v2505_v37 = vsel %vm9833_vm14, %v8190_v10, %v10412_v29  ;;  %v2729_v16 = vsel %vm9829_vm6, %v2708_v18, %v10413_v56  ;;  %vm10415_vm12 = vmmov %vm10393_vm0  ;;  %v10416_v24 = vld [vmem:[#allocation27_spill] sm:$0xff]  ;;  %v10417_v36 = vld [vmem:[#allocation218_spill] sm:$0xff]  ;;  %5378 = vmatprep.mubr.msk.f32.mxu0 %vm2985_vm13, %v2952_v60 }
 0x4fa   : > { %v2668_v32 = vsel %vm10415_vm12, %v2647_v44, %v10414_v9  ;;  %v2526_v17 = vsel %vm2512_vm15, %v2505_v37, %v10416_v24  ;;  %v2607_v21 = vsel %vm9830_vm2, %v2586_v11, %v10417_v36  ;;  %v10418_v63 = vld [vmem:[#allocation220_spill] sm:$0xff]  ;;  %v10420_v52 = vld [vmem:[#allocation221_spill] sm:$0xff]  ;;  %v10421_v22 = vld [vmem:[#allocation223_spill] sm:$0xff]  ;;  %5379 = vmatmul.mubr.msk.f32.gmra.mrb[6].mxu0 %vm2985_vm13, %v2953_v0  ;;  %v2906_v44 = vpop.permute.xlu0 %2905 }
 0x4fb   : > { %v2689_v43 = vsel %vm2680_vm11, %v2668_v32, %v10418_v63  ;;  %v10419_v30 = vld [vmem:[#allocation36_spill] sm:$0xff]  ;;  %v2648_v45 = vsel %vm2638_vm9, %v2627_v39, %v10420_v52  ;;  %v2546_v54 = vsel %vm9832_vm4, %v2525_v15, %v10421_v22  ;;  %v10422_v38 = vld [vmem:[#allocation21_spill] sm:$0xff]  ;;  %v10424_v6 = vld [vmem:[#allocation226_spill] sm:$0xff] }
 0x4fc   : > { %v2587_v10 = vsel %vm9831_vm8, %v2566_v59, %v10419_v30  ;;  %v2730_v5 = vsel %vm9829_vm6, %v2709_v62, %v10422_v38  ;;  %v10423_v46 = vld [vmem:[#allocation225_spill] sm:$0xff]  ;;  %v2669_v25 = vsel %vm10393_vm0, %v2648_v45, %v10424_v6  ;;  %v10425_v31 = vld [vmem:[#allocation228_spill] sm:$0xff]  ;;  %v10426_v23 = vld [vmem:[#allocation11_spill] sm:$0xff]  ;;  %v2900_v59 = vpop.permute.xlu1 %2899 }
 0x4fd   : > { %v2628_v53 = vsel %vm2617_vm10, %v2607_v21, %v10423_v46  ;;  %v2608_v2 = vsel %vm9830_vm2, %v2587_v10, %v10425_v31  ;;  %v2547_v39 = vsel %vm9832_vm4, %v2526_v17, %v10426_v23  ;;  %v10427_v41 = vld [vmem:[#allocation12_spill] sm:$0xff]  ;;  %v10428_v62 = vld [vmem:[#allocation227_spill] sm:$0xff]  ;;  %v10430_v15 = vld [vmem:[#allocation233_spill] sm:$0xff]  ;;  %v2954_v11 = vsel %vm2947_vm1, %v2729_v16, %v2900_v59 }
 0x4fe   : > { %v2567_v26 = vsel %vm2554_vm5, %v2546_v54, %v10427_v41  ;;  %v2710_v47 = vsel %vm2701_vm7, %v2689_v43, %v10428_v62  ;;  %v10429_v18 = vld [vmem:[#allocation8_spill] sm:$0xff]  ;;  %v2568_v58 = vsel %vm2554_vm5, %v2547_v39, %v10430_v15  ;;  %v10431_v29 = vld [vmem:[#allocation31_spill] sm:$0xff]  ;;  %v2955_v9 = vsel %vm2947_vm1, %v2730_v5, %v2902_v1  ;;  %5381 = vmatprep.mubr.msk.f32.mxu0 %vm2985_vm13, %v2954_v11  ;;  %v10433_v32 = vld [vmem:[#allocation229_spill] sm:$0xff]  ;;  %v2910_v63 = vpop.permute.xlu0 %2909 }
 0x4ff   : > { %v2690_v13 = vsel %vm2680_vm11, %v2669_v25, %v10429_v18  ;;  %v2649_v37 = vsel %vm2638_vm9, %v2628_v53, %v10431_v29  ;;  %v10432_v49 = vld [vmem:[#allocation235_spill] sm:$0xff]  ;;  %v2629_v24 = vsel %vm2617_vm10, %v2608_v2, %v10433_v32  ;;  %v10434_v17 = vld [vmem:[#allocation30_spill] sm:$0xff]  ;;  %vm10435_vm12 = vmmov %vm10393_vm0  ;;  %5382 = vmatmul.mubr.msk.f32.gmra.mrb[8].mxu0 %vm2985_vm13, %v2955_v9 }
 0x500   : > { %v2731_v56 = vsel %vm9829_vm6, %v2710_v47, %v10432_v49  ;;  %v2670_v60 = vsel %vm10435_vm12, %v2649_v37, %v10434_v17  ;;  %v10436_v36 = vld [vmem:[#allocation40_spill] sm:$0xff]  ;;  %v10437_v43 = vld [vmem:[#allocation230_spill] sm:$0xff]  ;;  %v10438_v1 = vld [vmem:[#allocation237_spill] sm:$0xff]  ;;  %v2908_v54 = vpop.permute.xlu1 %2907 }
 0x501   : > { %v2588_v21 = vsel %vm9831_vm8, %v2567_v26, %v10436_v36  ;;  %v2956_v16 = vsel %vm2947_vm1, %v2731_v56, %v2904_v12  ;;  %v2711_v30 = vsel %vm2701_vm7, %v2690_v13, %v10437_v43  ;;  %v10439_v0 = vld [vmem:[#allocation239_spill] sm:$0xff]  ;;  %v10440_v45 = vld [vmem:[#allocation44_spill] sm:$0xff]  ;;  %v10441_v38 = vld [vmem:[#allocation234_spill] sm:$0xff] }
 0x502   : > { %v2609_v10 = vsel %vm9830_vm2, %v2588_v21, %v10438_v1  ;;  %v2691_v52 = vsel %vm2680_vm11, %v2670_v60, %v10439_v0  ;;  %v2589_v22 = vsel %vm9831_vm8, %v2568_v58, %v10440_v45  ;;  %5384 = vmatprep.mubr.msk.f32.mxu0 %vm2985_vm13, %v2956_v16  ;;  %v2650_v12 = vsel %vm2638_vm9, %v2629_v24, %v10441_v38  ;;  %v10442_v5 = vld [vmem:[#allocation236_spill] sm:$0xff]  ;;  %v10443_v53 = vld [vmem:[#allocation53_spill] sm:$0xff]  ;;  %v10445_v2 = vld [vmem:[#allocation238_spill] sm:$0xff]  ;;  %v2914_v58 = vpop.permute.xlu0 %2913 }
 0x503   : > { %v2732_v46 = vsel %vm9829_vm6, %v2711_v30, %v10442_v5  ;;  %v2630_v6 = vsel %vm2617_vm10, %v2609_v10, %v10443_v53  ;;  %v10444_v25 = vld [vmem:[#allocation60_spill] sm:$0xff]  ;;  %v2671_v23 = vsel %vm10393_vm0, %v2650_v12, %v10445_v2  ;;  %v10446_v59 = vld [vmem:[#allocation39_spill] sm:$0xff]  ;;  %v10447_v47 = vld [vmem:[#allocation49_spill] sm:$0xff] }
 0x504   : > { %v2712_v31 = vsel %vm2701_vm7, %v2691_v52, %v10444_v25  ;;  %v2651_v39 = vsel %vm2638_vm9, %v2630_v6, %v8141_v20  ;;  %v2957_v26 = vsel %vm2947_vm1, %v2732_v46, %v2906_v44  ;;  %v2610_v62 = vsel %vm9830_vm2, %v2589_v22, %v10446_v59  ;;  %vm10448_vm12 = vmmov %vm10393_vm0  ;;  %v2912_v11 = vpop.permute.xlu1 %2911  ;;  %v10449_v37 = vld [vmem:[#allocation66_spill] sm:$0xff]  ;;  %v10450_v56 = vld [vmem:[#allocation73_spill] sm:$0xff] }
 0x505   : > { %v2733_v41 = vsel %vm9829_vm6, %v2712_v31, %v8161_v14  ;;  %v2692_v18 = vsel %vm2680_vm11, %v2671_v23, %v10447_v47  ;;  %v2672_v13 = vsel %vm10448_vm12, %v2651_v39, %v8216_v40  ;;  %5385 = vmatmul.mubr.msk.f32.gmra.mrb[10].mxu0 %vm2985_vm13, %v2957_v26  ;;  %v2631_v20 = vsel %vm2617_vm10, %v2610_v62, %v8147_v4  ;;  %v10451_v9 = vld [vmem:[#allocation79_spill] sm:$0xff]  ;;  %v10454_v60 = vld [vmem:[#allocation173_spill] sm:$0xff]  ;;  %v10458_v52 = vld [vmem:[#allocation232_spill] sm:$0xff] }
 0x506   : > { %v2958_v15 = vsel %vm2947_vm1, %v2733_v41, %v2908_v54  ;;  %v2713_v14 = vsel %vm2701_vm7, %v2692_v18, %v8167_v7  ;;  %v2693_v44 = vsel %vm2680_vm11, %v2672_v13, %v8250_v33  ;;  %v2652_v40 = vsel %vm2638_vm9, %v2631_v20, %v8210_v51  ;;  %v10452_v32 = vld [vmem:[#allocation75_spill] sm:$0xff]  ;;  %v8879_v51 = vpop.permute.xlu0 %1925  ;;  %v10461_v12 = vld [vmem:[#allocation34_spill] sm:$0xff]  ;;  %v10464_v41 = vld [vmem:[#allocation57_spill] sm:$0xff] }
 0x507   : > { %5387 = vmatprep.mubr.msk.f32.mxu0 %vm2985_vm13, %v2958_v15  ;;  %v2734_v29 = vsel %vm9829_vm6, %v2713_v14, %v8225_v28  ;;  %v2714_v49 = vsel %vm2701_vm7, %v2693_v44, %v10449_v37  ;;  %v2673_v4 = vsel %vm10393_vm0, %v2652_v40, %v10450_v56  ;;  %v10453_v28 = vld [vmem:[#allocation222_spill] sm:$0xff]  ;;  %v10455_v21 = vld [vmem:[#allocation59_spill] sm:$0xff]  ;;  %vm10457_vm12 = vcmask 64512   ;;  %v10465_v59 = vld [vmem:[#allocation64_spill] sm:$0xff] }
 0x508   : > { %v2735_v7 = vsel %vm9829_vm6, %v2714_v49, %v10451_v9  ;;  %v2959_v33 = vsel %vm2947_vm1, %v2734_v29, %v2910_v63  ;;  %v2694_v24 = vsel %vm2680_vm11, %v2673_v4, %v10452_v32  ;;  %v2444_v36 = vsel %vm702_vm3, %v10454_v60, %v10453_v28  ;;  %v2132_v43 = vpop.permute.xlu1 %2131  ;;  %v10456_v63 = vld [vmem:[#allocation231_spill] sm:$0xff] }
 0x509   : > { %v2960_v17 = vsel %vm2947_vm1, %v2735_v7, %v2912_v11  ;;  %5388 = vmatmul.mubr.msk.f32.gmra.mrb[12].mxu0 %vm2985_vm13, %v2959_v33  ;;  %v2715_v16 = vsel %vm2701_vm7, %v2694_v24, %v10455_v21  ;;  %v2465_v30 = vsel %vm10457_vm12, %v2444_v36, %v10456_v63  ;;  %vm10459_vm0 = vcmask 97280   ;;  %v10460_v54 = vld [vmem:[#allocation35_spill] sm:$0xff] }
 0x50a   : > { %5390 = vmatprep.mubr.msk.f32.mxu0 %vm2985_vm13, %v2960_v17  ;;  %v2736_v1 = vsel %vm9829_vm6, %v2715_v16, %v8354_v19  ;;  %v2198_v0 = vpop.permute.xlu0 %2197  ;;  %v2486_v45 = vsel %vm10459_vm0, %v2465_v30, %v10458_v52  ;;  %v2716_v46 = vsel %vm2701_vm7, %v8418_v42, %v8527_v27  ;;  %v10462_v19 = vld [vmem:[#allocation55_spill] sm:$0xff]  ;;  %v10466_v27 = vld [vmem:[#allocation77_spill] sm:$0xff]  ;;  %vm10467_vm3 = vcmask 392192  }
 0x50b   : > { %v2961_v10 = vsel %vm2947_vm1, %v2736_v1, %v2914_v58  ;;  %v2507_v38 = vsel %vm9833_vm14, %v2486_v45, %v10460_v54  ;;  %v2737_v6 = vsel %vm9829_vm6, %v2716_v46, %v8631_v34  ;;  %v10463_v31 = vld [vmem:[#allocation71_spill] sm:$0xff]  ;;  %v2656_v60 = vsel %vm2638_vm9, %v8577_v55, %v2132_v43  ;;  %vm10470_vm12 = vmmov %vm10467_vm3 }
 0x50c   : > { %v2400_v22 = vpop.permute.xlu1 %2399  ;;  %v2528_v5 = vsel %vm2512_vm15, %v2507_v38, %v10461_v12  ;;  %vm10468_vm15 = vmmov %vm10467_vm3  ;;  %v2594_v55 = vsel %vm9831_vm8, %v8568_v35, %v8879_v51  ;;  %vm10476_vm14 = vcmask 1042432  }
 0x50d   : > { %5391 = vmatmul.mubr.msk.f32.gmra.mrb[14].mxu0 %vm2985_vm13, %v2961_v10  ;;  %v2549_v53 = vsel %vm9832_vm4, %v2528_v5, %v10462_v19  ;;  %vm10471_vm0 = vmmov %vm10467_vm3 }
 0x50e   : > { %v2916_v25 = vpop.permute.xlu0 %2915  ;;  %v2570_v2 = vsel %vm2554_vm5, %v2549_v53, %v10463_v31  ;;  %vm10469_vm5 = vmmov %vm10467_vm3 }
 0x50f   : > { %v2962_v39 = vsel %vm2947_vm1, %v2737_v6, %v2916_v25  ;;  %v2591_v26 = vsel %vm9831_vm8, %v2570_v2, %v10464_v41 }
 0x510   : > { %v1928_v23 = vpop.permute.xlu1 %1927  ;;  %5393 = vmatprep.mubr.msk.f32.mxu0 %vm2985_vm13, %v2962_v39  ;;  %v2612_v42 = vsel %vm9830_vm2, %v2591_v26, %v10465_v59 }
 0x511   : > { %v2633_v62 = vsel %vm2617_vm10, %v2612_v42, %v10466_v27  ;;  %v2595_v45 = vsel %vm9831_vm8, %v8647_v57, %v1928_v23  ;;  %v10472_v42 = vmov 0.0   ;;  %v8970_v27 = vld [vmem:[%s9680_s7] ss:$0 sm:$0xff] }
 0x512   : > { %v1998_v47 = vpop.permute.xlu0 %1997  ;;  %v2654_v34 = vsel %vm2638_vm9, %v2633_v62, %v8334_v8 }
 0x513   : > { %v2675_v13 = vsel %vm10467_vm3, %v2654_v34, %v8441_v3 }
 0x514   : > { %v2200_v18 = vpop.permute.xlu1 %2199  ;;  %v2696_v15 = vsel %vm2680_vm11, %v2675_v13, %v8511_v50 }
 0x515   : > { %v2717_v58 = vsel %vm2701_vm7, %v2696_v15, %v8602_v48  ;;  %v2676_v48 = vsel %vm10468_vm15, %v8605_v61, %v2198_v0  ;;  %v2677_v21 = vsel %vm10469_vm5, %v2656_v60, %v2200_v18  ;;  %vm9835_vm15 = vcmask 64519  }
 0x516   : > { %v2266_v20 = vpop.permute.xlu0 %2265  ;;  %v2738_v14 = vsel %vm9829_vm6, %v2717_v58, %v2400_v22  ;;  %v2615_v22 = vsel %vm9830_vm2, %v2594_v55, %v1998_v47  ;;  %vm3467_vm5 = vcmask 57344  }
 0x517   : > { %v2697_v7 = vsel %vm2680_vm11, %v2676_v48, %v2266_v20 }
 0x518   : > { %v2918_v44 = vpop.permute.xlu1 %2917 }
 0x519   : > { %v2963_v11 = vsel %vm2947_vm1, %v2738_v14, %v2918_v44 }
 0x51a   : > { %5394 = vmatmul.mubr.msk.f32.gmra.mrb[16].mxu0 %vm2985_vm13, %v2963_v11  ;;  %v2000_v40 = vpop.permute.xlu0 %1999 }
 0x51b   : > { %v2616_v38 = vsel %vm9830_vm2, %v2595_v45, %v2000_v40  ;;  %vm9836_vm2 = vcmask 59392  }
 0x51c   : > { %v2066_v8 = vpop.permute.xlu1 %2065 }
 0x51d   : > { %v2636_v54 = vsel %vm2617_vm10, %v2615_v22, %v2066_v8 }
 0x51e   : > { %v2268_v29 = vpop.permute.xlu0 %2267 }
 0x51f   : > { %v2698_v61 = vsel %vm2680_vm11, %v2677_v21, %v2268_v29 }
 0x520   : > { %v2334_v37 = vpop.permute.xlu1 %2333 }
 0x521   : > { %v2718_v33 = vsel %vm2701_vm7, %v2697_v7, %v2334_v37 }
 0x522   : > { %v2068_v49 = vpop.permute.xlu0 %2067 }
 0x523   : > { %v2637_v5 = vsel %vm2617_vm10, %v2616_v38, %v2068_v49  ;;  %vm3331_vm10 = vcmask 61440  }
 0x524   : > { %v2134_v3 = vpop.permute.xlu1 %2133 }
 0x525   : > { %v2657_v12 = vsel %vm2638_vm9, %v2636_v54, %v2134_v3 }
 0x526   : > { %v2336_v56 = vpop.permute.xlu0 %2335 }
 0x527   : > { %v2719_v63 = vsel %vm2701_vm7, %v2698_v61, %v2336_v56 }
 0x528   : > { %v2402_v4 = vpop.permute.xlu1 %2401 }
 0x529   : > { %v2739_v24 = vsel %vm9829_vm6, %v2718_v33, %v2402_v4 }
 0x52a   : > { %v2136_v50 = vpop.permute.xlu0 %2135 }
 0x52b   : > { %v2658_v53 = vsel %vm2638_vm9, %v2637_v5, %v2136_v50  ;;  %vm10473_vm9 = vmmov 0  }
 0x52c   : > { %v2202_v9 = vpop.permute.xlu1 %2201 }
 0x52d   : > { %v2678_v19 = vsel %vm10470_vm12, %v2657_v12, %v2202_v9  ;;  %vm3503_vm12 = vcmask 62465  }
 0x52e   : > { %v2404_v32 = vpop.permute.xlu0 %2403 }
 0x52f   : > { %v2740_v30 = vsel %vm9829_vm6, %v2719_v63, %v2404_v32 }
 0x530   : > { %v2920_v17 = vpop.permute.xlu1 %2919 }
 0x531   : > { %v2964_v28 = vsel %vm2947_vm1, %v2739_v24, %v2920_v17 }
 0x532   : > { %5396 = vmatprep.mubr.msk.f32.mxu0 %vm2985_vm13, %v2964_v28  ;;  %v2204_v36 = vpop.permute.xlu0 %2203 }
 0x533   : > { %v2679_v57 = vsel %vm10471_vm0, %v2658_v53, %v2204_v36  ;;  %vm9834_vm0 = vcmask 60416  }
 0x534   : > { %v2270_v16 = vpop.permute.xlu1 %2269 }
 0x535   : > { %v2699_v51 = vsel %vm2680_vm11, %v2678_v19, %v2270_v16 }
 0x536   : > { %v2922_v1 = vpop.permute.xlu0 %2921 }
 0x537   : > { %v2965_v0 = vsel %vm2947_vm1, %v2740_v30, %v2922_v1 }
 0x538   : > { %v2272_v10 = vpop.permute.xlu1 %2271  ;;  %5397 = vmatmul.mubr.msk.f32.gmra.mrb[18].mxu0 %vm2985_vm13, %v2965_v0 }
 0x539   : > { %v2700_v6 = vsel %vm2680_vm11, %v2679_v57, %v2272_v10  ;;  %vm3360_vm11 = vcmask 64517  }
 0x53a   : > { %v2338_v52 = vpop.permute.xlu0 %2337 }
 0x53b   : > { %v2720_v25 = vsel %vm2701_vm7, %v2699_v51, %v2338_v52 }
 0x53c   : > { %v2340_v43 = vpop.permute.xlu1 %2339 }
 0x53d   : > { %v2721_v31 = vsel %vm2701_vm7, %v2700_v6, %v2340_v43  ;;  %vm3398_vm7 = vcmask 63490  }
 0x53e   : > { %v2406_v46 = vpop.permute.xlu0 %2405 }
 0x53f   : > { %v2741_v2 = vsel %vm9829_vm6, %v2720_v25, %v2406_v46 }
 0x540   : > { %v2408_v35 = vpop.permute.xlu1 %2407 }
 0x541   : > { %v2742_v39 = vsel %vm9829_vm6, %v2721_v31, %v2408_v35  ;;  %vm3532_vm6 = vcmask 64518  }
 0x542   : > { %v2924_v23 = vpop.permute.xlu0 %2923 }
 0x543   : > { %v2966_v26 = vsel %vm2947_vm1, %v2741_v2, %v2924_v23 }
 0x544   : > { %v2926_v41 = vpop.permute.xlu1 %2925  ;;  %5399 = vmatprep.mubr.msk.f32.mxu0 %vm2985_vm13, %v2966_v26 }
 0x545   : > { %v2967_v59 = vsel %vm2947_vm1, %v2742_v39, %v2926_v41  ;;  %vm3362_vm1 = vcmask 58368  }
 0x546   : > { %5400 = vmatmul.mubr.msk.f32.gmra.mrb[20].mxu0 %vm2985_vm13, %v2967_v59 }
 0x547   : > { %5476 = vmatprep.mubr.msk.f32.mxu0 %vm10473_vm9, %v10472_v42 }
 0x5c1   : > { %v5374_v62 = vpop.f32.mrb[2].mxu0 }
 0x5c2   : > { %v3118_v47 = vadd.f32 %v5374_v62, %v8970_v27  ;;  %v3112_v34 = vpop.f32.mrb[3].mxu0 }
 0x5c3   : > { %v3113_v18 = vadd.f32 %v8970_v27, %v3112_v34 }
 0x5c4   : > { %v3232_v13 = vmin.f32 %v3118_v47, 0.0  ;;  %vm3212_vm13 = vcmp.gt.f32.partialorder %v3118_v47, 0.0 }
 0x5c5   : > { %v3231_v15 = vmin.f32 %v3113_v18, 0.0  ;;  %vm3211_vm3 = vcmp.gt.f32.partialorder %v3113_v18, 0.0 }
 0x5c6   : > { %v3253_v58 = vmul.f32 1.442695, %v3232_v13 }
 0x5c7   : > { %v3251_v20 = vmul.f32 1.442695, %v3231_v15 }
 0x5c8   : > { %5616 = vpow2.f32 %v3253_v58  ;;  %v5377_v14 = vpop.f32.mrb[4].mxu0 }
 0x5c9   : > { %5618 = vpow2.f32 %v3251_v20  ;;  %v8975_v44 = vadd.f32 %v5377_v14, %v8970_v27  ;;  %v3122_v11 = vpop.f32.mrb[5].mxu0 }
 0x5ca   : > { %v8978_v40 = vadd.f32 %v8970_v27, %v3122_v11 }
 0x5cb   : > { %v3234_v8 = vmin.f32 %v8975_v44, 0.0 }
 0x5cc   : > { %v3233_v29 = vmin.f32 %v8978_v40, 0.0  ;;  %vm3213_vm8 = vcmp.gt.f32.partialorder %v8978_v40, 0.0 }
 0x5cd   : > { %v3257_v37 = vmul.f32 1.442695, %v3234_v8  ;;  %v5380_v49 = vpop.f32.mrb[6].mxu0 }
 0x5ce   : > { %v3255_v3 = vmul.f32 1.442695, %v3233_v29  ;;  %v8983_v56 = vadd.f32 %v5380_v49, %v8970_v27  ;;  %v3132_v4 = vpop.f32.mrb[7].mxu0 }
 0x5cf   : > { %5620 = vpow2.f32 %v3257_v37  ;;  %v8986_v50 = vadd.f32 %v8970_v27, %v3132_v4 }
 0x5d0   : > { %5622 = vpow2.f32 %v3255_v3  ;;  %v3236_v9 = vmin.f32 %v8983_v56, 0.0  ;;  %vm3216_vm4 = vcmp.gt.f32.partialorder %v8983_v56, 0.0 }
 0x5d1   : > { %v3235_v48 = vmin.f32 %v8986_v50, 0.0 }
 0x5d2   : > { %v5383_v7 = vpop.f32.mrb[8].mxu0  ;;  %v5617_v33 = vpop.eup %5616  ;;  %v3261_v32 = vmul.f32 1.442695, %v3236_v9 }
 0x5d3   : > { %v8991_v24 = vadd.f32 %v5383_v7, %v8970_v27  ;;  %v3142_v17 = vpop.f32.mrb[9].mxu0  ;;  %v5619_v28 = vpop.eup %5618  ;;  %v5204_v60 = vadd.f32 -1.0, %v5617_v33  ;;  %v3259_v36 = vmul.f32 1.442695, %v3235_v48 }
 0x5d4   : > { %v8994_v21 = vadd.f32 %v8970_v27, %v3142_v17  ;;  %v5203_v16 = vadd.f32 -1.0, %v5619_v28  ;;  %5624 = vpow2.f32 %v3261_v32 }
 0x5d5   : > { %v3238_v61 = vmin.f32 %v8991_v24, 0.0  ;;  %v3312_v63 = vsel %vm3212_vm13, %v3118_v47, %v5204_v60  ;;  %5626 = vpow2.f32 %v3259_v36  ;;  %vm3465_vm13 = vcmask 64516  }
 0x5d6   : > { %v3237_v30 = vmin.f32 %v8994_v21, 0.0  ;;  %v3363_v10 = vsel %vm3362_vm1, %v3312_v63, -inf  ;;  %v3399_v0 = vsel %vm3398_vm7, %v3312_v63, -inf  ;;  %v3311_v52 = vsel %vm3211_vm3, %v3113_v18, %v5203_v16 }
 0x5d7   : > { %v3400_v43 = vrot.slane %v3399_v0, 4  ;;  %v3332_v45 = vsel %vm3331_vm10, %v3311_v52, -inf  ;;  %v3361_v22 = vsel %vm3360_vm11, %v3311_v52, -inf  ;;  %v3265_v54 = vmul.f32 1.442695, %v3238_v61 }
 0x5d8   : > { %v8998_v1 = vpop.f32.mrb[10].mxu0  ;;  %v3333_v38 = vrot.slane %v3332_v45, 4  ;;  %v3364_v12 = vmax.f32 %v3361_v22, %v3363_v10  ;;  %v3263_v19 = vmul.f32 1.442695, %v3237_v30  ;;  %vm3214_vm3 = vcmp.gt.f32.partialorder %v8975_v44, 0.0 }
 0x5d9   : > { %v9002_v55 = vpop.f32.mrb[11].mxu0  ;;  %v5621_v5 = vpop.eup %5620  ;;  %v3401_v46 = vmax.f32 %v3399_v0, %v3400_v43  ;;  %5628 = vpow2.f32 %v3265_v54  ;;  %v3428_v14 = vsel %vm9835_vm15, %v3312_v63, -inf  ;;  %v9032_v36 = vadd.f32 %v8998_v1, %v8970_v27 }
 0x5da   : > { %v5623_v35 = vpop.eup %5622  ;;  %v3334_v51 = vmax.f32 %v3332_v45, %v3333_v38  ;;  %v3365_v57 = vrot.slane %v3364_v12, 4  ;;  %v5206_v6 = vadd.f32 -1.0, %v5621_v5  ;;  %5630 = vpow2.f32 %v3263_v19 }
 0x5db   : > { %v3402_v31 = vrot.slane %v3401_v46, 2  ;;  %v5205_v2 = vadd.f32 -1.0, %v5623_v35  ;;  %v3240_v35 = vmin.f32 %v9032_v36, 0.0 }
 0x5dc   : > { %v9006_v53 = vpop.f32.mrb[12].mxu0  ;;  %v3335_v23 = vrot.slane %v3334_v51, 2  ;;  %v3366_v39 = vmax.f32 %v3364_v12, %v3365_v57  ;;  %v3314_v41 = vsel %vm3214_vm3, %v8975_v44, %v5206_v6  ;;  %vm3570_vm3 = vcmask 64515  }
 0x5dd   : > { %v9008_v25 = vpop.f32.mrb[13].mxu0  ;;  %v3403_v26 = vmax.f32 %v3401_v46, %v3402_v31  ;;  %v3504_v59 = vsel %vm3503_vm12, %v3314_v41, -inf  ;;  %v3468_v13 = vsel %vm3467_vm5, %v3314_v41, -inf  ;;  %v3313_v15 = vsel %vm3213_vm8, %v8978_v40, %v5205_v2 }
 0x5de   : > { %v5625_v47 = vpop.eup %5624  ;;  %v3336_v34 = vmax.f32 %v3334_v51, %v3335_v23  ;;  %v3367_v18 = vrot.slane %v3366_v39, 2  ;;  %v3430_v44 = vsel %vm9834_vm0, %v3313_v15, -inf  ;;  %v3466_v11 = vsel %vm3465_vm13, %v3313_v15, -inf }
 0x5df   : > { %v5627_v20 = vpop.eup %5626  ;;  %v5208_v8 = vadd.f32 -1.0, %v5625_v47  ;;  %v3505_v49 = vrot.slane %v3504_v59, 4  ;;  %v3431_v3 = vmax.f32 %v3428_v14, %v3430_v44  ;;  %v3404_v4 = vrot.slane %v3403_v26, 1 }
 0x5e0   : > { %v9015_v62 = vpop.f32.mrb[14].mxu0  ;;  %v3337_v29 = vrot.slane %v3336_v34, 1  ;;  %v3368_v37 = vmax.f32 %v3366_v39, %v3367_v18  ;;  %v3469_v9 = vmax.f32 %v3466_v11, %v3468_v13  ;;  %v5207_v48 = vadd.f32 -1.0, %v5627_v20 }
 0x5e1   : > { %v9019_v58 = vpop.f32.mrb[15].mxu0  ;;  %v3316_v40 = vsel %vm3216_vm4, %v8983_v56, %v5208_v8  ;;  %v3432_v33 = vrot.slane %v3431_v3, 4  ;;  %vm3215_vm8 = vcmp.gt.f32.partialorder %v8986_v50, 0.0  ;;  %v3405_v30 = vmax.f32 %v3403_v26, %v3404_v4 }
 0x5e2   : > { %v3369_v7 = vrot.slane %v3368_v37, 1  ;;  %v3470_v17 = vrot.slane %v3469_v9, 4  ;;  %v3339_v28 = vsel %vm3331_vm10, %v3316_v40, -inf  ;;  %v3315_v60 = vsel %vm3215_vm8, %v8986_v50, %v5207_v48 }
 0x5e3   : > { %v5629_v32 = vpop.eup %5628  ;;  %v3338_v16 = vmax.f32 %v3336_v34, %v3337_v29  ;;  %v3433_v63 = vmax.f32 %v3431_v3, %v3432_v33  ;;  %v3340_v56 = vrot.slane %v3339_v28, 4  ;;  %v3506_v10 = vmax.f32 %v3504_v59, %v3505_v49 }
 0x5e4   : > { %v3370_v61 = vmax.f32 %v3368_v37, %v3369_v7  ;;  %v3471_v0 = vmax.f32 %v3469_v9, %v3470_v17  ;;  %v3535_v52 = vsel %vm9836_vm2, %v3315_v60, -inf  ;;  %vm10474_vm4 = vcmask 1040384   ;;  %v5631_v50 = vpop.eup %5630 }
 0x5e5   : > { %v3533_v45 = vsel %vm3532_vm6, %v3314_v41, -inf  ;;  %v3434_v22 = vrot.slane %v3433_v63, 2  ;;  %v5210_v54 = vadd.f32 -1.0, %v5629_v32  ;;  %vm10475_vm8 = vcmask 1041408  }
 0x5e6   : > { %v3599_v43 = vsel %vm10474_vm4, %v3338_v16, %v3370_v61  ;;  %v3472_v1 = vrot.slane %v3471_v0, 2  ;;  %v3341_v12 = vmax.f32 %v3339_v28, %v3340_v56  ;;  %v3536_v5 = vmax.f32 %v3533_v45, %v3535_v52 }
 0x5e7   : > { %v3603_v38 = vsel %vm10475_vm8, %v3599_v43, %v3405_v30  ;;  %v3435_v46 = vmax.f32 %v3433_v63, %v3434_v22  ;;  %v3571_v19 = vsel %vm3570_vm3, %v3315_v60, -inf  ;;  %v9042_v51 = vadd.f32 %v8970_v27, %v9002_v55 }
 0x5e8   : > { %v3507_v57 = vrot.slane %v3506_v10, 2  ;;  %v3473_v6 = vmax.f32 %v3471_v0, %v3472_v1  ;;  %v3537_v31 = vrot.slane %v3536_v5, 4  ;;  %vm3218_vm4 = vcmp.gt.f32.partialorder %v8991_v24, 0.0 }
 0x5e9   : > { %v3436_v2 = vrot.slane %v3435_v46, 1  ;;  %v3371_v23 = vsel %vm3360_vm11, %v3316_v40, -inf  ;;  %vm3217_vm8 = vcmp.gt.f32.partialorder %v8994_v21, 0.0  ;;  %v5209_v39 = vadd.f32 -1.0, %v5631_v50 }
 0x5ea   : > { %v3474_v41 = vrot.slane %v3473_v6, 1  ;;  %v3342_v26 = vrot.slane %v3341_v12, 2  ;;  %v3572_v59 = vrot.slane %v3571_v19, 4  ;;  %v9048_v47 = vsel %vm3218_vm4, %v8991_v24, %v5210_v54 }
 0x5eb   : > { %v3437_v34 = vmax.f32 %v3435_v46, %v3436_v2  ;;  %v3317_v55 = vsel %vm3217_vm8, %v8994_v21, %v5209_v39  ;;  %v3269_v18 = vmul.f32 1.442695, %v3240_v35  ;;  %v3239_v13 = vmin.f32 %v9042_v51, 0.0 }
 0x5ec   : > { %v3508_v20 = vmax.f32 %v3506_v10, %v3507_v57  ;;  %v3475_v14 = vmax.f32 %v3473_v6, %v3474_v41  ;;  %v3538_v44 = vmax.f32 %v3536_v5, %v3537_v31  ;;  %v3372_v11 = vsel %vm3362_vm1, %v3317_v55, -inf }
 0x5ed   : > { %v9052_v15 = vpop.f32.mrb[16].mxu0  ;;  %v3607_v29 = vsel %vm10476_vm14, %v3603_v38, %v3437_v34  ;;  %v3439_v24 = vsel %vm9834_vm0, %v9048_v47, -inf  ;;  %v3373_v37 = vmax.f32 %v3371_v23, %v3372_v11  ;;  %v3406_v49 = vsel %vm3398_vm7, %v3317_v55, -inf }
 0x5ee   : > { %v3182_v8 = vpop.f32.mrb[17].mxu0  ;;  %vm10477_vm4 = vcmask 1043456   ;;  %v3343_v3 = vmax.f32 %v3341_v12, %v3342_v26  ;;  %v3573_v4 = vmax.f32 %v3571_v19, %v3572_v59  ;;  %v3407_v9 = vrot.slane %v3406_v49, 4 }
 0x5ef   : > { %v3611_v21 = vsel %vm10477_vm4, %v3607_v29, %v3475_v14  ;;  %v3374_v40 = vrot.slane %v3373_v37, 4  ;;  %v3438_v48 = vsel %vm9835_vm15, %v3317_v55, -inf  ;;  %5632 = vpow2.f32 %v3269_v18 }
 0x5f0   : > { %v3267_v7 = vmul.f32 1.442695, %v3239_v13  ;;  %v3539_v33 = vrot.slane %v3538_v44, 2  ;;  %v3408_v32 = vmax.f32 %v3406_v49, %v3407_v9  ;;  %v3440_v17 = vmax.f32 %v3438_v48, %v3439_v24 }
 0x5f1   : > { %v3375_v28 = vmax.f32 %v3373_v37, %v3374_v40  ;;  %v9063_v60 = vadd.f32 %v9006_v53, %v8970_v27  ;;  %v9067_v16 = vadd.f32 %v8970_v27, %v9008_v25  ;;  %v3509_v61 = vrot.slane %v3508_v20, 1 }
 0x5f2   : > { %5634 = vpow2.f32 %v3267_v7  ;;  %v3409_v63 = vrot.slane %v3408_v32, 2  ;;  %v3441_v56 = vrot.slane %v3440_v17, 4  ;;  %v9071_v30 = vadd.f32 %v9015_v62, %v8970_v27 }
 0x5f3   : > { %v3344_v10 = vrot.slane %v3343_v3, 1  ;;  %v3574_v0 = vrot.slane %v3573_v4, 2  ;;  %v3376_v52 = vrot.slane %v3375_v28, 2  ;;  %v3242_v43 = vmin.f32 %v9063_v60, 0.0 }
 0x5f4   : > { %v3540_v45 = vmax.f32 %v3538_v44, %v3539_v33  ;;  %v3410_v22 = vmax.f32 %v3408_v32, %v3409_v63  ;;  %v3442_v53 = vmax.f32 %v3440_v17, %v3441_v56  ;;  %v3241_v54 = vmin.f32 %v9067_v16, 0.0 }
 0x5f5   : > { %v3377_v50 = vmax.f32 %v3375_v28, %v3376_v52  ;;  %v3273_v25 = vmul.f32 1.442695, %v3242_v43  ;;  %v3244_v38 = vmin.f32 %v9071_v30, 0.0  ;;  %v9078_v1 = vadd.f32 %v8970_v27, %v9019_v58 }
 0x5f6   : > { %v3411_v62 = vrot.slane %v3410_v22, 1  ;;  %v3443_v12 = vrot.slane %v3442_v53, 2  ;;  %vm3220_vm14 = vcmp.gt.f32.partialorder %v9032_v36, 0.0  ;;  %v3271_v5 = vmul.f32 1.442695, %v3241_v54 }
 0x5f7   : > { %v3510_v46 = vmax.f32 %v3508_v20, %v3509_v61  ;;  %v3378_v19 = vrot.slane %v3377_v50, 1  ;;  %5636 = vpow2.f32 %v3273_v25  ;;  %v3277_v35 = vmul.f32 1.442695, %v3244_v38 }
 0x5f8   : > { %v3575_v57 = vmax.f32 %v3573_v4, %v3574_v0  ;;  %v3444_v6 = vmax.f32 %v3442_v53, %v3443_v12  ;;  %5638 = vpow2.f32 %v3271_v5  ;;  %v3243_v31 = vmin.f32 %v9078_v1, 0.0 }
 0x5f9   : > { %v5633_v2 = vpop.eup %5632  ;;  %v3345_v23 = vmax.f32 %v3343_v3, %v3344_v10  ;;  %v3541_v39 = vrot.slane %v3540_v45, 1  ;;  %v3379_v41 = vmax.f32 %v3377_v50, %v3378_v19  ;;  %5640 = vpow2.f32 %v3277_v35 }
 0x5fa   : > { %v3412_v58 = vmax.f32 %v3410_v22, %v3411_v62  ;;  %v3445_v26 = vrot.slane %v3444_v6, 1  ;;  %v5212_v59 = vadd.f32 -1.0, %v5633_v2  ;;  %vm3219_vm8 = vcmp.gt.f32.partialorder %v9042_v51, 0.0 }
 0x5fb   : > { %vm10478_vm4 = vcmask 1040384   ;;  %v3275_v18 = vmul.f32 1.442695, %v3243_v31  ;;  %v9085_v13 = vadd.f32 %v8970_v27, %v3182_v8  ;;  %vm10479_vm0 = vcmask 1044480  }
 0x5fc   : > { %v5635_v34 = vpop.eup %5634  ;;  %v3600_v55 = vsel %vm10478_vm4, %v3345_v23, %v3379_v41  ;;  %v3615_v20 = vsel %vm10479_vm0, %v3611_v21, %v3510_v46  ;;  %v3446_v14 = vmax.f32 %v3444_v6, %v3445_v26  ;;  %vm10480_vm15 = vcmask 1041408  }
 0x5fd   : > { %v3604_v44 = vsel %vm10480_vm15, %v3600_v55, %v3412_v58  ;;  %v3320_v11 = vsel %vm3220_vm14, %v9032_v36, %v5212_v59  ;;  %v5211_v29 = vadd.f32 -1.0, %v5635_v34  ;;  %v3542_v24 = vmax.f32 %v3540_v45, %v3541_v39 }
 0x5fe   : > { %v3576_v37 = vrot.slane %v3575_v57, 1  ;;  %v3544_v49 = vsel %vm9836_vm2, %v3320_v11, -inf  ;;  %v3578_v3 = vsel %vm3570_vm3, %v3320_v11, -inf  ;;  %v3476_v8 = vsel %vm3465_vm13, %v9048_v47, -inf }
 0x5ff   : > { %vm10481_vm4 = vcmask 1042432   ;;  %v3579_v21 = vrot.slane %v3578_v3, 4  ;;  %v3319_v9 = vsel %vm3219_vm8, %v9042_v51, %v5211_v29  ;;  %v3245_v7 = vmin.f32 %v9085_v13, 0.0 }
 0x600   : > { %v9097_v4 = vsel %vm10481_vm4, %v3604_v44, %v3446_v14  ;;  %v3477_v36 = vsel %vm3467_vm5, %v3319_v9, -inf  ;;  %v3511_v40 = vsel %vm3503_vm12, %v3319_v9, -inf  ;;  %v3543_v48 = vsel %vm3532_vm6, %v3319_v9, -inf }
 0x601   : > { %v3478_v33 = vmax.f32 %v3476_v8, %v3477_v36  ;;  %v3512_v32 = vrot.slane %v3511_v40, 4  ;;  %v3545_v17 = vmax.f32 %v3543_v48, %v3544_v49  ;;  %5642 = vpow2.f32 %v3275_v18  ;;  %v5637_v47 = vpop.eup %5636 }
 0x602   : > { %v3577_v28 = vmax.f32 %v3575_v57, %v3576_v37  ;;  %v3279_v61 = vmul.f32 1.442695, %v3245_v7  ;;  %vm10482_vm15 = vcmask 1045504   ;;  %v5639_v56 = vpop.eup %5638  ;;  %vm3222_vm0 = vcmp.gt.f32.partialorder %v9063_v60, 0.0 }
 0x603   : > { %v3619_v63 = vsel %vm10482_vm15, %v3615_v20, %v3542_v24  ;;  %v3479_v10 = vrot.slane %v3478_v33, 4  ;;  %v3513_v51 = vmax.f32 %v3511_v40, %v3512_v32  ;;  %v9110_v0 = vadd.f32 %v9052_v15, %v8970_v27  ;;  %v5641_v52 = vpop.eup %5640 }
 0x604   : > { %v3580_v43 = vmax.f32 %v3578_v3, %v3579_v21  ;;  %v5214_v45 = vadd.f32 -1.0, %v5637_v47  ;;  %v5213_v22 = vadd.f32 -1.0, %v5639_v56  ;;  %vm10483_vm14 = vcmask 1046528  }
 0x605   : > { %v9113_v53 = vsel %vm10483_vm14, %v3619_v63, %v3577_v28  ;;  %v3480_v54 = vmax.f32 %v3478_v33, %v3479_v10  ;;  %v3514_v50 = vrot.slane %v3513_v51, 2  ;;  %v3546_v25 = vrot.slane %v3545_v17, 4 }
 0x606   : > { %vm3221_vm8 = vcmp.gt.f32.partialorder %v9067_v16, 0.0  ;;  %v3322_v38 = vsel %vm3222_vm0, %v9063_v60, %v5214_v45  ;;  %v5216_v12 = vadd.f32 -1.0, %v5641_v52  ;;  %5644 = vpow2.f32 %v3279_v61 }
 0x607   : > { %v3321_v62 = vsel %vm3221_vm8, %v9067_v16, %v5213_v22  ;;  %v3481_v15 = vrot.slane %v3480_v54, 2  ;;  %v3515_v5 = vmax.f32 %v3513_v51, %v3514_v50  ;;  %v3246_v46 = vmin.f32 %v9110_v0, 0.0 }
 0x608   : > { %v3581_v19 = vrot.slane %v3580_v43, 2  ;;  %v3381_v35 = vsel %vm3362_vm1, %v3322_v38, -inf  ;;  %v3413_v57 = vsel %vm3398_vm7, %v3322_v38, -inf  ;;  %v3346_v6 = vsel %vm3331_vm10, %v3321_v62, -inf }
 0x609   : > { %v3482_v31 = vmax.f32 %v3480_v54, %v3481_v15  ;;  %v3516_v2 = vrot.slane %v3515_v5, 1  ;;  %v3547_v23 = vmax.f32 %v3545_v17, %v3546_v25  ;;  %vm3224_vm4 = vcmp.gt.f32.partialorder %v9071_v30, 0.0 }
 0x60a   : > { %v3414_v60 = vrot.slane %v3413_v57, 4  ;;  %v3347_v16 = vrot.slane %v3346_v6, 4  ;;  %v3380_v39 = vsel %vm3360_vm11, %v3321_v62, -inf  ;;  %v3324_v41 = vsel %vm3224_vm4, %v9071_v30, %v5216_v12 }
 0x60b   : > { %v5643_v58 = vpop.eup %5642  ;;  %v3483_v26 = vrot.slane %v3482_v31, 1  ;;  %v3382_v59 = vmax.f32 %v3380_v39, %v3381_v35  ;;  %vm3223_vm15 = vcmp.gt.f32.partialorder %v9078_v1, 0.0  ;;  %v3281_v34 = vmul.f32 1.442695, %v3246_v46  ;;  %v9126_v55 = vpop.f32.mrb[18].mxu0 }
 0x60c   : > { %v9128_v18 = vmax.f32 %v3580_v43, %v3581_v19  ;;  %v3415_v20 = vmax.f32 %v3413_v57, %v3414_v60  ;;  %v3348_v14 = vmax.f32 %v3346_v6, %v3347_v16  ;;  %v3518_v44 = vsel %vm3503_vm12, %v3324_v41, -inf  ;;  %v9131_v11 = vpop.f32.mrb[19].mxu0 }
 0x60d   : > { %v3484_v29 = vmax.f32 %v3482_v31, %v3483_v26  ;;  %v3548_v24 = vrot.slane %v3547_v23, 2  ;;  %v3383_v37 = vrot.slane %v3382_v59, 4  ;;  %v3519_v30 = vrot.slane %v3518_v44, 4 }
 0x60e   : > { %v3517_v49 = vmax.f32 %v3515_v5, %v3516_v2  ;;  %v3416_v3 = vrot.slane %v3415_v20, 2  ;;  %v3349_v8 = vrot.slane %v3348_v14, 2  ;;  %v5215_v21 = vadd.f32 -1.0, %v5643_v58 }
 0x60f   : > { %vm10484_vm0 = vcmask 1043456   ;;  %v3384_v36 = vmax.f32 %v3382_v59, %v3383_v37  ;;  %v3486_v40 = vsel %vm3467_vm5, %v3324_v41, -inf  ;;  %v3520_v48 = vmax.f32 %v3518_v44, %v3519_v30 }
 0x610   : > { %v3612_v9 = vsel %vm10484_vm0, %v9097_v4, %v3484_v29  ;;  %v5645_v7 = vpop.eup %5644  ;;  %vm10485_vm14 = vcmask 1044480   ;;  %v3417_v32 = vmax.f32 %v3415_v20, %v3416_v3  ;;  %v3350_v17 = vmax.f32 %v3348_v14, %v3349_v8 }
 0x611   : > { %v9137_v33 = vsel %vm10485_vm14, %v3612_v9, %v3517_v49  ;;  %v3323_v47 = vsel %vm3223_vm15, %v9078_v1, %v5215_v21  ;;  %vm10486_vm8 = vcmask 64519   ;;  %v3385_v61 = vrot.slane %v3384_v36, 2 }
 0x612   : > { %v3447_v28 = vsel %vm10486_vm8, %v3322_v38, -inf  ;;  %vm10487_vm4 = vcmask 60416   ;;  %v3485_v4 = vsel %vm3465_vm13, %v3323_v47, -inf  ;;  %v3521_v56 = vrot.slane %v3520_v48, 2 }
 0x613   : > { %v3448_v63 = vsel %vm10487_vm4, %v3323_v47, -inf  ;;  %v3487_v51 = vmax.f32 %v3485_v4, %v3486_v40  ;;  %vm3225_vm0 = vcmp.gt.f32.partialorder %v9085_v13, 0.0  ;;  %v3351_v52 = vrot.slane %v3350_v17, 1 }
 0x614   : > { %v3449_v10 = vmax.f32 %v3447_v28, %v3448_v63  ;;  %v3386_v43 = vmax.f32 %v3384_v36, %v3385_v61  ;;  %5646 = vpow2.f32 %v3281_v34  ;;  %v5217_v45 = vadd.f32 -1.0, %v5645_v7 }
 0x615   : > { %v3418_v22 = vrot.slane %v3417_v32, 1  ;;  %v3488_v50 = vrot.slane %v3487_v51, 4  ;;  %v3631_v1 = vrot.slane %v9113_v53, 7  ;;  %v3583_v25 = vrot.slane %v9128_v18, 1 }
 0x616   : > { %v3450_v54 = vrot.slane %v3449_v10, 4  ;;  %v3549_v38 = vmax.f32 %v3547_v23, %v3548_v24  ;;  %v3387_v62 = vrot.slane %v3386_v43, 1  ;;  %v3552_v12 = vsel %vm3532_vm6, %v3324_v41, -inf }
 0x617   : > { %v3522_v15 = vmax.f32 %v3520_v48, %v3521_v56  ;;  %v3489_v46 = vmax.f32 %v3487_v51, %v3488_v50  ;;  %v3325_v19 = vsel %vm3225_vm0, %v9085_v13, %v5217_v45  ;;  %v3352_v35 = vmax.f32 %v3350_v17, %v3351_v52 }
 0x618   : > { %v3451_v5 = vmax.f32 %v3449_v10, %v3450_v54  ;;  %v3388_v57 = vmax.f32 %v3386_v43, %v3387_v62  ;;  %v3553_v6 = vsel %vm9836_vm2, %v3325_v19, -inf  ;;  %v3585_v31 = vsel %vm3570_vm3, %v3325_v19, -inf }
 0x619   : > { %v3419_v53 = vmax.f32 %v3417_v32, %v3418_v22  ;;  %v3490_v60 = vrot.slane %v3489_v46, 2  ;;  %v3554_v23 = vmax.f32 %v3552_v12, %v3553_v6  ;;  %v5401_v16 = vpop.f32.mrb[20].mxu0  ;;  %vm10488_vm15 = vcmask 1040384  }
 0x61a   : > { %v3452_v2 = vrot.slane %v3451_v5, 2  ;;  %v3601_v39 = vsel %vm10488_vm15, %v3352_v35, %v3388_v57  ;;  %v3586_v41 = vrot.slane %v3585_v31, 4  ;;  %vm10489_vm14 = vmmov %vm10488_vm15  ;;  %v3202_v13 = vpop.f32.mrb[21].mxu0  ;;  %v3550_v59 = vrot.slane %v3549_v38, 1 }
 0x61b   : > { %v9156_v58 = vsel %vm10489_vm14, 0.0, %v3631_v1  ;;  %vm10490_vm8 = vmmov %vm10489_vm14  ;;  %vm10491_vm4 = vcmask 1041408   ;;  %v3491_v14 = vmax.f32 %v3489_v46, %v3490_v60  ;;  %v3555_v44 = vrot.slane %v3554_v23, 4  ;;  %v3739_v60 = vld [vmem:[%s9681_s8] sm:$0xff] }
 0x61c   : > { %v3643_v26 = vsel %vm10490_vm8, %v3631_v1, 0.0  ;;  %v3605_v34 = vsel %vm10491_vm4, %v3601_v39, %v3419_v53  ;;  %v3453_v20 = vmax.f32 %v3451_v5, %v3452_v2  ;;  %v3587_v29 = vmax.f32 %v3585_v31, %v3586_v41 }
 0x61d   : > { %v3655_v24 = vrot.slane %v9156_v58, 1  ;;  %v3656_v37 = vrot.slane %v3643_v26, 1  ;;  %v3523_v30 = vrot.slane %v3522_v15, 1  ;;  %v3492_v3 = vrot.slane %v3491_v14, 1 }
 0x61e   : > { %v3454_v49 = vrot.slane %v3453_v20, 1  ;;  %v3679_v8 = vrot.slane %v9156_v58, 2  ;;  %v5647_v21 = vpop.eup %5646  ;;  %v3556_v9 = vmax.f32 %v3554_v23, %v3555_v44  ;;  %v3588_v36 = vrot.slane %v3587_v29, 2  ;;  %v3740_v23 = vld [vmem:[%s9681_s8 + $0x8] sm:$0xff] }
 0x61f   : > { %vm10492_vm0 = vcmask 1046528   ;;  %v3680_v48 = vrot.slane %v3643_v26, 2  ;;  %v3551_v7 = vmax.f32 %v3549_v38, %v3550_v59  ;;  %v3493_v17 = vmax.f32 %v3491_v14, %v3492_v3 }
 0x620   : > { %v3657_v40 = vsel %vm10492_vm0, %v3655_v24, %v3656_v37  ;;  %v3455_v32 = vmax.f32 %v3453_v20, %v3454_v49  ;;  %v3584_v47 = vmax.f32 %v9128_v18, %v3583_v25  ;;  %v3557_v28 = vrot.slane %v3556_v9, 2 }
 0x621   : > { %3667 = vrot.lane.b32.xlu0 %v3657_v40, %s9991_s20  ;;  %v3589_v61 = vmax.f32 %v3587_v29, %v3588_v36  ;;  %v3703_v63 = vrot.slane %v9156_v58, 3  ;;  %vm10493_vm15 = vcmask 1042432   ;;  %v3704_v56 = vrot.slane %v3643_v26, 3  ;;  %v3742_v26 = vld [vmem:[%s9681_s8 + $0x18] sm:$0xff] }
 0x622   : > { %v3609_v4 = vsel %vm10493_vm15, %v3605_v34, %v3455_v32  ;;  %vm10494_vm14 = vcmask 1045504   ;;  %v9171_v51 = vadd.f32 %v9126_v55, %v8970_v27  ;;  %v3524_v52 = vmax.f32 %v3522_v15, %v3523_v30 }
 0x623   : > { %v3620_v10 = vsel %vm10494_vm14, %v9137_v33, %v3551_v7  ;;  %vm10495_vm8 = vcmask 1043456   ;;  %v3558_v45 = vmax.f32 %v3556_v9, %v3557_v28  ;;  %vm10496_vm4 = vmmov %vm10494_vm14  ;;  %v5218_v22 = vadd.f32 -1.0, %v5647_v21 }
 0x624   : > { %v3613_v43 = vsel %vm10495_vm8, %v3609_v4, %v3493_v17  ;;  %v3681_v18 = vsel %vm10496_vm4, %v3679_v8, %v3680_v48  ;;  %v3624_v54 = vsel %vm10492_vm0, %v3620_v10, %v3584_v47  ;;  %v3248_v50 = vmin.f32 %v9171_v51, 0.0 }
 0x625   : > { %3691 = vrot.lane.b32.xlu0 %v3681_v18, %s10014_s26  ;;  %v9180_v33 = vadd.f32 %v8970_v27, %v9131_v11  ;;  %v3559_v1 = vrot.slane %v3558_v45, 1  ;;  %v3590_v55 = vrot.slane %v3589_v61, 1  ;;  %v3632_v25 = vrot.slane %v3624_v54, 7 }
 0x626   : > { %vm10497_vm15 = vcmask 1044480   ;;  %v3285_v12 = vmul.f32 1.442695, %v3248_v50  ;;  %vm10499_vm8 = vcmask 1040384   ;;  %v9190_v35 = vadd.f32 %v5401_v16, %v8970_v27 }
 0x627   : > { %v3617_v38 = vsel %vm10497_vm15, %v3613_v43, %v3524_v52  ;;  %vm10498_vm14 = vmmov %vm10497_vm15  ;;  %v3247_v15 = vmin.f32 %v9180_v33, 0.0  ;;  %v3560_v5 = vmax.f32 %v3558_v45, %v3559_v1  ;;  %v9186_v46 = vsel %vm10499_vm8, 0.0, %v3632_v25 }
 0x628   : > { %v3705_v62 = vsel %vm10498_vm14, %v3703_v63, %v3704_v56  ;;  %vm10500_vm4 = vmmov %vm10499_vm8  ;;  %vm3226_vm0 = vcmp.gt.f32.partialorder %v9110_v0, 0.0  ;;  %v3658_v11 = vrot.slane %v9186_v46, 1  ;;  %v9196_v6 = vadd.f32 %v8970_v27, %v3202_v13 }
 0x629   : > { %v3644_v19 = vsel %vm10500_vm4, %v3632_v25, 0.0  ;;  %3715 = vrot.lane.b32.xlu0 %v3705_v62, %s10172_s3  ;;  %v3326_v31 = vsel %vm3226_vm0, %v9110_v0, %v5218_v22  ;;  %v3591_v53 = vmax.f32 %v3589_v61, %v3590_v55  ;;  %5648 = vpow2.f32 %v3285_v12  ;;  %v3741_v0 = vld [vmem:[%s9681_s8 + $0x10] sm:$0xff] }
 0x62a   : > { %v3659_v57 = vrot.slane %v3644_v19, 1  ;;  %v3283_v2 = vmul.f32 1.442695, %v3247_v15  ;;  %vm10501_vm15 = vcmask 1046528   ;;  %v3682_v39 = vrot.slane %v9186_v46, 2 }
 0x62b   : > { %v3683_v41 = vrot.slane %v3644_v19, 2  ;;  %vm10502_vm14 = vcmask 1045504   ;;  %vm10503_vm8 = vmmov %vm10501_vm15  ;;  %v3250_v59 = vmin.f32 %v9190_v35, 0.0  ;;  %v3353_v34 = vsel %vm3331_vm10, %v3326_v31, -inf }
 0x62c   : > { %v3660_v16 = vsel %vm10501_vm15, %v3658_v11, %v3659_v57  ;;  %v3621_v27 = vsel %vm10502_vm14, %v3617_v38, %v3560_v5  ;;  %5650 = vpow2.f32 %v3283_v2  ;;  %v3249_v14 = vmin.f32 %v9196_v6, 0.0  ;;  %vm10504_vm4 = vmmov %vm10502_vm14 }
 0x62d   : > { %3669 = vrot.lane.b32.xlu1 %v3660_v16, %s9991_s20  ;;  %v3625_v13 = vsel %vm10503_vm8, %v3621_v27, %v3591_v53  ;;  %v5526_v44 = vpack.c.bf16 %v3740_v23, %v3739_v60  ;;  %v3706_v29 = vrot.slane %v9186_v46, 3  ;;  %v3707_v24 = vrot.slane %v3644_v19, 3  ;;  %vm10507_vm10 = vmmov %vm10503_vm8 }
 0x62e   : > { %v3633_v20 = vrot.slane %v3625_v13, 7  ;;  %v3289_v37 = vmul.f32 1.442695, %v3250_v59  ;;  %v5530_v30 = vpack.c.bf16 %v3742_v26, %v3741_v0  ;;  %v3684_v49 = vsel %vm10504_vm4, %v3682_v39, %v3683_v41 }
 0x62f   : > { %vm10505_vm0 = vcmask 1040384   ;;  %v3287_v21 = vmul.f32 1.442695, %v3249_v14  ;;  %5527 = vmatprep.subr.bf16.mxu1 %v5526_v44  ;;  %v3354_v40 = vrot.slane %v3353_v34, 4  ;;  %vm10508_vm14 = vcmask 1044480  }
 0x630   : > { %v9222_v3 = vsel %vm10505_vm0, 0.0, %v3633_v20  ;;  %vm10506_vm15 = vmmov %vm10505_vm0  ;;  %5652 = vpow2.f32 %v3289_v37  ;;  %5529 = vmatpush3.bf16.msra.mxu1 %v5526_v44  ;;  %v3708_v17 = vsel %vm10508_vm14, %v3706_v29, %v3707_v24  ;;  %vm3228_vm8 = vcmp.gt.f32.partialorder %v9171_v51, 0.0 }
 0x631   : > { %v3645_v8 = vsel %vm10506_vm15, %v3633_v20, 0.0  ;;  %3693 = vrot.lane.b32.xlu1 %v3684_v49, %s10014_s26  ;;  %v3661_v9 = vrot.slane %v9222_v3, 1  ;;  %5654 = vpow2.f32 %v3287_v21  ;;  %5531 = vmatprep.subr.bf16.mxu1 %v5530_v30  ;;  %v3685_v7 = vrot.slane %v9222_v3, 2 }
 0x632   : > { %v3662_v36 = vrot.slane %v3645_v8, 1  ;;  %v3686_v32 = vrot.slane %v3645_v8, 2  ;;  %v3355_v28 = vmax.f32 %v3353_v34, %v3354_v40  ;;  %v3709_v56 = vrot.slane %v9222_v3, 3 }
 0x633   : > { %v5649_v47 = vpop.eup %5648  ;;  %v3710_v10 = vrot.slane %v3645_v8, 3  ;;  %vm10509_vm0 = vcmask 60416   ;;  %vm3227_vm15 = vcmp.gt.f32.partialorder %v9180_v33, 0.0  ;;  %v3389_v22 = vsel %vm3360_vm11, %v3326_v31, -inf }
 0x634   : > { %v3663_v48 = vsel %vm10507_vm10, %v3661_v9, %v3662_v36  ;;  %5533 = vmatpush3.bf16.msra.mxu1 %v5530_v30  ;;  %v5220_v61 = vadd.f32 -1.0, %v5649_v47  ;;  %v3687_v4 = vsel %vm10504_vm4, %v3685_v7, %v3686_v32  ;;  %v3356_v18 = vrot.slane %v3355_v28, 2 }
 0x635   : > { %3671 = vrot.lane.b32.xlu0 %v3663_v48, %s9991_s20  ;;  %3717 = vrot.lane.b32.xlu1 %v3708_v17, %s10172_s3  ;;  %vm10510_vm10 = vcmask 64519   ;;  %vm3230_vm11 = vcmp.gt.f32.partialorder %v9190_v35, 0.0  ;;  %vm10514_vm4 = vcmask 1043456  }
 0x636   : > { %v5651_v63 = vpop.eup %5650  ;;  %v3328_v52 = vsel %vm3228_vm8, %v9171_v51, %v5220_v61  ;;  %v3711_v51 = vsel %vm10508_vm14, %v3709_v56, %v3710_v10  ;;  %vm3229_vm8 = vcmp.gt.f32.partialorder %v9196_v6, 0.0  ;;  %v3357_v53 = vmax.f32 %v3355_v28, %v3356_v18 }
 0x637   : > { %v5219_v43 = vadd.f32 -1.0, %v5651_v63  ;;  %v3457_v45 = vsel %vm10509_vm0, %v3328_v52, -inf  ;;  %v3494_v0 = vsel %vm3465_vm13, %v3328_v52, -inf  ;;  %vm10513_vm13 = vcmask 1042432   ;;  %vm10515_vm0 = vmmov %vm10508_vm14 }
 0x639   : > { %3695 = vrot.lane.b32.xlu0 %v3687_v4, %s10014_s26  ;;  %v3327_v54 = vsel %vm3227_vm15, %v9180_v33, %v5219_v43  ;;  %vm10516_vm15 = vcmask 1045504  }
 0x63a   : > { %v5653_v50 = vpop.eup %5652  ;;  %v3390_v1 = vsel %vm3362_vm1, %v3327_v54, -inf  ;;  %v3420_v55 = vsel %vm3398_vm7, %v3327_v54, -inf  ;;  %v3456_v25 = vsel %vm10510_vm10, %v3327_v54, -inf  ;;  %vm10511_vm7 = vcmask 1040384  }
 0x63b   : > { %v5655_v38 = vpop.eup %5654  ;;  %v3391_v62 = vmax.f32 %v3389_v22, %v3390_v1  ;;  %v3421_v12 = vrot.slane %v3420_v55, 4  ;;  %v3458_v15 = vmax.f32 %v3456_v25, %v3457_v45  ;;  %v5222_v5 = vadd.f32 -1.0, %v5653_v50  ;;  %vm10518_vm14 = vmmov %vm10511_vm7 }
 0x63c   : > { %v5221_v33 = vadd.f32 -1.0, %v5655_v38  ;;  %vm10517_vm10 = vcmask 1046528  }
 0x63d   : > { %3719 = vrot.lane.b32.xlu0 %v3711_v51, %s10172_s3  ;;  %v3392_v19 = vrot.slane %v3391_v62, 4  ;;  %v3422_v11 = vmax.f32 %v3420_v55, %v3421_v12  ;;  %v3459_v57 = vrot.slane %v3458_v15, 4  ;;  %v3330_v31 = vsel %vm3230_vm11, %v9190_v35, %v5222_v5  ;;  %vm10519_vm11 = vmmov %vm10511_vm7 }
 0x63e   : > { %v3562_v2 = vsel %vm9836_vm2, %v3330_v31, -inf  ;;  %v3592_v60 = vsel %vm3570_vm3, %v3330_v31, -inf  ;;  %v3329_v23 = vsel %vm3229_vm8, %v9196_v6, %v5221_v33  ;;  %v3358_v6 = vrot.slane %v3357_v53, 1  ;;  %vm10520_vm8 = vmmov %vm10517_vm10 }
 0x63f   : > { %v3393_v16 = vmax.f32 %v3391_v62, %v3392_v19  ;;  %v3423_v39 = vrot.slane %v3422_v11, 2  ;;  %v3460_v41 = vmax.f32 %v3458_v15, %v3459_v57  ;;  %v3593_v27 = vrot.slane %v3592_v60, 4 }
 0x640   : > { %v3495_v26 = vsel %vm3467_vm5, %v3329_v23, -inf  ;;  %v3525_v13 = vsel %vm3503_vm12, %v3329_v23, -inf  ;;  %v3561_v59 = vsel %vm3532_vm6, %v3329_v23, -inf  ;;  %v3359_v47 = vmax.f32 %v3357_v53, %v3358_v6  ;;  %v4008_v6 = vld [vmem:[%s9677_s4 + $0x8] sm:$0xf] }
 0x641   : > { %v3394_v35 = vrot.slane %v3393_v16, 2  ;;  %v3424_v34 = vmax.f32 %v3422_v11, %v3423_v39  ;;  %v3461_v20 = vrot.slane %v3460_v41, 2  ;;  %v3594_v14 = vmax.f32 %v3592_v60, %v3593_v27 }
 0x642   : > { %v3496_v44 = vmax.f32 %v3494_v0, %v3495_v26  ;;  %v3526_v29 = vrot.slane %v3525_v13, 4  ;;  %v3563_v24 = vmax.f32 %v3561_v59, %v3562_v2  ;;  %vm10512_vm12 = vcmask 1041408  }
 0x643   : > { %v3395_v37 = vmax.f32 %v3393_v16, %v3394_v35  ;;  %v3462_v30 = vmax.f32 %v3460_v41, %v3461_v20  ;;  %v3425_v49 = vrot.slane %v3424_v34, 1  ;;  %v3595_v48 = vrot.slane %v3594_v14, 2 }
 0x644   : > { %v3497_v8 = vrot.slane %v3496_v44, 4  ;;  %v3527_v21 = vmax.f32 %v3525_v13, %v3526_v29  ;;  %v3564_v9 = vrot.slane %v3563_v24, 4  ;;  %v5702_v19 = vmov 0.0|0.0  }
 0x645   : > { %v3396_v36 = vrot.slane %v3395_v37, 1  ;;  %v3463_v40 = vrot.slane %v3462_v30, 1  ;;  %v3426_v61 = vmax.f32 %v3424_v34, %v3425_v49  ;;  %v3596_v43 = vmax.f32 %v3594_v14, %v3595_v48  ;;  %5534 = vmatprep.subr.bf16.mxu1 %v5702_v19  ;;  %5570 = vmatprep.subr.bf16.mxu0 %v5702_v19  ;;  %v9299_v49 = vld [vmem:[%s9293_s29] sm:$0xff] }
 0x646   : > { %v3498_v7 = vmax.f32 %v3496_v44, %v3497_v8  ;;  %v3528_v32 = vrot.slane %v3527_v21, 2  ;;  %v3565_v17 = vmax.f32 %v3563_v24, %v3564_v9  ;;  %v4007_v24 = vld [vmem:[%s9677_s4] sm:$0xff]  ;;  %v9303_v9 = vld [vmem:[%s9293_s29 + $0x8] sm:$0xff] }
 0x647   : > { %v3397_v28 = vmax.f32 %v3395_v37, %v3396_v36  ;;  %v3464_v10 = vmax.f32 %v3462_v30, %v3463_v40  ;;  %v3597_v25 = vrot.slane %v3596_v43, 1  ;;  %v5535_v30 = vpack.c.bf16 %v4008_v6, %v4007_v24  ;;  %v9306_v36 = vld [vmem:[%s9293_s29 + $0x18] sm:$0xff]  ;;  %v9309_v40 = vld [vmem:[%s9293_s29 + $0x20] sm:$0xff] }
 0x648   : > { %v3499_v63 = vrot.slane %v3498_v7, 2  ;;  %v3529_v4 = vmax.f32 %v3527_v21, %v3528_v32  ;;  %v3566_v56 = vrot.slane %v3565_v17, 2  ;;  %v4013_v32 = vrot.slane %v9303_v9, 2 }
 0x649   : > { %v3602_v52 = vsel %vm10511_vm7, %v3359_v47, %v3397_v28  ;;  %v3598_v15 = vmax.f32 %v3596_v43, %v3597_v25  ;;  %vm10521_vm7 = vmmov %vm10516_vm15  ;;  %v4041_v47 = vrot.slane %v9309_v40, 2 }
 0x64a   : > { %v3606_v45 = vsel %vm10512_vm12, %v3602_v52, %v3426_v61  ;;  %v3500_v18 = vmax.f32 %v3498_v7, %v3499_v63  ;;  %v3567_v22 = vmax.f32 %v3565_v17, %v3566_v56  ;;  %v3530_v50 = vrot.slane %v3529_v4, 1  ;;  %vm10522_vm12 = vmmov %vm10515_vm0 }
 0x64b   : > { %v3610_v54 = vsel %vm10513_vm13, %v3606_v45, %v3464_v10  ;;  %vm10523_vm13 = vcmask 64512   ;;  %v4012_v7 = vrot.slane %v9299_v49, 2  ;;  %v4040_v17 = vrot.slane %v9306_v36, 2 }
 0x64c   : > { %v3501_v1 = vrot.slane %v3500_v18, 1  ;;  %v3568_v55 = vrot.slane %v3567_v22, 1  ;;  %v3531_v38 = vmax.f32 %v3529_v4, %v3530_v50 }
 0x64e   : > { %v3502_v51 = vmax.f32 %v3500_v18, %v3501_v1  ;;  %v3569_v62 = vmax.f32 %v3567_v22, %v3568_v55 }
 0x650   : > { %v3614_v12 = vsel %vm10514_vm4, %v3610_v54, %v3502_v51  ;;  %vm10524_vm4 = vcmask 130048  }
 0x651   : > { %v3618_v5 = vsel %vm10515_vm0, %v3614_v12, %v3531_v38  ;;  %vm10525_vm0 = vcmask 195584  }
 0x652   : > { %v3622_v33 = vsel %vm10516_vm15, %v3618_v5, %v3569_v62  ;;  %vm10526_vm15 = vcmask 261120  }
 0x653   : > { %v3626_v11 = vsel %vm10517_vm10, %v3622_v33, %v3598_v15  ;;  %vm10528_vm10 = vmmov %vm10523_vm13 }
 0x654   : > { %v3634_v57 = vrot.slane %v3626_v11, 7 }
 0x656   : > { %v9266_v31 = vsel %vm10518_vm14, 0.0, %v3634_v57  ;;  %v3646_v53 = vsel %vm10519_vm11, %v3634_v57, 0.0  ;;  %vm5703_vm14 = vmmov 1   ;;  %vm10529_vm11 = vcmask 1043456  }
 0x657   : > { %v3664_v2 = vrot.slane %v9266_v31, 1  ;;  %v3665_v60 = vrot.slane %v3646_v53, 1  ;;  %v3688_v16 = vrot.slane %v9266_v31, 2  ;;  %v3689_v39 = vrot.slane %v3646_v53, 2 }
 0x658   : > { %v3712_v27 = vrot.slane %v9266_v31, 3  ;;  %v3713_v0 = vrot.slane %v3646_v53, 3 }
 0x659   : > { %v3666_v23 = vsel %vm10520_vm8, %v3664_v2, %v3665_v60  ;;  %v3690_v41 = vsel %vm10521_vm7, %v3688_v16, %v3689_v39  ;;  %vm5536_vm8 = vmpackc.low %vm10529_vm11, %vm5703_vm14 }
 0x65a   : > { %3673 = vrot.lane.b32.xlu1 %v3666_v23, %s9991_s20  ;;  %v3714_v26 = vsel %vm10522_vm12, %v3712_v27, %v3713_v0  ;;  %vm10530_vm7 = vmmov %vm10524_vm4 }
 0x65b   : > { %vm10531_vm12 = vmmov %vm10525_vm0 }
 0x65c   : > { %vm10537_vm11 = vmmov %vm10531_vm12 }
 0x65e   : > { %3697 = vrot.lane.b32.xlu1 %v3690_v41, %s10014_s26 }
 0x662   : > { %3721 = vrot.lane.b32.xlu1 %v3714_v26, %s10172_s3 }
 0x693   : > { %v3668_v13 = vpop.permute.xlu0 %3667 }
 0x694   : > { %v3727_v35 = vsel %vm10523_vm13, %v9156_v58, %v3668_v13  ;;  %vm10532_vm13 = vmmov %vm10526_vm15 }
 0x697   : > { %v3692_v59 = vpop.permute.xlu0 %3691 }
 0x698   : > { %v3731_v34 = vsel %vm10524_vm4, %v3727_v35, %v3692_v59  ;;  %vm10533_vm4 = vmmov %vm10528_vm10 }
 0x69b   : > { %v3716_v20 = vpop.permute.xlu0 %3715 }
 0x69c   : > { %v3735_v14 = vsel %vm10525_vm0, %v3731_v34, %v3716_v20  ;;  %vm10534_vm0 = vmmov %vm10530_vm7 }
 0x69d   : > { %5410 = vmatprep.mubr.msk.f32.mxu1 %vm10526_vm15, %v3735_v14  ;;  %vm10535_vm15 = vcmask 1045504  }
 0x69e   : > { %v4014_v4 = vsel %vm10535_vm15, %v4012_v7, %v4013_v32  ;;  %vm10536_vm14 = vmmov %vm10535_vm15  ;;  %vm10542_vm15 = vcmask 130048  }
 0x69f   : > { %v3670_v44 = vpop.permute.xlu1 %3669  ;;  %v4042_v56 = vsel %vm10536_vm14, %v4040_v17, %v4041_v47 }
 0x6a0   : > { %v3728_v58 = vsel %vm10528_vm10, %v9186_v46, %v3670_v44  ;;  %vm4018_vm10 = vcmask 93184  }
 0x6a1   : > { %v4019_v43 = vsel %vm4018_vm10, %v4013_v32, 0.0  ;;  %v4046_v18 = vsel %vm4018_vm10, %v4041_v47, 0.0  ;;  %vm10543_vm10 = vmmov %vm10537_vm11 }
 0x6a3   : > { %v3694_v29 = vpop.permute.xlu1 %3693 }
 0x6a4   : > { %v3732_v8 = vsel %vm10530_vm7, %v3728_v58, %v3694_v29  ;;  %vm10539_vm7 = vcmask 97280  }
 0x6a5   : > { %v4017_v52 = vsel %vm10539_vm7, %v4014_v4, 0.0 }
 0x6a7   : > { %v3672_v37 = vpop.permute.xlu0 %3671  ;;  %v3718_v21 = vpop.permute.xlu1 %3717 }
 0x6a8   : > { %v3736_v48 = vsel %vm10531_vm12, %v3732_v8, %v3718_v21  ;;  %v3729_v28 = vsel %vm10533_vm4, %v9222_v3, %v3672_v37  ;;  %vm10540_vm12 = vmmov %vm10539_vm7  ;;  %vm4029_vm4 = vcmask 95232   ;;  %v4020_v3 = vadd.f32 %v4019_v43, %v4017_v52 }
 0x6a9   : > { %5411 = vmatmul.mubr.msk.f32.vlgmr.msra.gmra.mrb[2].mxu1 %vm10532_vm13, %v3736_v48  ;;  %v4045_v45 = vsel %vm10540_vm12, %v4042_v56, 0.0  ;;  %v4030_v50 = vsel %vm4029_vm4, %v9303_v9, -inf  ;;  %v4056_v55 = vsel %vm4029_vm4, %v9309_v40, -inf  ;;  %vm3899_vm12 = vcmask 60418  }
 0x6aa   : > { %5537 = vmatpush3.bf16.msk.msra.mxu1 %vm5536_vm8, %v5535_v30  ;;  %vm10538_vm8 = vmmov %vm10532_vm13  ;;  %vm4027_vm13 = vcmask 97282   ;;  %v4047_v22 = vadd.f32 %v4046_v18, %v4045_v45  ;;  %v4021_v25 = vrot.slane %v4020_v3, 4 }
 0x6ab   : > { %v3696_v46 = vpop.permute.xlu0 %3695  ;;  %5423 = vmatprep.subr.mxu1 %v10472_v42  ;;  %v4028_v54 = vsel %vm4027_vm13, %v9299_v49, -inf  ;;  %v4055_v1 = vsel %vm4027_vm13, %v9306_v36, -inf  ;;  %vm10544_vm14 = vmmov %vm10538_vm8 }
 0x6ac   : > { %v3733_v61 = vsel %vm10534_vm0, %v3729_v28, %v3696_v46  ;;  %v4031_v51 = vmax.f32 %v4028_v54, %v4030_v50  ;;  %v4048_v38 = vrot.slane %v4047_v22, 4  ;;  %v4057_v62 = vmax.f32 %v4055_v1, %v4056_v55  ;;  %v9353_v46 = vld [vmem:[%s9682_s9] ss:$0 sm:$0xff] }
 0x6ad   : > { %v4022_v12 = vadd.f32 %v4021_v25, %v4020_v3  ;;  %vm10541_vm0 = vcmask 64512  }
 0x6ae   : > { %v4032_v15 = vrot.slane %v4031_v51, 4  ;;  %v4049_v5 = vadd.f32 %v4048_v38, %v4047_v22  ;;  %v4058_v33 = vrot.slane %v4057_v62, 4 }
 0x6af   : > { %v3720_v63 = vpop.permute.xlu0 %3719  ;;  %v4023_v11 = vrot.slane %v4022_v12, 2 }
 0x6b0   : > { %v3737_v10 = vsel %vm10537_vm11, %v3733_v61, %v3720_v63  ;;  %v4033_v57 = vmax.f32 %v4031_v51, %v4032_v15  ;;  %v4050_v53 = vrot.slane %v4049_v5, 2  ;;  %v4059_v2 = vmax.f32 %v4057_v62, %v4058_v33 }
 0x6b1   : > { %5413 = vmatprep.mubr.msk.f32.mxu1 %vm10538_vm8, %v3737_v10  ;;  %v4024_v60 = vadd.f32 %v4023_v11, %v4022_v12  ;;  %vm10545_vm11 = vcmask 1040384   ;;  %vm10546_vm8 = vmmov %vm10539_vm7  ;;  %vm10547_vm7 = vcmask 1045504  }
 0x6b2   : > { %v4034_v23 = vrot.slane %v4033_v57, 2  ;;  %v4051_v16 = vadd.f32 %v4050_v53, %v4049_v5  ;;  %v4060_v39 = vrot.slane %v4059_v2, 2 }
 0x6b3   : > { %v4025_v41 = vrot.slane %v4024_v60, 1 }
 0x6b4   : > { %v4035_v27 = vmax.f32 %v4033_v57, %v4034_v23  ;;  %v4052_v0 = vrot.slane %v4051_v16, 1  ;;  %v4061_v26 = vmax.f32 %v4059_v2, %v4060_v39 }
 0x6b5   : > { %v4026_v13 = vadd.f32 %v4025_v41, %v4024_v60 }
 0x6b6   : > { %v4036_v59 = vrot.slane %v4035_v27, 1  ;;  %v4053_v35 = vadd.f32 %v4052_v0, %v4051_v16  ;;  %v4062_v34 = vrot.slane %v4061_v26, 1 }
 0x6b8   : > { %v4037_v14 = vmax.f32 %v4035_v27, %v4036_v59  ;;  %v4054_v44 = vadd.f32 %v4053_v35, %v4026_v13  ;;  %v4063_v29 = vmax.f32 %v4061_v26, %v4062_v34 }
 0x6ba   : > { %v4064_v58 = vmax.f32 %v4037_v14, %v4063_v29  ;;  %v4065_v37 = vmul.f32 0.041666668, %v4054_v44 }
 0x6bc   : > { %v4066_v48 = vsel %vm10545_vm11, %v4065_v37, %v4064_v58 }
 0x6cc   : > { %v3674_v20 = vpop.permute.xlu1 %3673 }
 0x6cd   : > { %v3730_v6 = vsel %vm10541_vm0, %v9266_v31, %v3674_v20  ;;  %v4009_v31 = vld [vmem:[%s9678_s5] sm:$0x3f]  ;;  %vm3928_vm0 = vcmask 62468  }
 0x6d0   : > { %v3698_v24 = vpop.permute.xlu1 %3697 }
 0x6d1   : > { %v3734_v30 = vsel %vm10542_vm15, %v3730_v6, %v3698_v24 }
 0x6d4   : > { %v3722_v8 = vpop.permute.xlu1 %3721 }
 0x6d5   : > { %v3738_v21 = vsel %vm10543_vm10, %v3734_v30, %v3722_v8 }
 0x6d6   : > { %5414 = vmatmul.mubr.msk.f32.gmra.mrb[4].mxu1 %vm10544_vm14, %v3738_v21  ;;  %vm10548_vm14 = vmmov %vm10545_vm11  ;;  %vm10549_vm11 = vcmask 1041408  }
 0x6d7   : > { %5420 = vmatprep.mubr.msk.f32.mxu1 %vm10473_vm9, %v10472_v42 }
 0x6da   : > { %5421 = vmatmul.mubr.msk.f32.vlgmr.msra.gmra.mrb[6].mxu1 %vm10546_vm8, %v4066_v48  ;;  %vm10550_vm8 = vcmask 1042432  }
 0x6db   : > { %5425 = vmatprep.mubr.msk.f32.mxu1 %vm10473_vm9, %v10472_v42  ;;  %5424 = vmatpush3.msk.msra.mxu1 %vm10547_vm7, %v4009_v31  ;;  %vm10551_vm7 = vcmask 60416  }
 0x6dc   : > { %vm10555_vm2 = vmmov %vm10551_vm7 }
 0x77c   : > { %v5412_v7 = vpop.f32.mrb[2].mxu1 }
 0x77d   : > { %v3834_v32 = vadd.f32 %v5412_v7, %v9353_v46  ;;  %v3828_v17 = vpop.f32.mrb[3].mxu1 }
 0x77e   : > { %v3829_v47 = vadd.f32 %v9353_v46, %v3828_v17 }
 0x77f   : > { %v3852_v28 = vmin.f32 %v3834_v32, 0.0  ;;  %vm3848_vm15 = vcmp.gt.f32.partialorder %v3834_v32, 0.0 }
 0x780   : > { %v3851_v61 = vmin.f32 %v3829_v47, 0.0  ;;  %vm3847_vm10 = vcmp.gt.f32.partialorder %v3829_v47, 0.0 }
 0x781   : > { %v3857_v63 = vmul.f32 1.442695, %v3852_v28 }
 0x782   : > { %v3855_v4 = vmul.f32 1.442695, %v3851_v61 }
 0x783   : > { %5656 = vpow2.f32 %v3857_v63 }
 0x784   : > { %5658 = vpow2.f32 %v3855_v4 }
 0x78d   : > { %v5657_v56 = vpop.eup %5656 }
 0x78e   : > { %v5659_v10 = vpop.eup %5658  ;;  %v5229_v52 = vadd.f32 -1.0, %v5657_v56 }
 0x78f   : > { %v5228_v43 = vadd.f32 -1.0, %v5659_v10 }
 0x790   : > { %v3868_v45 = vsel %vm3848_vm15, %v3834_v32, %v5229_v52  ;;  %vm10552_vm15 = vmmov %vm10548_vm14 }
 0x791   : > { %v3878_v18 = vsel %vm3362_vm1, %v3868_v45, -inf  ;;  %v3907_v3 = vsel %vm3899_vm12, %v3868_v45, -inf  ;;  %v3936_v22 = vsel %vm3928_vm0, %v3868_v45, -inf  ;;  %v3964_v54 = vsel %vm3532_vm6, %v3868_v45, -inf }
 0x792   : > { %v3879_v50 = vrot.slane %v3878_v18, 4  ;;  %v3908_v1 = vrot.slane %v3907_v3, 4  ;;  %v3937_v55 = vrot.slane %v3936_v22, 4  ;;  %v3965_v25 = vrot.slane %v3964_v54, 4 }
 0x793   : > { %v3867_v51 = vsel %vm3847_vm10, %v3829_v47, %v5228_v43  ;;  %vm10553_vm10 = vmmov %vm10549_vm11 }
 0x794   : > { %v3880_v38 = vmax.f32 %v3878_v18, %v3879_v50  ;;  %v3909_v62 = vmax.f32 %v3907_v3, %v3908_v1  ;;  %v3938_v12 = vmax.f32 %v3936_v22, %v3937_v55  ;;  %v3966_v15 = vmax.f32 %v3964_v54, %v3965_v25 }
 0x795   : > { %v3871_v5 = vsel %vm3362_vm1, %v3867_v51, -inf  ;;  %v3900_v33 = vsel %vm3899_vm12, %v3867_v51, -inf  ;;  %v3929_v11 = vsel %vm3928_vm0, %v3867_v51, -inf  ;;  %v3957_v57 = vsel %vm3532_vm6, %v3867_v51, -inf }
 0x796   : > { %v3881_v53 = vrot.slane %v3880_v38, 2  ;;  %v3910_v2 = vrot.slane %v3909_v62, 2  ;;  %v3939_v60 = vrot.slane %v3938_v12, 2  ;;  %v3967_v23 = vrot.slane %v3966_v15, 2 }
 0x797   : > { %v3872_v16 = vrot.slane %v3871_v5, 4  ;;  %v3901_v39 = vrot.slane %v3900_v33, 4  ;;  %v3930_v41 = vrot.slane %v3929_v11, 4  ;;  %v3958_v27 = vrot.slane %v3957_v57, 4 }
 0x798   : > { %v3882_v0 = vmax.f32 %v3880_v38, %v3881_v53  ;;  %v3911_v26 = vmax.f32 %v3909_v62, %v3910_v2  ;;  %v3940_v13 = vmax.f32 %v3938_v12, %v3939_v60  ;;  %v3968_v59 = vmax.f32 %v3966_v15, %v3967_v23 }
 0x799   : > { %v3873_v35 = vmax.f32 %v3871_v5, %v3872_v16  ;;  %v3902_v34 = vmax.f32 %v3900_v33, %v3901_v39  ;;  %v3931_v20 = vmax.f32 %v3929_v11, %v3930_v41  ;;  %v3959_v14 = vmax.f32 %v3957_v57, %v3958_v27 }
 0x79a   : > { %v3883_v44 = vrot.slane %v3882_v0, 1  ;;  %v3912_v29 = vrot.slane %v3911_v26, 1  ;;  %v3941_v24 = vrot.slane %v3940_v13, 1  ;;  %v3969_v6 = vrot.slane %v3968_v59, 1 }
 0x79b   : > { %v3874_v58 = vrot.slane %v3873_v35, 2  ;;  %v3903_v37 = vrot.slane %v3902_v34, 2  ;;  %v3932_v30 = vrot.slane %v3931_v20, 2  ;;  %v3960_v8 = vrot.slane %v3959_v14, 2 }
 0x79c   : > { %v3884_v21 = vmax.f32 %v3882_v0, %v3883_v44  ;;  %v3913_v48 = vmax.f32 %v3911_v26, %v3912_v29  ;;  %v3942_v31 = vmax.f32 %v3940_v13, %v3941_v24  ;;  %v3970_v28 = vmax.f32 %v3968_v59, %v3969_v6 }
 0x79d   : > { %v3875_v7 = vmax.f32 %v3873_v35, %v3874_v58  ;;  %v3904_v32 = vmax.f32 %v3902_v34, %v3903_v37  ;;  %v3933_v17 = vmax.f32 %v3931_v20, %v3932_v30  ;;  %v3961_v47 = vmax.f32 %v3959_v14, %v3960_v8 }
 0x79e   : > { %v3986_v61 = vsel %vm10548_vm14, %v3884_v21, %v3913_v48  ;;  %vm10554_vm14 = vmmov %vm10550_vm8 }
 0x79f   : > { %v3990_v63 = vsel %vm10549_vm11, %v3986_v61, %v3942_v31  ;;  %v3876_v4 = vrot.slane %v3875_v7, 1  ;;  %v3905_v56 = vrot.slane %v3904_v32, 1  ;;  %v3934_v10 = vrot.slane %v3933_v17, 1 }
 0x7a0   : > { %v3962_v52 = vrot.slane %v3961_v47, 1  ;;  %v3994_v43 = vsel %vm10550_vm8, %v3990_v63, %v3970_v28  ;;  %vm4144_vm11 = vcmask 48128  }
 0x7a1   : > { %v3877_v45 = vmax.f32 %v3875_v7, %v3876_v4  ;;  %v3906_v18 = vmax.f32 %v3904_v32, %v3905_v56  ;;  %v3935_v3 = vmax.f32 %v3933_v17, %v3934_v10  ;;  %3998 = vst.msk [vmem:[%s9372_s14 + $0x4] sm:$0xf] %vm10551_vm7, %v3994_v43 }
 0x7a2   : > { %v3963_v22 = vmax.f32 %v3961_v47, %v3962_v52 }
 0x7a3   : > { %v3985_v54 = vsel %vm10552_vm15, %v3877_v45, %v3906_v18 }
 0x7a4   : > { %v3989_v50 = vsel %vm10553_vm10, %v3985_v54, %v3935_v3 }
 0x7a5   : > { %v3993_v1 = vsel %vm10554_vm14, %v3989_v50, %v3963_v22 }
 0x7a6   : > { %3997 = vst.msk [vmem:[%s9372_s14] sm:$0xf] %vm10555_vm2, %v3993_v1 }
 0x7a9   : > { %v5415_v55 = vpop.f32.mrb[4].mxu1 }
 0x7aa   : > { %v3844_v25 = vadd.f32 %v5415_v55, %v9353_v46  ;;  %v3838_v51 = vpop.f32.mrb[5].mxu1 }
 0x7ab   : > { %v3839_v38 = vadd.f32 %v9353_v46, %v3838_v51 }
 0x7ac   : > { %v3854_v62 = vmin.f32 %v3844_v25, 0.0  ;;  %vm3850_vm2 = vcmp.gt.f32.partialorder %v3844_v25, 0.0 }
 0x7ad   : > { %v3853_v12 = vmin.f32 %v3839_v38, 0.0  ;;  %v4139_v15 = vpop.f32.mrb[6].mxu1  ;;  %vm3849_vm8 = vcmp.gt.f32.partialorder %v3839_v38, 0.0 }
 0x7ae   : > { %v3861_v5 = vmul.f32 1.442695, %v3854_v62  ;;  %v4143_v33 = vmax.f32 %v4139_v15, 0.0  ;;  %v5422_v11 = vpop.f32.mrb[7].mxu1 }
 0x7af   : > { %v3859_v57 = vmul.f32 1.442695, %v3853_v12 }
 0x7b0   : > { %5660 = vpow2.f32 %v3861_v5  ;;  %5426 = vmatmul.mubr.msk.f32.vlgmr.msra.gmra.mrb[8].mxu1 %vm4144_vm11, %v4143_v33  ;;  %vm10561_vm11 = vmmov %vm10551_vm7 }
 0x7b1   : > { %5662 = vpow2.f32 %v3859_v57 }
 0x7ba   : > { %v5661_v53 = vpop.eup %5660 }
 0x7bb   : > { %v5663_v2 = vpop.eup %5662  ;;  %v5231_v60 = vadd.f32 -1.0, %v5661_v53 }
 0x7bc   : > { %v5230_v23 = vadd.f32 -1.0, %v5663_v2 }
 0x7bd   : > { %v3870_v16 = vsel %vm3850_vm2, %v3844_v25, %v5231_v60  ;;  %vm10564_vm2 = vcmask 1046528  }
 0x7be   : > { %v3892_v46 = vsel %vm3362_vm1, %v3870_v16, -inf  ;;  %v3921_v39 = vsel %vm3899_vm12, %v3870_v16, -inf  ;;  %v3950_v41 = vsel %vm3928_vm0, %v3870_v16, -inf  ;;  %v3978_v27 = vsel %vm3532_vm6, %v3870_v16, -inf }
 0x7bf   : > { %v3893_v0 = vrot.slane %v3892_v46, 4  ;;  %v3922_v26 = vrot.slane %v3921_v39, 4  ;;  %v3951_v13 = vrot.slane %v3950_v41, 4  ;;  %v3979_v59 = vrot.slane %v3978_v27, 4 }
 0x7c0   : > { %v3869_v35 = vsel %vm3849_vm8, %v3839_v38, %v5230_v23  ;;  %vm10567_vm8 = vcmask 1043456  }
 0x7c1   : > { %v3894_v34 = vmax.f32 %v3892_v46, %v3893_v0  ;;  %v3923_v20 = vmax.f32 %v3921_v39, %v3922_v26  ;;  %v3952_v14 = vmax.f32 %v3950_v41, %v3951_v13  ;;  %v3980_v44 = vmax.f32 %v3978_v27, %v3979_v59 }
 0x7c2   : > { %v3885_v29 = vsel %vm3362_vm1, %v3869_v35, -inf  ;;  %v3914_v24 = vsel %vm3899_vm12, %v3869_v35, -inf  ;;  %v3943_v6 = vsel %vm3928_vm0, %v3869_v35, -inf  ;;  %v3971_v58 = vsel %vm3532_vm6, %v3869_v35, -inf  ;;  %vm10556_vm1 = vmmov %vm10552_vm15 }
 0x7c3   : > { %v3895_v37 = vrot.slane %v3894_v34, 2  ;;  %v3924_v30 = vrot.slane %v3923_v20, 2  ;;  %v3953_v8 = vrot.slane %v3952_v14, 2  ;;  %v3981_v21 = vrot.slane %v3980_v44, 2  ;;  %vm10557_vm12 = vmmov %vm10553_vm10 }
 0x7c4   : > { %v3886_v48 = vrot.slane %v3885_v29, 4  ;;  %v3915_v31 = vrot.slane %v3914_v24, 4  ;;  %v3944_v7 = vrot.slane %v3943_v6, 4  ;;  %v3972_v32 = vrot.slane %v3971_v58, 4  ;;  %vm10558_vm0 = vmmov %vm10554_vm14 }
 0x7c5   : > { %v3896_v17 = vmax.f32 %v3894_v34, %v3895_v37  ;;  %v3925_v47 = vmax.f32 %v3923_v20, %v3924_v30  ;;  %v3954_v28 = vmax.f32 %v3952_v14, %v3953_v8  ;;  %v3982_v61 = vmax.f32 %v3980_v44, %v3981_v21  ;;  %vm10559_vm15 = vmmov %vm10556_vm1  ;;  %v4308_v37 = vld [vmem:[%s9683_s10 + $0x18] sm:$0xff]  ;;  %v10562_v21 = vld [vmem:[#allocation3_spill] sm:$0xff] }
 0x7c6   : > { %v3887_v63 = vmax.f32 %v3885_v29, %v3886_v48  ;;  %v3916_v4 = vmax.f32 %v3914_v24, %v3915_v31  ;;  %v3945_v56 = vmax.f32 %v3943_v6, %v3944_v7  ;;  %v3973_v10 = vmax.f32 %v3971_v58, %v3972_v32  ;;  %vm10560_vm14 = vmmov %vm10558_vm0  ;;  %v4305_v29 = vld [vmem:[%s9683_s10] sm:$0xff]  ;;  %v4306_v24 = vld [vmem:[%s9683_s10 + $0x8] sm:$0xff] }
 0x7c7   : > { %v3897_v52 = vrot.slane %v3896_v17, 1  ;;  %v3926_v43 = vrot.slane %v3925_v47, 1  ;;  %v3955_v45 = vrot.slane %v3954_v28, 1  ;;  %v3983_v18 = vrot.slane %v3982_v61, 1  ;;  %v4307_v58 = vld [vmem:[%s9683_s10 + $0x10] sm:$0xff] }
 0x7c8   : > { %v3888_v3 = vrot.slane %v3887_v63, 2  ;;  %v3917_v22 = vrot.slane %v3916_v4, 2  ;;  %v3946_v54 = vrot.slane %v3945_v56, 2  ;;  %v3974_v50 = vrot.slane %v3973_v10, 2 }
 0x7c9   : > { %v3898_v1 = vmax.f32 %v3896_v17, %v3897_v52  ;;  %v3927_v55 = vmax.f32 %v3925_v47, %v3926_v43  ;;  %v3956_v25 = vmax.f32 %v3954_v28, %v3955_v45  ;;  %v3984_v15 = vmax.f32 %v3982_v61, %v3983_v18  ;;  %v4309_v47 = vld [vmem:[%s9683_s10 + $0x20] sm:$0xff]  ;;  %v4310_v28 = vld [vmem:[%s9683_s10 + $0x28] sm:$0xff]  ;;  %v4003_v18 = vld [vmem:[%s9293_s29 + $0x10] sm:$0x1] }
 0x7ca   : > { %v3889_v51 = vmax.f32 %v3887_v63, %v3888_v3  ;;  %v3918_v38 = vmax.f32 %v3916_v4, %v3917_v22  ;;  %v3947_v62 = vmax.f32 %v3945_v56, %v3946_v54  ;;  %v3975_v12 = vmax.f32 %v3973_v10, %v3974_v50  ;;  %v4311_v56 = vld [vmem:[%s9683_s10 + $0x30] sm:$0xff]  ;;  %v4312_v10 = vld [vmem:[%s9683_s10 + $0x38] sm:$0xff]  ;;  %v9489_v22 = vld [vmem:[%s9683_s10 + $0x40] sm:$0xff] }
 0x7cb   : > { %v3988_v5 = vsel %vm10556_vm1, %v3898_v1, %v3927_v55  ;;  %v9409_v6 = vpack.c.bf16 %v4306_v24, %v4305_v29  ;;  %v9420_v8 = vpack.c.bf16 %v4308_v37, %v4307_v58  ;;  %v10563_v48 = vsub.s32 0, %v10562_v21  ;;  %vm10568_vm1 = vmmov %vm10558_vm0 }
 0x7cc   : > { %v3992_v33 = vsel %vm10557_vm12, %v3988_v5, %v3956_v25  ;;  %v3890_v11 = vrot.slane %v3889_v51, 1  ;;  %v3919_v57 = vrot.slane %v3918_v38, 1  ;;  %v3948_v53 = vrot.slane %v3947_v62, 1  ;;  %vm10569_vm12 = vmmov %vm10558_vm0 }
 0x7cd   : > { %v3976_v2 = vrot.slane %v3975_v12, 1  ;;  %v3996_v60 = vsel %vm10558_vm0, %v3992_v33, %v3984_v15  ;;  %5539 = vmatprep.subr.bf16.mxu1 %v9409_v6  ;;  %v9484_v3 = vpack.c.bf16 %v4312_v10, %v4311_v56  ;;  %vm10570_vm0 = vmmov %vm10564_vm2 }
 0x7ce   : > { %v3891_v23 = vmax.f32 %v3889_v51, %v3890_v11  ;;  %v3920_v16 = vmax.f32 %v3918_v38, %v3919_v57  ;;  %v3949_v46 = vmax.f32 %v3947_v62, %v3948_v53  ;;  %4000 = vst.msk [vmem:[%s9372_s14 + $0xc] sm:$0xf] %vm10551_vm7, %v3996_v60  ;;  %5541 = vmatpush3.bf16.msra.mxu1 %v9409_v6 }
 0x7cf   : > { %v3977_v39 = vmax.f32 %v3975_v12, %v3976_v2  ;;  %5543 = vmatprep.subr.bf16.mxu1 %v9420_v8 }
 0x7d0   : > { %v3987_v41 = vsel %vm10559_vm15, %v3891_v23, %v3920_v16  ;;  %v4006_v16 = vld [vmem:[%s9293_s29 + $0x28] sm:$0x1] }
 0x7d1   : > { %v3991_v27 = vsel %vm10553_vm10, %v3987_v41, %v3949_v46  ;;  %vm10573_vm10 = vmmov %vm10567_vm8 }
 0x7d2   : > { %v3995_v0 = vsel %vm10560_vm14, %v3991_v27, %v3977_v39  ;;  %5545 = vmatpush3.bf16.msra.mxu1 %v9420_v8  ;;  %vm10574_vm14 = vmmov %vm10568_vm1 }
 0x7d3   : > { %3999 = vst.msk [vmem:[%s9372_s14 + $0x8] sm:$0xf] %vm10561_vm11, %v3995_v0  ;;  %vm10575_vm11 = vmmov %vm10568_vm1 }
 0x883   : > { %v4217_v26 = vpop.f32.mrb[8].mxu1 }
 0x884   : > { %v4222_v13 = vrot.slane %v4217_v26, 1  ;;  %v5427_v59 = vpop.f32.mrb[9].mxu1 }
 0x886   : > { %v4224_v35 = vadd.f32 %v4222_v13, %v4217_v26 }
 0x888   : > { %v4225_v34 = vsub.f32 0.0, %v4224_v35 }
 0x88a   : > { %v4226_v20 = vmul.f32 1.442695, %v4225_v34 }
 0x88c   : > { %5664 = vpow2.f32 %v4226_v20 }
 0x896   : > { %v5665_v14 = vpop.eup %5664 }
 0x897   : > { %v4228_v44 = vadd.f32 1.0, %v5665_v14 }
 0x899   : > { %5666 = vrcp.f32 %v4228_v44 }
 0x8a3   : > { %v5667_v30 = vpop.eup %5666 }
 0x8a4   : > { %v9424_v31 = vrot.slane %v5667_v30, %v10563_v48 }
 0x8a6   : > { %v9432_v7 = vmul.f32 %v9424_v31, %v9303_v9  ;;  %v9436_v32 = vmul.f32 %v9424_v31, %v9299_v49  ;;  %v9440_v17 = vmul.f32 %v9424_v31, %v9309_v40  ;;  %v9451_v9 = vmul.f32 %v9424_v31, %v9306_v36 }
 0x8a7   : > { %v9453_v49 = vpack.c.bf16 %v4310_v28, %v4309_v47  ;;  %v4237_v54 = vmul.f32 %v9424_v31, %v4003_v18  ;;  %v4240_v46 = vmul.f32 %v9424_v31, %v4006_v16 }
 0x8a8   : > { %v4248_v61 = vrot.slane %v9432_v7, 1  ;;  %4242 = vst.msk [vmem:[%s629_s30 + $0x6] sm:$0x3f] %vm4029_vm4, %v9432_v7  ;;  %v4247_v40 = vrot.slane %v9436_v32, 1  ;;  %4244 = vst.msk [vmem:[%s629_s30 + $0x16] sm:$0x3f] %vm4029_vm4, %v9440_v17 }
 0x8a9   : > { %4241 = vst.msk [vmem:[%s629_s30 - $0x2] sm:$0xfc] %vm4027_vm13, %v9436_v32  ;;  %4243 = vst.msk [vmem:[%s629_s30 + $0xe] sm:$0xfc] %vm4027_vm13, %v9451_v9  ;;  %5547 = vmatprep.subr.bf16.mxu1 %v9453_v49  ;;  %v4257_v63 = vrot.slane %v9432_v7, 2  ;;  %v4256_v4 = vrot.slane %v9436_v32, 2 }
 0x8aa   : > { %4252 = vrot.lane.b32.xlu1 %v4248_v61, %s10003_s0  ;;  %v4249_v36 = vsel %vm10564_vm2, %v4247_v40, %v4248_v61  ;;  %5549 = vmatpush3.bf16.msra.mxu1 %v9453_v49  ;;  %vm10565_vm13 = vcmask 1045504   ;;  %v4266_v43 = vrot.slane %v9432_v7, 3  ;;  %v4265_v45 = vrot.slane %v9436_v32, 3 }
 0x8ab   : > { %4250 = vrot.lane.b32.xlu0 %v4249_v36, %s10003_s0  ;;  %v4258_v52 = vsel %vm10565_vm13, %v4256_v4, %v4257_v63  ;;  %5551 = vmatprep.subr.bf16.mxu1 %v9484_v3  ;;  %vm10566_vm4 = vcmask 1044480   ;;  %v4275_v1 = vrot.slane %v9432_v7, 4  ;;  %v4274_v55 = vrot.slane %v9436_v32, 4  ;;  %vm10571_vm7 = vmmov %vm10565_vm13 }
 0x8ac   : > { %v4267_v50 = vsel %vm10566_vm4, %v4265_v45, %v4266_v43  ;;  %v4285_v25 = vrot.slane %v9432_v7, 5  ;;  %v4287_v51 = vrot.slane %v4237_v54, 5  ;;  %v4284_v62 = vrot.slane %v9436_v32, 5  ;;  %vm10572_vm15 = vmmov %vm10566_vm4 }
 0x8ad   : > { %v4276_v38 = vsel %vm10567_vm8, %v4274_v55, %v4275_v1  ;;  %v4446_v5 = vrot.slane %v9440_v17, 1  ;;  %v4445_v33 = vrot.slane %v9451_v9, 1  ;;  %v4455_v57 = vrot.slane %v9440_v17, 2 }
 0x8ae   : > { %4261 = vrot.lane.b32.xlu1 %v4257_v63, %s10172_s3  ;;  %5553 = vmatpush3.bf16.msra.mxu1 %v9484_v3  ;;  %v4288_v12 = vsel %vm10568_vm1, %v4285_v25, %v4287_v51  ;;  %v4286_v15 = vsel %vm10569_vm12, %v4284_v62, %v4285_v25  ;;  %v4454_v53 = vrot.slane %v9451_v9, 2  ;;  %v4464_v60 = vrot.slane %v9440_v17, 3 }
 0x8af   : > { %4259 = vrot.lane.b32.xlu0 %v4258_v52, %s10172_s3  ;;  %5444 = vmatprep.subr.mxu1 %v9489_v22  ;;  %v4447_v11 = vsel %vm10570_vm0, %v4445_v33, %v4446_v5  ;;  %v4463_v23 = vrot.slane %v9451_v9, 3  ;;  %v4473_v41 = vrot.slane %v9440_v17, 4  ;;  %v4472_v27 = vrot.slane %v9451_v9, 4 }
 0x8b0   : > { %v4456_v2 = vsel %vm10571_vm7, %v4454_v53, %v4455_v57  ;;  %v4483_v0 = vrot.slane %v9440_v17, 5  ;;  %v4485_v26 = vrot.slane %v4240_v46, 5  ;;  %v4482_v59 = vrot.slane %v9451_v9, 5 }
 0x8b1   : > { %v4465_v39 = vsel %vm10572_vm15, %v4463_v23, %v4464_v60  ;;  %v4474_v13 = vsel %vm10573_vm10, %v4472_v27, %v4473_v41  ;;  %vm10576_vm2 = vcmask 97280   ;;  %vm10578_vm4 = vcmask 195584  }
 0x8b2   : > { %4270 = vrot.lane.b32.xlu1 %v4266_v43, %s10173_s18  ;;  %5445 = vmatpush3.msra.mxu1 %v9489_v22  ;;  %v4486_v35 = vsel %vm10574_vm14, %v4483_v0, %v4485_v26  ;;  %v4484_v34 = vsel %vm10575_vm11, %v4482_v59, %v4483_v0  ;;  %vm10577_vm13 = vmmov %vm10576_vm2  ;;  %vm10580_vm1 = vcmask 293888   ;;  %vm4321_vm12 = vcmask 588800  }
 0x8b3   : > { %4268 = vrot.lane.b32.xlu0 %v4267_v50, %s10173_s18  ;;  %5555 = vmatprep.subr.bf16.mxu1 %v9409_v6  ;;  %vm10579_vm8 = vmmov %vm10578_vm4  ;;  %vm10582_vm7 = vcmask 392192   ;;  %vm10584_vm10 = vcmask 490496  }
 0x8b4   : > { %vm10581_vm0 = vmmov %vm10580_vm1 }
 0x8b5   : > { %vm10583_vm15 = vmmov %vm10582_vm7 }
 0x8b6   : > { %4279 = vrot.lane.b32.xlu1 %v4275_v1, %s10169_s21  ;;  %vm10585_vm14 = vmmov %vm10584_vm10 }
 0x8b7   : > { %4277 = vrot.lane.b32.xlu0 %v4276_v38, %s10169_s21  ;;  %vm10586_vm11 = vmmov %vm10576_vm2 }
 0x8ba   : > { %4291 = vrot.lane.b32.xlu1 %v4288_v12, %s10151_s2  ;;  %v4643_v12 = vld [vmem:[%s9685_s12] sm:$0xff] }
 0x8bb   : > { %4289 = vrot.lane.b32.xlu0 %v4286_v15, %s10151_s2 }
 0x8be   : > { %4450 = vrot.lane.b32.xlu1 %v4446_v5, %s10003_s0  ;;  %v5236_v5 = vld [vmem:[%s9684_s11] ss:$0 sm:$0xff] }
 0x8bf   : > { %4448 = vrot.lane.b32.xlu0 %v4447_v11, %s10003_s0 }
 0x8c2   : > { %4459 = vrot.lane.b32.xlu1 %v4455_v57, %s10172_s3 }
 0x8c3   : > { %4457 = vrot.lane.b32.xlu0 %v4456_v2, %s10172_s3 }
 0x8c6   : > { %4468 = vrot.lane.b32.xlu1 %v4464_v60, %s10173_s18 }
 0x8c7   : > { %4466 = vrot.lane.b32.xlu0 %v4465_v39, %s10173_s18  ;;  %s10620_s18 = sld [smem:[#allocation245_spill]] }
 0x8ca   : > { %4477 = vrot.lane.b32.xlu1 %v4473_v41, %s10169_s21 }
 0x8cb   : > { %4475 = vrot.lane.b32.xlu0 %v4474_v13, %s10169_s21 }
 0x8cd   : > { %s644_s0 = scalar_lea.vmem %s10620_s18, %s10619_s25 }
 0x8ce   : > { %4489 = vrot.lane.b32.xlu1 %v4486_v35, %s10151_s2 }
 0x8cf   : > { %4487 = vrot.lane.b32.xlu0 %v4484_v34, %s10151_s2 }
 0x91c   : > { %v4253_v20 = vpop.permute.xlu1 %4252 }
 0x91d   : > { %v4251_v14 = vpop.permute.xlu0 %4250  ;;  %v4296_v48 = vsel %vm10577_vm13, %v9432_v7, %v4253_v20  ;;  %vm10587_vm13 = vmmov %vm10578_vm4 }
 0x91e   : > { %v4295_v21 = vsel %vm10576_vm2, %v9436_v32, %v4251_v14 }
 0x920   : > { %v4262_v44 = vpop.permute.xlu1 %4261 }
 0x921   : > { %v4260_v29 = vpop.permute.xlu0 %4259  ;;  %v4298_v47 = vsel %vm10579_vm8, %v4296_v48, %v4262_v44  ;;  %vm10588_vm8 = vmmov %vm10581_vm0 }
 0x922   : > { %v4297_v31 = vsel %vm10578_vm4, %v4295_v21, %v4260_v29 }
 0x924   : > { %v4271_v24 = vpop.permute.xlu1 %4270 }
 0x925   : > { %v4269_v58 = vpop.permute.xlu0 %4268  ;;  %v4300_v40 = vsel %vm10581_vm0, %v4298_v47, %v4271_v24 }
 0x926   : > { %v4299_v28 = vsel %vm10580_vm1, %v4297_v31, %v4269_v58  ;;  %vm10589_vm1 = vmmov %vm10581_vm0 }
 0x927   : > { %vm10590_vm0 = vmmov %vm10582_vm7 }
 0x928   : > { %v4280_v37 = vpop.permute.xlu1 %4279 }
 0x929   : > { %v4278_v30 = vpop.permute.xlu0 %4277  ;;  %v4302_v4 = vsel %vm10583_vm15, %v4300_v40, %v4280_v37  ;;  %vm10592_vm15 = vmmov %vm10584_vm10 }
 0x92a   : > { %v4301_v36 = vsel %vm10582_vm7, %v4299_v28, %v4278_v30  ;;  %vm10591_vm7 = vmmov %vm10590_vm0 }
 0x92c   : > { %v4292_v61 = vpop.permute.xlu1 %4291 }
 0x92d   : > { %v4290_v63 = vpop.permute.xlu0 %4289  ;;  %v4304_v56 = vsel %vm10585_vm14, %v4302_v4, %v4292_v61  ;;  %vm4415_vm14 = vcmask 62464  }
 0x92e   : > { %v4303_v32 = vsel %vm10584_vm10, %v4301_v36, %v4290_v63 }
 0x92f   : > { %5446 = vmatprep.mubr.msk.f32.mxu1 %vm4321_vm12, %v4303_v32 }
 0x930   : > { %v4451_v7 = vpop.permute.xlu1 %4450  ;;  %5447 = vmatmul.mubr.msk.f32.vlgmr.msra.gmra.mrb[10].mxu1 %vm4321_vm12, %v4304_v56 }
 0x931   : > { %v4449_v10 = vpop.permute.xlu0 %4448  ;;  %5557 = vmatpush3.bf16.msra.mxu1 %v9409_v6 }
 0x932   : > { %5559 = vmatprep.subr.bf16.mxu1 %v9420_v8  ;;  %v4493_v6 = vsel %vm10586_vm11, %v9451_v9, %v4449_v10  ;;  %v9602_v10 = vld [vmem:[%s9685_s12 + $0x10] sm:$0xff] }
 0x934   : > { %v4460_v52 = vpop.permute.xlu1 %4459 }
 0x935   : > { %v4458_v43 = vpop.permute.xlu0 %4457  ;;  %5561 = vmatpush3.bf16.msra.mxu1 %v9420_v8  ;;  %v4494_v8 = vsel %vm10576_vm2, %v9440_v17, %v4451_v7  ;;  %vm10593_vm2 = vcmask 60416  }
 0x936   : > { %5563 = vmatprep.subr.bf16.mxu1 %v9453_v49  ;;  %v4495_v1 = vsel %vm10587_vm13, %v4493_v6, %v4458_v43  ;;  %v4496_v55 = vsel %vm10578_vm4, %v4494_v8, %v4460_v52  ;;  %vm10594_vm13 = vcmask 1040384   ;;  %vm10595_vm4 = vcmask 1041408  }
 0x938   : > { %v4469_v45 = vpop.permute.xlu1 %4468 }
 0x939   : > { %v4467_v18 = vpop.permute.xlu0 %4466  ;;  %5565 = vmatpush3.bf16.msra.mxu1 %v9453_v49  ;;  %v4498_v51 = vsel %vm10589_vm1, %v4496_v55, %v4469_v45  ;;  %vm10597_vm1 = vcmask 59392  }
 0x93a   : > { %5567 = vmatprep.subr.bf16.mxu1 %v9484_v3  ;;  %v4497_v49 = vsel %vm10588_vm8, %v4495_v1, %v4467_v18  ;;  %vm10596_vm8 = vmmov %vm10594_vm13 }
 0x93c   : > { %v4478_v54 = vpop.permute.xlu1 %4477 }
 0x93d   : > { %v4476_v50 = vpop.permute.xlu0 %4475  ;;  %5569 = vmatpush3.bf16.msra.mxu1 %v9484_v3  ;;  %v4500_v9 = vsel %vm10591_vm7, %v4498_v51, %v4478_v54  ;;  %vm10598_vm7 = vmmov %vm10595_vm4 }
 0x93e   : > { %5465 = vmatprep.subr.mxu1 %v9489_v22  ;;  %v4499_v38 = vsel %vm10590_vm0, %v4497_v49, %v4476_v50 }
 0x940   : > { %v4490_v25 = vpop.permute.xlu1 %4489 }
 0x941   : > { %v4488_v3 = vpop.permute.xlu0 %4487  ;;  %5466 = vmatpush3.msra.mxu1 %v9489_v22  ;;  %v4502_v17 = vsel %vm10584_vm10, %v4500_v9, %v4490_v25  ;;  %v4644_v22 = vld [vmem:[%s9685_s12 + $0x8] sm:$0xff]  ;;  %vm10599_vm10 = vcmask 1042432  }
 0x942   : > { %v4501_v62 = vsel %vm10592_vm15, %v4499_v38, %v4488_v3  ;;  %5573 = vmatprep.subr.bf16.mxu1 %v5702_v19  ;;  %v9585_v15 = vpack.c.bf16 %v4644_v22, %v4643_v12 }
 0x943   : > { %5467 = vmatprep.mubr.msk.f32.mxu1 %vm4321_vm12, %v4501_v62 }
 0x944   : > { %5468 = vmatmul.mubr.msk.f32.vlgmr.msra.gmra.mrb[12].mxu1 %vm4321_vm12, %v4502_v17  ;;  %5572 = vmatpush3.bf16.msra.mxu0 %v9585_v15 }
 0x945   : > { %5485 = vmatprep.mubr.msk.f32.mxu1 %vm10473_vm9, %v10472_v42  ;;  %5575 = vmatpush3.bf16.msra.mxu1 %v9585_v15 }
 0x946   : > { %5474 = vmatprep.subr.mxu0 %v10472_v42  ;;  %5483 = vmatprep.subr.mxu1 %v10472_v42 }
 0x948   : > { %5475 = vmatpush3.msra.mxu0 %v9602_v10 }
 0x949   : > { %5484 = vmatpush3.msra.mxu1 %v9602_v10  ;;  %5576 = vmatprep.subr.bf16.mxu0 %v5702_v19 }
 0x94a   : > { %5579 = vmatprep.subr.bf16.mxu1 %v5702_v19 }
 0xa03   : > { %v5448_v33 = vpop.f32.mrb[10].mxu1 }
 0xa04   : > { %v4400_v11 = vadd.f32 %v5448_v33, %v5236_v5  ;;  %v4394_v57 = vpop.f32.mrb[11].mxu1 }
 0xa05   : > { %v4395_v53 = vadd.f32 %v5236_v5, %v4394_v57 }
 0xa06   : > { %v4406_v2 = vmin.f32 %v4400_v11, 0.0  ;;  %vm4404_vm12 = vcmp.gt.f32.partialorder %v4400_v11, 0.0 }
 0xa07   : > { %v4405_v60 = vmin.f32 %v4395_v53, 0.0  ;;  %vm4403_vm11 = vcmp.gt.f32.partialorder %v4395_v53, 0.0 }
 0xa08   : > { %v4409_v23 = vmul.f32 1.442695, %v4406_v2 }
 0xa09   : > { %v4407_v16 = vmul.f32 1.442695, %v4405_v60 }
 0xa0a   : > { %5668 = vpow2.f32 %v4409_v23 }
 0xa0b   : > { %5670 = vpow2.f32 %v4407_v16 }
 0xa14   : > { %v5669_v46 = vpop.eup %5668 }
 0xa15   : > { %v5671_v39 = vpop.eup %5670  ;;  %v5240_v41 = vadd.f32 -1.0, %v5669_v46 }
 0xa16   : > { %v5239_v27 = vadd.f32 -1.0, %v5671_v39 }
 0xa17   : > { %v4414_v0 = vsel %vm4404_vm12, %v4400_v11, %v5240_v41  ;;  %v5469_v26 = vpop.f32.mrb[12].mxu1  ;;  %vm10600_vm12 = vmmov %vm10593_vm2 }
 0xa18   : > { %v4424_v13 = vsel %vm3467_vm5, %v4414_v0, -inf  ;;  %v4433_v59 = vsel %vm10593_vm2, %v4414_v0, -inf  ;;  %v4413_v35 = vsel %vm4403_vm11, %v4395_v53, %v5239_v27  ;;  %v4581_v34 = vadd.f32 %v5469_v26, %v5236_v5  ;;  %v4575_v20 = vpop.f32.mrb[13].mxu1  ;;  %vm10605_vm11 = vmmov %vm10595_vm4 }
 0xa19   : > { %v4416_v14 = vsel %vm4415_vm14, %v4413_v35, -inf  ;;  %v4423_v44 = vsel %vm3570_vm3, %v4413_v35, -inf  ;;  %v4432_v29 = vsel %vm3532_vm6, %v4413_v35, -inf  ;;  %v4576_v24 = vadd.f32 %v5236_v5, %v4575_v20  ;;  %vm10606_vm2 = vmmov %vm10599_vm10 }
 0xa1a   : > { %v4417_v58 = vrot.slane %v4416_v14, 4  ;;  %v4425_v37 = vmax.f32 %v4423_v44, %v4424_v13  ;;  %v4434_v30 = vmax.f32 %v4432_v29, %v4433_v59  ;;  %v4587_v21 = vmin.f32 %v4581_v34, 0.0 }
 0xa1b   : > { %v4586_v48 = vmin.f32 %v4576_v24, 0.0  ;;  %vm4585_vm0 = vcmp.gt.f32.partialorder %v4581_v34, 0.0  ;;  %vm4584_vm15 = vcmp.gt.f32.partialorder %v4576_v24, 0.0 }
 0xa1c   : > { %v4418_v31 = vmax.f32 %v4416_v14, %v4417_v58  ;;  %v4426_v47 = vrot.slane %v4425_v37, 4  ;;  %v4435_v28 = vrot.slane %v4434_v30, 4  ;;  %v4590_v61 = vmul.f32 1.442695, %v4587_v21 }
 0xa1d   : > { %v4588_v40 = vmul.f32 1.442695, %v4586_v48 }
 0xa1e   : > { %v4419_v36 = vrot.slane %v4418_v31, 2  ;;  %v4427_v63 = vmax.f32 %v4425_v37, %v4426_v47  ;;  %v4436_v4 = vmax.f32 %v4434_v30, %v4435_v28  ;;  %5672 = vpow2.f32 %v4590_v61 }
 0xa1f   : > { %5674 = vpow2.f32 %v4588_v40 }
 0xa20   : > { %v4420_v32 = vmax.f32 %v4418_v31, %v4419_v36  ;;  %v4428_v56 = vrot.slane %v4427_v63, 2  ;;  %v4437_v7 = vrot.slane %v4436_v4, 2 }
 0xa22   : > { %v4421_v52 = vrot.slane %v4420_v32, 1  ;;  %v4429_v43 = vmax.f32 %v4427_v63, %v4428_v56  ;;  %v4438_v45 = vmax.f32 %v4436_v4, %v4437_v7 }
 0xa24   : > { %v4430_v18 = vrot.slane %v4429_v43, 1  ;;  %v4439_v54 = vrot.slane %v4438_v45, 1  ;;  %v4422_v50 = vmax.f32 %v4420_v32, %v4421_v52 }
 0xa26   : > { %v4431_v6 = vmax.f32 %v4429_v43, %v4430_v18  ;;  %v4440_v8 = vmax.f32 %v4438_v45, %v4439_v54  ;;  %v5245_v43 = vld [vmem:[%s9686_s13] ss:$0 sm:$0xff] }
 0xa28   : > { %v4441_v1 = vsel %vm10594_vm13, %v4422_v50, %v4431_v6  ;;  %v5673_v55 = vpop.eup %5672  ;;  %vm10607_vm13 = vcmask 64512  }
 0xa29   : > { %v4442_v49 = vsel %vm10595_vm4, %v4441_v1, %v4440_v8  ;;  %v5675_v25 = vpop.eup %5674  ;;  %v5244_v51 = vadd.f32 -1.0, %v5673_v55 }
 0xa2a   : > { %v4626_v19 = vrot.slane %v4442_v49, 7  ;;  %v4628_v38 = vsel %vm10596_vm8, 0.0, %v4442_v49  ;;  %4623 = vst.msk [vmem:[%s9612_s27] sm:$0x7] %vm10597_vm1, %v4442_v49  ;;  %v5243_v3 = vadd.f32 -1.0, %v5675_v25 }
 0xa2b   : > { %v4629_v9 = vsel %vm10598_vm7, %v4628_v38, 0.0  ;;  %v4595_v62 = vsel %vm4585_vm0, %v4581_v34, %v5244_v51 }
 0xa2c   : > { %v4630_v17 = vsel %vm10599_vm10, %v4629_v9, %v4626_v19  ;;  %v4604_v12 = vsel %vm3467_vm5, %v4595_v62, -inf  ;;  %v4613_v22 = vsel %vm10600_vm12, %v4595_v62, -inf  ;;  %v4594_v5 = vsel %vm4584_vm15, %v4576_v24, %v5243_v3  ;;  %vm10602_vm5 = vmmov %vm10595_vm4 }
 0xa2d   : > { %4638 = vrot.lane.b32.xlu0 %v4630_v17, %s9991_s20  ;;  %v4596_v33 = vsel %vm4415_vm14, %v4594_v5, -inf  ;;  %v4603_v11 = vsel %vm3570_vm3, %v4594_v5, -inf  ;;  %v4612_v57 = vsel %vm3532_vm6, %v4594_v5, -inf  ;;  %vm10601_vm6 = vmmov %vm10596_vm8  ;;  %vm10608_vm4 = vcmask 130048  }
 0xa2e   : > { %v4597_v53 = vrot.slane %v4596_v33, 4  ;;  %v4605_v2 = vmax.f32 %v4603_v11, %v4604_v12  ;;  %v4614_v60 = vmax.f32 %v4612_v57, %v4613_v22  ;;  %vm10603_vm3 = vmmov %vm10601_vm6  ;;  %vm10609_vm8 = vcmask 195584  }
 0xa2f   : > { %vm10604_vm14 = vmmov %vm10597_vm1 }
 0xa30   : > { %v4598_v23 = vmax.f32 %v4596_v33, %v4597_v53  ;;  %v4606_v16 = vrot.slane %v4605_v2, 4  ;;  %v4615_v46 = vrot.slane %v4614_v60, 4  ;;  %vm10610_vm1 = vmmov %vm10607_vm13 }
 0xa31   : > { %v4730_v36 = vsel %vm10610_vm1, %v4630_v17, 0.0  ;;  %vm10611_vm0 = vmmov %vm10608_vm4 }
 0xa32   : > { %v4599_v39 = vrot.slane %v4598_v23, 2  ;;  %v4607_v41 = vmax.f32 %v4605_v2, %v4606_v16  ;;  %v4616_v27 = vmax.f32 %v4614_v60, %v4615_v46  ;;  %vm10612_vm7 = vmmov %vm10610_vm1 }
 0xa33   : > { %vm10613_vm15 = vmmov %vm10611_vm0 }
 0xa34   : > { %v4600_v0 = vmax.f32 %v4598_v23, %v4599_v39  ;;  %v4608_v26 = vrot.slane %v4607_v41, 2  ;;  %v4617_v13 = vrot.slane %v4616_v27, 2  ;;  %vm10614_vm10 = vmmov %vm10609_vm8 }
 0xa35   : > { %vm10615_vm12 = vmmov %vm10609_vm8 }
 0xa36   : > { %v4601_v59 = vrot.slane %v4600_v0, 1  ;;  %v4609_v35 = vmax.f32 %v4607_v41, %v4608_v26  ;;  %v4618_v34 = vmax.f32 %v4616_v27, %v4617_v13 }
 0xa38   : > { %v4610_v20 = vrot.slane %v4609_v35, 1  ;;  %v4619_v14 = vrot.slane %v4618_v34, 1  ;;  %v4602_v44 = vmax.f32 %v4600_v0, %v4601_v59 }
 0xa3a   : > { %v4611_v29 = vmax.f32 %v4609_v35, %v4610_v20  ;;  %v4620_v24 = vmax.f32 %v4618_v34, %v4619_v14 }
 0xa3c   : > { %v4621_v58 = vsel %vm10601_vm6, %v4602_v44, %v4611_v29  ;;  %vm10616_vm6 = vmmov %vm10610_vm1 }
 0xa3d   : > { %v4622_v37 = vsel %vm10602_vm5, %v4621_v58, %v4620_v24  ;;  %vm10617_vm5 = vmmov %vm10611_vm0 }
 0xa3e   : > { %v4632_v30 = vrot.slane %v4622_v37, 7  ;;  %v4634_v21 = vsel %vm10603_vm3, 0.0, %v4622_v37  ;;  %4624 = vst.msk [vmem:[%s9612_s27 + $0x4] sm:$0x7] %vm10604_vm14, %v4622_v37  ;;  %vm10618_vm3 = vmmov %vm10609_vm8  ;;  %vm10621_vm14 = vcmask 60416  }
 0xa3f   : > { %v4635_v48 = vsel %vm10605_vm11, %v4634_v21, 0.0 }
 0xa40   : > { %v4636_v31 = vsel %vm10606_vm2, %v4635_v48, %v4632_v30 }
 0xa41   : > { %4727 = vrot.lane.b32.xlu1 %v4636_v31, %s10014_s26  ;;  %4805 = vrot.lane.b32.xlu0 %v4636_v31, %s9991_s20  ;;  %v4883_v7 = vsel %vm10616_vm6, %v4636_v31, 0.0 }
 0xa42   : > { %v4884_v52 = vsel %vm10617_vm5, %v4883_v7, 0.0 }
 0xa9f   : > { %v4639_v47 = vpop.permute.xlu0 %4638 }
 0xaa0   : > { %v4641_v28 = vsel %vm10607_vm13, 0.0, %v4639_v47 }
 0xaa1   : > { %v4642_v61 = vsel %vm10608_vm4, %v4641_v28, 0.0 }
 0xaa2   : > { %5477 = vmatmul.mubr.msk.f32.vlgmr.msra.gmra.mrb[22].mxu0 %vm10609_vm8, %v4642_v61 }
 0xaa3   : > { %5578 = vmatpush3.bf16.msra.mxu0 %v9585_v15  ;;  %5494 = vmatprep.mubr.msk.f32.mxu0 %vm10473_vm9, %v10472_v42 }
 0xaa4   : > { %5492 = vmatprep.subr.mxu0 %v10472_v42 }
 0xaa7   : > { %5493 = vmatpush3.msra.mxu0 %v9602_v10 }
 0xab3   : > { %v4728_v40 = vpop.permute.xlu1 %4727  ;;  %v4806_v63 = vpop.permute.xlu0 %4805 }
 0xab4   : > { %v4731_v4 = vsel %vm10611_vm0, %v4730_v36, %v4728_v40  ;;  %v4808_v32 = vsel %vm10612_vm7, 0.0, %v4806_v63 }
 0xab5   : > { %v4809_v56 = vsel %vm10613_vm15, %v4808_v32, 0.0  ;;  %5486 = vmatmul.mubr.msk.f32.vlgmr.msra.gmra.mrb[14].mxu1 %vm10614_vm10, %v4731_v4 }
 0xab6   : > { %5581 = vmatpush3.bf16.msra.mxu1 %v9585_v15  ;;  %5495 = vmatmul.mubr.msk.f32.vlgmr.msra.gmra.mrb[24].mxu0 %vm10615_vm12, %v4809_v56 }
 0xab7   : > { %5501 = vmatprep.subr.mxu1 %v10472_v42  ;;  %5503 = vmatprep.mubr.msk.f32.mxu1 %vm10473_vm9, %v10472_v42  ;;  %vm10622_vm9 = vmmov %vm10621_vm14 }
 0xab8   : > { %vm10623_vm11 = vmmov %vm10622_vm9 }
 0xab9   : > { %vm10624_vm2 = vmmov %vm10622_vm9 }
 0xaba   : > { %5502 = vmatpush3.msra.mxu1 %v9602_v10 }
 0xabb   : > { %5504 = vmatmul.mubr.msk.f32.vlgmr.msra.gmra.mrb[16].mxu1 %vm10618_vm3, %v4884_v52 }
 0xb75   : > { %v4722_v15 = vpop.f32.mrb[22].mxu0 }
 0xb76   : > { %v4723_v45 = vadd.f32 %v5245_v43, %v4722_v15  ;;  %v5478_v18 = vpop.f32.mrb[23].mxu0 }
 0xb78   : > { %4958 = vst.msk [vmem:[%s644_s0] sm:$0xf] %vm10621_vm14, %v4723_v45 }
 0xb88   : > { %v4801_v42 = vpop.f32.mrb[14].mxu1 }
 0xb89   : > { %v4802_v10 = vadd.f32 %v5245_v43, %v4801_v42  ;;  %v5487_v54 = vpop.f32.mrb[15].mxu1  ;;  %v4879_v50 = vpop.f32.mrb[24].mxu0 }
 0xb8a   : > { %v4880_v6 = vadd.f32 %v5245_v43, %v4879_v50  ;;  %v5496_v8 = vpop.f32.mrb[25].mxu0 }
 0xb8b   : > { %4959 = vst.msk [vmem:[%s644_s0 + $0x4] sm:$0xf] %vm10622_vm9, %v4802_v10 }
 0xb8c   : > { %4960 = vst.msk [vmem:[%s644_s0 + $0x8] sm:$0xf] %vm10623_vm11, %v4880_v6 }
 0xb8e   : > { %v4954_v1 = vpop.f32.mrb[16].mxu1 }
 0xb8f   : > { %v4955_v55 = vadd.f32 %v5245_v43, %v4954_v1  ;;  %v5505_v49 = vpop.f32.mrb[17].mxu1 }
 0xb91   : > { %4961 = vst.msk [vmem:[%s644_s0 + $0xc] sm:$0xf] %vm10624_vm2, %v4955_v55 }
 0xb92 PF: > { %s10625_s28 = sld [smem:[#allocation2_spill]] }
 0xb98   : > { %s29_s27 = sadd.s32 1, %s10625_s28  }
 0xb99   : > { %p26_p4 = scmp.ge.s32.totalorder %s29_s27, 4  }
 0xb9b   :  { %28 = sbr.rel (!%p26_p4) target bundleno = 7 (0x7), region = 157 }

</bundles_post_ra>
